<compile_context>
chip_gen: v7x
topology: tpu7x:2x2x1
jax: 0.10.0
libtpu: 0.0.40
codegen_flags: <defaults>
</compile_context>

<pallas_src>
import numpy as np
import jax
import jax.numpy as jnp
from jax import lax
from jax.experimental import pallas as pl
from jax.experimental.pallas import tpu as pltpu


# --------------------------------------------------------------------------
# Host-side precompute (numpy) -- mirrors torch_harmonics legendre/quadrature.
# --------------------------------------------------------------------------
def _legpoly(mmax, lmax, x, norm="ortho", inverse=False, csphase=True):
    """(-1)^m c^l_m P^l_m(x); returns array of shape (mmax, lmax, len(x))."""
    nmax = max(mmax, lmax)
    vdm = np.zeros((nmax, nmax, len(x)), dtype=np.float64)
    norm_factor = 1.0 if norm == "ortho" else np.sqrt(4.0 * np.pi)
    norm_factor = 1.0 / norm_factor if inverse else norm_factor
    vdm[0, 0, :] = norm_factor / np.sqrt(4.0 * np.pi)
    for l in range(1, nmax):
        vdm[l - 1, l, :] = np.sqrt(2 * l + 1) * x * vdm[l - 1, l - 1, :]
        vdm[l, l, :] = np.sqrt((2 * l + 1) * (1 + x) * (1 - x) / 2.0 / l) * vdm[l - 1, l - 1, :]
    for l in range(2, nmax):
        for m in range(0, l - 1):
            vdm[m, l, :] = (
                x * np.sqrt((2 * l - 1) / (l - m) * (2 * l + 1) / (l + m)) * vdm[m, l - 1, :]
                - np.sqrt((l + m - 1) / (l - m) * (2 * l + 1) / (2 * l - 3) * (l - m - 1) / (l + m))
                * vdm[m, l - 2, :]
            )
    if norm == "schmidt":
        for l in range(0, nmax):
            if inverse:
                vdm[:, l, :] = vdm[:, l, :] * np.sqrt(2 * l + 1)
            else:
                vdm[:, l, :] = vdm[:, l, :] / np.sqrt(2 * l + 1)
    vdm = vdm[:mmax, :lmax]
    if csphase:
        for m in range(1, mmax, 2):
            vdm[m] *= -1.0
    return vdm


def _precompute_dlegpoly(mmax, lmax, t, norm="ortho", inverse=False, csphase=True):
    """dpct[0] ~ dP/dtheta, dpct[1] ~ m/sin(theta)*P. Shape (2, mmax, lmax, nlat)."""
    pct = _legpoly(mmax + 1, lmax + 1, np.cos(t), norm=norm, inverse=inverse, csphase=False)
    dpct = np.zeros((2, mmax, lmax, len(t)), dtype=np.float64)
    for l in range(lmax):
        # d/dtheta terms
        dpct[0, 0, l] = -np.sqrt(l * (l + 1.0)) * pct[1, l]
        for m in range(1, min(l, mmax)):
            dpct[0, m, l] = 0.5 * (
                np.sqrt((l + m) * (l - m + 1.0)) * pct[m - 1, l]
                - np.sqrt((l - m) * (l + m + 1.0)) * pct[m + 1, l]
            )
        if mmax > l and l > 0:
            dpct[0, l, l] = np.sqrt(l / 2.0) * pct[l - 1, l]
        # m / sin(theta) terms (implicitly imaginary; handled in the forward combination)
        for m in range(1, min(l + 1, mmax)):
            dpct[1, m, l] = 0.5 * np.sqrt((2 * l + 1.0) / (2 * l + 3.0)) * (
                np.sqrt((l - m + 1.0) * (l - m + 2.0)) * pct[m - 1, l + 1]
                + np.sqrt((l + m + 1.0) * (l + m + 2.0)) * pct[m + 1, l + 1]
            )
    if csphase:
        dpct[:, 1::2] *= -1.0
    return dpct


def _idft_matrices(nlon, mmax):
    """Dense real-iDFT matrices reproducing torch.fft.irfft(n=nlon, norm='forward')."""
    nfreq = nlon // 2 + 1
    m = np.arange(mmax)
    j = np.arange(nlon)
    ang = 2.0 * np.pi * np.outer(m, j) / nlon
    w = np.where(m == 0, 1.0, 2.0)
    if nlon % 2 == 0:
        w = np.where(m == nlon // 2, 1.0, w)
    valid = (m < nfreq).astype(np.float64)
    cmat = (w * valid)[:, None] * np.cos(ang)
    smat = -(w * valid)[:, None] * np.sin(ang)
    # module zeroes the imaginary part at m=0 (and Nyquist) before the irfft
    smat[0, :] = 0.0
    if nlon % 2 == 0 and nlon // 2 < mmax:
        smat[nlon // 2, :] = 0.0
    return cmat, smat


def precompute_ivsht(nlat, nlon, lmax=None, mmax=None, norm="ortho", csphase=True):
    """Kernel-layout buffers:
         d0, d1 : (mmax, lmax, nlat) f32  (no lane duplication)
         c2     : (2*mmax, nlon)     f32  fused [cos | sin] iDFT matrix (channel = p*mmax+m)
       plus the float64 dpct (2, mmax, lmax, nlat) for the numpy reference."""
    lmax = lmax or nlat
    mmax = mmax or (nlon // 2 + 1)
    # equiangular (Clenshaw-Curtiss) nodes, t = colatitudes in [0, pi]
    cost = np.cos(np.linspace(np.pi, 0.0, nlat))
    t = np.flip(np.arccos(np.clip(cost, -1.0, 1.0)))
    dpct = _precompute_dlegpoly(mmax, lmax, t, norm=norm, inverse=True, csphase=csphase)

    cmat, smat = _idft_matrices(nlon, mmax)
    c2 = np.concatenate([cmat, smat], axis=0)          # (2*mmax, nlon)

    d0 = jnp.asarray(dpct[0], jnp.float32)             # (mmax, lmax, nlat)
    d1 = jnp.asarray(dpct[1], jnp.float32)
    return d0, d1, jnp.asarray(c2, jnp.float32), dpct


# --------------------------------------------------------------------------
# Pallas kernel
# --------------------------------------------------------------------------
def _ivsht_kernel(a_ref, b_ref, d0_ref, d1_ref, c2_ref, o_ref, z_ref):
    # a_ref, b_ref : (mmax, LB, 2*QB)   lhs planes; lane r = 2*q_local + part(re/im)
    # d0_ref,d1_ref: (mmax, LB, nlat)   vector-Legendre operators (l-blocked)
    # c2_ref       : (2*mmax, nlon)     fused [cos|sin] iDFT matrix (f32)
    # o_ref        : (QB, nlat, nlon)   resident output block (written at last l step)
    # z_ref        : (mmax, 2*QB, nlat) VMEM scratch accumulator (m-major intermediate)
    li = pl.program_id(1)

    @pl.when(li == 0)
    def _init():
        z_ref[...] = jnp.zeros_like(z_ref)

    # ---- Step 1: vector-Legendre synthesis on the MXU (m-batched, contract l) ----
    a = a_ref[...]
    b = b_ref[...]
    z_ref[...] += (
        jnp.einsum("mlr,mlk->mrk", a, d0_ref[...], preferred_element_type=jnp.float32)
        + jnp.einsum("mlr,mlk->mrk", b, d1_ref[...], preferred_element_type=jnp.float32)
    )

    # ---- Step 2 (finalize): inverse real FFT (norm='forward') as one f32 MXU matmul ----
    @pl.when(li == pl.num_programs(1) - 1)
    def _finalize():
        mmax, r2, nlat = z_ref.shape
        qb = r2 // 2
        z = z_ref[...]                             # (mmax, 2*QB, nlat)
        z = z.reshape(mmax, qb, 2, nlat)           # row r = 2*q_local + p
        # one relayout per q-block (not per l-step): m-major -> channel-minor
        z = jnp.transpose(z, (1, 3, 2, 0))         # (QB, nlat, 2, mmax)
        z = z.reshape(qb, nlat, 2 * mmax)          # channel c = p*mmax + m
        y = lax.dot_general(
            z, c2_ref[...],
            dimension_numbers=(((2,), (0,)), ((), ())),
            preferred_element_type=jnp.float32,
        )                                          # (QB, nlat, nlon)
        o_ref[...] = y.astype(o_ref.dtype)


def inverse_real_vector_sht(x, d0, d1, c2):
    """x: (..., 2, lmax, mmax) complex -> (..., 2, nlat, nlon) float32."""
    assert x.ndim >= 3 and x.shape[-3] == 2
    lmax, mmax = x.shape[-2], x.shape[-1]
    assert d0.shape[0] == mmax and d0.shape[1] == lmax
    nlat = d0.shape[2]
    nlon = c2.shape[1]
    assert c2.shape[0] == 2 * mmax

    batch = x.shape[:-3]
    n = int(np.prod(batch)) if batch else 1
    xc = x.reshape(n, 2, lmax, mmax)
    ur = jnp.real(xc[:, 0]).astype(jnp.float32)
    ui = jnp.imag(xc[:, 0]).astype(jnp.float32)
    vr = jnp.real(xc[:, 1]).astype(jnp.float32)
    vi = jnp.imag(xc[:, 1]).astype(jnp.float32)

    # Wrapper-side layout plumbing (blessed by review): output rows q' = comp*n + sample.
    # Per (q', part) the coefficient plane multiplying d0 is A, the one multiplying d1 is B
    # (signs reproduce the module's srl/sim/trl/tim combination).
    A_rows = jnp.concatenate(
        [jnp.stack([ur, ui], axis=1),            # s-component rows: (re, im)
         jnp.stack([-vr, -vi], axis=1)],         # t-component rows
        axis=0)                                   # (Q2, 2, lmax, mmax)
    B_rows = jnp.concatenate(
        [jnp.stack([-vi, vr], axis=1),
         jnp.stack([-ui, ur], axis=1)],
        axis=0)

    Q2 = 2 * n
    # qb selection: never degrade to 1; pad the row axis to a multiple of the block instead.
    QB = Q2 if Q2 <= 64 else 64                  # 2*QB = 128 lanes at production sizes
    Q2p = ((Q2 + QB - 1) // QB) * QB
    if Q2p != Q2:
        pad = ((0, Q2p - Q2), (0, 0), (0, 0), (0, 0))
        A_rows = jnp.pad(A_rows, pad)
        B_rows = jnp.pad(B_rows, pad)

    # kernel layout: (mmax, lmax, 2*Q2p), lane r = 2*q' + part
    A = jnp.transpose(A_rows, (3, 2, 0, 1)).reshape(mmax, lmax, 2 * Q2p)
    B = jnp.transpose(B_rows, (3, 2, 0, 1)).reshape(mmax, lmax, 2 * Q2p)

    # l-tile: 8 fits the v7x 64 MiB VMEM budget; raise to 16-32 on v5e/v6e (128 MiB).
    LB = 8 if (lmax % 8 == 0) else lmax
    grid = (Q2p // QB, lmax // LB)               # q parallel (megacore), l arbitrary (reduction)

    # VMEM budget: double-buffered input blocks + c2 + resident output block + z scratch.
    blk_bytes = 4 * (
        2 * 2 * (mmax * LB * 2 * QB)             # a, b blocks (x2 pipeline buffers)
        + 2 * 2 * (mmax * LB * nlat)             # d0, d1 blocks
        + 2 * (2 * mmax * nlon)                  # c2
        + (QB * nlat * nlon)                     # output block
        + (mmax * 2 * QB * nlat)                 # z accumulator
    )
    vmem_limit = int(min(110 * 2**20, max(32 * 2**20, 2 * blk_bytes)))

    flops = 8 * mmax * Q2p * nlat * lmax + 4 * Q2p * nlat * nlon * mmax
    bytes_accessed = 4 * (A.size + B.size
                          + (d0.size + d1.size) * (Q2p // QB)
                          + c2.size + Q2p * nlat * nlon)

    out = pl.pallas_call(
        _ivsht_kernel,
        out_shape=jax.ShapeDtypeStruct((Q2p, nlat, nlon), jnp.float32),
        grid_spec=pltpu.PrefetchScalarGridSpec(
            num_scalar_prefetch=0,
            grid=grid,
            in_specs=[
                pl.BlockSpec((mmax, LB, 2 * QB), lambda i, l: (0, l, i)),   # A
                pl.BlockSpec((mmax, LB, 2 * QB), lambda i, l: (0, l, i)),   # B
                pl.BlockSpec((mmax, LB, nlat), lambda i, l: (0, l, 0)),     # d0
                pl.BlockSpec((mmax, LB, nlat), lambda i, l: (0, l, 0)),     # d1
                pl.BlockSpec((2 * mmax, nlon), lambda i, l: (0, 0)),        # c2
            ],
            out_specs=pl.BlockSpec((QB, nlat, nlon), lambda i, l: (i, 0, 0)),
            scratch_shapes=[pltpu.VMEM((mmax, 2 * QB, nlat), jnp.float32)],
        ),
        compiler_params=pltpu.CompilerParams(
            dimension_semantics=("parallel", "arbitrary"),
            vmem_limit_bytes=vmem_limit,
        ),
        cost_estimate=pl.CostEstimate(flops=int(flops), transcendentals=0,
                                      bytes_accessed=int(bytes_accessed)),
    )(A, B, d0, d1, c2)

    # rows q' = comp*n + sample  ->  (..., 2, nlat, nlon)
    out = out[:Q2].reshape(2, n, nlat, nlon)
    out = jnp.transpose(out, (1, 0, 2, 3))
    return out.reshape(*batch, 2, nlat, nlon)


# --------------------------------------------------------------------------
# Host (numpy, float64) reference mirroring the PyTorch forward
# --------------------------------------------------------------------------
def reference_ivsht(x_np, dpct, nlat, nlon):
    xr = np.real(x_np).astype(np.float64)
    xi = np.imag(x_np).astype(np.float64)
    d0, d1 = dpct[0], dpct[1]
    ur, ui = xr[..., 0, :, :], xi[..., 0, :, :]
    vr, vi = xr[..., 1, :, :], xi[..., 1, :, :]
    srl = np.einsum('...lm,mlk->...km', ur, d0) - np.einsum('...lm,mlk->...km', vi, d1)
    sim = np.einsum('...lm,mlk->...km', ui, d0) + np.einsum('...lm,mlk->...km', vr, d1)
    trl = -np.einsum('...lm,mlk->...km', ui, d1) - np.einsum('...lm,mlk->...km', vr, d0)
    tim = np.einsum('...lm,mlk->...km', ur, d1) - np.einsum('...lm,mlk->...km', vi, d0)
    S = srl + 1j * sim
    T = trl + 1j * tim
    X = np.stack([S, T], axis=-3)
    mmax = x_np.shape[-1]
    X[..., 0] = X[..., 0].real
    if nlon % 2 == 0 and (nlon // 2) < mmax:
        X[..., nlon // 2] = X[..., nlon // 2].real
    return np.fft.irfft(X, n=nlon, axis=-1, norm='forward')


# --------------------------------------------------------------------------
if __name__ == "__main__":
    B, C = 2, 4
    nlat, nlon = 16, 16
    lmax, mmax = nlat, nlon // 2 + 1          # 16, 9 (module defaults, equiangular grid)

    d0, d1, c2, dpct = precompute_ivsht(nlat, nlon, lmax, mmax)

    key = jax.random.PRNGKey(0)
    kr, ki = jax.random.split(key)
    x_re = jax.random.normal(kr, (B, C, 2, lmax, mmax), dtype=jnp.float32)
    x_im = jax.random.normal(ki, (B, C, 2, lmax, mmax), dtype=jnp.float32)
    x = (x_re + 1j * x_im).astype(jnp.complex64)

    out = inverse_real_vector_sht(x, d0, d1, c2)
    out = jax.block_until_ready(out)
    assert out.shape == (B, C, 2, nlat, nlon)
    assert out.dtype == jnp.float32

    ref = reference_ivsht(np.asarray(x), dpct, nlat, nlon)
    max_abs = float(np.max(np.abs(ref))) + 1e-6
    # all-f32 MXU path -> tight tolerance
    np.testing.assert_allclose(np.asarray(out), ref, rtol=1e-3, atol=1e-3 * max_abs)

    print("KERNEL_OK")
</pallas_src>

<mosaic_0001>
module attributes {stable_mosaic.version = 11 : i64} {
  func.func @_ivsht_kernel(%arg0: i32, %arg1: i32, %arg2: memref<9x8x32xf32, #tpu.memory_space<vmem>>, %arg3: memref<9x8x32xf32, #tpu.memory_space<vmem>>, %arg4: memref<9x8x16xf32, #tpu.memory_space<vmem>>, %arg5: memref<9x8x16xf32, #tpu.memory_space<vmem>>, %arg6: memref<18x16xf32, #tpu.memory_space<vmem>>, %arg7: memref<16x16x16xf32, #tpu.memory_space<vmem>>, %arg8: memref<9x32x16xf32, #tpu.memory_space<vmem>>) attributes {dimension_semantics = [#tpu.dimension_semantics<parallel>, #tpu.dimension_semantics<arbitrary>], iteration_bounds = array<i64: 1, 2>, scalar_prefetch = 0 : i64, scratch_operands = 1 : i64, tpu.core_type = #tpu.core_type<tc>, window_params = [{transform_indices = @transform_0, window_bounds = array<i64: 9, 8, 32>}, {transform_indices = @transform_1, window_bounds = array<i64: 9, 8, 32>}, {transform_indices = @transform_2, window_bounds = array<i64: 9, 8, 16>}, {transform_indices = @transform_3, window_bounds = array<i64: 9, 8, 16>}, {pipeline_mode = #tpu.pipeline_mode<synchronous>, transform_indices = @transform_4, window_bounds = array<i64: 18, 16>}, {transform_indices = @transform_5, window_bounds = array<i64: 16, 16, 16>}]} {
    %c0_i32 = arith.constant 0 : i32
    %0 = arith.cmpi eq, %arg1, %c0_i32 : i32
    %1 = arith.extui %0 : i1 to i32
    %c0_i32_0 = arith.constant 0 : i32
    %2 = arith.cmpi ne, %1, %c0_i32_0 : i32
    scf.if %2 {
      %cst_20 = arith.constant 0.000000e+00 : f32
      %16 = vector.broadcast %cst_20 : f32 to vector<9x32x16xf32>
      %c0_21 = arith.constant 0 : index
      %c0_22 = arith.constant 0 : index
      %c0_23 = arith.constant 0 : index
      %17 = vector.load %arg8[%c0_21, %c0_22, %c0_23] : memref<9x32x16xf32, #tpu.memory_space<vmem>>, vector<9x32x16xf32>
      tpu.vector_store %arg8[%c0_21, %c0_22, %c0_23], %16 {strides = array<i32>} : memref<9x32x16xf32, #tpu.memory_space<vmem>>, vector<9x32x16xf32>,
    } else {
    }
    %c0 = arith.constant 0 : index
    %c0_1 = arith.constant 0 : index
    %c0_2 = arith.constant 0 : index
    %3 = vector.load %arg2[%c0, %c0_1, %c0_2] : memref<9x8x32xf32, #tpu.memory_space<vmem>>, vector<9x8x32xf32>
    %c0_3 = arith.constant 0 : index
    %c0_4 = arith.constant 0 : index
    %c0_5 = arith.constant 0 : index
    %4 = vector.load %arg3[%c0_3, %c0_4, %c0_5] : memref<9x8x32xf32, #tpu.memory_space<vmem>>, vector<9x8x32xf32>
    %c0_6 = arith.constant 0 : index
    %c0_7 = arith.constant 0 : index
    %c0_8 = arith.constant 0 : index
    %5 = vector.load %arg8[%c0_6, %c0_7, %c0_8] : memref<9x32x16xf32, #tpu.memory_space<vmem>>, vector<9x32x16xf32>
    %c0_9 = arith.constant 0 : index
    %c0_10 = arith.constant 0 : index
    %c0_11 = arith.constant 0 : index
    %6 = vector.load %arg4[%c0_9, %c0_10, %c0_11] : memref<9x8x16xf32, #tpu.memory_space<vmem>>, vector<9x8x16xf32>
    "tpu.trace_start"() <{level = 10 : i32, message = "mlr,mlk->mrk"}> : () -> ()
    %cst = arith.constant dense<0.000000e+00> : vector<9x32x16xf32>
    %7 = tpu.matmul %3, %6, %cst {dimension_numbers = #tpu.dot_dimension_numbers<[1], [1], [2], [2], [0, 0, 0, 2, 1, 2], [0], [0]>} : vector<9x8x32xf32>, vector<9x8x16xf32>, vector<9x32x16xf32> -> vector<9x32x16xf32>
    "tpu.trace_stop"() : () -> ()
    %c0_12 = arith.constant 0 : index
    %c0_13 = arith.constant 0 : index
    %c0_14 = arith.constant 0 : index
    %8 = vector.load %arg5[%c0_12, %c0_13, %c0_14] : memref<9x8x16xf32, #tpu.memory_space<vmem>>, vector<9x8x16xf32>
    "tpu.trace_start"() <{level = 10 : i32, message = "mlr,mlk->mrk"}> : () -> ()
    %cst_15 = arith.constant dense<0.000000e+00> : vector<9x32x16xf32>
    %9 = tpu.matmul %4, %8, %cst_15 {dimension_numbers = #tpu.dot_dimension_numbers<[1], [1], [2], [2], [0, 0, 0, 2, 1, 2], [0], [0]>} : vector<9x8x32xf32>, vector<9x8x16xf32>, vector<9x32x16xf32> -> vector<9x32x16xf32>
    "tpu.trace_stop"() : () -> ()
    %10 = arith.addf %7, %9 : vector<9x32x16xf32>
    %11 = arith.addf %5, %10 : vector<9x32x16xf32>
    %c0_16 = arith.constant 0 : index
    %c0_17 = arith.constant 0 : index
    %c0_18 = arith.constant 0 : index
    %12 = vector.load %arg8[%c0_16, %c0_17, %c0_18] : memref<9x32x16xf32, #tpu.memory_space<vmem>>, vector<9x32x16xf32>
    tpu.vector_store %arg8[%c0_16, %c0_17, %c0_18], %11 {strides = array<i32>} : memref<9x32x16xf32, #tpu.memory_space<vmem>>, vector<9x32x16xf32>,
    %c1_i32 = arith.constant 1 : i32
    %13 = arith.cmpi eq, %arg1, %c1_i32 : i32
    %14 = arith.extui %13 : i1 to i32
    %c0_i32_19 = arith.constant 0 : i32
    %15 = arith.cmpi ne, %14, %c0_i32_19 : i32
    scf.if %15 {
      %c0_20 = arith.constant 0 : index
      %c0_21 = arith.constant 0 : index
      %c0_22 = arith.constant 0 : index
      %16 = vector.load %arg8[%c0_20, %c0_21, %c0_22] : memref<9x32x16xf32, #tpu.memory_space<vmem>>, vector<9x32x16xf32>
      %17 = vector.shape_cast %16 : vector<9x32x16xf32> to vector<9x16x2x16xf32>
      %18 = tpu.transpose %17, [1, 3, 2, 0] : vector<9x16x2x16xf32> -> vector<16x16x2x9xf32>
      %19 = vector.shape_cast %18 : vector<16x16x2x9xf32> to vector<16x16x18xf32>
      %c0_23 = arith.constant 0 : index
      %c0_24 = arith.constant 0 : index
      %20 = vector.load %arg6[%c0_23, %c0_24] : memref<18x16xf32, #tpu.memory_space<vmem>>, vector<18x16xf32>
      %cst_25 = arith.constant dense<0.000000e+00> : vector<16x16x16xf32>
      %21 = tpu.matmul %19, %20, %cst_25 {dimension_numbers = #tpu.dot_dimension_numbers<[2], [0], [0, 1], [1], [0, 0, 0, 1, 1, 1], [], []>} : vector<16x16x18xf32>, vector<18x16xf32>, vector<16x16x16xf32> -> vector<16x16x16xf32>
      %c0_26 = arith.constant 0 : index
      %c0_27 = arith.constant 0 : index
      %c0_28 = arith.constant 0 : index
      %22 = vector.load %arg7[%c0_26, %c0_27, %c0_28] : memref<16x16x16xf32, #tpu.memory_space<vmem>>, vector<16x16x16xf32>
      tpu.vector_store %arg7[%c0_26, %c0_27, %c0_28], %21 {strides = array<i32>} : memref<16x16x16xf32, #tpu.memory_space<vmem>>, vector<16x16x16xf32>,
    } else {
    }
    return
  }
  func.func @transform_0(%arg0: i32, %arg1: i32) -> (i32, i32, i32) {
    %c0_i32 = arith.constant 0 : i32
    %c0_i32_0 = arith.constant 0 : i32
    return %c0_i32, %arg1, %arg0 : i32, i32, i32
  }
  func.func @transform_1(%arg0: i32, %arg1: i32) -> (i32, i32, i32) {
    %c0_i32 = arith.constant 0 : i32
    %c0_i32_0 = arith.constant 0 : i32
    return %c0_i32, %arg1, %arg0 : i32, i32, i32
  }
  func.func @transform_2(%arg0: i32, %arg1: i32) -> (i32, i32, i32) {
    %c0_i32 = arith.constant 0 : i32
    %c0_i32_0 = arith.constant 0 : i32
    %c0_i32_1 = arith.constant 0 : i32
    return %c0_i32, %arg1, %c0_i32_0 : i32, i32, i32
  }
  func.func @transform_3(%arg0: i32, %arg1: i32) -> (i32, i32, i32) {
    %c0_i32 = arith.constant 0 : i32
    %c0_i32_0 = arith.constant 0 : i32
    %c0_i32_1 = arith.constant 0 : i32
    return %c0_i32, %arg1, %c0_i32_0 : i32, i32, i32
  }
  func.func @transform_4(%arg0: i32, %arg1: i32) -> (i32, i32) {
    %c0_i32 = arith.constant 0 : i32
    %c0_i32_0 = arith.constant 0 : i32
    %c0_i32_1 = arith.constant 0 : i32
    return %c0_i32, %c0_i32_0 : i32, i32
  }
  func.func @transform_5(%arg0: i32, %arg1: i32) -> (i32, i32, i32) {
    %c0_i32 = arith.constant 0 : i32
    %c0_i32_0 = arith.constant 0 : i32
    %c0_i32_1 = arith.constant 0 : i32
    return %arg0, %c0_i32, %c0_i32_0 : i32, i32, i32
  }
}

</mosaic_0001>

<bundles_post_ra>
// kernel: tpu_custom_call.1
= control target key start
LH: loop header
LB: loop body
LE: loop exit
PB: predicated region body
PF: predicated region fallthrough
CT: control target
= control target key end

     0   :  { %s30163_s0 = inlined_call_operand.hbm [shape: f32[9,16,32], index: 0, kind: input, shape index: {}]   ;;  %s30164_s1 = inlined_call_operand.hbm [shape: f32[9,16,32], index: 1, kind: input, shape index: {}]   ;;  %s30165_s2 = inlined_call_operand.hbm [shape: f32[9,16,16], index: 2, kind: input, shape index: {}]   ;;  %s30166_s3 = inlined_call_operand.hbm [shape: f32[9,16,16], index: 3, kind: input, shape index: {}]   ;;  %s30167_s4 = inlined_call_operand.vmem [shape: f32[18,16], index: 4, kind: input, shape index: {}]   ;;  %s30168_s5 = inlined_call_operand.hbm [shape: f32[16,16,16], index: 5, kind: output, shape index: {}]  }
   0x1   :  { %30624 = sst [smem:[#allocation222_spill]] %s30163_s0 }
   0x2   :  { %30625 = sst [smem:[#allocation223_spill]] %s30164_s1 }
   0x3   :  { %10 = vsyncpa [#allocation4], 0 }
   0x4   :  { %12 = vsyncpa [#allocation4 + $0x1], 0 }
   0x5   :  { %13 = vsyncpa [#allocation7], 0 }
   0x6   :  { %15 = vsyncpa [#allocation7 + $0x1], 0 }
   0x7   :  { %16 = vsyncpa [#allocation10], 0 }
   0x8   :  { %18 = vsyncpa [#allocation10 + $0x1], 0 }
   0x9   :  { %19 = vsyncpa [#allocation5], 0  ;;  %s25563_s18 = smov 0   ;;  %s25565_s19 = smov 0  }
   0xa   :  { %s25567_s20 = smov 0   ;;  %s25569_s21 = smov 0  }
   0xb   :  { %s25571_s22 = smov 0   ;;  %s25573_s23 = smov 0  }
   0xc LB: > { %30626 = sst [smem:[#allocation16_spill]] %s25504_s20  ;;  %s25592_s24 = sadd.s32 4294967295, %s25516_s23   ;;  %s25516_s23 = sphi %s25573_s23, %s25_s23   ;;  %s25512_s22 = sphi %s25571_s22, %s31480_s22   ;;  %s25508_s21 = sphi %s25569_s21, %s31479_s21   ;;  %s25504_s20 = sphi %s25567_s20, %s31478_s20   ;;  %s25500_s19 = sphi %s25565_s19, %s31482_s19   ;;  %s25496_s18 = sphi %s25563_s18, %s31481_s18  }
   0xd   : > { %30627 = sst [smem:[#allocation17_spill]] %s25512_s22  ;;  %s34_s25 = sadd.s32 1, %s25512_s22 }
   0xe   : > { %p35_p0 = scmp.ge.s32.totalorder %s34_s25, 2  ;;  %s46_s26 = sadd.s32 1, %s25504_s20 }
   0xf   : > { %p53_p1 = scmp.ne.s32.totalorder %s25504_s20, %s25500_s19  ;;  %p54_p2 = scmp.eq.s32.totalorder %s25516_s23, 0 }
  0x10   : > { %s31484_s25 = smov (%p35_p0, %s34_s25), 0  ;;  %p59_p4 = scmp.ne.s32.totalorder %s25500_s19, %s25496_s18 }
  0x11   : > { %30628 = sst [smem:[#allocation18_spill]] %s31484_s25  ;;  %p55_p3 = por %p54_p2, %p53_p1 }
  0x12   : > { %s41_s27 = ssub.s32 %s25512_s22, %s31484_s25  ;;  %p60_p5 = scmp.eq.s32.totalorder %s25592_s24, 0 }
  0x13   : > { %p44_p6 = scmp.eq.s32.totalorder %s41_s27, 0  ;;  %p25209_p8 = scmp.lt.s32.totalorder %s25516_s23, 2 }
  0x14   : > { %p25605_p7 = por %p60_p5, %p59_p4  ;;  %s25614_s30 = sand.u32 1, %s25504_s20  }
  0x15   : > { %s25611_s29 = scalar_select %p44_p6, %s25504_s20, %s46_s26  }
  0x16   : > { %s30629_s28 = scalar_select %p25605_p7, 1, 0 }
  0x17   : > { %30630 = sst [smem:[#allocation19_spill]] %s25611_s29  ;;  %s25617_s6 = sshll.u32 %s25512_s22, 7 }
  0x18   : > { %s25620_s7 = smul.u32 72, %s25614_s30  ;;  %p25622_p9 = pnand %p25209_p8, %p55_p3 }
  0x19   : > { %s234_s9 = sand.u32 1, %s25516_s23   ;;  %s30632_s1 = sld [smem:[#allocation223_spill]] }
  0x1a   : > { %s238_s13 = scalar_lea.vmem [#allocation6], %s25620_s7  ;;  %s25638_s15 = scalar_lea.sflag [#allocation7], %s234_s9 }
  0x1b   : > { %s245_s14 = sshll.u32 %s238_s13, 4  ;;  %p25644_p13 = pneg %p25622_p9  ;;  %s25635_s14 = int_to_ptr.vmem [resolvable:$true] %s245_s14 }
  0x1f   : > { %s25631_s12 = scalar_lea.hbm %s30632_s1, %s25617_s6  ;;  %s25313_s27 = scalar_lea.hbm %s30632_s1, 2304 }
  0x20   : > { %s25308_s16 = scalar_lea.hbm %s25631_s12, 1152  ;;  %p25314_p2 = scmp.lt.u32.totalorder %s25631_s12, %s30632_s1 }
  0x21   : > { %p25309_p12 = scmp.ne.s32.totalorder %s25631_s12, %s25308_s16  ;;  %p25315_p3 = scmp.lt.u32.totalorder %s25313_s27, %s25308_s16 }
  0x22   : > { %p25317_p5 = scmp.lt.u32.totalorder %s25308_s16, %s25631_s12 }
  0x23   : > { %p25311_p0 = pnand %p25644_p13, %p25309_p12  ;;  %p25316_p4 = por %p25315_p3, %p25314_p2 }
  0x25   : > { %p25312_p1 = pneg %p25311_p0  ;;  %p25318_p6 = por %p25317_p5, %p25316_p4 }
  0x27   : > { %p25319_p8 = pnand %p25318_p6, %p25312_p1 }
  0x29   : > { %25322 = shalt.err (!%p25319_p8)
}
  0x2a   : > { %s25323_s9 = scalar_lea.vmem %s25635_s14, 1152  ;;  %s25518_s13 = smov [#allocation6]  }
  0x2b   : > { %p25324_p12 = scmp.ne.s32.totalorder %s25635_s14, %s25323_s9  ;;  %s25328_s18 = sshll.u32 %s25518_s13, 4  ;;  %s25329_s18 = int_to_ptr.vmem [resolvable:$false] %s25328_s18 }
  0x2c   : > { %s25330_s26 = scalar_lea.vmem %s25329_s18, 2304  ;;  %p25331_p11 = scmp.lt.s32.totalorder %s25635_s14, %s25329_s18 }
  0x2d   : > { %p25326_p0 = pnand %p25324_p12, %p25644_p13  ;;  %p25332_p7 = scmp.lt.s32.totalorder %s25330_s26, %s25323_s9 }
  0x2f   : > { %p25327_p10 = pneg %p25326_p0  ;;  %p25333_p2 = por %p25332_p7, %p25331_p11 }
  0x31   : > { %p25334_p3 = pnand %p25333_p2, %p25327_p10 }
  0x33   : > { %25337 = shalt.err (!%p25334_p3)
}
  0x34   : > { %s30170_s16 = smov 256   ;;  %s30172_s27 = smov 128  }
  0x35   : > { %s30174_s10 = smov 8   ;;  %p30634_p7 = scmp.lt.s32.totalorder %s25516_s23, 3 }
  0x36   : > { %25202 = dma.hbm_to_vmem [thread:$0]  (!%p25622_p9), %s25631_s12, 1152, %s25635_s14, %s25638_s15, %s30170_s16, %s30172_s27, %s30174_s10  }
  0x37   : > { %p30635_p10 = scmp.ge.s32.totalorder %s25516_s23, 1  ;;  %s30637_s0 = sld [smem:[#allocation222_spill]] }
  0x38   : > { %s217_s26 = scalar_lea.vmem [#allocation3], %s25620_s7  ;;  %s25692_s16 = scalar_lea.hbm %s30165_s2, %s25617_s6 }
  0x39   : > { %p25675_p11 = pnand %p30635_p10, %p30634_p7  ;;  %s224_s1 = sshll.u32 %s217_s26, 4  ;;  %s25686_s1 = int_to_ptr.vmem [resolvable:$true] %s224_s1 }
  0x3a   : > { %s214_s27 = scalar_lea.sflag [#allocation4], %s25614_s30 }
  0x3b   : > { %s30636_s11 = scalar_select %p25675_p11, 1, 0 }
  0x3d   : > { %s25683_s18 = scalar_lea.hbm %s30637_s0, %s25617_s6  ;;  %s25343_s25 = scalar_lea.hbm %s30637_s0, 2304 }
  0x3e   : > { %s25338_s10 = scalar_lea.hbm %s25683_s18, 1152  ;;  %p25344_p6 = scmp.lt.u32.totalorder %s25683_s18, %s30637_s0 }
  0x3f   : > { %p25339_p1 = scmp.ne.s32.totalorder %s25683_s18, %s25338_s10  ;;  %p25345_p8 = scmp.lt.u32.totalorder %s25343_s25, %s25338_s10 }
  0x40   : > { %p25347_p0 = scmp.lt.u32.totalorder %s25338_s10, %s25683_s18 }
  0x41   : > { %p25341_p4 = pnand %p25339_p1, %p25644_p13  ;;  %p25346_p12 = por %p25345_p8, %p25344_p6 }
  0x43   : > { %p25342_p5 = pneg %p25341_p4  ;;  %p25348_p2 = por %p25347_p0, %p25346_p12 }
  0x45   : > { %p25349_p3 = pnand %p25348_p2, %p25342_p5 }
  0x47   : > { %25352 = shalt.err (!%p25349_p3)
}
  0x48   : > { %s25353_s26 = scalar_lea.vmem %s25686_s1, 1152  ;;  %s25522_s12 = smov [#allocation3]  }
  0x49   : > { %p25354_p7 = scmp.ne.s32.totalorder %s25686_s1, %s25353_s26  ;;  %s25358_s14 = sshll.u32 %s25522_s12, 4  ;;  %s25359_s14 = int_to_ptr.vmem [resolvable:$false] %s25358_s14 }
  0x4a   : > { %s25360_s22 = scalar_lea.vmem %s25359_s14, 2304  ;;  %p25361_p4 = scmp.lt.s32.totalorder %s25686_s1, %s25359_s14 }
  0x4b   : > { %p25356_p10 = pnand %p25354_p7, %p25644_p13  ;;  %p25362_p11 = scmp.lt.s32.totalorder %s25360_s22, %s25353_s26 }
  0x4d   : > { %p25357_p1 = pneg %p25356_p10  ;;  %p25363_p6 = por %p25362_p11, %p25361_p4 }
  0x4f   : > { %p25364_p8 = pnand %p25363_p6, %p25357_p1 }
  0x51   : > { %25367 = shalt.err (!%p25364_p8)
}
  0x52   : > { %s30638_s25 = smov 8   ;;  %s30639_s29 = smov 128  }
  0x53   : > { %s30640_s10 = smov 256   ;;  %s259_s9 = scalar_lea.vmem [#allocation8], %s25620_s7 }
  0x54   : > { %25199 = dma.hbm_to_vmem [thread:$0]  (!%p25622_p9), %s25683_s18, 1152, %s25686_s1, %s214_s27, %s30640_s10, %s30639_s29, %s30638_s25  }
  0x55   : > { %s265_s13 = sshll.u32 %s259_s9, 4  ;;  %s25368_s26 = scalar_lea.hbm %s25692_s16, 1152  ;;  %s25722_s13 = int_to_ptr.vmem [resolvable:$true] %s265_s13 }
  0x56   : > { %p25369_p11 = scmp.ne.s32.totalorder %s25692_s16, %s25368_s26  ;;  %s25373_s22 = scalar_lea.hbm %s30165_s2, 2304 }
  0x57   : > { %p25374_p0 = scmp.lt.u32.totalorder %s25692_s16, %s30165_s2  ;;  %p25375_p2 = scmp.lt.u32.totalorder %s25373_s22, %s25368_s26 }
  0x58   : > { %p25371_p5 = pnand %p25369_p11, %p25644_p13  ;;  %p25377_p7 = scmp.lt.u32.totalorder %s25368_s26, %s25692_s16 }
  0x59   : > { %p25376_p3 = por %p25375_p2, %p25374_p0 }
  0x5a   : > { %p25372_p12 = pneg %p25371_p5 }
  0x5b   : > { %p25378_p10 = por %p25377_p7, %p25376_p3 }
  0x5d   : > { %p25379_p1 = pnand %p25378_p10, %p25372_p12 }
  0x5f   : > { %25382 = shalt.err (!%p25379_p1)
}
  0x60   : > { %s25383_s1 = scalar_lea.vmem %s25722_s13, 1152  ;;  %s25523_s27 = smov [#allocation8]  }
  0x61   : > { %p25384_p4 = scmp.ne.s32.totalorder %s25722_s13, %s25383_s1  ;;  %s25388_s18 = sshll.u32 %s25523_s27, 4  ;;  %s25389_s18 = int_to_ptr.vmem [resolvable:$false] %s25388_s18 }
  0x62   : > { %s25390_s0 = scalar_lea.vmem %s25389_s18, 2304  ;;  %p25391_p11 = scmp.lt.s32.totalorder %s25722_s13, %s25389_s18 }
  0x63   : > { %p25386_p6 = pnand %p25384_p4, %p25644_p13  ;;  %p25392_p5 = scmp.lt.s32.totalorder %s25390_s0, %s25383_s1 }
  0x65   : > { %p25387_p8 = pneg %p25386_p6  ;;  %p25393_p0 = por %p25392_p5, %p25391_p11 }
  0x67   : > { %p25394_p2 = pnand %p25393_p0, %p25387_p8 }
  0x69   : > { %25397 = shalt.err (!%p25394_p2)
}
  0x6a   : > { %25205 = dma.hbm_to_vmem [thread:$0]  (!%p25622_p9), %s25692_s16, 1152, %s25722_s13, %s25638_s15, %s30640_s10, %s30639_s29, %s30638_s25  }
  0x6b   : > { %s25753_s26 = scalar_lea.hbm %s30166_s3, %s25617_s6  ;;  %s279_s12 = scalar_lea.vmem [#allocation9], %s25620_s7 }
  0x6c   : > { %s285_s14 = sshll.u32 %s279_s12, 4  ;;  %s276_s22 = scalar_lea.sflag [#allocation10], %s25614_s30  ;;  %s25756_s14 = int_to_ptr.vmem [resolvable:$true] %s285_s14 }
  0x6d   : > { %s25398_s1 = scalar_lea.hbm %s25753_s26, 1152  ;;  %s25403_s13 = scalar_lea.hbm %s30166_s3, 2304 }
  0x6e   : > { %p25399_p12 = scmp.ne.s32.totalorder %s25753_s26, %s25398_s1  ;;  %p25404_p10 = scmp.lt.u32.totalorder %s25753_s26, %s30166_s3 }
  0x6f   : > { %p25405_p1 = scmp.lt.u32.totalorder %s25403_s13, %s25398_s1  ;;  %p25407_p6 = scmp.lt.u32.totalorder %s25398_s1, %s25753_s26 }
  0x70   : > { %p25401_p3 = pnand %p25399_p12, %p25644_p13 }
  0x71   : > { %p25406_p4 = por %p25405_p1, %p25404_p10 }
  0x72   : > { %p25402_p7 = pneg %p25401_p3 }
  0x73   : > { %p25408_p8 = por %p25407_p6, %p25406_p4 }
  0x75   : > { %p25409_p11 = pnand %p25408_p8, %p25402_p7 }
  0x77   : > { %25412 = shalt.err (!%p25409_p11)
}
  0x78   : > { %s25413_s7 = scalar_lea.vmem %s25756_s14, 1152  ;;  %s25524_s18 = smov [#allocation9]  }
  0x79   : > { %p25414_p5 = scmp.ne.s32.totalorder %s25756_s14, %s25413_s7  ;;  %s25418_s0 = sshll.u32 %s25524_s18, 4  ;;  %s25419_s0 = int_to_ptr.vmem [resolvable:$false] %s25418_s0 }
  0x7a   : > { %s25420_s20 = scalar_lea.vmem %s25419_s0, 2304  ;;  %p25421_p12 = scmp.lt.s32.totalorder %s25756_s14, %s25419_s0 }
  0x7b   : > { %p25416_p0 = pnand %p25414_p5, %p25644_p13  ;;  %p25422_p3 = scmp.lt.s32.totalorder %s25420_s20, %s25413_s7 }
  0x7d   : > { %p25417_p2 = pneg %p25416_p0  ;;  %p25423_p10 = por %p25422_p3, %p25421_p12 }
  0x7f   : > { %p25424_p1 = pnand %p25423_p10, %p25417_p2 }
  0x81   : > { %25427 = shalt.err (!%p25424_p1)
}
  0x82   : > { %25208 = dma.hbm_to_vmem [thread:$0]  (!%p25622_p9), %s25753_s26, 1152, %s25756_s14, %s276_s22, %s30640_s10, %s30639_s29, %s30638_s25  }
  0x83   : > { %p30641_p13 = scmp.ne.s32.totalorder %s30636_s11, 0 }
  0x84   : > { %s299_s17 = sand.u32 (!%p30641_p13), 1, %s25500_s19   ;;  %p30642_p7 = scmp.ne.s32.totalorder (!%p30641_p13), %s30629_s28, 0 }
  0x85   : > { %297 = sbr.rel (%p30641_p13) target bundleno = 2816 (0xb00), region = 40  ;;  %s300_s12 = scalar_lea.sflag (!%p30641_p13), [#allocation4], %s299_s17 }
  0x86   : > { %s25183_s9 = smul.u32 (!%p30641_p13), 72, %s299_s17 }
  0x88   : > { %s25788_s1 = scalar_lea.vmem (!%p30641_p13), [#allocation3], %s25183_s9 }
  0x8c   : > { %25479 = dma.done.wait (%p30642_p7), %s300_s12, 1152  }
  0x8d   : > { %25481 = vsyncadd (%p30642_p7), %s300_s12, 4294966144  ;;  %s308_s30 = sand.u32 1, %s25592_s24   ;;  %s25795_s25 = scalar_lea.vmem [#allocation6], %s25183_s9 }
  0x8e   : > { %s309_s8 = scalar_lea.sflag [#allocation7], %s308_s30 }
  0x8f   : > { %25483 = dma.done.wait (%p30642_p7), %s309_s8, 2304  }
  0x90   : > { %25485 = vsyncadd (%p30642_p7), %s309_s8, 4294964992  ;;  %s25801_s11 = scalar_lea.vmem [#allocation8], %s25183_s9  ;;  %s327_s29 = scalar_lea.sflag [#allocation10], %s299_s17 }
  0x91   : > { %s25803_s10 = scalar_lea.vmem [#allocation9], %s25183_s9 }
  0x92   : > { %25487 = dma.done.wait (%p30642_p7), %s327_s29, 1152  }
  0x93   : > { %25489 = vsyncadd (%p30642_p7), %s327_s29, 4294966144  ;;  %p24701_p9 = scmp.ne.s32.totalorder %s25508_s21, 0 }
  0x94   : > { %vm372_vm0 = vcmask (!%p24701_p9), 130048   ;;  %v25525_v0 = vmov (!%p24701_p9), 0.0  }
  0x95   : > { %371 = sbr.rel (%p24701_p9) target bundleno = 167 (0xa7), region = 60  ;;  %373 = vst.msk [vmem:[#allocation2] sm:$0xff] (!%p24701_p9), %vm372_vm0, %v25525_v0  ;;  %374 = vst.msk [vmem:[#allocation2 + $0x8] sm:$0xff] (!%p24701_p9), %vm372_vm0, %v25525_v0 }
  0x96   : > { %375 = vst.msk [vmem:[#allocation2 + $0x10] sm:$0xff] (!%p24701_p9), %vm372_vm0, %v25525_v0  ;;  %376 = vst.msk [vmem:[#allocation2 + $0x18] sm:$0xff] (!%p24701_p9), %vm372_vm0, %v25525_v0 }
  0x97   : > { %377 = vst.msk [vmem:[#allocation2 + $0x20] sm:$0xff] (!%p24701_p9), %vm372_vm0, %v25525_v0  ;;  %378 = vst.msk [vmem:[#allocation2 + $0x28] sm:$0xff] (!%p24701_p9), %vm372_vm0, %v25525_v0 }
  0x98   : > { %379 = vst.msk [vmem:[#allocation2 + $0x30] sm:$0xff] (!%p24701_p9), %vm372_vm0, %v25525_v0  ;;  %380 = vst.msk [vmem:[#allocation2 + $0x38] sm:$0xff] (!%p24701_p9), %vm372_vm0, %v25525_v0 }
  0x99   : > { %381 = vst.msk [vmem:[#allocation2 + $0x40] sm:$0xff] (!%p24701_p9), %vm372_vm0, %v25525_v0  ;;  %382 = vst.msk [vmem:[#allocation2 + $0x48] sm:$0xff] (!%p24701_p9), %vm372_vm0, %v25525_v0 }
  0x9a   : > { %383 = vst.msk [vmem:[#allocation2 + $0x50] sm:$0xff] (!%p24701_p9), %vm372_vm0, %v25525_v0  ;;  %384 = vst.msk [vmem:[#allocation2 + $0x58] sm:$0xff] (!%p24701_p9), %vm372_vm0, %v25525_v0 }
  0x9b   : > { %385 = vst.msk [vmem:[#allocation2 + $0x60] sm:$0xff] (!%p24701_p9), %vm372_vm0, %v25525_v0  ;;  %386 = vst.msk [vmem:[#allocation2 + $0x68] sm:$0xff] (!%p24701_p9), %vm372_vm0, %v25525_v0 }
  0x9c   : > { %387 = vst.msk [vmem:[#allocation2 + $0x70] sm:$0xff] %vm372_vm0, %v25525_v0  ;;  %388 = vst.msk [vmem:[#allocation2 + $0x78] sm:$0xff] %vm372_vm0, %v25525_v0 }
  0x9d   : > { %389 = vst.msk [vmem:[#allocation2 + $0x80] sm:$0xff] %vm372_vm0, %v25525_v0  ;;  %390 = vst.msk [vmem:[#allocation2 + $0x88] sm:$0xff] %vm372_vm0, %v25525_v0 }
  0x9e   : > { %391 = vst.msk [vmem:[#allocation2 + $0x90] sm:$0xff] %vm372_vm0, %v25525_v0  ;;  %392 = vst.msk [vmem:[#allocation2 + $0x98] sm:$0xff] %vm372_vm0, %v25525_v0 }
  0x9f   : > { %393 = vst.msk [vmem:[#allocation2 + $0xa0] sm:$0xff] %vm372_vm0, %v25525_v0  ;;  %394 = vst.msk [vmem:[#allocation2 + $0xa8] sm:$0xff] %vm372_vm0, %v25525_v0 }
  0xa0   : > { %395 = vst.msk [vmem:[#allocation2 + $0xb0] sm:$0xff] %vm372_vm0, %v25525_v0  ;;  %396 = vst.msk [vmem:[#allocation2 + $0xb8] sm:$0xff] %vm372_vm0, %v25525_v0 }
  0xa1   : > { %397 = vst.msk [vmem:[#allocation2 + $0xc0] sm:$0xff] %vm372_vm0, %v25525_v0  ;;  %398 = vst.msk [vmem:[#allocation2 + $0xc8] sm:$0xff] %vm372_vm0, %v25525_v0 }
  0xa2   : > { %399 = vst.msk [vmem:[#allocation2 + $0xd0] sm:$0xff] %vm372_vm0, %v25525_v0  ;;  %400 = vst.msk [vmem:[#allocation2 + $0xd8] sm:$0xff] %vm372_vm0, %v25525_v0 }
  0xa3   : > { %401 = vst.msk [vmem:[#allocation2 + $0xe0] sm:$0xff] %vm372_vm0, %v25525_v0  ;;  %402 = vst.msk [vmem:[#allocation2 + $0xe8] sm:$0xff] %vm372_vm0, %v25525_v0 }
  0xa4   : > { %403 = vst.msk [vmem:[#allocation2 + $0xf0] sm:$0xff] %vm372_vm0, %v25525_v0  ;;  %404 = vst.msk [vmem:[#allocation2 + $0xf8] sm:$0xff] %vm372_vm0, %v25525_v0 }
  0xa5   : > { %405 = vst.msk [vmem:[#allocation2 + $0x100] sm:$0xff] %vm372_vm0, %v25525_v0  ;;  %406 = vst.msk [vmem:[#allocation2 + $0x108] sm:$0xff] %vm372_vm0, %v25525_v0 }
  0xa6   : > { %407 = vst.msk [vmem:[#allocation2 + $0x110] sm:$0xff] %vm372_vm0, %v25525_v0  ;;  %408 = vst.msk [vmem:[#allocation2 + $0x118] sm:$0xff] %vm372_vm0, %v25525_v0 }
  0xa7 PF: > { %v419_v1 = vld [vmem:[%s25795_s25 + $0x8] sm:$0xff]  ;;  %v418_v2 = vld [vmem:[%s25795_s25] sm:$0xff]  ;;  %v420_v5 = vld [vmem:[%s25795_s25 + $0x10] sm:$0xff]  ;;  %vm513_vm1 = vcmask 64512   ;;  %vm2840_vm2 = vcmask 130048   ;;  %p24774_p4 = scmp.ne.s32.totalorder %s25508_s21, 1 }
  0xa8   : > { %611 = vxpose.xlu1.b32.start.end [1/1] (short) (narrow) %v419_v1, 32  ;;  %481 = vxpose.xlu0.b32.start.end [1/1] (short) (narrow) %v418_v2, 32  ;;  %v472_v3 = vld [vmem:[%s25803_s10] sm:$0xff]  ;;  %v473_v6 = vld [vmem:[%s25803_s10 + $0x8] sm:$0xff]  ;;  %v474_v7 = vld [vmem:[%s25803_s10 + $0x10] sm:$0xff] }
  0xa9   : > { %24937 = vmatprep.subr.mxu1 %v472_v3  ;;  %v422_v4 = vld [vmem:[%s25795_s25 + $0x20] sm:$0xff]  ;;  %24953 = vmatprep.subr.mxu0 %v474_v7  ;;  %v424_v8 = vld [vmem:[%s25795_s25 + $0x30] sm:$0xff]  ;;  %v421_v9 = vld [vmem:[%s25795_s25 + $0x18] sm:$0xff] }
  0xaa   : > { %24938 = vmatpush3.msra.mxu1 %v472_v3  ;;  %24954 = vmatpush3.msra.mxu0 %v474_v7  ;;  %v476_v10 = vld [vmem:[%s25803_s10 + $0x20] sm:$0xff]  ;;  %v423_v12 = vld [vmem:[%s25795_s25 + $0x28] sm:$0xff]  ;;  %v425_v13 = vld [vmem:[%s25795_s25 + $0x38] sm:$0xff] }
  0xab   : > { %24945 = vmatprep.subr.mxu1 %v473_v6  ;;  %24969 = vmatprep.subr.mxu0 %v476_v10  ;;  %v426_v11 = vld [vmem:[%s25795_s25 + $0x40] sm:$0xff]  ;;  %v409_v14 = vld [vmem:[%s25788_s1] sm:$0xff]  ;;  %v410_v15 = vld [vmem:[%s25788_s1 + $0x8] sm:$0xff] }
  0xac   : > { %v411_v16 = vld [vmem:[%s25788_s1 + $0x10] sm:$0xff]  ;;  %v412_v17 = vld [vmem:[%s25788_s1 + $0x18] sm:$0xff]  ;;  %v413_v18 = vld [vmem:[%s25788_s1 + $0x20] sm:$0xff] }
  0xad   : > { %v414_v19 = vld [vmem:[%s25788_s1 + $0x28] sm:$0xff]  ;;  %v415_v20 = vld [vmem:[%s25788_s1 + $0x30] sm:$0xff]  ;;  %v416_v21 = vld [vmem:[%s25788_s1 + $0x38] sm:$0xff] }
  0xae   : > { %v417_v22 = vld [vmem:[%s25788_s1 + $0x40] sm:$0xff]  ;;  %v475_v27 = vld [vmem:[%s25803_s10 + $0x18] sm:$0xff]  ;;  %v477_v34 = vld [vmem:[%s25803_s10 + $0x28] sm:$0xff] }
  0xaf   : > { %v478_v37 = vld [vmem:[%s25803_s10 + $0x30] sm:$0xff]  ;;  %v480_v44 = vld [vmem:[%s25803_s10 + $0x40] sm:$0xff]  ;;  %v479_v47 = vld [vmem:[%s25803_s10 + $0x38] sm:$0xff] }
  0xb0   : > { %v463_v50 = vld [vmem:[%s25801_s11] sm:$0xff]  ;;  %v464_v57 = vld [vmem:[%s25801_s11 + $0x8] sm:$0xff]  ;;  %v465_v58 = vld [vmem:[%s25801_s11 + $0x10] sm:$0xff] }
  0xb1   : > { %v466_v3 = vld [vmem:[%s25801_s11 + $0x18] sm:$0xff] }
  0xb5   : > { %998 = vxpose.xlu1.b32.start.end [1/1] (short) (narrow) %v422_v4, 32  ;;  %740 = vxpose.xlu0.b32.start.end [1/1] (short) (narrow) %v420_v5, 32  ;;  %v467_v4 = vld [vmem:[%s25801_s11 + $0x20] sm:$0xff] }
  0xc2   : > { %1256 = vxpose.xlu1.b32.start.end [1/1] (short) (narrow) %v424_v8, 32  ;;  %869 = vxpose.xlu0.b32.start.end [1/1] (short) (narrow) %v421_v9, 32 }
  0xcf   : > { %1514 = vxpose.xlu1.b32.start.end [1/1] (short) (narrow) %v426_v11, 32  ;;  %1127 = vxpose.xlu0.b32.start.end [1/1] (short) (narrow) %v423_v12, 32 }
  0xdc   : > { %1385 = vxpose.xlu0.b32.start.end [1/1] (short) (narrow) %v425_v13, 32  ;;  %1643 = vxpose.xlu1.b32.start.end [1/1] (short) (narrow) %v409_v14, 32  ;;  %v468_v13 = vld [vmem:[%s25801_s11 + $0x28] sm:$0xff]  ;;  %v469_v14 = vld [vmem:[%s25801_s11 + $0x30] sm:$0xff] }
  0xe9   : > { %1772 = vxpose.xlu0.b32.start.end [1/1] (short) (narrow) %v410_v15, 32  ;;  %1901 = vxpose.xlu1.b32.start.end [1/1] (short) (narrow) %v411_v16, 32 }
  0xf6   : > { %2030 = vxpose.xlu0.b32.start.end [1/1] (short) (narrow) %v412_v17, 32  ;;  %2159 = vxpose.xlu1.b32.start.end [1/1] (short) (narrow) %v413_v18, 32 }
 0x103   : > { %2288 = vxpose.xlu0.b32.start.end [1/1] (short) (narrow) %v414_v19, 32  ;;  %2417 = vxpose.xlu1.b32.start.end [1/1] (short) (narrow) %v415_v20, 32 }
 0x110   : > { %2546 = vxpose.xlu0.b32.start.end [1/1] (short) (narrow) %v416_v21, 32  ;;  %2675 = vxpose.xlu1.b32.start.end [1/1] (short) (narrow) %v417_v22, 32 }
 0x128   : > { %v627_v23 = vpop.trf.xlu1  ;;  %v497_v24 = vpop.trf.xlu0 }
 0x129   : > { %24939 = vmatprep.mubr.msk.f32.mxu1 %vm513_vm1, %v497_v24  ;;  %v471_v24 = vld [vmem:[%s25801_s11 + $0x40] sm:$0xff] }
 0x12c   : > { %v628_v25 = vpop.trf.xlu1  ;;  %v498_v26 = vpop.trf.xlu0 }
 0x12d   : > { %24940 = vmatmul.mubr.msk.f32.vlgmr.msra.gmra.mrb[0].mxu1 %vm513_vm1, %v498_v26 }
 0x12e   : > { %24946 = vmatpush3.msra.mxu1 %v473_v6 }
 0x12f   : > { %24961 = vmatprep.subr.mxu1 %v475_v27 }
 0x130   : > { %v629_v28 = vpop.trf.xlu1  ;;  %v499_v29 = vpop.trf.xlu0 }
 0x131   : > { %24942 = vmatprep.mubr.msk.f32.mxu1 %vm513_vm1, %v499_v29 }
 0x134   : > { %v630_v30 = vpop.trf.xlu1  ;;  %v500_v31 = vpop.trf.xlu0 }
 0x135   : > { %24943 = vmatmul.mubr.msk.f32.gmra.mrb[2].mxu1 %vm513_vm1, %v500_v31 }
 0x136   : > { %24947 = vmatprep.mubr.msk.f32.mxu1 %vm513_vm1, %v627_v23  ;;  %v470_v23 = vld [vmem:[%s25801_s11 + $0x38] sm:$0xff] }
 0x138   : > { %v1014_v32 = vpop.trf.xlu1  ;;  %v756_v33 = vpop.trf.xlu0 }
 0x139   : > { %24948 = vmatmul.mubr.msk.f32.vlgmr.msra.gmra.mrb[4].mxu1 %vm513_vm1, %v628_v25  ;;  %24955 = vmatprep.mubr.msk.f32.mxu0 %vm513_vm1, %v756_v33 }
 0x13a   : > { %24950 = vmatprep.mubr.msk.f32.mxu1 %vm513_vm1, %v629_v28  ;;  %24962 = vmatpush3.msra.mxu1 %v475_v27 }
 0x13b   : > { %24977 = vmatprep.subr.mxu1 %v477_v34 }
 0x13c   : > { %v1015_v35 = vpop.trf.xlu1  ;;  %v757_v36 = vpop.trf.xlu0 }
 0x13d   : > { %24951 = vmatmul.mubr.msk.f32.gmra.mrb[6].mxu1 %vm513_vm1, %v630_v30  ;;  %24956 = vmatmul.mubr.msk.f32.vlgmr.msra.gmra.mrb[0].mxu0 %vm513_vm1, %v757_v36 }
 0x13e   : > { %24970 = vmatpush3.msra.mxu0 %v476_v10 }
 0x13f   : > { %24985 = vmatprep.subr.mxu0 %v478_v37 }
 0x140   : > { %v1016_v38 = vpop.trf.xlu1  ;;  %v758_v39 = vpop.trf.xlu0 }
 0x141   : > { %24958 = vmatprep.mubr.msk.f32.mxu0 %vm513_vm1, %v758_v39 }
 0x144   : > { %v1017_v40 = vpop.trf.xlu1  ;;  %v759_v41 = vpop.trf.xlu0 }
 0x145   : > { %24959 = vmatmul.mubr.msk.f32.gmra.mrb[2].mxu0 %vm513_vm1, %v759_v41 }
 0x146   : > { %24971 = vmatprep.mubr.msk.f32.mxu0 %vm513_vm1, %v1014_v32 }
 0x148   : > { %v1272_v42 = vpop.trf.xlu1  ;;  %v885_v43 = vpop.trf.xlu0 }
 0x149   : > { %24963 = vmatprep.mubr.msk.f32.mxu1 %vm513_vm1, %v885_v43  ;;  %24972 = vmatmul.mubr.msk.f32.vlgmr.msra.gmra.mrb[4].mxu0 %vm513_vm1, %v1015_v35 }
 0x14a   : > { %24974 = vmatprep.mubr.msk.f32.mxu0 %vm513_vm1, %v1016_v38  ;;  %24986 = vmatpush3.msra.mxu0 %v478_v37 }
 0x14b   : > { %25001 = vmatprep.subr.mxu0 %v480_v44 }
 0x14c   : > { %v1273_v45 = vpop.trf.xlu1  ;;  %v886_v46 = vpop.trf.xlu0 }
 0x14d   : > { %24964 = vmatmul.mubr.msk.f32.vlgmr.msra.gmra.mrb[8].mxu1 %vm513_vm1, %v886_v46  ;;  %24975 = vmatmul.mubr.msk.f32.gmra.mrb[6].mxu0 %vm513_vm1, %v1017_v40 }
 0x14e   : > { %24987 = vmatprep.mubr.msk.f32.mxu0 %vm513_vm1, %v1272_v42  ;;  %24978 = vmatpush3.msra.mxu1 %v477_v34 }
 0x14f   : > { %24993 = vmatprep.subr.mxu1 %v479_v47 }
 0x150   : > { %v1274_v48 = vpop.trf.xlu1  ;;  %v887_v49 = vpop.trf.xlu0 }
 0x151   : > { %24966 = vmatprep.mubr.msk.f32.mxu1 %vm513_vm1, %v887_v49  ;;  %24988 = vmatmul.mubr.msk.f32.vlgmr.msra.gmra.mrb[8].mxu0 %vm513_vm1, %v1273_v45  ;;  %v428_v49 = vld [vmem:[#allocation2 + $0x8] sm:$0xff] }
 0x152   : > { %24990 = vmatprep.mubr.msk.f32.mxu0 %vm513_vm1, %v1274_v48  ;;  %25002 = vmatpush3.msra.mxu0 %v480_v44 }
 0x153   : > { %25009 = vmatprep.subr.mxu0 %v463_v50 }
 0x154   : > { %v1275_v51 = vpop.trf.xlu1  ;;  %v888_v52 = vpop.trf.xlu0 }
 0x155   : > { %24967 = vmatmul.mubr.msk.f32.gmra.mrb[10].mxu1 %vm513_vm1, %v888_v52  ;;  %24991 = vmatmul.mubr.msk.f32.gmra.mrb[10].mxu0 %vm513_vm1, %v1275_v51  ;;  %v427_v52 = vld [vmem:[#allocation2] sm:$0xff] }
 0x158   : > { %v1530_v53 = vpop.trf.xlu1  ;;  %v1143_v54 = vpop.trf.xlu0 }
 0x159   : > { %24979 = vmatprep.mubr.msk.f32.mxu1 %vm513_vm1, %v1143_v54  ;;  %25003 = vmatprep.mubr.msk.f32.mxu0 %vm513_vm1, %v1530_v53 }
 0x15c   : > { %v1531_v55 = vpop.trf.xlu1  ;;  %v1144_v56 = vpop.trf.xlu0 }
 0x15d   : > { %24980 = vmatmul.mubr.msk.f32.vlgmr.msra.gmra.mrb[12].mxu1 %vm513_vm1, %v1144_v56  ;;  %25004 = vmatmul.mubr.msk.f32.vlgmr.msra.gmra.mrb[12].mxu0 %vm513_vm1, %v1531_v55 }
 0x15e   : > { %24994 = vmatpush3.msra.mxu1 %v479_v47  ;;  %25010 = vmatpush3.msra.mxu0 %v463_v50 }
 0x15f   : > { %25017 = vmatprep.subr.mxu1 %v464_v57  ;;  %25025 = vmatprep.subr.mxu0 %v465_v58 }
 0x160   : > { %v1532_v59 = vpop.trf.xlu1  ;;  %v1145_v60 = vpop.trf.xlu0 }
 0x161   : > { %24982 = vmatprep.mubr.msk.f32.mxu1 %vm513_vm1, %v1145_v60  ;;  %25006 = vmatprep.mubr.msk.f32.mxu0 %vm513_vm1, %v1532_v59  ;;  %v429_v60 = vld [vmem:[#allocation2 + $0x10] sm:$0xff] }
 0x164   : > { %v1533_v61 = vpop.trf.xlu1  ;;  %v1146_v62 = vpop.trf.xlu0 }
 0x165   : > { %24983 = vmatmul.mubr.msk.f32.gmra.mrb[14].mxu1 %vm513_vm1, %v1146_v62  ;;  %25007 = vmatmul.mubr.msk.f32.gmra.mrb[14].mxu0 %vm513_vm1, %v1533_v61 }
 0x168   : > { %v1401_v63 = vpop.trf.xlu0  ;;  %v1659_v0 = vpop.trf.xlu1 }
 0x169   : > { %24995 = vmatprep.mubr.msk.f32.mxu1 %vm513_vm1, %v1401_v63  ;;  %25011 = vmatprep.mubr.msk.f32.mxu0 %vm513_vm1, %v1659_v0 }
 0x16c   : > { %v1402_v1 = vpop.trf.xlu0  ;;  %v1660_v2 = vpop.trf.xlu1 }
 0x16d   : > { %24996 = vmatmul.mubr.msk.f32.vlgmr.msra.gmra.mrb[16].mxu1 %vm513_vm1, %v1402_v1  ;;  %25012 = vmatmul.mubr.msk.f32.vlgmr.msra.gmra.mrb[16].mxu0 %vm513_vm1, %v1660_v2  ;;  %v432_v1 = vld [vmem:[#allocation2 + $0x28] sm:$0xff] }
 0x16e   : > { %25018 = vmatpush3.msra.mxu1 %v464_v57  ;;  %25026 = vmatpush3.msra.mxu0 %v465_v58  ;;  %v430_v57 = vld [vmem:[#allocation2 + $0x18] sm:$0xff]  ;;  %v436_v2 = vld [vmem:[#allocation2 + $0x48] sm:$0xff] }
 0x16f   : > { %25033 = vmatprep.subr.mxu1 %v466_v3  ;;  %25041 = vmatprep.subr.mxu0 %v467_v4 }
 0x170   : > { %v1403_v5 = vpop.trf.xlu0  ;;  %v1661_v6 = vpop.trf.xlu1 }
 0x171   : > { %24998 = vmatprep.mubr.msk.f32.mxu1 %vm513_vm1, %v1403_v5  ;;  %25014 = vmatprep.mubr.msk.f32.mxu0 %vm513_vm1, %v1661_v6 }
 0x174   : > { %v1404_v7 = vpop.trf.xlu0  ;;  %v1662_v8 = vpop.trf.xlu1 }
 0x175   : > { %24999 = vmatmul.mubr.msk.f32.gmra.mrb[18].mxu1 %vm513_vm1, %v1404_v7  ;;  %25015 = vmatmul.mubr.msk.f32.gmra.mrb[18].mxu0 %vm513_vm1, %v1662_v8 }
 0x178   : > { %v1788_v9 = vpop.trf.xlu0  ;;  %v1917_v10 = vpop.trf.xlu1 }
 0x179   : > { %25019 = vmatprep.mubr.msk.f32.mxu1 %vm513_vm1, %v1788_v9  ;;  %25027 = vmatprep.mubr.msk.f32.mxu0 %vm513_vm1, %v1917_v10 }
 0x17c   : > { %v1789_v11 = vpop.trf.xlu0  ;;  %v1918_v12 = vpop.trf.xlu1 }
 0x17d   : > { %25020 = vmatmul.mubr.msk.f32.vlgmr.msra.gmra.mrb[4].mxu1 %vm513_vm1, %v1789_v11  ;;  %25028 = vmatmul.mubr.msk.f32.vlgmr.msra.gmra.mrb[0].mxu0 %vm513_vm1, %v1918_v12 }
 0x17e   : > { %25034 = vmatpush3.msra.mxu1 %v466_v3  ;;  %25042 = vmatpush3.msra.mxu0 %v467_v4  ;;  %v431_v3 = vld [vmem:[#allocation2 + $0x20] sm:$0xff] }
 0x17f   : > { %25049 = vmatprep.subr.mxu1 %v468_v13  ;;  %25057 = vmatprep.subr.mxu0 %v469_v14  ;;  %v435_v4 = vld [vmem:[#allocation2 + $0x40] sm:$0xff] }
 0x180   : > { %v1790_v15 = vpop.trf.xlu0  ;;  %v1919_v16 = vpop.trf.xlu1 }
 0x181   : > { %25022 = vmatprep.mubr.msk.f32.mxu1 %vm513_vm1, %v1790_v15  ;;  %25030 = vmatprep.mubr.msk.f32.mxu0 %vm513_vm1, %v1919_v16  ;;  %v433_v15 = vld [vmem:[#allocation2 + $0x30] sm:$0xff] }
 0x182   : > { %v437_v16 = vld [vmem:[#allocation2 + $0x50] sm:$0xff] }
 0x184   : > { %v1791_v17 = vpop.trf.xlu0  ;;  %v1920_v18 = vpop.trf.xlu1 }
 0x185   : > { %25023 = vmatmul.mubr.msk.f32.gmra.mrb[6].mxu1 %vm513_vm1, %v1791_v17  ;;  %25031 = vmatmul.mubr.msk.f32.gmra.mrb[2].mxu0 %vm513_vm1, %v1920_v18 }
 0x188   : > { %v2046_v19 = vpop.trf.xlu0  ;;  %v2175_v20 = vpop.trf.xlu1 }
 0x189   : > { %25035 = vmatprep.mubr.msk.f32.mxu1 %vm513_vm1, %v2046_v19  ;;  %25043 = vmatprep.mubr.msk.f32.mxu0 %vm513_vm1, %v2175_v20 }
 0x18c   : > { %v2047_v21 = vpop.trf.xlu0  ;;  %v2176_v22 = vpop.trf.xlu1 }
 0x18d   : > { %25036 = vmatmul.mubr.msk.f32.vlgmr.msra.gmra.mrb[8].mxu1 %vm513_vm1, %v2047_v21  ;;  %25044 = vmatmul.mubr.msk.f32.vlgmr.msra.gmra.mrb[4].mxu0 %vm513_vm1, %v2176_v22 }
 0x18e   : > { %25050 = vmatpush3.msra.mxu1 %v468_v13  ;;  %25058 = vmatpush3.msra.mxu0 %v469_v14  ;;  %v434_v13 = vld [vmem:[#allocation2 + $0x38] sm:$0xff] }
 0x18f   : > { %25065 = vmatprep.subr.mxu1 %v470_v23  ;;  %25073 = vmatprep.subr.mxu0 %v471_v24  ;;  %v438_v14 = vld [vmem:[#allocation2 + $0x58] sm:$0xff] }
 0x190   : > { %v2048_v25 = vpop.trf.xlu0  ;;  %v2177_v26 = vpop.trf.xlu1 }
 0x191   : > { %25038 = vmatprep.mubr.msk.f32.mxu1 %vm513_vm1, %v2048_v25  ;;  %25046 = vmatprep.mubr.msk.f32.mxu0 %vm513_vm1, %v2177_v26  ;;  %v440_v25 = vld [vmem:[#allocation2 + $0x68] sm:$0xff] }
 0x192   : > { %v444_v26 = vld [vmem:[#allocation2 + $0x88] sm:$0xff] }
 0x194   : > { %v2049_v27 = vpop.trf.xlu0  ;;  %v2178_v28 = vpop.trf.xlu1 }
 0x195   : > { %25039 = vmatmul.mubr.msk.f32.gmra.mrb[10].mxu1 %vm513_vm1, %v2049_v27  ;;  %25047 = vmatmul.mubr.msk.f32.gmra.mrb[6].mxu0 %vm513_vm1, %v2178_v28  ;;  %v439_v27 = vld [vmem:[#allocation2 + $0x60] sm:$0xff] }
 0x196   : > { %v443_v28 = vld [vmem:[#allocation2 + $0x80] sm:$0xff] }
 0x198   : > { %v2304_v29 = vpop.trf.xlu0  ;;  %v2433_v30 = vpop.trf.xlu1 }
 0x199   : > { %25051 = vmatprep.mubr.msk.f32.mxu1 %vm513_vm1, %v2304_v29  ;;  %25059 = vmatprep.mubr.msk.f32.mxu0 %vm513_vm1, %v2433_v30 }
 0x19c   : > { %v2305_v31 = vpop.trf.xlu0  ;;  %v2434_v32 = vpop.trf.xlu1 }
 0x19d   : > { %25052 = vmatmul.mubr.msk.f32.vlgmr.msra.gmra.mrb[12].mxu1 %vm513_vm1, %v2305_v31  ;;  %25060 = vmatmul.mubr.msk.f32.vlgmr.msra.gmra.mrb[8].mxu0 %vm513_vm1, %v2434_v32 }
 0x19e   : > { %25066 = vmatpush3.msra.mxu1 %v470_v23  ;;  %25074 = vmatpush3.msra.mxu0 %v471_v24 }
 0x1a0   : > { %v2306_v33 = vpop.trf.xlu0  ;;  %v2435_v34 = vpop.trf.xlu1 }
 0x1a1   : > { %25054 = vmatprep.mubr.msk.f32.mxu1 %vm513_vm1, %v2306_v33  ;;  %25062 = vmatprep.mubr.msk.f32.mxu0 %vm513_vm1, %v2435_v34 }
 0x1a4   : > { %v2307_v35 = vpop.trf.xlu0  ;;  %v2436_v36 = vpop.trf.xlu1 }
 0x1a5   : > { %25055 = vmatmul.mubr.msk.f32.gmra.mrb[14].mxu1 %vm513_vm1, %v2307_v35  ;;  %25063 = vmatmul.mubr.msk.f32.gmra.mrb[10].mxu0 %vm513_vm1, %v2436_v36 }
 0x1a8   : > { %v2562_v37 = vpop.trf.xlu0  ;;  %v2691_v38 = vpop.trf.xlu1 }
 0x1a9   : > { %25067 = vmatprep.mubr.msk.f32.mxu1 %vm513_vm1, %v2562_v37  ;;  %25075 = vmatprep.mubr.msk.f32.mxu0 %vm513_vm1, %v2691_v38  ;;  %v442_v37 = vld [vmem:[#allocation2 + $0x78] sm:$0xff] }
 0x1aa   : > { %v446_v38 = vld [vmem:[#allocation2 + $0x98] sm:$0xff] }
 0x1ac   : > { %v2563_v39 = vpop.trf.xlu0  ;;  %v2692_v40 = vpop.trf.xlu1 }
 0x1ad   : > { %25068 = vmatmul.mubr.msk.f32.vlgmr.msra.gmra.mrb[16].mxu1 %vm513_vm1, %v2563_v39  ;;  %25076 = vmatmul.mubr.msk.f32.vlgmr.msra.gmra.mrb[12].mxu0 %vm513_vm1, %v2692_v40  ;;  %v441_v39 = vld [vmem:[#allocation2 + $0x70] sm:$0xff] }
 0x1ae   : > { %v445_v40 = vld [vmem:[#allocation2 + $0x90] sm:$0xff] }
 0x1b0   : > { %v2564_v41 = vpop.trf.xlu0  ;;  %v2693_v42 = vpop.trf.xlu1 }
 0x1b1   : > { %25070 = vmatprep.mubr.msk.f32.mxu1 %vm513_vm1, %v2564_v41  ;;  %25078 = vmatprep.mubr.msk.f32.mxu0 %vm513_vm1, %v2693_v42 }
 0x1b4   : > { %v2565_v43 = vpop.trf.xlu0  ;;  %v2694_v44 = vpop.trf.xlu1 }
 0x1b5   : > { %25071 = vmatmul.mubr.msk.f32.gmra.mrb[18].mxu1 %vm513_vm1, %v2565_v43  ;;  %25079 = vmatmul.mubr.msk.f32.gmra.mrb[14].mxu0 %vm513_vm1, %v2694_v44 }
 0x200   : > { %v24941_v45 = vpop.f32.mrb[0].mxu1 }
 0x201   : > { %v592_v46 = vpop.f32.mrb[1].mxu1 }
 0x208   : > { %v24944_v47 = vpop.f32.mrb[2].mxu1 }
 0x209   : > { %v602_v48 = vpop.f32.mrb[3].mxu1 }
 0x240   : > { %v25013_v50 = vpop.f32.mrb[16].mxu0 }
 0x241   : > { %v1759_v51 = vadd.f32 %v25013_v50, %v24941_v45  ;;  %v1753_v53 = vpop.f32.mrb[17].mxu0  ;;  %v452_v50 = vld [vmem:[#allocation2 + $0xc8] sm:$0xff] }
 0x242   : > { %v1754_v54 = vadd.f32 %v1753_v53, %v592_v46 }
 0x243   : > { %v2805_v55 = vadd.f32 %v1759_v51, %v428_v49  ;;  %v448_v49 = vld [vmem:[#allocation2 + $0xa8] sm:$0xff]  ;;  %v447_v51 = vld [vmem:[#allocation2 + $0xa0] sm:$0xff] }
 0x244   : > { %v2804_v56 = vadd.f32 %v1754_v54, %v427_v52  ;;  %v451_v52 = vld [vmem:[#allocation2 + $0xc0] sm:$0xff] }
 0x245   : > { %2842 = vst.msk [vmem:[#allocation2 + $0x8] sm:$0xff] %vm2840_vm2, %v2805_v55 }
 0x246   : > { %2841 = vst.msk [vmem:[#allocation2] sm:$0xff] %vm2840_vm2, %v2804_v56 }
 0x248   : > { %v25016_v58 = vpop.f32.mrb[18].mxu0 }
 0x249   : > { %v1769_v59 = vadd.f32 %v25016_v58, %v24944_v47  ;;  %v1763_v61 = vpop.f32.mrb[19].mxu0 }
 0x24a   : > { %v1764_v62 = vadd.f32 %v1763_v61, %v602_v48  ;;  %v450_v61 = vld [vmem:[#allocation2 + $0xb8] sm:$0xff] }
 0x24b   : > { %v2807_v63 = vadd.f32 %v1769_v59, %v430_v57 }
 0x24c   : > { %v2806_v0 = vadd.f32 %v1764_v62, %v429_v60  ;;  %v454_v62 = vld [vmem:[#allocation2 + $0xd8] sm:$0xff] }
 0x24d   : > { %2844 = vst.msk [vmem:[#allocation2 + $0x18] sm:$0xff] %vm2840_vm2, %v2807_v63  ;;  %v449_v63 = vld [vmem:[#allocation2 + $0xb0] sm:$0xff] }
 0x24e   : > { %2843 = vst.msk [vmem:[#allocation2 + $0x10] sm:$0xff] %vm2840_vm2, %v2806_v0  ;;  %v453_v0 = vld [vmem:[#allocation2 + $0xd0] sm:$0xff] }
 0x250   : > { %v25021_v5 = vpop.f32.mrb[4].mxu1  ;;  %v25029_v6 = vpop.f32.mrb[0].mxu0 }
 0x251   : > { %v2809_v7 = vadd.f32 %v25021_v5, %v432_v1  ;;  %v2813_v8 = vadd.f32 %v25029_v6, %v436_v2  ;;  %v1882_v9 = vpop.f32.mrb[5].mxu1  ;;  %v2011_v10 = vpop.f32.mrb[1].mxu0 }
 0x252   : > { %v2808_v11 = vadd.f32 %v1882_v9, %v431_v3  ;;  %v2812_v12 = vadd.f32 %v2011_v10, %v435_v4  ;;  %v456_v9 = vld [vmem:[#allocation2 + $0xe8] sm:$0xff] }
 0x253   : > { %2846 = vst.msk [vmem:[#allocation2 + $0x28] sm:$0xff] %vm2840_vm2, %v2809_v7  ;;  %2850 = vst.msk [vmem:[#allocation2 + $0x48] sm:$0xff] %vm2840_vm2, %v2813_v8  ;;  %v460_v10 = vld [vmem:[#allocation2 + $0x108] sm:$0xff] }
 0x254   : > { %2845 = vst.msk [vmem:[#allocation2 + $0x20] sm:$0xff] %vm2840_vm2, %v2808_v11  ;;  %2849 = vst.msk [vmem:[#allocation2 + $0x40] sm:$0xff] %vm2840_vm2, %v2812_v12  ;;  %v455_v11 = vld [vmem:[#allocation2 + $0xe0] sm:$0xff] }
 0x255   : > { %v459_v12 = vld [vmem:[#allocation2 + $0x100] sm:$0xff] }
 0x258   : > { %v25024_v17 = vpop.f32.mrb[6].mxu1  ;;  %v25032_v18 = vpop.f32.mrb[2].mxu0 }
 0x259   : > { %v2811_v19 = vadd.f32 %v25024_v17, %v434_v13  ;;  %v2815_v20 = vadd.f32 %v25032_v18, %v438_v14  ;;  %v1892_v21 = vpop.f32.mrb[7].mxu1  ;;  %v2021_v22 = vpop.f32.mrb[3].mxu0 }
 0x25a   : > { %v2810_v23 = vadd.f32 %v1892_v21, %v433_v15  ;;  %v2814_v24 = vadd.f32 %v2021_v22, %v437_v16  ;;  %v458_v21 = vld [vmem:[#allocation2 + $0xf8] sm:$0xff] }
 0x25b   : > { %2848 = vst.msk [vmem:[#allocation2 + $0x38] sm:$0xff] %vm2840_vm2, %v2811_v19  ;;  %2852 = vst.msk [vmem:[#allocation2 + $0x58] sm:$0xff] %vm2840_vm2, %v2815_v20  ;;  %v462_v22 = vld [vmem:[#allocation2 + $0x118] sm:$0xff] }
 0x25c   : > { %2847 = vst.msk [vmem:[#allocation2 + $0x30] sm:$0xff] %vm2840_vm2, %v2810_v23  ;;  %2851 = vst.msk [vmem:[#allocation2 + $0x50] sm:$0xff] %vm2840_vm2, %v2814_v24  ;;  %v457_v23 = vld [vmem:[#allocation2 + $0xf0] sm:$0xff] }
 0x25d   : > { %v461_v24 = vld [vmem:[#allocation2 + $0x110] sm:$0xff] }
 0x260   : > { %v25037_v29 = vpop.f32.mrb[8].mxu1  ;;  %v25045_v30 = vpop.f32.mrb[4].mxu0 }
 0x261   : > { %v2817_v31 = vadd.f32 %v25037_v29, %v440_v25  ;;  %v2821_v32 = vadd.f32 %v25045_v30, %v444_v26  ;;  %v2140_v33 = vpop.f32.mrb[9].mxu1  ;;  %v2269_v34 = vpop.f32.mrb[5].mxu0 }
 0x262   : > { %v2816_v35 = vadd.f32 %v2140_v33, %v439_v27  ;;  %v2820_v36 = vadd.f32 %v2269_v34, %v443_v28 }
 0x263   : > { %2854 = vst.msk [vmem:[#allocation2 + $0x68] sm:$0xff] %vm2840_vm2, %v2817_v31  ;;  %2858 = vst.msk [vmem:[#allocation2 + $0x88] sm:$0xff] %vm2840_vm2, %v2821_v32 }
 0x264   : > { %2853 = vst.msk [vmem:[#allocation2 + $0x60] sm:$0xff] %vm2840_vm2, %v2816_v35  ;;  %2857 = vst.msk [vmem:[#allocation2 + $0x80] sm:$0xff] %vm2840_vm2, %v2820_v36 }
 0x268   : > { %v25040_v41 = vpop.f32.mrb[10].mxu1  ;;  %v25048_v42 = vpop.f32.mrb[6].mxu0 }
 0x269   : > { %v2819_v43 = vadd.f32 %v25040_v41, %v442_v37  ;;  %v2823_v44 = vadd.f32 %v25048_v42, %v446_v38  ;;  %v2150_v45 = vpop.f32.mrb[11].mxu1  ;;  %v2279_v46 = vpop.f32.mrb[7].mxu0 }
 0x26a   : > { %v2818_v47 = vadd.f32 %v2150_v45, %v441_v39  ;;  %v2822_v48 = vadd.f32 %v2279_v46, %v445_v40 }
 0x26b   : > { %2856 = vst.msk [vmem:[#allocation2 + $0x78] sm:$0xff] %vm2840_vm2, %v2819_v43  ;;  %2860 = vst.msk [vmem:[#allocation2 + $0x98] sm:$0xff] %vm2840_vm2, %v2823_v44 }
 0x26c   : > { %2855 = vst.msk [vmem:[#allocation2 + $0x70] sm:$0xff] %vm2840_vm2, %v2818_v47  ;;  %2859 = vst.msk [vmem:[#allocation2 + $0x90] sm:$0xff] %vm2840_vm2, %v2822_v48 }
 0x270   : > { %v25053_v53 = vpop.f32.mrb[12].mxu1  ;;  %v25061_v54 = vpop.f32.mrb[8].mxu0 }
 0x271   : > { %v2825_v55 = vadd.f32 %v25053_v53, %v448_v49  ;;  %v2829_v56 = vadd.f32 %v25061_v54, %v452_v50  ;;  %v2398_v57 = vpop.f32.mrb[13].mxu1  ;;  %v2527_v58 = vpop.f32.mrb[9].mxu0 }
 0x272   : > { %v2824_v59 = vadd.f32 %v2398_v57, %v447_v51  ;;  %v2828_v60 = vadd.f32 %v2527_v58, %v451_v52 }
 0x273   : > { %2862 = vst.msk [vmem:[#allocation2 + $0xa8] sm:$0xff] %vm2840_vm2, %v2825_v55  ;;  %2866 = vst.msk [vmem:[#allocation2 + $0xc8] sm:$0xff] %vm2840_vm2, %v2829_v56 }
 0x274   : > { %2861 = vst.msk [vmem:[#allocation2 + $0xa0] sm:$0xff] %vm2840_vm2, %v2824_v59  ;;  %2865 = vst.msk [vmem:[#allocation2 + $0xc0] sm:$0xff] %vm2840_vm2, %v2828_v60 }
 0x278   : > { %v25056_v1 = vpop.f32.mrb[14].mxu1  ;;  %v25064_v2 = vpop.f32.mrb[10].mxu0 }
 0x279   : > { %v2827_v3 = vadd.f32 %v25056_v1, %v450_v61  ;;  %v2831_v4 = vadd.f32 %v25064_v2, %v454_v62  ;;  %v2408_v5 = vpop.f32.mrb[15].mxu1  ;;  %v2537_v6 = vpop.f32.mrb[11].mxu0 }
 0x27a   : > { %v2826_v7 = vadd.f32 %v2408_v5, %v449_v63  ;;  %v2830_v8 = vadd.f32 %v2537_v6, %v453_v0 }
 0x27b   : > { %2864 = vst.msk [vmem:[#allocation2 + $0xb8] sm:$0xff] %vm2840_vm2, %v2827_v3  ;;  %2868 = vst.msk [vmem:[#allocation2 + $0xd8] sm:$0xff] %vm2840_vm2, %v2831_v4 }
 0x27c   : > { %2863 = vst.msk [vmem:[#allocation2 + $0xb0] sm:$0xff] %vm2840_vm2, %v2826_v7  ;;  %2867 = vst.msk [vmem:[#allocation2 + $0xd0] sm:$0xff] %vm2840_vm2, %v2830_v8 }
 0x280   : > { %v25069_v13 = vpop.f32.mrb[16].mxu1  ;;  %v25077_v14 = vpop.f32.mrb[12].mxu0 }
 0x281   : > { %v2833_v15 = vadd.f32 %v25069_v13, %v456_v9  ;;  %v2837_v16 = vadd.f32 %v25077_v14, %v460_v10  ;;  %v2656_v17 = vpop.f32.mrb[17].mxu1  ;;  %v2785_v18 = vpop.f32.mrb[13].mxu0 }
 0x282   : > { %v2832_v19 = vadd.f32 %v2656_v17, %v455_v11  ;;  %v2836_v20 = vadd.f32 %v2785_v18, %v459_v12 }
 0x283   : > { %2870 = vst.msk [vmem:[#allocation2 + $0xe8] sm:$0xff] %vm2840_vm2, %v2833_v15  ;;  %2874 = vst.msk [vmem:[#allocation2 + $0x108] sm:$0xff] %vm2840_vm2, %v2837_v16 }
 0x284   : > { %2869 = vst.msk [vmem:[#allocation2 + $0xe0] sm:$0xff] %vm2840_vm2, %v2832_v19  ;;  %2873 = vst.msk [vmem:[#allocation2 + $0x100] sm:$0xff] %vm2840_vm2, %v2836_v20 }
 0x286   : > { %2880 = sbr.rel (%p24774_p4) target bundleno = 2790 (0xae6), region = 64 }
 0x288   : > { %v25072_v25 = vpop.f32.mrb[18].mxu1  ;;  %v25080_v26 = vpop.f32.mrb[14].mxu0 }
 0x289   : > { %v2835_v27 = vadd.f32 %v25072_v25, %v458_v21  ;;  %v2839_v28 = vadd.f32 %v25080_v26, %v462_v22  ;;  %v2666_v29 = vpop.f32.mrb[19].mxu1  ;;  %v2795_v30 = vpop.f32.mrb[15].mxu0 }
 0x28a   : > { %v2834_v31 = vadd.f32 %v2666_v29, %v457_v23  ;;  %v2838_v32 = vadd.f32 %v2795_v30, %v461_v24 }
 0x28b   : > { %2872 = vst.msk [vmem:[#allocation2 + $0xf8] sm:$0xff] %vm2840_vm2, %v2835_v27  ;;  %2876 = vst.msk [vmem:[#allocation2 + $0x118] sm:$0xff] %vm2840_vm2, %v2839_v28 }
 0x28c   : > { %2871 = vst.msk [vmem:[#allocation2 + $0xf0] sm:$0xff] %vm2840_vm2, %v2834_v31  ;;  %2875 = vst.msk [vmem:[#allocation2 + $0x110] sm:$0xff] %vm2840_vm2, %v2838_v32 }
 0x28d   : > { %v2881_v33 = vld [vmem:[#allocation2] sm:$0xff]  ;;  %v2957_v34 = vlaneseq  ;;  %v25526_v35 = vmov 1983009808   ;;  %v2882_v43 = vld [vmem:[#allocation2 + $0x8] sm:$0xff]  ;;  %v2883_v50 = vld [vmem:[#allocation2 + $0x10] sm:$0xff]  ;;  %vm24290_vm3 = vcmask 1041408  }
 0x28e   : > { %v2955_v36 = vunpack.c.l.s4 %v25526_v35  ;;  %v2953_v39 = vcombine.high %v2881_v33, %v2881_v33  ;;  %v2970_v46 = vcombine.high %v2882_v43, %v2882_v43  ;;  %v2987_v53 = vcombine.high %v2883_v50, %v2883_v50  ;;  %v2884_v56 = vld [vmem:[#allocation2 + $0x18] sm:$0xff]  ;;  %v2885_v62 = vld [vmem:[#allocation2 + $0x20] sm:$0xff]  ;;  %v2886_v4 = vld [vmem:[#allocation2 + $0x28] sm:$0xff]  ;;  %s25529_s16 = smov 9  }
 0x28f   : > { %v25991_v37 = vshrl.u32 %v2957_v34, 7  ;;  %v3004_v59 = vcombine.high %v2884_v56, %v2884_v56  ;;  %v3021_v1 = vcombine.high %v2885_v62, %v2885_v62  ;;  %v3038_v7 = vcombine.high %v2886_v4, %v2886_v4  ;;  %v2887_v10 = vld [vmem:[#allocation2 + $0x30] sm:$0xff]  ;;  %v2888_v16 = vld [vmem:[#allocation2 + $0x38] sm:$0xff]  ;;  %v2889_v22 = vld [vmem:[#allocation2 + $0x40] sm:$0xff] }
 0x290   : > { %v2956_v38 = vunpack.c.0.s8 %v2955_v36  ;;  %v3055_v13 = vcombine.high %v2887_v10, %v2887_v10  ;;  %v3072_v19 = vcombine.high %v2888_v16, %v2888_v16  ;;  %v3089_v25 = vcombine.high %v2889_v22, %v2889_v22  ;;  %v2890_v28 = vld [vmem:[#allocation2 + $0x48] sm:$0xff]  ;;  %v2891_v34 = vld [vmem:[#allocation2 + $0x50] sm:$0xff] }
 0x291   : > { %30643 = vst [vmem:[#allocation20_spill] sm:$0xff] %v25991_v37  ;;  %v3106_v31 = vcombine.high %v2890_v28, %v2890_v28  ;;  %vm24157_vm4 = vcmask 72704   ;;  %vm24193_vm5 = vcmask 146432  }
 0x292   : > { %v25994_v40 = vsub.s32 %v2956_v38, %v25991_v37  ;;  %v3123_v38 = vcombine.high %v2891_v34, %v2891_v34 }
 0x294   : > { %v2960_v41 = vrot.slane %v2881_v33, %v25994_v40  ;;  %v2967_v42 = vrot.slane %v2953_v39, %v25994_v40  ;;  %v2977_v44 = vrot.slane %v2882_v43, %v25994_v40  ;;  %v2984_v49 = vrot.slane %v2970_v46, %v25994_v40 }
 0x295   : > { %v2994_v52 = vrot.slane %v2883_v50, %v25994_v40  ;;  %v3001_v55 = vrot.slane %v2987_v53, %v25994_v40  ;;  %v3011_v58 = vrot.slane %v2884_v56, %v25994_v40  ;;  %v3018_v61 = vrot.slane %v3004_v59, %v25994_v40  ;;  %v2894_v59 = vld [vmem:[#allocation2 + $0x68] sm:$0xff] }
 0x296   : > { %3709 = vxpose.xlu0.b32.start.end [1/1] (short) (narrow) %v2960_v41, 16  ;;  %3773 = vxpose.xlu1.b32.start.end [1/1] (short) (narrow) %v2967_v42, 16  ;;  %v2969_v45 = vcombine.high %v2967_v42, %v2967_v42  ;;  %v2968_v47 = vcombine.high %v2960_v41, %v2960_v41  ;;  %v2985_v48 = vcombine.high %v2977_v44, %v2977_v44  ;;  %v2892_v42 = vld [vmem:[#allocation2 + $0x58] sm:$0xff] }
 0x297   : > { %v2986_v51 = vcombine.high %v2984_v49, %v2984_v49  ;;  %v3002_v54 = vcombine.high %v2994_v52, %v2994_v52  ;;  %v3003_v57 = vcombine.high %v3001_v55, %v3001_v55  ;;  %v3019_v60 = vcombine.high %v3011_v58, %v3011_v58 }
 0x298   : > { %v3020_v63 = vcombine.high %v3018_v61, %v3018_v61  ;;  %v3028_v0 = vrot.slane %v2885_v62, %v25994_v40  ;;  %v3035_v3 = vrot.slane %v3021_v1, %v25994_v40  ;;  %v3045_v6 = vrot.slane %v2886_v4, %v25994_v40 }
 0x299   : > { %v3052_v9 = vrot.slane %v3038_v7, %v25994_v40  ;;  %v3062_v12 = vrot.slane %v2887_v10, %v25994_v40  ;;  %v3069_v15 = vrot.slane %v3055_v13, %v25994_v40  ;;  %v3079_v18 = vrot.slane %v2888_v16, %v25994_v40 }
 0x29a   : > { %v3036_v2 = vcombine.high %v3028_v0, %v3028_v0  ;;  %v3037_v5 = vcombine.high %v3035_v3, %v3035_v3  ;;  %v3053_v8 = vcombine.high %v3045_v6, %v3045_v6  ;;  %v3086_v21 = vrot.slane %v3072_v19, %v25994_v40 }
 0x29b   : > { %3837 = vxpose.xlu0.b32.start.end [1/1] (short) (narrow) %v2977_v44, 16  ;;  %3805 = vxpose.xlu1.b32.start.end [1/1] (short) (narrow) %v2969_v45, 16  ;;  %v3054_v11 = vcombine.high %v3052_v9, %v3052_v9  ;;  %v3070_v14 = vcombine.high %v3062_v12, %v3062_v12  ;;  %v3071_v17 = vcombine.high %v3069_v15, %v3069_v15 }
 0x29c   : > { %v3087_v20 = vcombine.high %v3079_v18, %v3079_v18  ;;  %v3088_v23 = vcombine.high %v3086_v21, %v3086_v21  ;;  %v3096_v24 = vrot.slane %v2889_v22, %v25994_v40  ;;  %v3103_v27 = vrot.slane %v3089_v25, %v25994_v40 }
 0x29d   : > { %v3113_v30 = vrot.slane %v2890_v28, %v25994_v40  ;;  %v3120_v33 = vrot.slane %v3106_v31, %v25994_v40  ;;  %v3130_v36 = vrot.slane %v2891_v34, %v25994_v40  ;;  %v3137_v41 = vrot.slane %v3123_v38, %v25994_v40  ;;  %v2897_v38 = vld [vmem:[#allocation2 + $0x80] sm:$0xff] }
 0x29e   : > { %v3104_v26 = vcombine.high %v3096_v24, %v3096_v24  ;;  %v3105_v29 = vcombine.high %v3103_v27, %v3103_v27  ;;  %v3147_v44 = vrot.slane %v2892_v42, %v25994_v40  ;;  %v3140_v45 = vcombine.high %v2892_v42, %v2892_v42 }
 0x29f   : > { %v3121_v32 = vcombine.high %v3113_v30, %v3113_v30  ;;  %v3122_v35 = vcombine.high %v3120_v33, %v3120_v33  ;;  %v3138_v39 = vcombine.high %v3130_v36, %v3130_v36  ;;  %v3139_v43 = vcombine.high %v3137_v41, %v3137_v41 }
 0x2a0   : > { %3741 = vxpose.xlu0.b32.start.end [1/1] (short) (narrow) %v2968_v47, 16  ;;  %3869 = vxpose.xlu1.b32.start.end [1/1] (short) (narrow) %v2985_v48, 16  ;;  %v3155_v46 = vcombine.high %v3147_v44, %v3147_v44  ;;  %v3154_v47 = vrot.slane %v3140_v45, %v25994_v40  ;;  %v3181_v62 = vrot.slane %v2894_v59, %v25994_v40 }
 0x2a1   : > { %v3232_v42 = vrot.slane %v2897_v38, %v25994_v40 }
 0x2a2   : > { %v3156_v48 = vcombine.high %v3154_v47, %v3154_v47  ;;  %v3189_v1 = vcombine.high %v3181_v62, %v3181_v62 }
 0x2a3   : > { %v3240_v45 = vcombine.high %v3232_v42, %v3232_v42 }
 0x2a5   : > { %3901 = vxpose.xlu0.b32.start.end [1/1] (short) (narrow) %v2984_v49, 16  ;;  %3933 = vxpose.xlu1.b32.start.end [1/1] (short) (narrow) %v2986_v51, 16  ;;  %v2893_v49 = vld [vmem:[#allocation2 + $0x60] sm:$0xff] }
 0x2a6   : > { %v3164_v50 = vrot.slane %v2893_v49, %v25994_v40 }
 0x2a8   : > { %v3172_v51 = vcombine.high %v3164_v50, %v3164_v50 }
 0x2aa   : > { %3965 = vxpose.xlu0.b32.start.end [1/1] (short) (narrow) %v2994_v52, 16  ;;  %3997 = vxpose.xlu1.b32.start.end [1/1] (short) (narrow) %v3002_v54, 16  ;;  %v3157_v52 = vcombine.high %v2893_v49, %v2893_v49 }
 0x2af   : > { %4029 = vxpose.xlu0.b32.start.end [1/1] (short) (narrow) %v3001_v55, 16  ;;  %4061 = vxpose.xlu1.b32.start.end [1/1] (short) (narrow) %v3003_v57, 16  ;;  %v3171_v55 = vrot.slane %v3157_v52, %v25994_v40 }
 0x2b4   : > { %4093 = vxpose.xlu0.b32.start.end [1/1] (short) (narrow) %v3011_v58, 16  ;;  %4125 = vxpose.xlu1.b32.start.end [1/1] (short) (narrow) %v3019_v60, 16  ;;  %v3173_v58 = vcombine.high %v3171_v55, %v3171_v55 }
 0x2b9   : > { %4157 = vxpose.xlu0.b32.start.end [1/1] (short) (narrow) %v3018_v61, 16  ;;  %4189 = vxpose.xlu1.b32.start.end [1/1] (short) (narrow) %v3020_v63, 16 }
 0x2be   : > { %4221 = vxpose.xlu0.b32.start.end [1/1] (short) (narrow) %v3028_v0, 16  ;;  %4253 = vxpose.xlu1.b32.start.end [1/1] (short) (narrow) %v3036_v2, 16  ;;  %v3174_v2 = vcombine.high %v2894_v59, %v2894_v59 }
 0x2c3   : > { %4285 = vxpose.xlu0.b32.start.end [1/1] (short) (narrow) %v3035_v3, 16  ;;  %4317 = vxpose.xlu1.b32.start.end [1/1] (short) (narrow) %v3037_v5, 16  ;;  %v3188_v5 = vrot.slane %v3174_v2, %v25994_v40 }
 0x2c8   : > { %4349 = vxpose.xlu0.b32.start.end [1/1] (short) (narrow) %v3045_v6, 16  ;;  %4381 = vxpose.xlu1.b32.start.end [1/1] (short) (narrow) %v3053_v8, 16  ;;  %v3190_v8 = vcombine.high %v3188_v5, %v3188_v5 }
 0x2cd   : > { %4413 = vxpose.xlu0.b32.start.end [1/1] (short) (narrow) %v3052_v9, 16  ;;  %4445 = vxpose.xlu1.b32.start.end [1/1] (short) (narrow) %v3054_v11, 16  ;;  %v2895_v9 = vld [vmem:[#allocation2 + $0x70] sm:$0xff] }
 0x2ce   : > { %v3191_v16 = vcombine.high %v2895_v9, %v2895_v9 }
 0x2d0   : > { %v3205_v19 = vrot.slane %v3191_v16, %v25994_v40 }
 0x2d2   : > { %4477 = vxpose.xlu0.b32.start.end [1/1] (short) (narrow) %v3062_v12, 16  ;;  %4509 = vxpose.xlu1.b32.start.end [1/1] (short) (narrow) %v3070_v14, 16  ;;  %v3198_v12 = vrot.slane %v2895_v9, %v25994_v40  ;;  %v3207_v22 = vcombine.high %v3205_v19, %v3205_v19 }
 0x2d7   : > { %4541 = vxpose.xlu0.b32.start.end [1/1] (short) (narrow) %v3069_v15, 16  ;;  %4573 = vxpose.xlu1.b32.start.end [1/1] (short) (narrow) %v3071_v17, 16  ;;  %v3206_v15 = vcombine.high %v3198_v12, %v3198_v12 }
 0x2dc   : > { %4605 = vxpose.xlu0.b32.start.end [1/1] (short) (narrow) %v3079_v18, 16  ;;  %4637 = vxpose.xlu1.b32.start.end [1/1] (short) (narrow) %v3087_v20, 16 }
 0x2e1   : > { %4669 = vxpose.xlu0.b32.start.end [1/1] (short) (narrow) %v3086_v21, 16  ;;  %4701 = vxpose.xlu1.b32.start.end [1/1] (short) (narrow) %v3088_v23, 16  ;;  %v2896_v23 = vld [vmem:[#allocation2 + $0x78] sm:$0xff] }
 0x2e6   : > { %4733 = vxpose.xlu0.b32.start.end [1/1] (short) (narrow) %v3096_v24, 16  ;;  %4765 = vxpose.xlu1.b32.start.end [1/1] (short) (narrow) %v3104_v26, 16  ;;  %v3215_v26 = vrot.slane %v2896_v23, %v25994_v40 }
 0x2eb   : > { %4797 = vxpose.xlu0.b32.start.end [1/1] (short) (narrow) %v3103_v27, 16  ;;  %4829 = vxpose.xlu1.b32.start.end [1/1] (short) (narrow) %v3105_v29, 16  ;;  %v3223_v29 = vcombine.high %v3215_v26, %v3215_v26 }
 0x2f0   : > { %4861 = vxpose.xlu0.b32.start.end [1/1] (short) (narrow) %v3113_v30, 16  ;;  %4893 = vxpose.xlu1.b32.start.end [1/1] (short) (narrow) %v3121_v32, 16  ;;  %v3208_v30 = vcombine.high %v2896_v23, %v2896_v23  ;;  %v2899_v23 = vld [vmem:[#allocation2 + $0x90] sm:$0xff] }
 0x2f5   : > { %4925 = vxpose.xlu0.b32.start.end [1/1] (short) (narrow) %v3120_v33, 16  ;;  %4957 = vxpose.xlu1.b32.start.end [1/1] (short) (narrow) %v3122_v35, 16  ;;  %v3222_v33 = vrot.slane %v3208_v30, %v25994_v40  ;;  %v3266_v30 = vrot.slane %v2899_v23, %v25994_v40 }
 0x2fa   : > { %4989 = vxpose.xlu0.b32.start.end [1/1] (short) (narrow) %v3130_v36, 16  ;;  %5021 = vxpose.xlu1.b32.start.end [1/1] (short) (narrow) %v3138_v39, 16  ;;  %v3224_v36 = vcombine.high %v3222_v33, %v3222_v33 }
 0x2ff   : > { %5053 = vxpose.xlu0.b32.start.end [1/1] (short) (narrow) %v3137_v41, 16  ;;  %5085 = vxpose.xlu1.b32.start.end [1/1] (short) (narrow) %v3139_v43, 16 }
 0x304   : > { %5117 = vxpose.xlu0.b32.start.end [1/1] (short) (narrow) %v3147_v44, 16  ;;  %5149 = vxpose.xlu1.b32.start.end [1/1] (short) (narrow) %v3155_v46, 16  ;;  %v3225_v46 = vcombine.high %v2897_v38, %v2897_v38  ;;  %v3274_v38 = vcombine.high %v3266_v30, %v3266_v30 }
 0x306   : > { %v3239_v49 = vrot.slane %v3225_v46, %v25994_v40 }
 0x308   : > { %v3241_v52 = vcombine.high %v3239_v49, %v3239_v49 }
 0x309   : > { %5181 = vxpose.xlu0.b32.start.end [1/1] (short) (narrow) %v3154_v47, 16  ;;  %5213 = vxpose.xlu1.b32.start.end [1/1] (short) (narrow) %v3156_v48, 16 }
 0x316   : > { %v26021_v53 = vpop.trf.xlu0  ;;  %v26023_v54 = vpop.trf.xlu1  ;;  %5245 = vxpose.xlu0.b32.start.end [1/1] (short) (narrow) %v3164_v50, 16  ;;  %5277 = vxpose.xlu1.b32.start.end [1/1] (short) (narrow) %v3172_v51, 16 }
 0x31a   : > { %v26026_v56 = vpop.trf.xlu0  ;;  %v26028_v57 = vpop.trf.xlu1 }
 0x31e   : > { %v26030_v60 = vpop.trf.xlu0  ;;  %v26032_v61 = vpop.trf.xlu1  ;;  %5309 = vxpose.xlu0.b32.start.end [1/1] (short) (narrow) %v3171_v55, 16  ;;  %5341 = vxpose.xlu1.b32.start.end [1/1] (short) (narrow) %v3173_v58, 16  ;;  %v2898_v55 = vld [vmem:[#allocation2 + $0x88] sm:$0xff] }
 0x322   : > { %v26035_v63 = vpop.trf.xlu0  ;;  %v26037_v0 = vpop.trf.xlu1 }
 0x326   : > { %v26039_v3 = vpop.trf.xlu0  ;;  %v26041_v4 = vpop.trf.xlu1  ;;  %5373 = vxpose.xlu0.b32.start.end [1/1] (short) (narrow) %v3181_v62, 16  ;;  %5405 = vxpose.xlu1.b32.start.end [1/1] (short) (narrow) %v3189_v1, 16  ;;  %v3249_v62 = vrot.slane %v2898_v55, %v25994_v40 }
 0x32a   : > { %v26044_v6 = vpop.trf.xlu0  ;;  %v26046_v7 = vpop.trf.xlu1 }
 0x32e   : > { %v26048_v10 = vpop.trf.xlu0  ;;  %v26050_v11 = vpop.trf.xlu1  ;;  %5437 = vxpose.xlu0.b32.start.end [1/1] (short) (narrow) %v3188_v5, 16  ;;  %5469 = vxpose.xlu1.b32.start.end [1/1] (short) (narrow) %v3190_v8, 16  ;;  %v3257_v5 = vcombine.high %v3249_v62, %v3249_v62  ;;  %v3242_v8 = vcombine.high %v2898_v55, %v2898_v55 }
 0x332   : > { %v26053_v13 = vpop.trf.xlu0  ;;  %v26055_v14 = vpop.trf.xlu1 }
 0x336   : > { %v26057_v17 = vpop.trf.xlu0  ;;  %v26059_v18 = vpop.trf.xlu1  ;;  %5501 = vxpose.xlu0.b32.start.end [1/1] (short) (narrow) %v3198_v12, 16  ;;  %5533 = vxpose.xlu1.b32.start.end [1/1] (short) (narrow) %v3206_v15, 16  ;;  %v3256_v15 = vrot.slane %v3242_v8, %v25994_v40 }
 0x33a   : > { %v26062_v20 = vpop.trf.xlu0  ;;  %v26064_v21 = vpop.trf.xlu1 }
 0x33e   : > { %v26066_v24 = vpop.trf.xlu0  ;;  %v26068_v25 = vpop.trf.xlu1  ;;  %5565 = vxpose.xlu0.b32.start.end [1/1] (short) (narrow) %v3205_v19, 16  ;;  %5597 = vxpose.xlu1.b32.start.end [1/1] (short) (narrow) %v3207_v22, 16  ;;  %v3258_v22 = vcombine.high %v3256_v15, %v3256_v15 }
 0x342   : > { %v26071_v27 = vpop.trf.xlu0  ;;  %v26073_v28 = vpop.trf.xlu1 }
 0x346   : > { %v26075_v31 = vpop.trf.xlu0  ;;  %v26077_v32 = vpop.trf.xlu1  ;;  %5629 = vxpose.xlu0.b32.start.end [1/1] (short) (narrow) %v3215_v26, 16  ;;  %5661 = vxpose.xlu1.b32.start.end [1/1] (short) (narrow) %v3223_v29, 16 }
 0x34a   : > { %v26080_v34 = vpop.trf.xlu0  ;;  %v26082_v35 = vpop.trf.xlu1 }
 0x34e   : > { %v26084_v39 = vpop.trf.xlu0  ;;  %v26086_v41 = vpop.trf.xlu1  ;;  %5693 = vxpose.xlu0.b32.start.end [1/1] (short) (narrow) %v3222_v33, 16  ;;  %5725 = vxpose.xlu1.b32.start.end [1/1] (short) (narrow) %v3224_v36, 16 }
 0x352   : > { %v26089_v43 = vpop.trf.xlu0  ;;  %v26091_v44 = vpop.trf.xlu1 }
 0x353   : > { %30644 = vst [vmem:[#allocation21_spill] sm:$0xff] %v26089_v43  ;;  %30645 = vst [vmem:[#allocation22_spill] sm:$0xff] %v26091_v44 }
 0x356   : > { %v26093_v47 = vpop.trf.xlu0  ;;  %v26095_v48 = vpop.trf.xlu1  ;;  %5757 = vxpose.xlu0.b32.start.end [1/1] (short) (narrow) %v3232_v42, 16  ;;  %5789 = vxpose.xlu1.b32.start.end [1/1] (short) (narrow) %v3240_v45, 16  ;;  %v3259_v42 = vcombine.high %v2899_v23, %v2899_v23 }
 0x357   : > { %30646 = vst [vmem:[#allocation23_spill] sm:$0xff] %v26093_v47  ;;  %30647 = vst [vmem:[#allocation24_spill] sm:$0xff] %v26095_v48 }
 0x35a   : > { %v26098_v50 = vpop.trf.xlu0  ;;  %v26100_v51 = vpop.trf.xlu1 }
 0x35b   : > { %30648 = vst [vmem:[#allocation25_spill] sm:$0xff] %v26098_v50  ;;  %30649 = vst [vmem:[#allocation26_spill] sm:$0xff] %v26100_v51 }
 0x35e   : > { %v26102_v58 = vpop.trf.xlu0  ;;  %v26104_v59 = vpop.trf.xlu1  ;;  %5821 = vxpose.xlu0.b32.start.end [1/1] (short) (narrow) %v3239_v49, 16  ;;  %5853 = vxpose.xlu1.b32.start.end [1/1] (short) (narrow) %v3241_v52, 16  ;;  %v3273_v49 = vrot.slane %v3259_v42, %v25994_v40 }
 0x35f   : > { %30650 = vst [vmem:[#allocation27_spill] sm:$0xff] %v26102_v58  ;;  %30651 = vst [vmem:[#allocation28_spill] sm:$0xff] %v26104_v59 }
 0x362   : > { %v26107_v1 = vpop.trf.xlu0  ;;  %v26109_v2 = vpop.trf.xlu1 }
 0x363   : > { %30652 = vst [vmem:[#allocation29_spill] sm:$0xff] %v26107_v1  ;;  %30653 = vst [vmem:[#allocation30_spill] sm:$0xff] %v26109_v2 }
 0x366   : > { %v26111_v9 = vpop.trf.xlu0  ;;  %v26113_v12 = vpop.trf.xlu1  ;;  %5885 = vxpose.xlu0.b32.start.end [1/1] (short) (narrow) %v3249_v62, 16  ;;  %5917 = vxpose.xlu1.b32.start.end [1/1] (short) (narrow) %v3257_v5, 16  ;;  %v3275_v62 = vcombine.high %v3273_v49, %v3273_v49  ;;  %v2900_v5 = vld [vmem:[#allocation2 + $0x98] sm:$0xff] }
 0x367   : > { %30654 = vst [vmem:[#allocation31_spill] sm:$0xff] %v26111_v9  ;;  %30655 = vst [vmem:[#allocation32_spill] sm:$0xff] %v26113_v12  ;;  %v3276_v42 = vcombine.high %v2900_v5, %v2900_v5  ;;  %v2905_v9 = vld [vmem:[#allocation2 + $0xc0] sm:$0xff] }
 0x368   : > { %v26207_v59 = vrot.slane %v2905_v9, %v25994_v40 }
 0x36a   : > { %v26116_v16 = vpop.trf.xlu0  ;;  %v26118_v19 = vpop.trf.xlu1 }
 0x36b   : > { %30656 = vst [vmem:[#allocation33_spill] sm:$0xff] %v26116_v16  ;;  %30657 = vst [vmem:[#allocation34_spill] sm:$0xff] %v26118_v19  ;;  %v2904_v16 = vld [vmem:[#allocation2 + $0xb8] sm:$0xff] }
 0x36c   : > { %v3344_v12 = vcombine.high %v2904_v16, %v2904_v16 }
 0x36e   : > { %v26120_v26 = vpop.trf.xlu0  ;;  %v26122_v29 = vpop.trf.xlu1  ;;  %5949 = vxpose.xlu0.b32.start.end [1/1] (short) (narrow) %v3256_v15, 16  ;;  %5981 = vxpose.xlu1.b32.start.end [1/1] (short) (narrow) %v3258_v22, 16  ;;  %v3283_v22 = vrot.slane %v2900_v5, %v25994_v40  ;;  %v26204_v1 = vrot.slane %v3344_v12, %v25994_v40 }
 0x36f   : > { %30658 = vst [vmem:[#allocation35_spill] sm:$0xff] %v26120_v26  ;;  %30659 = vst [vmem:[#allocation36_spill] sm:$0xff] %v26122_v29  ;;  %v2903_v26 = vld [vmem:[#allocation2 + $0xb0] sm:$0xff] }
 0x370   : > { %v3327_v19 = vcombine.high %v2903_v26, %v2903_v26 }
 0x372   : > { %v26125_v33 = vpop.trf.xlu0  ;;  %v26127_v36 = vpop.trf.xlu1 }
 0x373   : > { %30660 = vst [vmem:[#allocation37_spill] sm:$0xff] %v26125_v33  ;;  %30661 = vst [vmem:[#allocation38_spill] sm:$0xff] %v26127_v36 }
 0x376   : > { %v26129_v45 = vpop.trf.xlu0  ;;  %v26131_v46 = vpop.trf.xlu1  ;;  %6013 = vxpose.xlu0.b32.start.end [1/1] (short) (narrow) %v3266_v30, 16  ;;  %6045 = vxpose.xlu1.b32.start.end [1/1] (short) (narrow) %v3274_v38, 16  ;;  %v3291_v38 = vcombine.high %v3283_v22, %v3283_v22 }
 0x377   : > { %30662 = vst [vmem:[#allocation39_spill] sm:$0xff] %v26129_v45  ;;  %30663 = vst [vmem:[#allocation40_spill] sm:$0xff] %v26131_v46 }
 0x37a   : > { %v26134_v52 = vpop.trf.xlu0  ;;  %v26136_v55 = vpop.trf.xlu1 }
 0x37b   : > { %30664 = vst [vmem:[#allocation41_spill] sm:$0xff] %v26134_v52  ;;  %30665 = vst [vmem:[#allocation42_spill] sm:$0xff] %v26136_v55 }
 0x37e   : > { %v26138_v8 = vpop.trf.xlu0  ;;  %v26140_v15 = vpop.trf.xlu1  ;;  %6077 = vxpose.xlu0.b32.start.end [1/1] (short) (narrow) %v3273_v49, 16  ;;  %6109 = vxpose.xlu1.b32.start.end [1/1] (short) (narrow) %v3275_v62, 16 }
 0x37f   : > { %30666 = vst [vmem:[#allocation43_spill] sm:$0xff] %v26138_v8  ;;  %30667 = vst [vmem:[#allocation44_spill] sm:$0xff] %v26140_v15  ;;  %v3290_v8 = vrot.slane %v3276_v42, %v25994_v40  ;;  %v2901_v15 = vld [vmem:[#allocation2 + $0xa0] sm:$0xff] }
 0x380   : > { %v3300_v5 = vrot.slane %v2901_v15, %v25994_v40  ;;  %v3293_v42 = vcombine.high %v2901_v15, %v2901_v15 }
 0x381   : > { %v3292_v62 = vcombine.high %v3290_v8, %v3290_v8 }
 0x382   : > { %v26143_v23 = vpop.trf.xlu0  ;;  %v26145_v30 = vpop.trf.xlu1 }
 0x383   : > { %30668 = vst [vmem:[#allocation45_spill] sm:$0xff] %v26143_v23  ;;  %30669 = vst [vmem:[#allocation46_spill] sm:$0xff] %v26145_v30 }
 0x386   : > { %v26147_v37 = vpop.trf.xlu0  ;;  %v26149_v52 = vpop.trf.xlu1  ;;  %6141 = vxpose.xlu0.b32.start.end [1/1] (short) (narrow) %v3283_v22, 16  ;;  %6173 = vxpose.xlu1.b32.start.end [1/1] (short) (narrow) %v3291_v38, 16  ;;  %v3308_v38 = vcombine.high %v3300_v5, %v3300_v5 }
 0x387   : > { %30670 = vst [vmem:[#allocation47_spill] sm:$0xff] %v26147_v37  ;;  %30671 = vst [vmem:[#allocation48_spill] sm:$0xff] %v26149_v52 }
 0x38a   : > { %v26152_v55 = vpop.trf.xlu0  ;;  %v26154_v49 = vpop.trf.xlu1 }
 0x38b   : > { %30672 = vst [vmem:[#allocation49_spill] sm:$0xff] %v26152_v55  ;;  %30673 = vst [vmem:[#allocation50_spill] sm:$0xff] %v26154_v49 }
 0x38e   : > { %v26156_v46 = vpop.trf.xlu0  ;;  %v26158_v23 = vpop.trf.xlu1  ;;  %6205 = vxpose.xlu0.b32.start.end [1/1] (short) (narrow) %v3290_v8, 16  ;;  %6237 = vxpose.xlu1.b32.start.end [1/1] (short) (narrow) %v3292_v62, 16 }
 0x38f   : > { %30674 = vst [vmem:[#allocation51_spill] sm:$0xff] %v26156_v46  ;;  %30675 = vst [vmem:[#allocation52_spill] sm:$0xff] %v26158_v23  ;;  %v3307_v46 = vrot.slane %v3293_v42, %v25994_v40  ;;  %v2902_v23 = vld [vmem:[#allocation2 + $0xa8] sm:$0xff] }
 0x390   : > { %v3317_v15 = vrot.slane %v2902_v23, %v25994_v40  ;;  %v3310_v42 = vcombine.high %v2902_v23, %v2902_v23 }
 0x391   : > { %v3309_v62 = vcombine.high %v3307_v46, %v3307_v46 }
 0x392   : > { %v26161_v37 = vpop.trf.xlu0  ;;  %v26163_v22 = vpop.trf.xlu1  ;;  %v3324_v33 = vrot.slane %v3310_v42, %v25994_v40  ;;  %v26201_v42 = vrot.slane %v2904_v16, %v25994_v40 }
 0x393   : > { %30676 = vst [vmem:[#allocation53_spill] sm:$0xff] %v26161_v37  ;;  %30677 = vst [vmem:[#allocation54_spill] sm:$0xff] %v26163_v22 }
 0x396   : > { %v26165_v52 = vpop.trf.xlu0  ;;  %v26167_v55 = vpop.trf.xlu1  ;;  %6269 = vxpose.xlu0.b32.start.end [1/1] (short) (narrow) %v3300_v5, 16  ;;  %6301 = vxpose.xlu1.b32.start.end [1/1] (short) (narrow) %v3308_v38, 16  ;;  %v3325_v38 = vcombine.high %v3317_v15, %v3317_v15 }
 0x397   : > { %v8317_v58 = vcombine.low %v26021_v53, %v26165_v52  ;;  %v8687_v16 = vcombine.low %v26039_v3, %v26167_v55  ;;  %v8688_v44 = vcombine.high %v26039_v3, %v26167_v55 }
 0x39a   : > { %v26170_v49 = vpop.trf.xlu0  ;;  %v26172_v8 = vpop.trf.xlu1 }
 0x39b   : > { %v8502_v48 = vcombine.low %v26026_v56, %v26170_v49  ;;  %v8503_v47 = vcombine.high %v26026_v56, %v26170_v49  ;;  %v8872_v50 = vcombine.low %v26044_v6, %v26172_v8  ;;  %v8873_v3 = vcombine.high %v26044_v6, %v26172_v8 }
 0x39c   : > { %v26255_v6 = vrot.slane %v8687_v16, %v25994_v40 }
 0x39d   : > { %v26265_v8 = vrot.slane %v8502_v48, %v25994_v40  ;;  %v26275_v16 = vrot.slane %v8872_v50, %v25994_v40 }
 0x39e   : > { %v26174_v30 = vpop.trf.xlu0  ;;  %v26176_v37 = vpop.trf.xlu1  ;;  %6333 = vxpose.xlu0.b32.start.end [1/1] (short) (narrow) %v3307_v46, 16  ;;  %6365 = vxpose.xlu1.b32.start.end [1/1] (short) (narrow) %v3309_v62, 16  ;;  %v3326_v62 = vcombine.high %v3324_v33, %v3324_v33  ;;  %30680 = vst [vmem:[#allocation57_spill] sm:$0xff] %v26255_v6 }
 0x39f   : > { %v9057_v55 = vcombine.low %v26023_v54, %v26174_v30  ;;  %v9427_v49 = vcombine.low %v26032_v61, %v26176_v37  ;;  %30682 = vst [vmem:[#allocation59_spill] sm:$0xff] %v26275_v16 }
 0x3a1   : > { %v26285_v48 = vrot.slane %v9057_v55, %v25994_v40  ;;  %v26297_v16 = vrot.slane %v9427_v49, %v25994_v40 }
 0x3a2   : > { %v26179_v22 = vpop.trf.xlu0  ;;  %v26181_v5 = vpop.trf.xlu1 }
 0x3a3   : > { %30685 = vst [vmem:[#allocation62_spill] sm:$0xff] %v26297_v16 }
 0x3a6   : > { %v26183_v45 = vpop.trf.xlu0  ;;  %v26185_v36 = vpop.trf.xlu1  ;;  %6397 = vxpose.xlu0.b32.start.end [1/1] (short) (narrow) %v3317_v15, 16  ;;  %6429 = vxpose.xlu1.b32.start.end [1/1] (short) (narrow) %v3325_v38, 16  ;;  %v3334_v15 = vrot.slane %v2903_v26, %v25994_v40  ;;  %v26198_v38 = vrot.slane %v3327_v19, %v25994_v40  ;;  %v8318_v19 = vcombine.high %v26021_v53, %v26165_v52 }
 0x3a7   : > { %v26232_v52 = vrot.slane %v8317_v58, %v25994_v40  ;;  %v9798_v49 = vcombine.high %v26030_v60, %v26183_v45 }
 0x3a8   : > { %v3342_v26 = vcombine.high %v3334_v15, %v3334_v15  ;;  %v3343_v12 = vcombine.high %v26198_v38, %v26198_v38  ;;  %v26252_v58 = vrot.slane %v8318_v19, %v25994_v40  ;;  %v26272_v19 = vrot.slane %v8503_v47, %v25994_v40 }
 0x3a9   : > { %30678 = vst [vmem:[#allocation55_spill] sm:$0xff] %v26232_v52 }
 0x3aa   : > { %v26188_v29 = vpop.trf.xlu0  ;;  %v26190_v46 = vpop.trf.xlu1  ;;  %30679 = vst [vmem:[#allocation56_spill] sm:$0xff] %v26252_v58 }
 0x3ae   : > { %v26192_v2 = vpop.trf.xlu0  ;;  %v26194_v23 = vpop.trf.xlu1  ;;  %6461 = vxpose.xlu0.b32.start.end [1/1] (short) (narrow) %v3324_v33, 16  ;;  %6493 = vxpose.xlu1.b32.start.end [1/1] (short) (narrow) %v3326_v62, 16  ;;  %v3361_v62 = vcombine.high %v2905_v9, %v2905_v9  ;;  %v9058_v9 = vcombine.high %v26023_v54, %v26174_v30  ;;  %v9428_v54 = vcombine.high %v26032_v61, %v26176_v37 }
 0x3af   : > { %v26262_v30 = vrot.slane %v8688_v44, %v25994_v40  ;;  %v9612_v37 = vcombine.low %v26037_v0, %v26181_v5  ;;  %v9613_v61 = vcombine.high %v26037_v0, %v26181_v5  ;;  %v26282_v44 = vrot.slane %v8873_v3, %v25994_v40 }
 0x3b0   : > { %v26249_v56 = vrot.slane %v3361_v62, %v25994_v40  ;;  %v2906_v62 = vld [vmem:[#allocation2 + $0xc8] sm:$0xff]  ;;  %v26300_v0 = vrot.slane %v9428_v54, %v25994_v40 }
 0x3b1   : > { %30681 = vst [vmem:[#allocation58_spill] sm:$0xff] %v26262_v30  ;;  %30683 = vst [vmem:[#allocation60_spill] sm:$0xff] %v26282_v44  ;;  %v26303_v5 = vrot.slane %v2906_v62, %v25994_v40  ;;  %v3378_v3 = vcombine.high %v2906_v62, %v2906_v62  ;;  %v26316_v50 = vrot.slane %v9612_v37, %v25994_v40  ;;  %v30759_v30 = vld [vmem:[#allocation30_spill] sm:$0xff] }
 0x3b2   : > { %v26211_v51 = vpop.trf.xlu0  ;;  %v26213_v33 = vpop.trf.xlu1  ;;  %30686 = vst [vmem:[#allocation63_spill] sm:$0xff] %v26300_v0  ;;  %v26319_v54 = vrot.slane %v9613_v61, %v25994_v40  ;;  %v10167_v62 = vcombine.low %v26041_v4, %v26185_v36  ;;  %v10353_v61 = vcombine.high %v26046_v7, %v26190_v46  ;;  %v30767_v0 = vld [vmem:[#allocation32_spill] sm:$0xff] }
 0x3b3   : > { %30688 = vst [vmem:[#allocation65_spill] sm:$0xff] %v26316_v50  ;;  %v30775_v50 = vld [vmem:[#allocation34_spill] sm:$0xff] }
 0x3b4   : > { %30689 = vst [vmem:[#allocation66_spill] sm:$0xff] %v26319_v54  ;;  %v26349_v54 = vrot.slane %v9798_v49, %v25994_v40 }
 0x3b6   : > { %v26244_v43 = vpop.trf.xlu0  ;;  %v26246_v53 = vpop.trf.xlu1  ;;  %6525 = vxpose.xlu0.b32.start.end [1/1] (short) (narrow) %v3334_v15, 16  ;;  %6557 = vxpose.xlu1.b32.start.end [1/1] (short) (narrow) %v3342_v26, 16  ;;  %v9242_v15 = vcombine.low %v26028_v57, %v26179_v22  ;;  %v9243_v26 = vcombine.high %v26028_v57, %v26179_v22  ;;  %v26288_v57 = vrot.slane %v9058_v9, %v25994_v40 }
 0x3b7   : > { %30691 = vst [vmem:[#allocation68_spill] sm:$0xff] %v26349_v54 }
 0x3b8   : > { %30684 = vst [vmem:[#allocation61_spill] sm:$0xff] %v26288_v57  ;;  %v26306_v9 = vrot.slane %v9242_v15, %v25994_v40  ;;  %v26309_v55 = vrot.slane %v9243_v26, %v25994_v40  ;;  %v9797_v57 = vcombine.low %v26030_v60, %v26183_v45  ;;  %v10168_v15 = vcombine.high %v26041_v4, %v26185_v36 }
 0x3b9   : > { %v9982_v26 = vcombine.low %v26035_v63, %v26188_v29  ;;  %v10352_v60 = vcombine.low %v26046_v7, %v26190_v46  ;;  %v10537_v4 = vcombine.low %v26048_v10, %v26192_v2  ;;  %v10538_v36 = vcombine.high %v26048_v10, %v26192_v2 }
 0x3ba   : > { %v26290_v47 = vpop.trf.xlu0  ;;  %v26292_v22 = vpop.trf.xlu1  ;;  %30687 = vst [vmem:[#allocation64_spill] sm:$0xff] %v26309_v55  ;;  %v9983_v55 = vcombine.high %v26035_v63, %v26188_v29  ;;  %v26343_v63 = vrot.slane %v3378_v3, %v25994_v40  ;;  %v26346_v29 = vrot.slane %v9797_v57, %v25994_v40  ;;  %v26356_v46 = vrot.slane %v10167_v62, %v25994_v40 }
 0x3bb   : > { %v10908_v10 = vcombine.high %v26050_v11, %v26194_v23  ;;  %v10722_v2 = vcombine.low %v26053_v13, %v26211_v51  ;;  %v26365_v57 = vrot.slane %v10168_v15, %v25994_v40  ;;  %v26368_v3 = vrot.slane %v9982_v26, %v25994_v40 }
 0x3bc   : > { %30690 = vst [vmem:[#allocation67_spill] sm:$0xff] %v26346_v29  ;;  %30692 = vst [vmem:[#allocation69_spill] sm:$0xff] %v26356_v46  ;;  %v26371_v49 = vrot.slane %v9983_v55, %v25994_v40  ;;  %v26374_v62 = vrot.slane %v10352_v60, %v25994_v40  ;;  %v26381_v46 = vrot.slane %v10353_v61, %v25994_v40 }
 0x3bd   : > { %30693 = vst [vmem:[#allocation70_spill] sm:$0xff] %v26365_v57  ;;  %30694 = vst [vmem:[#allocation71_spill] sm:$0xff] %v26368_v3  ;;  %v11092_v26 = vcombine.low %v26055_v14, %v26213_v33  ;;  %v11093_v60 = vcombine.high %v26055_v14, %v26213_v33  ;;  %v11647_v14 = vcombine.low %v26059_v18, %v26246_v53  ;;  %v30783_v57 = vld [vmem:[#allocation36_spill] sm:$0xff] }
 0x3be   : > { %v26331_v45 = vpop.trf.xlu0  ;;  %v26333_v37 = vpop.trf.xlu1  ;;  %6589 = vxpose.xlu0.b32.start.end [1/1] (short) (narrow) %v26198_v38, 16  ;;  %6621 = vxpose.xlu1.b32.start.end [1/1] (short) (narrow) %v3343_v12, 16  ;;  %v10907_v38 = vcombine.low %v26050_v11, %v26194_v23  ;;  %v10723_v12 = vcombine.high %v26053_v13, %v26211_v51  ;;  %30695 = vst [vmem:[#allocation72_spill] sm:$0xff] %v26371_v49  ;;  %30696 = vst [vmem:[#allocation73_spill] sm:$0xff] %v26374_v62  ;;  %v2907_v23 = vld [vmem:[#allocation2 + $0xd0] sm:$0xff] }
 0x3bf   : > { %30697 = vst [vmem:[#allocation74_spill] sm:$0xff] %v26381_v46  ;;  %v26384_v13 = vrot.slane %v10537_v4, %v25994_v40  ;;  %v26387_v51 = vrot.slane %v10538_v36, %v25994_v40  ;;  %v3395_v61 = vcombine.high %v2907_v23, %v2907_v23  ;;  %v26399_v46 = vrot.slane %v10908_v10, %v25994_v40  ;;  %v30790_v62 = vld [vmem:[#allocation38_spill] sm:$0xff] }
 0x3c0   : > { %v26392_v15 = vrot.slane %v10907_v38, %v25994_v40  ;;  %v26402_v4 = vrot.slane %v10722_v2, %v25994_v40  ;;  %v26405_v36 = vrot.slane %v10723_v12, %v25994_v40  ;;  %v26408_v55 = vrot.slane %v2907_v23, %v25994_v40 }
 0x3c1   : > { %30698 = vst [vmem:[#allocation75_spill] sm:$0xff] %v26384_v13  ;;  %30699 = vst [vmem:[#allocation76_spill] sm:$0xff] %v26387_v51  ;;  %v11277_v38 = vcombine.low %v26057_v17, %v26244_v43  ;;  %v30704_v2 = vcombine.high %v26201_v42, %v26201_v42  ;;  %v11648_v12 = vcombine.high %v26059_v18, %v26246_v53 }
 0x3c2   : > { %v26376_v7 = vpop.trf.xlu0  ;;  %v26378_v11 = vpop.trf.xlu1  ;;  %30700 = vst [vmem:[#allocation77_spill] sm:$0xff] %v26392_v15  ;;  %30701 = vst [vmem:[#allocation78_spill] sm:$0xff] %v26399_v46  ;;  %v11278_v15 = vcombine.high %v26057_v17, %v26244_v43  ;;  %v11462_v23 = vcombine.low %v26062_v20, %v26290_v47  ;;  %v11463_v17 = vcombine.high %v26062_v20, %v26290_v47  ;;  %v30798_v46 = vld [vmem:[#allocation40_spill] sm:$0xff] }
 0x3c3   : > { %30702 = vst [vmem:[#allocation79_spill] sm:$0xff] %v26402_v4  ;;  %30703 = vst [vmem:[#allocation80_spill] sm:$0xff] %v26405_v36  ;;  %v11832_v43 = vcombine.low %v26064_v21, %v26292_v22  ;;  %v26431_v36 = vrot.slane %v11092_v26, %v25994_v40  ;;  %v26434_v4 = vrot.slane %v11093_v60, %v25994_v40 }
 0x3c4   : > { %v26439_v18 = vrot.slane %v3395_v61, %v25994_v40  ;;  %v12017_v53 = vcombine.low %v26066_v24, %v26331_v45  ;;  %v12018_v20 = vcombine.high %v26066_v24, %v26331_v45  ;;  %v12387_v47 = vcombine.low %v26068_v25, %v26333_v37 }
 0x3c5   : > { %30705 = vst [vmem:[#allocation81_spill] sm:$0xff] %v26431_v36  ;;  %30706 = vst [vmem:[#allocation82_spill] sm:$0xff] %v26434_v4  ;;  %v26450_v60 = vrot.slane %v11277_v38, %v25994_v40  ;;  %v12388_v61 = vcombine.high %v26068_v25, %v26333_v37  ;;  %v26461_v45 = vrot.slane %v11648_v12, %v25994_v40  ;;  %v30807_v36 = vld [vmem:[#allocation42_spill] sm:$0xff] }
 0x3c6   : > { %v5133_v33 = vpop.trf.xlu0  ;;  %v26416_v10 = vpop.trf.xlu1  ;;  %6653 = vxpose.xlu0.b32.start.end [1/1] (short) (narrow) %v26201_v42, 16  ;;  %6685 = vxpose.xlu1.b32.start.end [1/1] (short) (narrow) %v30704_v2, 16  ;;  %v11833_v42 = vcombine.high %v26064_v21, %v26292_v22  ;;  %v26453_v21 = vrot.slane %v11278_v15, %v25994_v40  ;;  %v26456_v22 = vrot.slane %v11647_v14, %v25994_v40 }
 0x3c7   : > { %30707 = vst [vmem:[#allocation83_spill] sm:$0xff] %v26450_v60  ;;  %30710 = vst [vmem:[#allocation86_spill] sm:$0xff] %v26461_v45  ;;  %v26464_v4 = vrot.slane %v11462_v23, %v25994_v40  ;;  %v26467_v38 = vrot.slane %v11463_v17, %v25994_v40  ;;  %v26470_v15 = vrot.slane %v11832_v43, %v25994_v40  ;;  %v2908_v23 = vld [vmem:[#allocation2 + $0xd8] sm:$0xff]  ;;  %v30814_v45 = vld [vmem:[#allocation44_spill] sm:$0xff] }
 0x3c8   : > { %30708 = vst [vmem:[#allocation84_spill] sm:$0xff] %v26453_v21  ;;  %30709 = vst [vmem:[#allocation85_spill] sm:$0xff] %v26456_v22  ;;  %v26473_v14 = vrot.slane %v11833_v42, %v25994_v40  ;;  %v12202_v25 = vcombine.low %v26071_v27, %v26376_v7  ;;  %v12203_v37 = vcombine.high %v26071_v27, %v26376_v7 }
 0x3c9   : > { %30711 = vst [vmem:[#allocation87_spill] sm:$0xff] %v26464_v4  ;;  %30712 = vst [vmem:[#allocation88_spill] sm:$0xff] %v26467_v38  ;;  %v26482_v26 = vrot.slane %v12017_v53, %v25994_v40  ;;  %v26485_v17 = vrot.slane %v12018_v20, %v25994_v40  ;;  %v26488_v43 = vrot.slane %v12387_v47, %v25994_v40 }
 0x3ca   : > { %v5134_v2 = vpop.trf.xlu0  ;;  %v5166_v24 = vpop.trf.xlu1  ;;  %30713 = vst [vmem:[#allocation89_spill] sm:$0xff] %v26470_v15  ;;  %30714 = vst [vmem:[#allocation90_spill] sm:$0xff] %v26473_v14  ;;  %v3412_v42 = vcombine.high %v2908_v23, %v2908_v23  ;;  %v26491_v14 = vrot.slane %v12388_v61, %v25994_v40  ;;  %v12572_v27 = vcombine.low %v26073_v28, %v26378_v11 }
 0x3cb   : > { %30715 = vst [vmem:[#allocation91_spill] sm:$0xff] %v26482_v26  ;;  %30716 = vst [vmem:[#allocation92_spill] sm:$0xff] %v26485_v17  ;;  %v12573_v7 = vcombine.high %v26073_v28, %v26378_v11  ;;  %v30719_v53 = vcombine.high %v26204_v1, %v26204_v1  ;;  %v12757_v20 = vcombine.low %v26075_v31, %v5133_v33 }
 0x3cc   : > { %30717 = vst [vmem:[#allocation93_spill] sm:$0xff] %v26488_v43  ;;  %30718 = vst [vmem:[#allocation94_spill] sm:$0xff] %v26491_v14  ;;  %v12758_v47 = vcombine.high %v26075_v31, %v5133_v33  ;;  %v13127_v61 = vcombine.low %v26077_v32, %v26416_v10  ;;  %v26506_v14 = vrot.slane %v2908_v23, %v25994_v40 }
 0x3cd   : > { %v26509_v28 = vrot.slane %v12202_v25, %v25994_v40  ;;  %v26512_v11 = vrot.slane %v12203_v37, %v25994_v40  ;;  %v12943_v43 = vcombine.high %v26080_v34, %v5134_v2  ;;  %v13312_v31 = vcombine.low %v26082_v35, %v5166_v24 }
 0x3ce   : > { %v5197_v12 = vpop.trf.xlu0  ;;  %v5229_v15 = vpop.trf.xlu1  ;;  %6717 = vxpose.xlu0.b32.start.end [1/1] (short) (narrow) %v26204_v1, 16  ;;  %6749 = vxpose.xlu1.b32.start.end [1/1] (short) (narrow) %v30719_v53, 16  ;;  %v13128_v1 = vcombine.high %v26077_v32, %v26416_v10  ;;  %v12942_v53 = vcombine.low %v26080_v34, %v5134_v2  ;;  %v13313_v33 = vcombine.high %v26082_v35, %v5166_v24  ;;  %v30735_v24 = vld [vmem:[#allocation21_spill] sm:$0xff] }
 0x3cf   : > { %30720 = vst [vmem:[#allocation95_spill] sm:$0xff] %v26509_v28  ;;  %30721 = vst [vmem:[#allocation96_spill] sm:$0xff] %v26512_v11  ;;  %v26521_v23 = vrot.slane %v3412_v42, %v25994_v40  ;;  %v26524_v25 = vrot.slane %v12572_v27, %v25994_v40  ;;  %v26527_v37 = vrot.slane %v12573_v7, %v25994_v40 }
 0x3d0   : > { %v13497_v11 = vcombine.low %v26084_v39, %v5197_v12  ;;  %v13498_v32 = vcombine.high %v26084_v39, %v5197_v12  ;;  %v26534_v34 = vrot.slane %v12757_v20, %v25994_v40  ;;  %v26537_v35 = vrot.slane %v12758_v47, %v25994_v40 }
 0x3d1   : > { %30722 = vst [vmem:[#allocation97_spill] sm:$0xff] %v26521_v23  ;;  %30723 = vst [vmem:[#allocation98_spill] sm:$0xff] %v26524_v25  ;;  %v26540_v2 = vrot.slane %v13127_v61, %v25994_v40  ;;  %v26545_v42 = vrot.slane %v13128_v1, %v25994_v40  ;;  %v26548_v39 = vrot.slane %v12942_v53, %v25994_v40  ;;  %v30839_v25 = vld [vmem:[#allocation50_spill] sm:$0xff] }
 0x3d2   : > { %30724 = vst [vmem:[#allocation99_spill] sm:$0xff] %v26527_v37  ;;  %v5198_v10 = vpop.trf.xlu0  ;;  %v26531_v28 = vpop.trf.xlu1  ;;  %30725 = vst [vmem:[#allocation100_spill] sm:$0xff] %v26534_v34  ;;  %v13867_v12 = vcombine.low %v26086_v41, %v5229_v15  ;;  %v13868_v27 = vcombine.high %v26086_v41, %v5229_v15  ;;  %v26553_v7 = vrot.slane %v12943_v43, %v25994_v40 }
 0x3d3   : > { %30726 = vst [vmem:[#allocation101_spill] sm:$0xff] %v26537_v35  ;;  %30727 = vst [vmem:[#allocation102_spill] sm:$0xff] %v26540_v2  ;;  %v26556_v20 = vrot.slane %v13312_v31, %v25994_v40  ;;  %v26559_v47 = vrot.slane %v13313_v33, %v25994_v40  ;;  %v26564_v1 = vrot.slane %v13497_v11, %v25994_v40  ;;  %v30737_v33 = vld [vmem:[#allocation23_spill] sm:$0xff] }
 0x3d4   : > { %30728 = vst [vmem:[#allocation103_spill] sm:$0xff] %v26545_v42  ;;  %30729 = vst [vmem:[#allocation104_spill] sm:$0xff] %v26548_v39  ;;  %v26567_v53 = vrot.slane %v13498_v32, %v25994_v40  ;;  %v13682_v41 = vcombine.low %v30735_v24, %v5198_v10  ;;  %v30736_v31 = vcombine.high %v26207_v59, %v26207_v59  ;;  %v2909_v32 = vld [vmem:[#allocation2 + $0xe0] sm:$0xff] }
 0x3d5   : > { %30730 = vst [vmem:[#allocation105_spill] sm:$0xff] %v26553_v7  ;;  %30731 = vst [vmem:[#allocation106_spill] sm:$0xff] %v26556_v20  ;;  %v30738_v20 = vld [vmem:[#allocation24_spill] sm:$0xff]  ;;  %v26582_v7 = vrot.slane %v13868_v27, %v25994_v40  ;;  %v13683_v39 = vcombine.high %v30735_v24, %v5198_v10 }
 0x3d6   : > { %30732 = vst [vmem:[#allocation107_spill] sm:$0xff] %v26559_v47  ;;  %30733 = vst [vmem:[#allocation108_spill] sm:$0xff] %v26564_v1  ;;  %v5261_v15 = vpop.trf.xlu0  ;;  %v5293_v43 = vpop.trf.xlu1  ;;  %6781 = vxpose.xlu0.b32.start.end [1/1] (short) (narrow) %v26207_v59, 16  ;;  %6813 = vxpose.xlu1.b32.start.end [1/1] (short) (narrow) %v30736_v31, 16  ;;  %v30741_v59 = vld [vmem:[#allocation22_spill] sm:$0xff]  ;;  %v26600_v27 = vrot.slane %v13682_v41, %v25994_v40 }
 0x3d7   : > { %30734 = vst [vmem:[#allocation109_spill] sm:$0xff] %v26567_v53  ;;  %v8333_v47 = vcombine.low %v30737_v33, %v5261_v15  ;;  %v8334_v61 = vcombine.high %v30737_v33, %v5261_v15  ;;  %v8703_v11 = vcombine.low %v30738_v20, %v5293_v43  ;;  %v8704_v1 = vcombine.high %v30738_v20, %v5293_v43 }
 0x3d8   : > { %v26579_v53 = vrot.slane %v13867_v12, %v25994_v40  ;;  %30740 = vst [vmem:[#allocation23_spill] sm:$0xff] %v26582_v7  ;;  %30746 = vst [vmem:[#allocation112_spill] sm:$0xff] %v26600_v27  ;;  %v3429_v33 = vcombine.high %v2909_v32, %v2909_v32  ;;  %v30747_v27 = vld [vmem:[#allocation25_spill] sm:$0xff] }
 0x3d9   : > { %v26588_v23 = vrot.slane %v8333_v47, %v25994_v40  ;;  %v26591_v15 = vrot.slane %v8334_v61, %v25994_v40  ;;  %v26594_v20 = vrot.slane %v8703_v11, %v25994_v40  ;;  %v26597_v12 = vrot.slane %v8704_v1, %v25994_v40  ;;  %v30748_v1 = vld [vmem:[#allocation26_spill] sm:$0xff]  ;;  %v30754_v61 = vld [vmem:[#allocation28_spill] sm:$0xff] }
 0x3da   : > { %30739 = vst [vmem:[#allocation21_spill] sm:$0xff] %v26579_v53  ;;  %v5262_v24 = vpop.trf.xlu0  ;;  %v5294_v43 = vpop.trf.xlu1  ;;  %v26605_v47 = vrot.slane %v2909_v32, %v25994_v40  ;;  %v30750_v32 = vcombine.high %v26249_v56, %v26249_v56 }
 0x3db   : > { %30742 = vst [vmem:[#allocation24_spill] sm:$0xff] %v26588_v23  ;;  %30743 = vst [vmem:[#allocation22_spill] sm:$0xff] %v26591_v15  ;;  %v8518_v11 = vcombine.low %v30747_v27, %v5262_v24  ;;  %v8519_v23 = vcombine.high %v30747_v27, %v5262_v24  ;;  %v8888_v52 = vcombine.low %v30748_v1, %v5294_v43 }
 0x3dc   : > { %30744 = vst [vmem:[#allocation110_spill] sm:$0xff] %v26594_v20  ;;  %30745 = vst [vmem:[#allocation111_spill] sm:$0xff] %v26597_v12  ;;  %v8889_v41 = vcombine.high %v30748_v1, %v5294_v43  ;;  %v26628_v15 = vrot.slane %v13683_v39, %v25994_v40  ;;  %v26637_v27 = vrot.slane %v3429_v33, %v25994_v40 }
 0x3dd   : > { %v26640_v24 = vrot.slane %v8518_v11, %v25994_v40  ;;  %v26643_v39 = vrot.slane %v8519_v23, %v25994_v40  ;;  %v26646_v43 = vrot.slane %v8888_v52, %v25994_v40 }
 0x3de   : > { %30749 = vst [vmem:[#allocation25_spill] sm:$0xff] %v26628_v15  ;;  %v5325_v10 = vpop.trf.xlu0  ;;  %v5357_v58 = vpop.trf.xlu1  ;;  %6845 = vxpose.xlu0.b32.start.end [1/1] (short) (narrow) %v26249_v56, 16  ;;  %6877 = vxpose.xlu1.b32.start.end [1/1] (short) (narrow) %v30750_v32, 16  ;;  %v26649_v1 = vrot.slane %v8889_v41, %v25994_v40  ;;  %v30753_v56 = vld [vmem:[#allocation27_spill] sm:$0xff] }
 0x3df   : > { %30751 = vst [vmem:[#allocation26_spill] sm:$0xff] %v26646_v43  ;;  %v9073_v32 = vcombine.low %v30753_v56, %v5325_v10  ;;  %v9074_v31 = vcombine.high %v30753_v56, %v5325_v10  ;;  %v9443_v12 = vcombine.low %v30754_v61, %v5357_v58  ;;  %v9444_v33 = vcombine.high %v30754_v61, %v5357_v58  ;;  %v30758_v10 = vld [vmem:[#allocation29_spill] sm:$0xff] }
 0x3e0   : > { %30752 = vst [vmem:[#allocation113_spill] sm:$0xff] %v26649_v1 }
 0x3e1   : > { %v26672_v11 = vrot.slane %v9073_v32, %v25994_v40  ;;  %v26675_v52 = vrot.slane %v9074_v31, %v25994_v40  ;;  %v26678_v41 = vrot.slane %v9443_v12, %v25994_v40  ;;  %v26681_v20 = vrot.slane %v9444_v33, %v25994_v40  ;;  %v30760_v12 = vld [vmem:[#allocation61_spill] sm:$0xff] }
 0x3e2   : > { %v5326_v56 = vpop.trf.xlu0  ;;  %v5358_v23 = vpop.trf.xlu1 }
 0x3e3   : > { %30756 = vst [vmem:[#allocation27_spill] sm:$0xff] %v26678_v41  ;;  %30757 = vst [vmem:[#allocation28_spill] sm:$0xff] %v26681_v20  ;;  %v9258_v43 = vcombine.low %v30758_v10, %v5326_v56  ;;  %v9259_v58 = vcombine.high %v30758_v10, %v5326_v56  ;;  %v9628_v61 = vcombine.low %v30759_v30, %v5358_v23 }
 0x3e4   : > { %v9629_v1 = vcombine.high %v30759_v30, %v5358_v23  ;;  %v30765_v30 = vcombine.high %v26303_v5, %v26303_v5  ;;  %v30766_v23 = vld [vmem:[#allocation31_spill] sm:$0xff] }
 0x3e5   : > { %v26705_v44 = vrot.slane %v9258_v43, %v25994_v40  ;;  %v26708_v33 = vrot.slane %v9259_v58, %v25994_v40  ;;  %v26711_v6 = vrot.slane %v9628_v61, %v25994_v40 }
 0x3e6   : > { %v5389_v56 = vpop.trf.xlu0  ;;  %v5421_v31 = vpop.trf.xlu1  ;;  %6909 = vxpose.xlu0.b32.start.end [1/1] (short) (narrow) %v26303_v5, 16  ;;  %v26714_v10 = vrot.slane %v9629_v1, %v25994_v40  ;;  %6941 = vxpose.xlu1.b32.start.end [1/1] (short) (narrow) %v30765_v30, 16  ;;  %v30768_v1 = vld [vmem:[#allocation64_spill] sm:$0xff] }
 0x3e7   : > { %30761 = vst [vmem:[#allocation29_spill] sm:$0xff] %v26705_v44  ;;  %30762 = vst [vmem:[#allocation30_spill] sm:$0xff] %v26708_v33  ;;  %v9813_v32 = vcombine.low %v30766_v23, %v5389_v56  ;;  %v9814_v20 = vcombine.high %v30766_v23, %v5389_v56  ;;  %v10183_v43 = vcombine.low %v30767_v0, %v5421_v31  ;;  %v30774_v23 = vld [vmem:[#allocation33_spill] sm:$0xff] }
 0x3e8   : > { %30763 = vst [vmem:[#allocation61_spill] sm:$0xff] %v26711_v6  ;;  %30764 = vst [vmem:[#allocation114_spill] sm:$0xff] %v26714_v10  ;;  %v10184_v41 = vcombine.high %v30767_v0, %v5421_v31 }
 0x3e9   : > { %v26740_v44 = vrot.slane %v9813_v32, %v25994_v40  ;;  %v26743_v16 = vrot.slane %v9814_v20, %v25994_v40  ;;  %v26746_v5 = vrot.slane %v10183_v43, %v25994_v40 }
 0x3ea   : > { %v5390_v58 = vpop.trf.xlu0  ;;  %v5422_v61 = vpop.trf.xlu1  ;;  %v26749_v30 = vrot.slane %v10184_v41, %v25994_v40 }
 0x3eb   : > { %30770 = vst [vmem:[#allocation31_spill] sm:$0xff] %v26740_v44  ;;  %30771 = vst [vmem:[#allocation32_spill] sm:$0xff] %v26743_v16  ;;  %v9998_v6 = vcombine.low %v30774_v23, %v5390_v58  ;;  %v9999_v31 = vcombine.high %v30774_v23, %v5390_v58  ;;  %v10368_v56 = vcombine.low %v30775_v50, %v5422_v61 }
 0x3ec   : > { %30772 = vst [vmem:[#allocation64_spill] sm:$0xff] %v26746_v5  ;;  %30773 = vst [vmem:[#allocation115_spill] sm:$0xff] %v26749_v30  ;;  %v10369_v10 = vcombine.high %v30775_v50, %v5422_v61  ;;  %v30781_v50 = vcombine.high %v26343_v63, %v26343_v63  ;;  %v30782_v61 = vld [vmem:[#allocation35_spill] sm:$0xff] }
 0x3ed   : > { %v26773_v43 = vrot.slane %v9998_v6, %v25994_v40  ;;  %v26776_v41 = vrot.slane %v9999_v31, %v25994_v40  ;;  %v26779_v33 = vrot.slane %v10368_v56, %v25994_v40 }
 0x3ee   : > { %v5453_v23 = vpop.trf.xlu0  ;;  %v5485_v20 = vpop.trf.xlu1  ;;  %6973 = vxpose.xlu0.b32.start.end [1/1] (short) (narrow) %v26343_v63, 16  ;;  %v26782_v58 = vrot.slane %v10369_v10, %v25994_v40  ;;  %7005 = vxpose.xlu1.b32.start.end [1/1] (short) (narrow) %v30781_v50, 16 }
 0x3ef   : > { %30777 = vst [vmem:[#allocation33_spill] sm:$0xff] %v26773_v43  ;;  %30778 = vst [vmem:[#allocation34_spill] sm:$0xff] %v26776_v41  ;;  %v10553_v32 = vcombine.low %v30782_v61, %v5453_v23  ;;  %v10554_v30 = vcombine.high %v30782_v61, %v5453_v23  ;;  %v10923_v6 = vcombine.low %v30783_v57, %v5485_v20  ;;  %v30789_v61 = vld [vmem:[#allocation37_spill] sm:$0xff] }
 0x3f0   : > { %30779 = vst [vmem:[#allocation116_spill] sm:$0xff] %v26779_v33  ;;  %30780 = vst [vmem:[#allocation117_spill] sm:$0xff] %v26782_v58  ;;  %v10924_v5 = vcombine.high %v30783_v57, %v5485_v20 }
 0x3f1   : > { %v26808_v0 = vrot.slane %v10553_v32, %v25994_v40  ;;  %v26811_v10 = vrot.slane %v10554_v30, %v25994_v40  ;;  %v26814_v63 = vrot.slane %v10923_v6, %v25994_v40 }
 0x3f2   : > { %v5454_v31 = vpop.trf.xlu0  ;;  %v5486_v56 = vpop.trf.xlu1  ;;  %v26817_v50 = vrot.slane %v10924_v5, %v25994_v40 }
 0x3f3   : > { %30785 = vst [vmem:[#allocation35_spill] sm:$0xff] %v26808_v0  ;;  %30786 = vst [vmem:[#allocation36_spill] sm:$0xff] %v26811_v10  ;;  %v10738_v33 = vcombine.low %v30789_v61, %v5454_v31  ;;  %v10739_v20 = vcombine.high %v30789_v61, %v5454_v31  ;;  %v11108_v23 = vcombine.low %v30790_v62, %v5486_v56 }
 0x3f4   : > { %30787 = vst [vmem:[#allocation118_spill] sm:$0xff] %v26814_v63  ;;  %30788 = vst [vmem:[#allocation119_spill] sm:$0xff] %v26817_v50  ;;  %v11109_v58 = vcombine.high %v30790_v62, %v5486_v56  ;;  %v30796_v62 = vcombine.high %v26408_v55, %v26408_v55  ;;  %v30797_v56 = vld [vmem:[#allocation39_spill] sm:$0xff] }
 0x3f5   : > { %v26841_v6 = vrot.slane %v10738_v33, %v25994_v40  ;;  %v26844_v5 = vrot.slane %v10739_v20, %v25994_v40  ;;  %v26847_v41 = vrot.slane %v11108_v23, %v25994_v40 }
 0x3f6   : > { %v5517_v61 = vpop.trf.xlu0  ;;  %v5549_v30 = vpop.trf.xlu1  ;;  %7037 = vxpose.xlu0.b32.start.end [1/1] (short) (narrow) %v26408_v55, 16  ;;  %v26850_v31 = vrot.slane %v11109_v58, %v25994_v40  ;;  %7069 = vxpose.xlu1.b32.start.end [1/1] (short) (narrow) %v30796_v62, 16 }
 0x3f7   : > { %30792 = vst [vmem:[#allocation37_spill] sm:$0xff] %v26841_v6  ;;  %30793 = vst [vmem:[#allocation38_spill] sm:$0xff] %v26844_v5  ;;  %v11293_v32 = vcombine.low %v30797_v56, %v5517_v61  ;;  %v11294_v50 = vcombine.high %v30797_v56, %v5517_v61  ;;  %v11663_v33 = vcombine.low %v30798_v46, %v5549_v30  ;;  %v30806_v56 = vld [vmem:[#allocation41_spill] sm:$0xff] }
 0x3f8   : > { %30794 = vst [vmem:[#allocation120_spill] sm:$0xff] %v26847_v41  ;;  %30795 = vst [vmem:[#allocation121_spill] sm:$0xff] %v26850_v31  ;;  %v11664_v63 = vcombine.high %v30798_v46, %v5549_v30 }
 0x3f9   : > { %v26876_v6 = vrot.slane %v11293_v32, %v25994_v40  ;;  %v26879_v10 = vrot.slane %v11294_v50, %v25994_v40  ;;  %v26882_v55 = vrot.slane %v11663_v33, %v25994_v40 }
 0x3fa   : > { %v5518_v57 = vpop.trf.xlu0  ;;  %v5550_v23 = vpop.trf.xlu1  ;;  %v26885_v62 = vrot.slane %v11664_v63, %v25994_v40 }
 0x3fb   : > { %30802 = vst [vmem:[#allocation39_spill] sm:$0xff] %v26876_v6  ;;  %30803 = vst [vmem:[#allocation40_spill] sm:$0xff] %v26879_v10  ;;  %v11478_v41 = vcombine.low %v30806_v56, %v5518_v57  ;;  %v11479_v30 = vcombine.high %v30806_v56, %v5518_v57  ;;  %v11848_v61 = vcombine.low %v30807_v36, %v5550_v23 }
 0x3fc   : > { %30804 = vst [vmem:[#allocation122_spill] sm:$0xff] %v26882_v55  ;;  %30805 = vst [vmem:[#allocation123_spill] sm:$0xff] %v26885_v62  ;;  %v11849_v31 = vcombine.high %v30807_v36, %v5550_v23  ;;  %v30812_v36 = vcombine.high %v26439_v18, %v26439_v18  ;;  %v30813_v23 = vld [vmem:[#allocation43_spill] sm:$0xff] }
 0x3fd   : > { %v26909_v33 = vrot.slane %v11478_v41, %v25994_v40  ;;  %v26912_v63 = vrot.slane %v11479_v30, %v25994_v40  ;;  %v26915_v46 = vrot.slane %v11848_v61, %v25994_v40 }
 0x3fe   : > { %v5581_v56 = vpop.trf.xlu0  ;;  %v5613_v50 = vpop.trf.xlu1  ;;  %7101 = vxpose.xlu0.b32.start.end [1/1] (short) (narrow) %v26439_v18, 16  ;;  %v26918_v57 = vrot.slane %v11849_v31, %v25994_v40  ;;  %7133 = vxpose.xlu1.b32.start.end [1/1] (short) (narrow) %v30812_v36, 16  ;;  %v30822_v36 = vld [vmem:[#allocation46_spill] sm:$0xff] }
 0x3ff   : > { %30808 = vst [vmem:[#allocation41_spill] sm:$0xff] %v26909_v33  ;;  %30809 = vst [vmem:[#allocation42_spill] sm:$0xff] %v26912_v63  ;;  %v12033_v32 = vcombine.low %v30813_v23, %v5581_v56  ;;  %v12034_v62 = vcombine.high %v30813_v23, %v5581_v56  ;;  %v12403_v41 = vcombine.low %v30814_v45, %v5613_v50  ;;  %v30821_v23 = vld [vmem:[#allocation45_spill] sm:$0xff] }
 0x400   : > { %30810 = vst [vmem:[#allocation124_spill] sm:$0xff] %v26915_v46  ;;  %30811 = vst [vmem:[#allocation125_spill] sm:$0xff] %v26918_v57  ;;  %v12404_v55 = vcombine.high %v30814_v45, %v5613_v50 }
 0x401   : > { %v26944_v33 = vrot.slane %v12033_v32, %v25994_v40  ;;  %v26947_v31 = vrot.slane %v12034_v62, %v25994_v40  ;;  %v26950_v18 = vrot.slane %v12403_v41, %v25994_v40 }
 0x402   : > { %v5582_v30 = vpop.trf.xlu0  ;;  %v5614_v61 = vpop.trf.xlu1  ;;  %v26953_v22 = vrot.slane %v12404_v55, %v25994_v40 }
 0x403   : > { %30817 = vst [vmem:[#allocation43_spill] sm:$0xff] %v26944_v33  ;;  %30818 = vst [vmem:[#allocation44_spill] sm:$0xff] %v26947_v31  ;;  %v12218_v46 = vcombine.low %v30821_v23, %v5582_v30  ;;  %v12219_v50 = vcombine.high %v30821_v23, %v5582_v30  ;;  %v12588_v56 = vcombine.low %v30822_v36, %v5614_v61  ;;  %v30830_v23 = vld [vmem:[#allocation47_spill] sm:$0xff] }
 0x404   : > { %30819 = vst [vmem:[#allocation126_spill] sm:$0xff] %v26950_v18  ;;  %30820 = vst [vmem:[#allocation127_spill] sm:$0xff] %v26953_v22  ;;  %v12589_v57 = vcombine.high %v30822_v36, %v5614_v61  ;;  %v30829_v36 = vcombine.high %v26506_v14, %v26506_v14  ;;  %v30831_v18 = vld [vmem:[#allocation48_spill] sm:$0xff] }
 0x405   : > { %v26977_v41 = vrot.slane %v12218_v46, %v25994_v40  ;;  %v26980_v55 = vrot.slane %v12219_v50, %v25994_v40  ;;  %v26983_v63 = vrot.slane %v12588_v56, %v25994_v40 }
 0x406   : > { %v5645_v32 = vpop.trf.xlu0  ;;  %v5677_v62 = vpop.trf.xlu1  ;;  %7165 = vxpose.xlu0.b32.start.end [1/1] (short) (narrow) %v26506_v14, 16  ;;  %v26986_v30 = vrot.slane %v12589_v57, %v25994_v40  ;;  %7197 = vxpose.xlu1.b32.start.end [1/1] (short) (narrow) %v30829_v36, 16 }
 0x407   : > { %30825 = vst [vmem:[#allocation45_spill] sm:$0xff] %v26977_v41  ;;  %30826 = vst [vmem:[#allocation46_spill] sm:$0xff] %v26980_v55  ;;  %v12773_v22 = vcombine.low %v30830_v23, %v5645_v32  ;;  %v12774_v61 = vcombine.high %v30830_v23, %v5645_v32  ;;  %v13143_v46 = vcombine.low %v30831_v18, %v5677_v62  ;;  %v30838_v32 = vld [vmem:[#allocation49_spill] sm:$0xff] }
 0x408   : > { %30827 = vst [vmem:[#allocation128_spill] sm:$0xff] %v26983_v63  ;;  %30828 = vst [vmem:[#allocation129_spill] sm:$0xff] %v26986_v30  ;;  %v13144_v45 = vcombine.high %v30831_v18, %v5677_v62 }
 0x409   : > { %v27012_v31 = vrot.slane %v12773_v22, %v25994_v40  ;;  %v27015_v17 = vrot.slane %v12774_v61, %v25994_v40  ;;  %v27018_v14 = vrot.slane %v13143_v46, %v25994_v40  ;;  %v30840_v22 = vld [vmem:[#allocation97_spill] sm:$0xff] }
 0x40a   : > { %v5646_v23 = vpop.trf.xlu0  ;;  %v5678_v56 = vpop.trf.xlu1  ;;  %v27021_v36 = vrot.slane %v13144_v45, %v25994_v40 }
 0x40b   : > { %30834 = vst [vmem:[#allocation47_spill] sm:$0xff] %v27012_v31  ;;  %30835 = vst [vmem:[#allocation48_spill] sm:$0xff] %v27015_v17  ;;  %v12958_v63 = vcombine.low %v30838_v32, %v5646_v23  ;;  %v12959_v18 = vcombine.high %v30838_v32, %v5646_v23  ;;  %v13328_v62 = vcombine.low %v30839_v25, %v5678_v56 }
 0x40c   : > { %30836 = vst [vmem:[#allocation130_spill] sm:$0xff] %v27018_v14  ;;  %30837 = vst [vmem:[#allocation131_spill] sm:$0xff] %v27021_v36  ;;  %v13329_v30 = vcombine.high %v30839_v25, %v5678_v56  ;;  %v30845_v25 = vcombine.high %v30840_v22, %v30840_v22  ;;  %v30846_v56 = vld [vmem:[#allocation51_spill] sm:$0xff]  ;;  %v30847_v14 = vld [vmem:[#allocation52_spill] sm:$0xff] }
 0x40d   : > { %v27045_v46 = vrot.slane %v12958_v63, %v25994_v40  ;;  %v27048_v45 = vrot.slane %v12959_v18, %v25994_v40  ;;  %v27051_v37 = vrot.slane %v13328_v62, %v25994_v40  ;;  %v2912_v18 = vld [vmem:[#allocation2 + $0xf8] sm:$0xff] }
 0x40e   : > { %v5709_v23 = vpop.trf.xlu0  ;;  %v5741_v61 = vpop.trf.xlu1  ;;  %7229 = vxpose.xlu0.b32.start.end [1/1] (short) (narrow) %v30840_v22, 16  ;;  %v27054_v32 = vrot.slane %v13329_v30, %v25994_v40  ;;  %7261 = vxpose.xlu1.b32.start.end [1/1] (short) (narrow) %v30845_v25, 16  ;;  %v30857_v25 = vld [vmem:[#allocation54_spill] sm:$0xff] }
 0x40f   : > { %30841 = vst [vmem:[#allocation49_spill] sm:$0xff] %v27045_v46  ;;  %30842 = vst [vmem:[#allocation50_spill] sm:$0xff] %v27048_v45  ;;  %v13513_v36 = vcombine.low %v30846_v56, %v5709_v23  ;;  %v13514_v42 = vcombine.high %v30846_v56, %v5709_v23  ;;  %v13883_v63 = vcombine.low %v30847_v14, %v5741_v61  ;;  %v30856_v56 = vld [vmem:[#allocation53_spill] sm:$0xff] }
 0x410   : > { %30843 = vst [vmem:[#allocation97_spill] sm:$0xff] %v27051_v37  ;;  %30844 = vst [vmem:[#allocation132_spill] sm:$0xff] %v27054_v32  ;;  %v13884_v2 = vcombine.high %v30847_v14, %v5741_v61  ;;  %v30865_v45 = vcombine.low %v30741_v59, %v26531_v28 }
 0x411   : > { %v27080_v46 = vrot.slane %v13513_v36, %v25994_v40  ;;  %v27083_v35 = vrot.slane %v13514_v42, %v25994_v40  ;;  %v27086_v22 = vrot.slane %v13883_v63, %v25994_v40 }
 0x412   : > { %v5710_v17 = vpop.trf.xlu0  ;;  %v5742_v62 = vpop.trf.xlu1  ;;  %v27089_v31 = vrot.slane %v13884_v2, %v25994_v40  ;;  %v27135_v14 = vrot.slane %v30865_v45, %v25994_v40 }
 0x413   : > { %30852 = vst [vmem:[#allocation51_spill] sm:$0xff] %v27080_v46  ;;  %30853 = vst [vmem:[#allocation52_spill] sm:$0xff] %v27083_v35  ;;  %v13698_v37 = vcombine.low %v30856_v56, %v5710_v17  ;;  %v13699_v61 = vcombine.high %v30856_v56, %v5710_v17  ;;  %v14068_v23 = vcombine.low %v30857_v25, %v5742_v62 }
 0x414   : > { %30854 = vst [vmem:[#allocation133_spill] sm:$0xff] %v27086_v22  ;;  %30855 = vst [vmem:[#allocation134_spill] sm:$0xff] %v27089_v31  ;;  %v14069_v32 = vcombine.high %v30857_v25, %v5742_v62  ;;  %v30864_v25 = vcombine.high %v26605_v47, %v26605_v47 }
 0x415   : > { %v27117_v2 = vrot.slane %v13698_v37, %v25994_v40  ;;  %v27120_v30 = vrot.slane %v13699_v61, %v25994_v40  ;;  %v27123_v17 = vrot.slane %v14068_v23, %v25994_v40  ;;  %30866 = vst [vmem:[#allocation137_spill] sm:$0xff] %v27135_v14  ;;  %v30867_v37 = vcombine.high %v30741_v59, %v26531_v28 }
 0x416   : > { %v27111_v56 = vpop.trf.xlu0  ;;  %v27113_v42 = vpop.trf.xlu1  ;;  %7293 = vxpose.xlu0.b32.start.end [1/1] (short) (narrow) %v26605_v47, 16  ;;  %v27126_v62 = vrot.slane %v14069_v32, %v25994_v40  ;;  %7325 = vxpose.xlu1.b32.start.end [1/1] (short) (narrow) %v30864_v25, 16  ;;  %v3445_v32 = vcombine.high %v26637_v27, %v26637_v27  ;;  %v2910_v25 = vld [vmem:[#allocation2 + $0xe8] sm:$0xff] }
 0x417   : > { %30860 = vst [vmem:[#allocation53_spill] sm:$0xff] %v27117_v2  ;;  %30861 = vst [vmem:[#allocation54_spill] sm:$0xff] %v27120_v30  ;;  %v27141_v61 = vrot.slane %v30867_v37, %v25994_v40  ;;  %v3453_v59 = vrot.slane %v2910_v25, %v25994_v40  ;;  %v3446_v31 = vcombine.high %v2910_v25, %v2910_v25  ;;  %v2911_v30 = vld [vmem:[#allocation2 + $0xf0] sm:$0xff] }
 0x418   : > { %30862 = vst [vmem:[#allocation135_spill] sm:$0xff] %v27123_v17  ;;  %30863 = vst [vmem:[#allocation136_spill] sm:$0xff] %v27126_v62  ;;  %v3470_v25 = vrot.slane %v2911_v30, %v25994_v40 }
 0x419   : > { %30868 = vst [vmem:[#allocation138_spill] sm:$0xff] %v27141_v61  ;;  %v3461_v17 = vcombine.high %v3453_v59, %v3453_v59  ;;  %v3460_v14 = vrot.slane %v3446_v31, %v25994_v40  ;;  %v3463_v31 = vcombine.high %v2911_v30, %v2911_v30  ;;  %v3487_v30 = vrot.slane %v2912_v18, %v25994_v40 }
 0x41a   : > { %v27161_v7 = vpop.trf.xlu0  ;;  %v27163_v47 = vpop.trf.xlu1 }
 0x41b   : > { %v3477_v46 = vrot.slane %v3463_v31, %v25994_v40  ;;  %v3480_v31 = vcombine.high %v2912_v18, %v2912_v18 }
 0x41d   : > { %v3494_v33 = vrot.slane %v3480_v31, %v25994_v40 }
 0x41e   : > { %v27165_v22 = vpop.trf.xlu0  ;;  %v27167_v45 = vpop.trf.xlu1  ;;  %7357 = vxpose.xlu0.b32.start.end [1/1] (short) (narrow) %v26637_v27, 16  ;;  %7389 = vxpose.xlu1.b32.start.end [1/1] (short) (narrow) %v3445_v32, 16  ;;  %v3462_v32 = vcombine.high %v3460_v14, %v3460_v14 }
 0x422   : > { %v27171_v28 = vpop.trf.xlu0  ;;  %v27173_v37 = vpop.trf.xlu1 }
 0x426   : > { %v27175_v62 = vpop.trf.xlu0  ;;  %v27177_v61 = vpop.trf.xlu1  ;;  %7421 = vxpose.xlu0.b32.start.end [1/1] (short) (narrow) %v3453_v59, 16  ;;  %7453 = vxpose.xlu1.b32.start.end [1/1] (short) (narrow) %v3461_v17, 16  ;;  %v3478_v17 = vcombine.high %v3470_v25, %v3470_v25 }
 0x427   : > { %30870 = vst [vmem:[#allocation139_spill] sm:$0xff] %v27177_v61 }
 0x42a   : > { %v27180_v53 = vpop.trf.xlu0  ;;  %v27182_v27 = vpop.trf.xlu1 }
 0x42b   : > { %30871 = vst [vmem:[#allocation140_spill] sm:$0xff] %v27180_v53  ;;  %30872 = vst [vmem:[#allocation141_spill] sm:$0xff] %v27182_v27 }
 0x42e   : > { %v27184_v15 = vpop.trf.xlu0  ;;  %v27186_v2 = vpop.trf.xlu1  ;;  %7485 = vxpose.xlu0.b32.start.end [1/1] (short) (narrow) %v3460_v14, 16  ;;  %7517 = vxpose.xlu1.b32.start.end [1/1] (short) (narrow) %v3462_v32, 16  ;;  %v3479_v32 = vcombine.high %v3477_v46, %v3477_v46 }
 0x42f   : > { %30873 = vst [vmem:[#allocation142_spill] sm:$0xff] %v27184_v15  ;;  %30874 = vst [vmem:[#allocation143_spill] sm:$0xff] %v27186_v2 }
 0x432   : > { %v27189_v23 = vpop.trf.xlu0  ;;  %v27191_v59 = vpop.trf.xlu1 }
 0x433   : > { %30875 = vst [vmem:[#allocation144_spill] sm:$0xff] %v27189_v23  ;;  %30876 = vst [vmem:[#allocation145_spill] sm:$0xff] %v27191_v59 }
 0x436   : > { %v27193_v35 = vpop.trf.xlu0  ;;  %v27195_v63 = vpop.trf.xlu1  ;;  %7549 = vxpose.xlu0.b32.start.end [1/1] (short) (narrow) %v3470_v25, 16  ;;  %7581 = vxpose.xlu1.b32.start.end [1/1] (short) (narrow) %v3478_v17, 16  ;;  %v3495_v17 = vcombine.high %v3487_v30, %v3487_v30 }
 0x437   : > { %30877 = vst [vmem:[#allocation146_spill] sm:$0xff] %v27193_v35  ;;  %30878 = vst [vmem:[#allocation147_spill] sm:$0xff] %v27195_v63 }
 0x43a   : > { %v27198_v36 = vpop.trf.xlu0  ;;  %v27200_v14 = vpop.trf.xlu1 }
 0x43b   : > { %30879 = vst [vmem:[#allocation148_spill] sm:$0xff] %v27198_v36  ;;  %30880 = vst [vmem:[#allocation149_spill] sm:$0xff] %v27200_v14  ;;  %v2915_v36 = vld [vmem:[#allocation2 + $0x110] sm:$0xff] }
 0x43e   : > { %v27202_v34 = vpop.trf.xlu0  ;;  %v27204_v55 = vpop.trf.xlu1  ;;  %7613 = vxpose.xlu0.b32.start.end [1/1] (short) (narrow) %v3477_v46, 16  ;;  %7645 = vxpose.xlu1.b32.start.end [1/1] (short) (narrow) %v3479_v32, 16  ;;  %v3496_v32 = vcombine.high %v3494_v33, %v3494_v33 }
 0x43f   : > { %30881 = vst [vmem:[#allocation150_spill] sm:$0xff] %v27202_v34  ;;  %30882 = vst [vmem:[#allocation151_spill] sm:$0xff] %v27204_v55  ;;  %v2913_v55 = vld [vmem:[#allocation2 + $0x100] sm:$0xff] }
 0x440   : > { %v3504_v18 = vrot.slane %v2913_v55, %v25994_v40  ;;  %v3497_v31 = vcombine.high %v2913_v55, %v2913_v55 }
 0x442   : > { %v27207_v57 = vpop.trf.xlu0  ;;  %v27209_v25 = vpop.trf.xlu1 }
 0x443   : > { %30883 = vst [vmem:[#allocation152_spill] sm:$0xff] %v27207_v57  ;;  %30884 = vst [vmem:[#allocation153_spill] sm:$0xff] %v27209_v25 }
 0x446   : > { %v27211_v41 = vpop.trf.xlu0  ;;  %v27213_v50 = vpop.trf.xlu1  ;;  %7677 = vxpose.xlu0.b32.start.end [1/1] (short) (narrow) %v3487_v30, 16  ;;  %7709 = vxpose.xlu1.b32.start.end [1/1] (short) (narrow) %v3495_v17, 16  ;;  %v3512_v17 = vcombine.high %v3504_v18, %v3504_v18 }
 0x447   : > { %30885 = vst [vmem:[#allocation154_spill] sm:$0xff] %v27211_v41  ;;  %30886 = vst [vmem:[#allocation155_spill] sm:$0xff] %v27213_v50 }
 0x44a   : > { %v27216_v26 = vpop.trf.xlu0  ;;  %v27218_v46 = vpop.trf.xlu1 }
 0x44b   : > { %30887 = vst [vmem:[#allocation156_spill] sm:$0xff] %v27216_v26  ;;  %30888 = vst [vmem:[#allocation157_spill] sm:$0xff] %v27218_v46 }
 0x44e   : > { %v27220_v34 = vpop.trf.xlu0  ;;  %v27222_v57 = vpop.trf.xlu1  ;;  %7741 = vxpose.xlu0.b32.start.end [1/1] (short) (narrow) %v3494_v33, 16  ;;  %7773 = vxpose.xlu1.b32.start.end [1/1] (short) (narrow) %v3496_v32, 16 }
 0x44f   : > { %30889 = vst [vmem:[#allocation158_spill] sm:$0xff] %v27220_v34  ;;  %30890 = vst [vmem:[#allocation159_spill] sm:$0xff] %v27222_v57  ;;  %v3511_v34 = vrot.slane %v3497_v31, %v25994_v40  ;;  %v2914_v57 = vld [vmem:[#allocation2 + $0x108] sm:$0xff] }
 0x450   : > { %v3521_v55 = vrot.slane %v2914_v57, %v25994_v40  ;;  %v3514_v31 = vcombine.high %v2914_v57, %v2914_v57  ;;  %v3538_v57 = vrot.slane %v2915_v36, %v25994_v40 }
 0x451   : > { %v3513_v32 = vcombine.high %v3511_v34, %v3511_v34 }
 0x452   : > { %v27225_v41 = vpop.trf.xlu0  ;;  %v27227_v30 = vpop.trf.xlu1  ;;  %v3528_v38 = vrot.slane %v3514_v31, %v25994_v40  ;;  %v3531_v31 = vcombine.high %v2915_v36, %v2915_v36 }
 0x453   : > { %30891 = vst [vmem:[#allocation160_spill] sm:$0xff] %v27225_v41  ;;  %30892 = vst [vmem:[#allocation161_spill] sm:$0xff] %v27227_v30 }
 0x454   : > { %v3545_v59 = vrot.slane %v3531_v31, %v25994_v40 }
 0x456   : > { %v27229_v50 = vpop.trf.xlu0  ;;  %v27231_v26 = vpop.trf.xlu1  ;;  %7805 = vxpose.xlu0.b32.start.end [1/1] (short) (narrow) %v3504_v18, 16  ;;  %7837 = vxpose.xlu1.b32.start.end [1/1] (short) (narrow) %v3512_v17, 16  ;;  %v3529_v17 = vcombine.high %v3521_v55, %v3521_v55 }
 0x45a   : > { %v27234_v46 = vpop.trf.xlu0  ;;  %v27236_v33 = vpop.trf.xlu1 }
 0x45e   : > { %v27238_v25 = vpop.trf.xlu0  ;;  %v27240_v41 = vpop.trf.xlu1  ;;  %7869 = vxpose.xlu0.b32.start.end [1/1] (short) (narrow) %v3511_v34, 16  ;;  %7901 = vxpose.xlu1.b32.start.end [1/1] (short) (narrow) %v3513_v32, 16  ;;  %v3530_v32 = vcombine.high %v3528_v38, %v3528_v38 }
 0x462   : > { %v27243_v30 = vpop.trf.xlu0  ;;  %v27245_v18 = vpop.trf.xlu1 }
 0x466   : > { %v27247_v14 = vpop.trf.xlu0  ;;  %v27249_v63 = vpop.trf.xlu1  ;;  %7933 = vxpose.xlu0.b32.start.end [1/1] (short) (narrow) %v3521_v55, 16  ;;  %7965 = vxpose.xlu1.b32.start.end [1/1] (short) (narrow) %v3529_v17, 16  ;;  %v3546_v17 = vcombine.high %v3538_v57, %v3538_v57 }
 0x467   : > { %30893 = vst [vmem:[#allocation162_spill] sm:$0xff] %v27249_v63  ;;  %v30938_v63 = vld [vmem:[#allocation55_spill] sm:$0xff] }
 0x46a   : > { %v27252_v4 = vpop.trf.xlu0  ;;  %v27254_v34 = vpop.trf.xlu1 }
 0x46b   : > { %30894 = vst [vmem:[#allocation163_spill] sm:$0xff] %v27252_v4  ;;  %30895 = vst [vmem:[#allocation164_spill] sm:$0xff] %v27254_v34 }
 0x46e   : > { %v27256_v10 = vpop.trf.xlu0  ;;  %v27258_v21 = vpop.trf.xlu1  ;;  %7997 = vxpose.xlu0.b32.start.end [1/1] (short) (narrow) %v3528_v38, 16  ;;  %8029 = vxpose.xlu1.b32.start.end [1/1] (short) (narrow) %v3530_v32, 16  ;;  %v3547_v32 = vcombine.high %v3545_v59, %v3545_v59 }
 0x46f   : > { %30896 = vst [vmem:[#allocation165_spill] sm:$0xff] %v27256_v10  ;;  %30897 = vst [vmem:[#allocation166_spill] sm:$0xff] %v27258_v21  ;;  %v2916_v21 = vld [vmem:[#allocation2 + $0x118] sm:$0xff] }
 0x470   : > { %v3555_v36 = vrot.slane %v2916_v21, %v25994_v40  ;;  %v3548_v31 = vcombine.high %v2916_v21, %v2916_v21 }
 0x472   : > { %v27261_v6 = vpop.trf.xlu0  ;;  %v27263_v55 = vpop.trf.xlu1 }
 0x473   : > { %30898 = vst [vmem:[#allocation167_spill] sm:$0xff] %v27261_v6  ;;  %30899 = vst [vmem:[#allocation168_spill] sm:$0xff] %v27263_v55 }
 0x476   : > { %v27265_v60 = vpop.trf.xlu0  ;;  %v27267_v35 = vpop.trf.xlu1  ;;  %8061 = vxpose.xlu0.b32.start.end [1/1] (short) (narrow) %v3538_v57, 16  ;;  %8093 = vxpose.xlu1.b32.start.end [1/1] (short) (narrow) %v3546_v17, 16  ;;  %v3563_v17 = vcombine.high %v3555_v36, %v3555_v36 }
 0x477   : > { %30900 = vst [vmem:[#allocation169_spill] sm:$0xff] %v27265_v60  ;;  %30901 = vst [vmem:[#allocation170_spill] sm:$0xff] %v27267_v35 }
 0x47a   : > { %v27270_v2 = vpop.trf.xlu0  ;;  %v27272_v38 = vpop.trf.xlu1 }
 0x47b   : > { %30902 = vst [vmem:[#allocation171_spill] sm:$0xff] %v27270_v2  ;;  %30903 = vst [vmem:[#allocation172_spill] sm:$0xff] %v27272_v38 }
 0x47e   : > { %v27274_v5 = vpop.trf.xlu0  ;;  %v27276_v58 = vpop.trf.xlu1  ;;  %8125 = vxpose.xlu0.b32.start.end [1/1] (short) (narrow) %v3545_v59, 16  ;;  %8157 = vxpose.xlu1.b32.start.end [1/1] (short) (narrow) %v3547_v32, 16 }
 0x47f   : > { %30904 = vst [vmem:[#allocation173_spill] sm:$0xff] %v27274_v5  ;;  %30905 = vst [vmem:[#allocation174_spill] sm:$0xff] %v27276_v58  ;;  %v3562_v5 = vrot.slane %v3548_v31, %v25994_v40 }
 0x481   : > { %v3564_v32 = vcombine.high %v3562_v5, %v3562_v5 }
 0x482   : > { %v27279_v60 = vpop.trf.xlu0  ;;  %v27281_v57 = vpop.trf.xlu1 }
 0x483   : > { %30906 = vst [vmem:[#allocation175_spill] sm:$0xff] %v27279_v60  ;;  %30907 = vst [vmem:[#allocation176_spill] sm:$0xff] %v27281_v57 }
 0x486   : > { %v27283_v35 = vpop.trf.xlu0  ;;  %v27285_v2 = vpop.trf.xlu1  ;;  %8189 = vxpose.xlu0.b32.start.end [1/1] (short) (narrow) %v3555_v36, 16  ;;  %8221 = vxpose.xlu1.b32.start.end [1/1] (short) (narrow) %v3563_v17, 16 }
 0x487   : > { %30908 = vst [vmem:[#allocation177_spill] sm:$0xff] %v27283_v35  ;;  %30909 = vst [vmem:[#allocation178_spill] sm:$0xff] %v27285_v2 }
 0x48a   : > { %v27288_v38 = vpop.trf.xlu0  ;;  %v27290_v59 = vpop.trf.xlu1 }
 0x48b   : > { %30910 = vst [vmem:[#allocation179_spill] sm:$0xff] %v27288_v38  ;;  %30911 = vst [vmem:[#allocation180_spill] sm:$0xff] %v27290_v59 }
 0x48e   : > { %v27292_v58 = vpop.trf.xlu0  ;;  %v27294_v60 = vpop.trf.xlu1  ;;  %8253 = vxpose.xlu0.b32.start.end [1/1] (short) (narrow) %v3562_v5, 16  ;;  %8285 = vxpose.xlu1.b32.start.end [1/1] (short) (narrow) %v3564_v32, 16 }
 0x48f   : > { %30912 = vst [vmem:[#allocation181_spill] sm:$0xff] %v27292_v58  ;;  %30913 = vst [vmem:[#allocation182_spill] sm:$0xff] %v27294_v60 }
 0x492   : > { %v27296_v21 = vpop.trf.xlu0  ;;  %v27298_v35 = vpop.trf.xlu1 }
 0x493   : > { %30914 = vst [vmem:[#allocation183_spill] sm:$0xff] %v27296_v21  ;;  %30915 = vst [vmem:[#allocation184_spill] sm:$0xff] %v27298_v35 }
 0x496   : > { %v27300_v2 = vpop.trf.xlu0  ;;  %v27302_v36 = vpop.trf.xlu1 }
 0x49a   : > { %v27304_v17 = vpop.trf.xlu0  ;;  %v27306_v31 = vpop.trf.xlu1 }
 0x49e   : > { %v27308_v59 = vpop.trf.xlu0  ;;  %v27310_v38 = vpop.trf.xlu1 }
 0x4a2   : > { %v27312_v58 = vpop.trf.xlu0  ;;  %v27314_v5 = vpop.trf.xlu1 }
 0x4a6   : > { %v27316_v32 = vpop.trf.xlu0  ;;  %v27318_v60 = vpop.trf.xlu1 }
 0x4a7   : > { %30916 = vst [vmem:[#allocation185_spill] sm:$0xff] %v27318_v60 }
 0x4aa   : > { %v27320_v35 = vpop.trf.xlu0  ;;  %v27324_v57 = vpop.trf.xlu1 }
 0x4ab   : > { %30917 = vst [vmem:[#allocation186_spill] sm:$0xff] %v27320_v35  ;;  %30919 = vst [vmem:[#allocation188_spill] sm:$0xff] %v27324_v57 }
 0x4ae   : > { %v27322_v21 = vpop.trf.xlu0  ;;  %v27328_v20 = vpop.trf.xlu1 }
 0x4af   : > { %30918 = vst [vmem:[#allocation187_spill] sm:$0xff] %v27322_v21  ;;  %30921 = vst [vmem:[#allocation190_spill] sm:$0xff] %v27328_v20 }
 0x4b2   : > { %v27326_v55 = vpop.trf.xlu0  ;;  %v27334_v51 = vpop.trf.xlu1 }
 0x4b3   : > { %30920 = vst [vmem:[#allocation189_spill] sm:$0xff] %v27326_v55  ;;  %30924 = vst [vmem:[#allocation193_spill] sm:$0xff] %v27334_v51  ;;  %v25527_v51 = vmov 1934713408  }
 0x4b6   : > { %v27330_v23 = vpop.trf.xlu0  ;;  %v27338_v13 = vpop.trf.xlu1 }
 0x4b7   : > { %30922 = vst [vmem:[#allocation191_spill] sm:$0xff] %v27330_v23  ;;  %30926 = vst [vmem:[#allocation195_spill] sm:$0xff] %v27338_v13 }
 0x4ba   : > { %v27332_v6 = vpop.trf.xlu0  ;;  %v27344_v21 = vpop.trf.xlu1 }
 0x4bb   : > { %30923 = vst [vmem:[#allocation192_spill] sm:$0xff] %v27332_v6  ;;  %30929 = vst [vmem:[#allocation198_spill] sm:$0xff] %v27344_v21 }
 0x4be   : > { %v27336_v0 = vpop.trf.xlu0  ;;  %v27348_v55 = vpop.trf.xlu1 }
 0x4bf   : > { %30925 = vst [vmem:[#allocation194_spill] sm:$0xff] %v27336_v0  ;;  %30931 = vst [vmem:[#allocation200_spill] sm:$0xff] %v27348_v55  ;;  %v8349_v0 = vcombine.low %v27111_v56, %v27300_v2 }
 0x4c2   : > { %v27340_v15 = vpop.trf.xlu0  ;;  %v27354_v6 = vpop.trf.xlu1 }
 0x4c3   : > { %30927 = vst [vmem:[#allocation196_spill] sm:$0xff] %v27340_v15  ;;  %30934 = vst [vmem:[#allocation203_spill] sm:$0xff] %v27354_v6  ;;  %v8384_v15 = vunpack.c.l.s4 %v25527_v51  ;;  %v30936_v6 = vld [vmem:[#allocation20_spill] sm:$0xff] }
 0x4c6   : > { %v27342_v10 = vpop.trf.xlu0  ;;  %v27361_v57 = vpop.trf.xlu1 }
 0x4c7   : > { %30928 = vst [vmem:[#allocation197_spill] sm:$0xff] %v27342_v10  ;;  %30935 = vst [vmem:[#allocation204_spill] sm:$0xff] %v27361_v57 }
 0x4ca   : > { %v27346_v27 = vpop.trf.xlu0  ;;  %v27370_v60 = vpop.trf.xlu1 }
 0x4cb   : > { %30930 = vst [vmem:[#allocation199_spill] sm:$0xff] %v27346_v27  ;;  %v8357_v27 = vrot.slane %v8349_v0, %v25994_v40  ;;  %30937 = vst [vmem:[#allocation20_spill] sm:$0xff] %v27370_v60 }
 0x4ce   : > { %v27350_v20 = vpop.trf.xlu0 }
 0x4cf   : > { %30932 = vst [vmem:[#allocation201_spill] sm:$0xff] %v27350_v20  ;;  %v8385_v20 = vunpack.c.0.s8 %v8384_v15  ;;  %v27379_v15 = vpop.trf.xlu1 }
 0x4d0   : > { %30941 = vst [vmem:[#allocation55_spill] sm:$0xff] %v27379_v15 }
 0x4d1   : > { %v27368_v61 = vsub.s32 %v8385_v20, %v30936_v6 }
 0x4d2   : > { %v27352_v23 = vpop.trf.xlu0 }
 0x4d3   : > { %30933 = vst [vmem:[#allocation202_spill] sm:$0xff] %v27352_v23  ;;  %v27385_v20 = vpop.trf.xlu1 }
 0x4d4   : > { %30943 = vst [vmem:[#allocation205_spill] sm:$0xff] %v27385_v20 }
 0x4d6   : > { %v7309_v13 = vpop.trf.xlu0 }
 0x4d7   : > { %v8365_v10 = vcombine.low %v27229_v50, %v7309_v13  ;;  %v27389_v60 = vpop.trf.xlu1 }
 0x4d9   : > { %v8373_v21 = vrot.slane %v8365_v10, %v25994_v40  ;;  %v30939_v10 = vld [vmem:[#allocation24_spill] sm:$0xff] }
 0x4da   : > { %v27363_v55 = vpop.trf.xlu0  ;;  %v30940_v49 = vcombine.low %v30938_v63, %v30939_v10 }
 0x4db   : > { %v8413_v23 = vcombine.low %v8357_v27, %v8373_v21  ;;  %v27395_v4 = vpop.trf.xlu1 }
 0x4dc   : > { %v8389_v0 = vrot.slane %v30940_v49, %v27368_v61 }
 0x4dd   : > { %v8421_v51 = vrot.slane %v8413_v23, %v27368_v61 }
 0x4de   : > { %v27365_v34 = vpop.trf.xlu0 }
 0x4df   : > { %v8445_v57 = vcombine.low %v8389_v0, %v8421_v51  ;;  %v8446_v3 = vcombine.high %v8389_v0, %v8421_v51 }
 0x4e1   : > { %14237 = vxpose.xlu0.b32.start [1/2] (short) (narrow) %v8445_v57, 8  ;;  %14269 = vxpose.xlu1.b32.start [1/2] (short) (narrow) %v8446_v3, 8  ;;  %v27399_v57 = vpop.trf.xlu1 }
 0x4e2   : > { %v27377_v43 = vpop.trf.xlu0 }
 0x4e5   : > { %v27405_v15 = vpop.trf.xlu1 }
 0x4e6   : > { %v27381_v53 = vpop.trf.xlu0 }
 0x4ea   : > { %v27383_v6 = vpop.trf.xlu0 }
 0x4eb   : > { %30942 = vst [vmem:[#allocation24_spill] sm:$0xff] %v27383_v6 }
 0x4ee   : > { %v27387_v23 = vpop.trf.xlu0 }
 0x4ef   : > { %30944 = vst [vmem:[#allocation206_spill] sm:$0xff] %v27387_v23  ;;  %v27409_v23 = vpop.trf.xlu1 }
 0x4f0   : > { %30951 = vst [vmem:[#allocation213_spill] sm:$0xff] %v27409_v23 }
 0x4f2   : > { %v27391_v35 = vpop.trf.xlu0 }
 0x4f3   : > { %30945 = vst [vmem:[#allocation207_spill] sm:$0xff] %v27391_v35 }
 0x4f6   : > { %v27393_v49 = vpop.trf.xlu0 }
 0x4f7   : > { %30946 = vst [vmem:[#allocation208_spill] sm:$0xff] %v27393_v49  ;;  %v27415_v49 = vpop.trf.xlu1 }
 0x4f8   : > { %30954 = vst [vmem:[#allocation216_spill] sm:$0xff] %v27415_v49 }
 0x4fa   : > { %v27397_v51 = vpop.trf.xlu0 }
 0x4fb   : > { %30947 = vst [vmem:[#allocation209_spill] sm:$0xff] %v27397_v51  ;;  %v27419_v51 = vpop.trf.xlu1 }
 0x4fc   : > { %30956 = vst [vmem:[#allocation218_spill] sm:$0xff] %v27419_v51  ;;  %v30542_v51 = vmov 0.0  }
 0x4fe   : > { %v27401_v0 = vpop.trf.xlu0 }
 0x4ff   : > { %30948 = vst [vmem:[#allocation210_spill] sm:$0xff] %v27401_v0  ;;  %v8366_v0 = vcombine.high %v27229_v50, %v7309_v13  ;;  %v27428_v49 = vpop.trf.xlu1  ;;  %v30958_v50 = vcombine.high %v30938_v63, %v30939_v10  ;;  %v30960_v10 = vld [vmem:[#allocation56_spill] sm:$0xff] }
 0x500   : > { %30957 = vst [vmem:[#allocation219_spill] sm:$0xff] %v27428_v49 }
 0x501   : > { %v8380_v23 = vrot.slane %v8366_v0, %v25994_v40 }
 0x502   : > { %v27403_v3 = vpop.trf.xlu0 }
 0x503   : > { %30949 = vst [vmem:[#allocation211_spill] sm:$0xff] %v27403_v3  ;;  %v8414_v3 = vcombine.high %v8357_v27, %v8373_v21 }
 0x506   : > { %v27407_v20 = vpop.trf.xlu0 }
 0x507   : > { %30950 = vst [vmem:[#allocation212_spill] sm:$0xff] %v27407_v20  ;;  %v8350_v20 = vcombine.high %v27111_v56, %v27300_v2  ;;  %v8396_v2 = vrot.slane %v30958_v50, %v27368_v61 }
 0x50a   : > { %v27411_v6 = vpop.trf.xlu0 }
 0x50b   : > { %30952 = vst [vmem:[#allocation214_spill] sm:$0xff] %v27411_v6 }
 0x50e   : > { %v27413_v35 = vpop.trf.xlu0 }
 0x50f   : > { %30953 = vst [vmem:[#allocation215_spill] sm:$0xff] %v27413_v35  ;;  %v8428_v35 = vrot.slane %v8414_v3, %v27368_v61  ;;  %v27439_v3 = vpop.trf.xlu1 }
 0x510   : > { %30959 = vst [vmem:[#allocation220_spill] sm:$0xff] %v27439_v3 }
 0x511   : > { %v8447_v27 = vcombine.low %v8396_v2, %v8428_v35  ;;  %v8448_v0 = vcombine.high %v8396_v2, %v8428_v35  ;;  %v8550_v35 = vcombine.low %v27234_v46, %v27363_v55 }
 0x512   : > { %v27417_v16 = vpop.trf.xlu0 }
 0x513   : > { %30955 = vst [vmem:[#allocation217_spill] sm:$0xff] %v27417_v16  ;;  %v8364_v16 = vrot.slane %v8350_v20, %v25994_v40  ;;  %v27450_v2 = vpop.trf.xlu1 }
 0x514   : > { %30963 = vst [vmem:[#allocation56_spill] sm:$0xff] %v27450_v2 }
 0x515   : > { %v8429_v56 = vcombine.low %v8364_v16, %v8380_v23 }
 0x516   : > { %v7821_v54 = vpop.trf.xlu0 }
 0x517   : > { %v8460_v44 = vrot.slane %v7821_v54, %v25994_v40  ;;  %v8453_v21 = vcombine.high %v7821_v54, %v30542_v51  ;;  %v8430_v54 = vcombine.high %v8364_v16, %v8380_v23 }
 0x519   : > { %v8475_v6 = vrot.slane %v8460_v44, %v27368_v61  ;;  %v8468_v29 = vcombine.high %v8460_v44, %v30542_v51  ;;  %v8437_v44 = vrot.slane %v8429_v56, %v27368_v61  ;;  %v8534_v56 = vcombine.low %v27161_v7, %v27304_v17 }
 0x51b   : > { %14238 = vxpose.xlu0.b32.end [2/2] (short) (narrow) %v8475_v6, 8  ;;  %v8498_v13 = vcombine.high %v8475_v6, %v30542_v51  ;;  %v8482_v20 = vrot.slane %v8468_v29, %v27368_v61  ;;  %v8467_v6 = vrot.slane %v8453_v21, %v25994_v40  ;;  %v8542_v16 = vrot.slane %v8534_v56, %v25994_v40 }
 0x51d   : > { %14270 = vxpose.xlu1.b32.end [2/2] (short) (narrow) %v8498_v13, 8  ;;  %v8499_v63 = vcombine.high %v8482_v20, %v30542_v51  ;;  %v30961_v13 = vld [vmem:[#allocation22_spill] sm:$0xff]  ;;  %v8490_v21 = vrot.slane %v8467_v6, %v27368_v61 }
 0x51e   : > { %v30962_v50 = vcombine.low %v30960_v10, %v30961_v13 }
 0x51f   : > { %14301 = vxpose.xlu0.b32.start [1/2] (short) (narrow) %v8447_v27, 8  ;;  %v8500_v23 = vcombine.high %v8490_v21, %v30542_v51 }
 0x520   : > { %v8405_v49 = vrot.slane %v30962_v50, %v27368_v61 }
 0x521   : > { %14333 = vxpose.xlu1.b32.start [1/2] (short) (narrow) %v8448_v0, 8  ;;  %v8558_v0 = vrot.slane %v8550_v35, %v25994_v40 }
 0x522   : > { %v8449_v29 = vcombine.low %v8405_v49, %v8437_v44  ;;  %v8450_v27 = vcombine.high %v8405_v49, %v8437_v44  ;;  %v27464_v49 = vpop.trf.xlu1 }
 0x523   : > { %14302 = vxpose.xlu0.b32.end [2/2] (short) (narrow) %v8482_v20, 8  ;;  %v8444_v20 = vrot.slane %v8430_v54, %v27368_v61  ;;  %v8598_v44 = vcombine.low %v8542_v16, %v8558_v0 }
 0x525   : > { %14334 = vxpose.xlu1.b32.end [2/2] (short) (narrow) %v8499_v63, 8  ;;  %v30964_v63 = vcombine.high %v30960_v10, %v30961_v13  ;;  %v8606_v2 = vrot.slane %v8598_v44, %v27368_v61  ;;  %v30965_v10 = vcombine.low %v26265_v8, %v26640_v24 }
 0x526   : > { %v27469_v3 = vpop.trf.xlu1 }
 0x527   : > { %14365 = vxpose.xlu0.b32.start [1/2] (short) (narrow) %v8449_v29, 8  ;;  %v8412_v50 = vrot.slane %v30964_v63, %v27368_v61  ;;  %v8483_v29 = vcombine.high %v8467_v6, %v30542_v51  ;;  %v8574_v13 = vrot.slane %v30965_v10, %v27368_v61 }
 0x529   : > { %14397 = vxpose.xlu1.b32.start [1/2] (short) (narrow) %v8450_v27, 8  ;;  %v8451_v35 = vcombine.low %v8412_v50, %v8444_v20  ;;  %v7822_v27 = vpop.trf.xlu0  ;;  %v8452_v54 = vcombine.high %v8412_v50, %v8444_v20  ;;  %v8497_v56 = vrot.slane %v8483_v29, %v27368_v61  ;;  %v8551_v20 = vcombine.high %v27234_v46, %v27363_v55 }
 0x52a   : > { %v8630_v63 = vcombine.low %v8574_v13, %v8606_v2  ;;  %v8535_v29 = vcombine.high %v27161_v7, %v27304_v17  ;;  %v8631_v44 = vcombine.high %v8574_v13, %v8606_v2  ;;  %v30966_v7 = vcombine.high %v26265_v8, %v26640_v24 }
 0x52b   : > { %14366 = vxpose.xlu0.b32.end [2/2] (short) (narrow) %v8490_v21, 8  ;;  %v8645_v21 = vrot.slane %v7822_v27, %v25994_v40  ;;  %v8501_v6 = vcombine.high %v8497_v56, %v30542_v51  ;;  %v30967_v24 = vcombine.low %v26272_v19, %v26643_v39 }
 0x52c   : > { %v8549_v46 = vrot.slane %v8535_v29, %v25994_v40  ;;  %v8581_v17 = vrot.slane %v30966_v7, %v27368_v61 }
 0x52d   : > { %14398 = vxpose.xlu1.b32.end [2/2] (short) (narrow) %v8500_v23, 8  ;;  %v8599_v23 = vcombine.high %v8542_v16, %v8558_v0  ;;  %v8660_v50 = vrot.slane %v8645_v21, %v27368_v61  ;;  %v8653_v55 = vcombine.high %v8645_v21, %v30542_v51 }
 0x52f   : > { %14429 = vxpose.xlu0.b32.start [1/2] (short) (narrow) %v8451_v35, 8  ;;  %v27481_v35 = vpop.trf.xlu1  ;;  %v8613_v10 = vrot.slane %v8599_v23, %v27368_v61 }
 0x531   : > { %14461 = vxpose.xlu1.b32.start [1/2] (short) (narrow) %v8452_v54, 8  ;;  %v8565_v54 = vrot.slane %v8551_v20, %v25994_v40  ;;  %v8632_v0 = vcombine.low %v8581_v17, %v8613_v10  ;;  %v8633_v13 = vcombine.high %v8581_v17, %v8613_v10  ;;  %v8667_v20 = vrot.slane %v8653_v55, %v27368_v61 }
 0x533   : > { %14430 = vxpose.xlu0.b32.end [2/2] (short) (narrow) %v8497_v56, 8  ;;  %v8683_v56 = vcombine.high %v8660_v50, %v30542_v51  ;;  %v8614_v2 = vcombine.low %v8549_v46, %v8565_v54  ;;  %v27492_v16 = vpop.trf.xlu1  ;;  %v8684_v8 = vcombine.high %v8667_v20, %v30542_v51  ;;  %v8615_v29 = vcombine.high %v8549_v46, %v8565_v54 }
 0x534   : > { %v30970_v46 = vcombine.high %v26272_v19, %v26643_v39  ;;  %v30971_v19 = vld [vmem:[#allocation57_spill] sm:$0xff]  ;;  %v30972_v39 = vld [vmem:[#allocation110_spill] sm:$0xff] }
 0x535   : > { %14462 = vxpose.xlu1.b32.end [2/2] (short) (narrow) %v8501_v6, 8  ;;  %v8638_v6 = vcombine.high %v7822_v27, %v30542_v51  ;;  %v8622_v21 = vrot.slane %v8614_v2, %v27368_v61  ;;  %v8735_v27 = vcombine.low %v27231_v26, %v27389_v60  ;;  %v8629_v17 = vrot.slane %v8615_v29, %v27368_v61 }
 0x537   : > { %14493 = vxpose.xlu0.b32.start [1/2] (short) (narrow) %v8630_v63, 8  ;;  %v8652_v23 = vrot.slane %v8638_v6, %v25994_v40  ;;  %v8590_v63 = vrot.slane %v30967_v24, %v27368_v61  ;;  %v8743_v7 = vrot.slane %v8735_v27, %v25994_v40  ;;  %v8597_v6 = vrot.slane %v30970_v46, %v27368_v61 }
 0x538   : > { %v8720_v46 = vcombine.high %v27113_v42, %v27302_v36 }
 0x539   : > { %14525 = vxpose.xlu1.b32.start [1/2] (short) (narrow) %v8631_v44, 8  ;;  %v8634_v44 = vcombine.low %v8590_v63, %v8622_v21  ;;  %v8635_v10 = vcombine.high %v8590_v63, %v8622_v21  ;;  %v8675_v55 = vrot.slane %v8652_v23, %v27368_v61  ;;  %v8636_v21 = vcombine.low %v8597_v6, %v8629_v17 }
 0x53a   : > { %v8637_v24 = vcombine.high %v8597_v6, %v8629_v17 }
 0x53b   : > { %14494 = vxpose.xlu0.b32.end [2/2] (short) (narrow) %v8660_v50, 8  ;;  %v27503_v50 = vpop.trf.xlu1  ;;  %v8685_v54 = vcombine.high %v8675_v55, %v30542_v51 }
 0x53c   : > { %30968 = vst [vmem:[#allocation22_spill] sm:$0xff] %v27503_v50 }
 0x53d   : > { %14526 = vxpose.xlu1.b32.end [2/2] (short) (narrow) %v8683_v56, 8  ;;  %v8719_v56 = vcombine.low %v27113_v42, %v27302_v36 }
 0x53f   : > { %14557 = vxpose.xlu0.b32.start [1/2] (short) (narrow) %v8632_v0, 8  ;;  %v27512_v2 = vpop.trf.xlu1  ;;  %v8727_v0 = vrot.slane %v8719_v56, %v25994_v40 }
 0x540   : > { %30969 = vst [vmem:[#allocation221_spill] sm:$0xff] %v27512_v2 }
 0x541   : > { %14589 = vxpose.xlu1.b32.start [1/2] (short) (narrow) %v8633_v13, 8  ;;  %v8668_v13 = vcombine.high %v8652_v23, %v30542_v51  ;;  %v30973_v23 = vcombine.low %v30971_v19, %v30972_v39 }
 0x543   : > { %14558 = vxpose.xlu0.b32.end [2/2] (short) (narrow) %v8667_v20, 8  ;;  %v8783_v20 = vcombine.low %v8727_v0, %v8743_v7  ;;  %v8682_v63 = vrot.slane %v8668_v13, %v27368_v61  ;;  %v8759_v56 = vrot.slane %v30973_v23, %v27368_v61 }
 0x545   : > { %14590 = vxpose.xlu1.b32.end [2/2] (short) (narrow) %v8684_v8, 8  ;;  %v7853_v8 = vpop.trf.xlu1  ;;  %v8791_v29 = vrot.slane %v8783_v20, %v27368_v61 }
 0x546   : > { %v8830_v27 = vrot.slane %v7853_v8, %v25994_v40 }
 0x547   : > { %14621 = vxpose.xlu0.b32.start [1/2] (short) (narrow) %v8634_v44, 8  ;;  %v8686_v44 = vcombine.high %v8682_v63, %v30542_v51  ;;  %v8815_v17 = vcombine.low %v8759_v56, %v8791_v29  ;;  %v8816_v6 = vcombine.high %v8759_v56, %v8791_v29 }
 0x549   : > { %14653 = vxpose.xlu1.b32.start [1/2] (short) (narrow) %v8635_v10, 8  ;;  %v8736_v10 = vcombine.high %v27231_v26, %v27389_v60  ;;  %v8838_v26 = vcombine.high %v8830_v27, %v30542_v51  ;;  %v30974_v60 = vcombine.high %v30971_v19, %v30972_v39  ;;  %v30975_v19 = vld [vmem:[#allocation58_spill] sm:$0xff]  ;;  %v30976_v39 = vld [vmem:[#allocation111_spill] sm:$0xff] }
 0x54a   : > { %v30977_v56 = vcombine.low %v30975_v19, %v30976_v39 }
 0x54b   : > { %14622 = vxpose.xlu0.b32.end [2/2] (short) (narrow) %v8675_v55, 8  ;;  %v8784_v55 = vcombine.high %v8727_v0, %v8743_v7  ;;  %v8750_v13 = vrot.slane %v8736_v10, %v25994_v40  ;;  %v8766_v7 = vrot.slane %v30974_v60, %v27368_v61  ;;  %v8823_v0 = vcombine.high %v7853_v8, %v30542_v51 }
 0x54c   : > { %v8852_v29 = vrot.slane %v8838_v26, %v27368_v61  ;;  %v8775_v10 = vrot.slane %v30977_v56, %v27368_v61  ;;  %v8920_v8 = vcombine.low %v27236_v33, %v27395_v4 }
 0x54d   : > { %14654 = vxpose.xlu1.b32.end [2/2] (short) (narrow) %v8685_v54, 8  ;;  %v8845_v54 = vrot.slane %v8830_v27, %v27368_v61  ;;  %v8837_v27 = vrot.slane %v8823_v0, %v25994_v40  ;;  %v7854_v0 = vpop.trf.xlu1 }
 0x54e   : > { %v8869_v23 = vcombine.high %v8852_v29, %v30542_v51 }
 0x54f   : > { %14685 = vxpose.xlu0.b32.start [1/2] (short) (narrow) %v8636_v21, 8  ;;  %v8868_v20 = vcombine.high %v8845_v54, %v30542_v51  ;;  %v8798_v21 = vrot.slane %v8784_v55, %v27368_v61 }
 0x551   : > { %14717 = vxpose.xlu1.b32.start [1/2] (short) (narrow) %v8637_v24, 8  ;;  %v8734_v24 = vrot.slane %v8720_v46, %v25994_v40  ;;  %v8817_v36 = vcombine.low %v8766_v7, %v8798_v21 }
 0x553   : > { %14686 = vxpose.xlu0.b32.end [2/2] (short) (narrow) %v8682_v63, 8  ;;  %v8799_v42 = vcombine.low %v8734_v24, %v8750_v13  ;;  %v8818_v63 = vcombine.high %v8766_v7, %v8798_v21  ;;  %v8800_v55 = vcombine.high %v8734_v24, %v8750_v13  ;;  %v30978_v24 = vcombine.high %v30975_v19, %v30976_v39  ;;  %v30979_v19 = vld [vmem:[#allocation59_spill] sm:$0xff]  ;;  %v30980_v39 = vld [vmem:[#allocation26_spill] sm:$0xff] }
 0x554   : > { %v8853_v7 = vcombine.high %v8837_v27, %v30542_v51 }
 0x555   : > { %14718 = vxpose.xlu1.b32.end [2/2] (short) (narrow) %v8686_v44, 8  ;;  %v8807_v44 = vrot.slane %v8799_v42, %v27368_v61  ;;  %v8814_v21 = vrot.slane %v8800_v55, %v27368_v61  ;;  %v8782_v60 = vrot.slane %v30978_v24, %v27368_v61  ;;  %v8921_v55 = vcombine.high %v27236_v33, %v27395_v4 }
 0x556   : > { %v30982_v33 = vcombine.high %v30979_v19, %v30980_v39 }
 0x557   : > { %14749 = vxpose.xlu0.b32.start [1/2] (short) (narrow) %v8815_v17, 8  ;;  %v8819_v17 = vcombine.low %v8775_v10, %v8807_v44  ;;  %v8820_v46 = vcombine.high %v8775_v10, %v8807_v44  ;;  %v9015_v44 = vrot.slane %v7854_v0, %v25994_v40 }
 0x559   : > { %14781 = vxpose.xlu1.b32.start [1/2] (short) (narrow) %v8816_v6, 8  ;;  %v8860_v6 = vrot.slane %v8837_v27, %v27368_v61  ;;  %v30981_v27 = vcombine.low %v30979_v19, %v30980_v39  ;;  %v9023_v4 = vcombine.high %v9015_v44, %v30542_v51 }
 0x55b   : > { %14750 = vxpose.xlu0.b32.end [2/2] (short) (narrow) %v8845_v54, 8  ;;  %v8904_v54 = vcombine.low %v27163_v47, %v27306_v31  ;;  %v8870_v13 = vcombine.high %v8860_v6, %v30542_v51  ;;  %v8944_v10 = vrot.slane %v30981_v27, %v27368_v61 }
 0x55d   : > { %14782 = vxpose.xlu1.b32.end [2/2] (short) (narrow) %v8868_v20, 8  ;;  %v8928_v20 = vrot.slane %v8920_v8, %v25994_v40  ;;  %v8912_v26 = vrot.slane %v8904_v54, %v25994_v40  ;;  %v9030_v54 = vrot.slane %v9015_v44, %v27368_v61  ;;  %v30983_v44 = vld [vmem:[#allocation60_spill] sm:$0xff] }
 0x55f   : > { %14813 = vxpose.xlu0.b32.start [1/2] (short) (narrow) %v8817_v36, 8  ;;  %v8968_v42 = vcombine.low %v8912_v26, %v8928_v20  ;;  %v8821_v36 = vcombine.low %v8782_v60, %v8814_v21  ;;  %v8969_v8 = vcombine.high %v8912_v26, %v8928_v20  ;;  %v8951_v20 = vrot.slane %v30982_v33, %v27368_v61  ;;  %v7885_v33 = vpop.trf.xlu0 }
 0x560   : > { %v9008_v26 = vcombine.high %v7854_v0, %v30542_v51  ;;  %v9105_v0 = vcombine.low %v27238_v25, %v27365_v34 }
 0x561   : > { %14845 = vxpose.xlu1.b32.start [1/2] (short) (narrow) %v8818_v63, 8  ;;  %v8822_v63 = vcombine.high %v8782_v60, %v8814_v21  ;;  %v8935_v21 = vrot.slane %v8921_v55, %v25994_v40  ;;  %v8983_v24 = vrot.slane %v8969_v8, %v27368_v61 }
 0x563   : > { %14814 = vxpose.xlu0.b32.end [2/2] (short) (narrow) %v8852_v29, 8  ;;  %v8867_v29 = vrot.slane %v8853_v7, %v27368_v61  ;;  %v9003_v7 = vcombine.high %v8951_v20, %v8983_v24 }
 0x565   : > { %14846 = vxpose.xlu1.b32.end [2/2] (short) (narrow) %v8869_v23, 8  ;;  %v8976_v23 = vrot.slane %v8968_v42, %v27368_v61  ;;  %v8871_v56 = vcombine.high %v8867_v29, %v30542_v51  ;;  %v9037_v42 = vrot.slane %v9023_v4, %v27368_v61 }
 0x567   : > { %14877 = vxpose.xlu0.b32.start [1/2] (short) (narrow) %v8819_v17, 8  ;;  %v9000_v17 = vcombine.low %v8944_v10, %v8976_v23 }
 0x569   : > { %14909 = vxpose.xlu1.b32.start [1/2] (short) (narrow) %v8820_v46, 8  ;;  %v8905_v46 = vcombine.high %v27163_v47, %v27306_v31  ;;  %v9002_v31 = vcombine.low %v8951_v20, %v8983_v24 }
 0x56b   : > { %14878 = vxpose.xlu0.b32.end [2/2] (short) (narrow) %v8860_v6, 8  ;;  %v9001_v6 = vcombine.high %v8944_v10, %v8976_v23  ;;  %v8919_v60 = vrot.slane %v8905_v46, %v25994_v40  ;;  %v30984_v23 = vld [vmem:[#allocation113_spill] sm:$0xff]  ;;  %v9089_v10 = vcombine.low %v27165_v22, %v27308_v59 }
 0x56d   : > { %14910 = vxpose.xlu1.b32.end [2/2] (short) (narrow) %v8870_v13, 8  ;;  %v9053_v13 = vcombine.high %v9030_v54, %v30542_v51  ;;  %v8984_v47 = vcombine.low %v8919_v60, %v8935_v21  ;;  %v8985_v39 = vcombine.high %v8919_v60, %v8935_v21  ;;  %v9097_v46 = vrot.slane %v9089_v10, %v25994_v40 }
 0x56e   : > { %v30986_v21 = vcombine.high %v30983_v44, %v30984_v23 }
 0x56f   : > { %14941 = vxpose.xlu0.b32.start [1/2] (short) (narrow) %v8821_v36, 8  ;;  %v8992_v36 = vrot.slane %v8984_v47, %v27368_v61 }
 0x571   : > { %14973 = vxpose.xlu1.b32.start [1/2] (short) (narrow) %v8822_v63, 8  ;;  %v9022_v63 = vrot.slane %v9008_v26, %v25994_v40 }
 0x573   : > { %14942 = vxpose.xlu0.b32.end [2/2] (short) (narrow) %v8867_v29, 8  ;;  %v9054_v29 = vcombine.high %v9037_v42, %v30542_v51  ;;  %v9045_v8 = vrot.slane %v9022_v63, %v27368_v61  ;;  %v9038_v24 = vcombine.high %v9022_v63, %v30542_v51  ;;  %v9106_v63 = vcombine.high %v27238_v25, %v27365_v34 }
 0x574   : > { %v30988_v34 = vcombine.high %v26285_v48, %v26672_v11 }
 0x575   : > { %14974 = vxpose.xlu1.b32.end [2/2] (short) (narrow) %v8871_v56, 8  ;;  %v30985_v56 = vcombine.low %v30983_v44, %v30984_v23  ;;  %v9052_v47 = vrot.slane %v9038_v24, %v27368_v61  ;;  %v9290_v24 = vcombine.low %v27243_v30, %v27377_v43 }
 0x577   : > { %15005 = vxpose.xlu0.b32.start [1/2] (short) (narrow) %v9000_v17, 8  ;;  %v8960_v19 = vrot.slane %v30985_v56, %v27368_v61  ;;  %v9113_v17 = vrot.slane %v9105_v0, %v25994_v40  ;;  %v9090_v56 = vcombine.high %v27165_v22, %v27308_v59 }
 0x579   : > { %15037 = vxpose.xlu1.b32.start [1/2] (short) (narrow) %v9001_v6, 8  ;;  %v9004_v27 = vcombine.low %v8960_v19, %v8992_v36  ;;  %v9005_v55 = vcombine.high %v8960_v19, %v8992_v36  ;;  %v9055_v6 = vcombine.high %v9045_v8, %v30542_v51  ;;  %v9153_v60 = vcombine.low %v9097_v46, %v9113_v17 }
 0x57a   : > { %v9104_v10 = vrot.slane %v9090_v56, %v25994_v40 }
 0x57b   : > { %15006 = vxpose.xlu0.b32.end [2/2] (short) (narrow) %v9030_v54, 8  ;;  %v8999_v54 = vrot.slane %v8985_v39, %v27368_v61  ;;  %v9161_v26 = vrot.slane %v9153_v60, %v27368_v61  ;;  %v9120_v39 = vrot.slane %v9106_v63, %v25994_v40 }
 0x57d   : > { %15038 = vxpose.xlu1.b32.end [2/2] (short) (narrow) %v9053_v13, 8  ;;  %v8967_v13 = vrot.slane %v30986_v21, %v27368_v61  ;;  %v9169_v22 = vcombine.low %v9104_v10, %v9120_v39 }
 0x57f   : > { %15069 = vxpose.xlu0.b32.start [1/2] (short) (narrow) %v9002_v31, 8  ;;  %v9006_v4 = vcombine.low %v8967_v13, %v8999_v54  ;;  %v9007_v20 = vcombine.high %v8967_v13, %v8999_v54  ;;  %v9200_v31 = vrot.slane %v7885_v33, %v25994_v40  ;;  %v9170_v13 = vcombine.high %v9104_v10, %v9120_v39 }
 0x581   : > { %15101 = vxpose.xlu1.b32.start [1/2] (short) (narrow) %v9003_v7, 8  ;;  %v9056_v7 = vcombine.high %v9052_v47, %v30542_v51  ;;  %v9215_v23 = vrot.slane %v9200_v31, %v27368_v61  ;;  %v9208_v25 = vcombine.high %v9200_v31, %v30542_v51  ;;  %v9184_v31 = vrot.slane %v9170_v13, %v27368_v61 }
 0x583   : > { %15070 = vxpose.xlu0.b32.end [2/2] (short) (narrow) %v9037_v42, 8  ;;  %v30987_v42 = vcombine.low %v26285_v48, %v26672_v11  ;;  %v9238_v0 = vcombine.high %v9215_v23, %v30542_v51  ;;  %v9222_v54 = vrot.slane %v9208_v25, %v27368_v61  ;;  %v30989_v48 = vcombine.low %v30760_v12, %v26675_v52 }
 0x584   : > { %v9291_v25 = vcombine.high %v27243_v30, %v27377_v43 }
 0x585   : > { %15102 = vxpose.xlu1.b32.end [2/2] (short) (narrow) %v9054_v29, 8  ;;  %v9129_v36 = vrot.slane %v30987_v42, %v27368_v61  ;;  %v9154_v29 = vcombine.high %v9097_v46, %v9113_v17  ;;  %v9177_v46 = vrot.slane %v9169_v22, %v27368_v61  ;;  %v9239_v21 = vcombine.high %v9222_v54, %v30542_v51 }
 0x586   : > { %v9145_v11 = vrot.slane %v30989_v48, %v27368_v61  ;;  %v30990_v42 = vcombine.high %v30760_v12, %v26675_v52  ;;  %v30991_v52 = vld [vmem:[#allocation29_spill] sm:$0xff] }
 0x587   : > { %15133 = vxpose.xlu0.b32.start [1/2] (short) (narrow) %v9004_v27, 8  ;;  %v9185_v44 = vcombine.low %v9129_v36, %v9161_v26  ;;  %v9186_v19 = vcombine.high %v9129_v36, %v9161_v26  ;;  %v9168_v27 = vrot.slane %v9154_v29, %v27368_v61  ;;  %v30992_v12 = vcombine.low %v26306_v9, %v30991_v52 }
 0x588   : > { %v9189_v60 = vcombine.low %v9145_v11, %v9177_v46  ;;  %v9152_v36 = vrot.slane %v30990_v42, %v27368_v61  ;;  %v30993_v30 = vcombine.high %v26306_v9, %v30991_v52  ;;  %v30994_v9 = vld [vmem:[#allocation30_spill] sm:$0xff]  ;;  %v7917_v52 = vpop.trf.xlu1 }
 0x589   : > { %15165 = vxpose.xlu1.b32.start [1/2] (short) (narrow) %v9005_v55, 8  ;;  %v9136_v55 = vrot.slane %v30988_v34, %v27368_v61  ;;  %v9314_v10 = vrot.slane %v30992_v12, %v27368_v61 }
 0x58a   : > { %v9192_v56 = vcombine.high %v9152_v36, %v9184_v31 }
 0x58b   : > { %15134 = vxpose.xlu0.b32.end [2/2] (short) (narrow) %v9045_v8, 8  ;;  %v9187_v59 = vcombine.low %v9136_v55, %v9168_v27  ;;  %v9193_v8 = vcombine.high %v7885_v33, %v30542_v51  ;;  %v9188_v17 = vcombine.high %v9136_v55, %v9168_v27  ;;  %v9190_v33 = vcombine.high %v9145_v11, %v9177_v46 }
 0x58d   : > { %15166 = vxpose.xlu1.b32.end [2/2] (short) (narrow) %v9055_v6, 8  ;;  %v9207_v6 = vrot.slane %v9193_v8, %v25994_v40 }
 0x58f   : > { %15197 = vxpose.xlu0.b32.start [1/2] (short) (narrow) %v9006_v4, 8  ;;  %v9274_v4 = vcombine.low %v27171_v28, %v27312_v58  ;;  %v9223_v63 = vcombine.high %v9207_v6, %v30542_v51 }
 0x591   : > { %15229 = vxpose.xlu1.b32.start [1/2] (short) (narrow) %v9007_v20, 8  ;;  %v9230_v20 = vrot.slane %v9207_v6, %v27368_v61  ;;  %v9282_v26 = vrot.slane %v9274_v4, %v25994_v40 }
 0x593   : > { %15198 = vxpose.xlu0.b32.end [2/2] (short) (narrow) %v9052_v47, 8  ;;  %v9298_v47 = vrot.slane %v9290_v24, %v25994_v40 }
 0x595   : > { %15230 = vxpose.xlu1.b32.end [2/2] (short) (narrow) %v9056_v7, 8  ;;  %v9240_v7 = vcombine.high %v9230_v20, %v30542_v51  ;;  %v9338_v29 = vcombine.low %v9282_v26, %v9298_v47  ;;  %v9339_v34 = vcombine.high %v9282_v26, %v9298_v47  ;;  %v9475_v47 = vcombine.low %v27240_v41, %v27399_v57 }
 0x597   : > { %15261 = vxpose.xlu0.b32.start [1/2] (short) (narrow) %v9185_v44, 8  ;;  %v9191_v44 = vcombine.low %v9152_v36, %v9184_v31  ;;  %v9353_v46 = vrot.slane %v9339_v34, %v27368_v61 }
 0x599   : > { %15293 = vxpose.xlu1.b32.start [1/2] (short) (narrow) %v9186_v19, 8  ;;  %v9237_v19 = vrot.slane %v9223_v63, %v27368_v61  ;;  %v9483_v63 = vrot.slane %v9475_v47, %v25994_v40  ;;  %v31002_v47 = vld [vmem:[#allocation28_spill] sm:$0xff] }
 0x59b   : > { %15262 = vxpose.xlu0.b32.end [2/2] (short) (narrow) %v9215_v23, 8  ;;  %v7886_v23 = vpop.trf.xlu0  ;;  %v9241_v27 = vcombine.high %v9237_v19, %v30542_v51 }
 0x59c   : > { %v9385_v39 = vrot.slane %v7886_v23, %v25994_v40  ;;  %v9378_v48 = vcombine.high %v7886_v23, %v30542_v51 }
 0x59d   : > { %15294 = vxpose.xlu1.b32.end [2/2] (short) (narrow) %v9238_v0, 8  ;;  %v9346_v0 = vrot.slane %v9338_v29, %v27368_v61 }
 0x59e   : > { %v9400_v22 = vrot.slane %v9385_v39, %v27368_v61  ;;  %v9393_v43 = vcombine.high %v9385_v39, %v30542_v51 }
 0x59f   : > { %15325 = vxpose.xlu0.b32.start [1/2] (short) (narrow) %v9187_v59, 8  ;;  %v9370_v55 = vcombine.low %v9314_v10, %v9346_v0  ;;  %v9275_v59 = vcombine.high %v27171_v28, %v27312_v58  ;;  %v9371_v8 = vcombine.high %v9314_v10, %v9346_v0 }
 0x5a0   : > { %v9407_v13 = vrot.slane %v9393_v43, %v27368_v61  ;;  %v9460_v43 = vcombine.high %v27167_v45, %v27310_v38 }
 0x5a1   : > { %15357 = vxpose.xlu1.b32.start [1/2] (short) (narrow) %v9188_v17, 8  ;;  %v9305_v17 = vrot.slane %v9291_v25, %v25994_v40  ;;  %v9289_v6 = vrot.slane %v9275_v59, %v25994_v40  ;;  %v9570_v25 = vrot.slane %v7917_v52, %v25994_v40 }
 0x5a2   : > { %v9424_v4 = vcombine.high %v9407_v13, %v30542_v51 }
 0x5a3   : > { %15326 = vxpose.xlu0.b32.end [2/2] (short) (narrow) %v9222_v54, 8  ;;  %v9423_v54 = vcombine.high %v9400_v22, %v30542_v51  ;;  %v9354_v58 = vcombine.low %v9289_v6, %v9305_v17  ;;  %v9355_v31 = vcombine.high %v9289_v6, %v9305_v17  ;;  %v9476_v17 = vcombine.high %v27240_v41, %v27399_v57 }
 0x5a4   : > { %v9585_v6 = vrot.slane %v9570_v25, %v27368_v61  ;;  %v9578_v41 = vcombine.high %v9570_v25, %v30542_v51  ;;  %v7918_v25 = vpop.trf.xlu1 }
 0x5a5   : > { %15358 = vxpose.xlu1.b32.end [2/2] (short) (narrow) %v9239_v21, 8  ;;  %v9321_v21 = vrot.slane %v30993_v30, %v27368_v61  ;;  %v9362_v24 = vrot.slane %v9354_v58, %v27368_v61  ;;  %v9369_v29 = vrot.slane %v9355_v31, %v27368_v61 }
 0x5a6   : > { %v9608_v58 = vcombine.high %v9585_v6, %v30542_v51 }
 0x5a7   : > { %15389 = vxpose.xlu0.b32.start [1/2] (short) (narrow) %v9189_v60, 8  ;;  %v9372_v28 = vcombine.low %v9321_v21, %v9353_v46  ;;  %v9373_v11 = vcombine.high %v9321_v21, %v9353_v46  ;;  %v9392_v60 = vrot.slane %v9378_v48, %v25994_v40  ;;  %v9490_v21 = vrot.slane %v9476_v17, %v25994_v40  ;;  %v31006_v17 = vld [vmem:[#allocation61_spill] sm:$0xff] }
 0x5a8   : > { %v9474_v48 = vrot.slane %v9460_v43, %v25994_v40 }
 0x5a9   : > { %15421 = vxpose.xlu1.b32.start [1/2] (short) (narrow) %v9190_v33, 8  ;;  %v30995_v33 = vcombine.low %v30768_v1, %v30994_v9  ;;  %v9415_v36 = vrot.slane %v9392_v60, %v27368_v61  ;;  %v9408_v39 = vcombine.high %v9392_v60, %v30542_v51  ;;  %v9592_v60 = vrot.slane %v9578_v41, %v27368_v61 }
 0x5ab   : > { %15390 = vxpose.xlu0.b32.end [2/2] (short) (narrow) %v9230_v20, 8  ;;  %v9330_v20 = vrot.slane %v30995_v33, %v27368_v61  ;;  %v9425_v23 = vcombine.high %v9415_v36, %v30542_v51  ;;  %v9422_v10 = vrot.slane %v9408_v39, %v27368_v61  ;;  %v9609_v33 = vcombine.high %v9592_v60, %v30542_v51 }
 0x5ad   : > { %15422 = vxpose.xlu1.b32.end [2/2] (short) (narrow) %v9240_v7, 8  ;;  %v9374_v26 = vcombine.low %v9330_v20, %v9362_v24  ;;  %v9459_v7 = vcombine.low %v27167_v45, %v27310_v38  ;;  %v9375_v42 = vcombine.high %v9330_v20, %v9362_v24  ;;  %v9539_v45 = vcombine.low %v9474_v48, %v9490_v21  ;;  %v31001_v20 = vld [vmem:[#allocation63_spill] sm:$0xff] }
 0x5ae   : > { %v31003_v31 = vcombine.low %v31001_v20, %v31002_v47 }
 0x5af   : > { %15453 = vxpose.xlu0.b32.start [1/2] (short) (narrow) %v9191_v44, 8  ;;  %v9467_v44 = vrot.slane %v9459_v7, %v25994_v40  ;;  %v9540_v7 = vcombine.high %v9474_v48, %v9490_v21 }
 0x5b1   : > { %15485 = vxpose.xlu1.b32.start [1/2] (short) (narrow) %v9192_v56, 8  ;;  %v30996_v56 = vcombine.high %v30768_v1, %v30994_v9  ;;  %v9523_v0 = vcombine.low %v9467_v44, %v9483_v63  ;;  %v30997_v1 = vld [vmem:[#allocation62_spill] sm:$0xff] }
 0x5b3   : > { %15454 = vxpose.xlu0.b32.end [2/2] (short) (narrow) %v9237_v19, 8  ;;  %v9337_v19 = vrot.slane %v30996_v56, %v27368_v61  ;;  %v9531_v34 = vrot.slane %v9523_v0, %v27368_v61  ;;  %v9554_v56 = vrot.slane %v9540_v7, %v27368_v61  ;;  %v31004_v0 = vcombine.high %v31001_v20, %v31002_v47  ;;  %v31010_v20 = vld [vmem:[#allocation114_spill] sm:$0xff] }
 0x5b4   : > { %v9845_v7 = vcombine.low %v27247_v14, %v27381_v53 }
 0x5b5   : > { %15486 = vxpose.xlu1.b32.end [2/2] (short) (narrow) %v9241_v27, 8  ;;  %v9376_v27 = vcombine.low %v9337_v19, %v9369_v29  ;;  %v9377_v12 = vcombine.high %v9337_v19, %v9369_v29 }
 0x5b7   : > { %15517 = vxpose.xlu0.b32.start [1/2] (short) (narrow) %v9370_v55, 8  ;;  %v9426_v55 = vcombine.high %v9422_v10, %v30542_v51 }
 0x5b9   : > { %15549 = vxpose.xlu1.b32.start [1/2] (short) (narrow) %v9371_v8, 8 }
 0x5bb   : > { %15518 = vxpose.xlu0.b32.end [2/2] (short) (narrow) %v9400_v22, 8  ;;  %v30998_v22 = vld [vmem:[#allocation27_spill] sm:$0xff] }
 0x5bc   : > { %v30999_v59 = vcombine.low %v30997_v1, %v30998_v22  ;;  %v31000_v57 = vcombine.high %v30997_v1, %v30998_v22  ;;  %v9755_v1 = vrot.slane %v7918_v25, %v25994_v40 }
 0x5bd   : > { %15550 = vxpose.xlu1.b32.end [2/2] (short) (narrow) %v9423_v54, 8  ;;  %v9524_v54 = vcombine.high %v9467_v44, %v9483_v63  ;;  %v9644_v63 = vcombine.low %v27173_v37, %v27314_v5 }
 0x5be   : > { %v9499_v8 = vrot.slane %v30999_v59, %v27368_v61  ;;  %v9770_v21 = vrot.slane %v9755_v1, %v27368_v61 }
 0x5bf   : > { %15581 = vxpose.xlu0.b32.start [1/2] (short) (narrow) %v9372_v28, 8  ;;  %v9538_v28 = vrot.slane %v9524_v54, %v27368_v61  ;;  %v9652_v19 = vrot.slane %v9644_v63, %v25994_v40 }
 0x5c0   : > { %v9555_v46 = vcombine.low %v9499_v8, %v9531_v34  ;;  %v9556_v30 = vcombine.high %v9499_v8, %v9531_v34  ;;  %v31005_v8 = vld [vmem:[#allocation65_spill] sm:$0xff]  ;;  %v9793_v41 = vcombine.high %v9770_v21, %v30542_v51 }
 0x5c1   : > { %15613 = vxpose.xlu1.b32.start [1/2] (short) (narrow) %v9373_v11, 8  ;;  %v9506_v11 = vrot.slane %v31000_v57, %v27368_v61  ;;  %v31007_v54 = vcombine.low %v31005_v8, %v31006_v17 }
 0x5c3   : > { %15582 = vxpose.xlu0.b32.end [2/2] (short) (narrow) %v9407_v13, 8  ;;  %v9557_v38 = vcombine.low %v9506_v11, %v9538_v28  ;;  %v9563_v13 = vcombine.high %v7917_v52, %v30542_v51  ;;  %v9558_v24 = vcombine.high %v9506_v11, %v9538_v28 }
 0x5c5   : > { %15614 = vxpose.xlu1.b32.end [2/2] (short) (narrow) %v9424_v4, 8  ;;  %v9547_v4 = vrot.slane %v9539_v45, %v27368_v61  ;;  %v9577_v9 = vrot.slane %v9563_v13, %v25994_v40 }
 0x5c7   : > { %15645 = vxpose.xlu0.b32.start [1/2] (short) (narrow) %v9374_v26, 8  ;;  %v9515_v26 = vrot.slane %v31003_v31, %v27368_v61  ;;  %v9600_v44 = vrot.slane %v9577_v9, %v27368_v61  ;;  %v9593_v52 = vcombine.high %v9577_v9, %v30542_v51 }
 0x5c9   : > { %15677 = vxpose.xlu1.b32.start [1/2] (short) (narrow) %v9375_v42, 8  ;;  %v9660_v42 = vcombine.low %v27245_v18, %v27405_v15  ;;  %v9560_v29 = vcombine.high %v9515_v26, %v9547_v4  ;;  %v9610_v39 = vcombine.high %v9600_v44, %v30542_v51 }
 0x5cb   : > { %15646 = vxpose.xlu0.b32.end [2/2] (short) (narrow) %v9415_v36, 8  ;;  %v9559_v36 = vcombine.low %v9515_v26, %v9547_v4 }
 0x5cd   : > { %15678 = vxpose.xlu1.b32.end [2/2] (short) (narrow) %v9425_v23, 8  ;;  %v9668_v23 = vrot.slane %v9660_v42, %v25994_v40 }
 0x5cf   : > { %15709 = vxpose.xlu0.b32.start [1/2] (short) (narrow) %v9376_v27, 8  ;;  %v9522_v27 = vrot.slane %v31004_v0, %v27368_v61  ;;  %v9709_v43 = vcombine.high %v9652_v19, %v9668_v23 }
 0x5d1   : > { %15741 = vxpose.xlu1.b32.start [1/2] (short) (narrow) %v9377_v12, 8  ;;  %v9708_v12 = vcombine.low %v9652_v19, %v9668_v23  ;;  %v9562_v34 = vcombine.high %v9522_v27, %v9554_v56  ;;  %v9723_v57 = vrot.slane %v9709_v43, %v27368_v61 }
 0x5d3   : > { %15710 = vxpose.xlu0.b32.end [2/2] (short) (narrow) %v9422_v10, 8  ;;  %v9561_v10 = vcombine.low %v9522_v27, %v9554_v56  ;;  %v9716_v22 = vrot.slane %v9708_v12, %v27368_v61 }
 0x5d5   : > { %15742 = vxpose.xlu1.b32.end [2/2] (short) (narrow) %v9426_v55, 8  ;;  %v9607_v55 = vrot.slane %v9593_v52, %v27368_v61 }
 0x5d7   : > { %15773 = vxpose.xlu0.b32.start [1/2] (short) (narrow) %v9555_v46, 8  ;;  %v9611_v59 = vcombine.high %v9607_v55, %v30542_v51  ;;  %v9684_v46 = vrot.slane %v31007_v54, %v27368_v61 }
 0x5d9   : > { %15805 = vxpose.xlu1.b32.start [1/2] (short) (narrow) %v9556_v30, 8  ;;  %v9740_v30 = vcombine.low %v9684_v46, %v9716_v22  ;;  %v9741_v28 = vcombine.high %v9684_v46, %v9716_v22  ;;  %v9846_v46 = vcombine.high %v27247_v14, %v27381_v53 }
 0x5db   : > { %15774 = vxpose.xlu0.b32.end [2/2] (short) (narrow) %v9585_v6, 8  ;;  %v9661_v6 = vcombine.high %v27245_v18, %v27405_v15  ;;  %v9763_v18 = vcombine.high %v9755_v1, %v30542_v51  ;;  %v31008_v15 = vcombine.high %v31005_v8, %v31006_v17  ;;  %v31014_v8 = vld [vmem:[#allocation31_spill] sm:$0xff] }
 0x5dd   : > { %15806 = vxpose.xlu1.b32.end [2/2] (short) (narrow) %v9608_v58, 8  ;;  %v9645_v58 = vcombine.high %v27173_v37, %v27314_v5  ;;  %v9675_v48 = vrot.slane %v9661_v6, %v25994_v40  ;;  %v9691_v45 = vrot.slane %v31008_v15, %v27368_v61 }
 0x5df   : > { %15837 = vxpose.xlu0.b32.start [1/2] (short) (narrow) %v9557_v38, 8  ;;  %v9659_v11 = vrot.slane %v9645_v58, %v25994_v40  ;;  %v9742_v5 = vcombine.low %v9691_v45, %v9723_v57  ;;  %v9748_v38 = vcombine.high %v7918_v25, %v30542_v51  ;;  %v9743_v13 = vcombine.high %v9691_v45, %v9723_v57 }
 0x5e1   : > { %15869 = vxpose.xlu1.b32.start [1/2] (short) (narrow) %v9558_v24, 8  ;;  %v9724_v37 = vcombine.low %v9659_v11, %v9675_v48  ;;  %v9777_v24 = vrot.slane %v9763_v18, %v27368_v61  ;;  %v9762_v4 = vrot.slane %v9748_v38, %v25994_v40  ;;  %v9725_v26 = vcombine.high %v9659_v11, %v9675_v48 }
 0x5e3   : > { %15838 = vxpose.xlu0.b32.end [2/2] (short) (narrow) %v9592_v60, 8  ;;  %v9732_v60 = vrot.slane %v9724_v37, %v27368_v61  ;;  %v9794_v9 = vcombine.high %v9777_v24, %v30542_v51  ;;  %v9739_v23 = vrot.slane %v9725_v26, %v27368_v61  ;;  %v9778_v27 = vcombine.high %v9762_v4, %v30542_v51  ;;  %v31022_v26 = vld [vmem:[#allocation186_spill] sm:$0xff] }
 0x5e5   : > { %15870 = vxpose.xlu1.b32.end [2/2] (short) (narrow) %v9609_v33, 8  ;;  %v31009_v33 = vld [vmem:[#allocation66_spill] sm:$0xff] }
 0x5e6   : > { %v31011_v47 = vcombine.low %v31009_v33, %v31010_v20 }
 0x5e7   : > { %15901 = vxpose.xlu0.b32.start [1/2] (short) (narrow) %v9559_v36, 8  ;;  %v9829_v36 = vcombine.low %v27175_v62, %v27316_v32 }
 0x5e8   : > { %v9700_v31 = vrot.slane %v31011_v47, %v27368_v61 }
 0x5e9   : > { %15933 = vxpose.xlu1.b32.start [1/2] (short) (narrow) %v9560_v29, 8  ;;  %v9785_v29 = vrot.slane %v9762_v4, %v27368_v61  ;;  %v9837_v56 = vrot.slane %v9829_v36, %v25994_v40 }
 0x5ea   : > { %v9744_v42 = vcombine.low %v9700_v31, %v9732_v60  ;;  %v9745_v63 = vcombine.high %v9700_v31, %v9732_v60 }
 0x5eb   : > { %15902 = vxpose.xlu0.b32.end [2/2] (short) (narrow) %v9600_v44, 8  ;;  %v9853_v44 = vrot.slane %v9845_v7, %v25994_v40  ;;  %v9795_v19 = vcombine.high %v9785_v29, %v30542_v51  ;;  %v31023_v7 = vld [vmem:[#allocation140_spill] sm:$0xff] }
 0x5ed   : > { %15934 = vxpose.xlu1.b32.end [2/2] (short) (narrow) %v9610_v39, 8  ;;  %v31012_v39 = vcombine.high %v31009_v33, %v31010_v20  ;;  %v9893_v52 = vcombine.low %v9837_v56, %v9853_v44  ;;  %v9894_v6 = vcombine.high %v9837_v56, %v9853_v44  ;;  %v31020_v33 = vld [vmem:[#allocation24_spill] sm:$0xff]  ;;  %v31021_v20 = vld [vmem:[#allocation163_spill] sm:$0xff] }
 0x5ee   : > { %v10030_v47 = vcombine.low %v31021_v20, %v31020_v33 }
 0x5ef   : > { %15965 = vxpose.xlu0.b32.start [1/2] (short) (narrow) %v9561_v10, 8  ;;  %v9707_v0 = vrot.slane %v31012_v39, %v27368_v61  ;;  %v7949_v10 = vpop.trf.xlu0  ;;  %v9901_v1 = vrot.slane %v9893_v52, %v27368_v61 }
 0x5f0   : > { %v9933_v18 = vcombine.high %v7949_v10, %v30542_v51 }
 0x5f1   : > { %15997 = vxpose.xlu1.b32.start [1/2] (short) (narrow) %v9562_v34, 8  ;;  %v9746_v12 = vcombine.low %v9707_v0, %v9739_v23  ;;  %v9747_v25 = vcombine.high %v9707_v0, %v9739_v23  ;;  %v9792_v34 = vrot.slane %v9778_v27, %v27368_v61 }
 0x5f3   : > { %15966 = vxpose.xlu0.b32.end [2/2] (short) (narrow) %v9607_v55, 8  ;;  %v9940_v55 = vrot.slane %v7949_v10, %v25994_v40  ;;  %v9796_v22 = vcombine.high %v9792_v34, %v30542_v51 }
 0x5f5   : > { %15998 = vxpose.xlu1.b32.end [2/2] (short) (narrow) %v9611_v59, 8  ;;  %v31013_v59 = vld [vmem:[#allocation67_spill] sm:$0xff]  ;;  %v9948_v53 = vcombine.high %v9940_v55, %v30542_v51 }
 0x5f6   : > { %v31015_v17 = vcombine.low %v31013_v59, %v31014_v8  ;;  %v31016_v14 = vcombine.high %v31013_v59, %v31014_v8  ;;  %v31026_v59 = vld [vmem:[#allocation33_spill] sm:$0xff] }
 0x5f7   : > { %16029 = vxpose.xlu0.b32.start [1/2] (short) (narrow) %v9740_v30, 8  ;;  %v9955_v30 = vrot.slane %v9940_v55, %v27368_v61  ;;  %v9962_v45 = vrot.slane %v9948_v53, %v27368_v61 }
 0x5f8   : > { %v9869_v54 = vrot.slane %v31015_v17, %v27368_v61  ;;  %v9876_v11 = vrot.slane %v31016_v14, %v27368_v61 }
 0x5f9   : > { %16061 = vxpose.xlu1.b32.start [1/2] (short) (narrow) %v9741_v28, 8  ;;  %v9860_v28 = vrot.slane %v9846_v46, %v25994_v40  ;;  %v9978_v48 = vcombine.high %v9955_v30, %v30542_v51  ;;  %v9979_v38 = vcombine.high %v9962_v45, %v30542_v51 }
 0x5fa   : > { %v9925_v43 = vcombine.low %v9869_v54, %v9901_v1  ;;  %v9926_v58 = vcombine.high %v9869_v54, %v9901_v1  ;;  %v10031_v54 = vcombine.high %v31021_v20, %v31020_v33  ;;  %v31033_v33 = vld [vmem:[#allocation162_spill] sm:$0xff] }
 0x5fb   : > { %16030 = vxpose.xlu0.b32.end [2/2] (short) (narrow) %v9770_v21, 8  ;;  %v9830_v21 = vcombine.high %v27175_v62, %v27316_v32 }
 0x5fd   : > { %16062 = vxpose.xlu1.b32.end [2/2] (short) (narrow) %v9793_v41, 8  ;;  %v9908_v41 = vrot.slane %v9894_v6, %v27368_v61  ;;  %v9844_v57 = vrot.slane %v9830_v21, %v25994_v40 }
 0x5ff   : > { %16093 = vxpose.xlu0.b32.start [1/2] (short) (narrow) %v9742_v5, 8  ;;  %v9909_v62 = vcombine.low %v9844_v57, %v9860_v28  ;;  %v9927_v32 = vcombine.low %v9876_v11, %v9908_v41  ;;  %v9928_v15 = vcombine.high %v9876_v11, %v9908_v41  ;;  %v9947_v5 = vrot.slane %v9933_v18, %v25994_v40  ;;  %v27859_v18 = vpop.trf.xlu1 }
 0x601   : > { %16125 = vxpose.xlu1.b32.start [1/2] (short) (narrow) %v9743_v13, 8  ;;  %v9917_v37 = vrot.slane %v9909_v62, %v27368_v61  ;;  %v31017_v13 = vld [vmem:[#allocation68_spill] sm:$0xff]  ;;  %v9963_v0 = vcombine.high %v9947_v5, %v30542_v51 }
 0x603   : > { %16094 = vxpose.xlu0.b32.end [2/2] (short) (narrow) %v9777_v24, 8  ;;  %v31018_v24 = vld [vmem:[#allocation32_spill] sm:$0xff] }
 0x604   : > { %v31019_v60 = vcombine.low %v31017_v13, %v31018_v24 }
 0x605   : > { %16126 = vxpose.xlu1.b32.end [2/2] (short) (narrow) %v9794_v9, 8  ;;  %v9910_v9 = vcombine.high %v9844_v57, %v9860_v28 }
 0x606   : > { %v9885_v4 = vrot.slane %v31019_v60, %v27368_v61 }
 0x607   : > { %16157 = vxpose.xlu0.b32.start [1/2] (short) (narrow) %v9744_v42, 8  ;;  %v10014_v42 = vcombine.low %v31023_v7, %v31022_v26  ;;  %v9924_v44 = vrot.slane %v9910_v9, %v27368_v61  ;;  %v31032_v9 = vld [vmem:[#allocation213_spill] sm:$0xff] }
 0x608   : > { %v9929_v31 = vcombine.low %v9885_v4, %v9917_v37  ;;  %v9930_v36 = vcombine.high %v9885_v4, %v9917_v37  ;;  %v10215_v20 = vcombine.low %v31033_v33, %v31032_v9 }
 0x609   : > { %16189 = vxpose.xlu1.b32.start [1/2] (short) (narrow) %v9745_v63, 8  ;;  %v9970_v63 = vrot.slane %v9947_v5, %v27368_v61  ;;  %v10022_v23 = vrot.slane %v10014_v42, %v25994_v40 }
 0x60b   : > { %16158 = vxpose.xlu0.b32.end [2/2] (short) (narrow) %v9785_v29, 8  ;;  %v10038_v29 = vrot.slane %v10030_v47, %v25994_v40  ;;  %v9980_v56 = vcombine.high %v9970_v63, %v30542_v51 }
 0x60d   : > { %16190 = vxpose.xlu1.b32.end [2/2] (short) (narrow) %v9795_v19, 8  ;;  %v31024_v19 = vcombine.high %v31017_v13, %v31018_v24  ;;  %v10078_v27 = vcombine.low %v10022_v23, %v10038_v29  ;;  %v10079_v46 = vcombine.high %v10022_v23, %v10038_v29  ;;  %v31029_v13 = vld [vmem:[#allocation72_spill] sm:$0xff]  ;;  %v31030_v24 = vld [vmem:[#allocation34_spill] sm:$0xff] }
 0x60e   : > { %v31031_v60 = vcombine.low %v31029_v13, %v31030_v24 }
 0x60f   : > { %16221 = vxpose.xlu0.b32.start [1/2] (short) (narrow) %v9746_v12, 8  ;;  %v9892_v39 = vrot.slane %v31024_v19, %v27368_v61  ;;  %v7950_v12 = vpop.trf.xlu0  ;;  %v10086_v55 = vrot.slane %v10078_v27, %v27368_v61 }
 0x610   : > { %v10070_v4 = vrot.slane %v31031_v60, %v27368_v61 }
 0x611   : > { %16253 = vxpose.xlu1.b32.start [1/2] (short) (narrow) %v9747_v25, 8  ;;  %v9931_v52 = vcombine.low %v9892_v39, %v9924_v44  ;;  %v9932_v10 = vcombine.high %v9892_v39, %v9924_v44  ;;  %v9977_v25 = vrot.slane %v9963_v0, %v27368_v61  ;;  %v10223_v44 = vrot.slane %v10215_v20, %v25994_v40 }
 0x612   : > { %v31036_v39 = vcombine.high %v31029_v13, %v31030_v24 }
 0x613   : > { %16222 = vxpose.xlu0.b32.end [2/2] (short) (narrow) %v9792_v34, 8  ;;  %v10125_v34 = vrot.slane %v7950_v12, %v25994_v40  ;;  %v9981_v1 = vcombine.high %v9977_v25, %v30542_v51 }
 0x614   : > { %v10077_v0 = vrot.slane %v31036_v39, %v27368_v61 }
 0x615   : > { %16254 = vxpose.xlu1.b32.end [2/2] (short) (narrow) %v9796_v22, 8  ;;  %v31025_v22 = vld [vmem:[#allocation71_spill] sm:$0xff]  ;;  %v10133_v57 = vcombine.high %v10125_v34, %v30542_v51 }
 0x616   : > { %v31027_v8 = vcombine.low %v31025_v22, %v31026_v59  ;;  %v31028_v53 = vcombine.high %v31025_v22, %v31026_v59  ;;  %v10310_v59 = vrot.slane %v27859_v18, %v25994_v40 }
 0x617   : > { %16285 = vxpose.xlu0.b32.start [1/2] (short) (narrow) %v9925_v43, 8  ;;  %v10140_v43 = vrot.slane %v10125_v34, %v27368_v61 }
 0x618   : > { %v10054_v17 = vrot.slane %v31027_v8, %v27368_v61  ;;  %v10061_v14 = vrot.slane %v31028_v53, %v27368_v61 }
 0x619   : > { %16317 = vxpose.xlu1.b32.start [1/2] (short) (narrow) %v9926_v58, 8  ;;  %v10045_v58 = vrot.slane %v10031_v54, %v25994_v40  ;;  %v10163_v28 = vcombine.high %v10140_v43, %v30542_v51  ;;  %v31037_v54 = vld [vmem:[#allocation69_spill] sm:$0xff] }
 0x61a   : > { %v10110_v6 = vcombine.low %v10054_v17, %v10086_v55  ;;  %v10111_v21 = vcombine.high %v10054_v17, %v10086_v55 }
 0x61b   : > { %16286 = vxpose.xlu0.b32.end [2/2] (short) (narrow) %v9955_v30, 8  ;;  %v10015_v30 = vcombine.high %v31023_v7, %v31022_v26  ;;  %v31034_v26 = vld [vmem:[#allocation185_spill] sm:$0xff]  ;;  %v31035_v7 = vld [vmem:[#allocation139_spill] sm:$0xff] }
 0x61c   : > { %v10199_v42 = vcombine.low %v31035_v7, %v31034_v26 }
 0x61d   : > { %16318 = vxpose.xlu1.b32.end [2/2] (short) (narrow) %v9978_v48, 8  ;;  %v10093_v48 = vrot.slane %v10079_v46, %v27368_v61  ;;  %v10029_v41 = vrot.slane %v10015_v30, %v25994_v40  ;;  %v31038_v46 = vld [vmem:[#allocation64_spill] sm:$0xff]  ;;  %v10216_v30 = vcombine.high %v31033_v33, %v31032_v9 }
 0x61f   : > { %16349 = vxpose.xlu0.b32.start [1/2] (short) (narrow) %v9927_v32, 8  ;;  %v10094_v11 = vcombine.low %v10029_v41, %v10045_v58  ;;  %v10112_v62 = vcombine.low %v10061_v14, %v10093_v48  ;;  %v10118_v32 = vcombine.high %v7950_v12, %v30542_v51  ;;  %v10095_v47 = vcombine.high %v10029_v41, %v10045_v58  ;;  %v27885_v12 = vpop.trf.xlu0 }
 0x621   : > { %16381 = vxpose.xlu1.b32.start [1/2] (short) (narrow) %v9928_v15, 8  ;;  %v10113_v15 = vcombine.high %v10061_v14, %v10093_v48  ;;  %v10102_v37 = vrot.slane %v10094_v11, %v27368_v61  ;;  %v10132_v5 = vrot.slane %v10118_v32, %v25994_v40  ;;  %v10109_v23 = vrot.slane %v10095_v47, %v27368_v61 }
 0x622   : > { %v10200_v48 = vcombine.high %v31035_v7, %v31034_v26  ;;  %v10230_v14 = vrot.slane %v10216_v30, %v25994_v40 }
 0x623   : > { %16350 = vxpose.xlu0.b32.end [2/2] (short) (narrow) %v9962_v45, 8  ;;  %v10147_v45 = vrot.slane %v10133_v57, %v27368_v61  ;;  %v10155_v29 = vrot.slane %v10132_v5, %v27368_v61  ;;  %v10148_v27 = vcombine.high %v10132_v5, %v30542_v51  ;;  %v10117_v34 = vcombine.high %v10077_v0, %v10109_v23  ;;  %v27896_v17 = vpop.trf.xlu0 }
 0x624   : > { %v10325_v57 = vrot.slane %v10310_v59, %v27368_v61  ;;  %v10214_v32 = vrot.slane %v10200_v48, %v25994_v40 }
 0x625   : > { %16382 = vxpose.xlu1.b32.end [2/2] (short) (narrow) %v9979_v38, 8  ;;  %v10164_v38 = vcombine.high %v10147_v45, %v30542_v51  ;;  %v10165_v19 = vcombine.high %v10155_v29, %v30542_v51  ;;  %v10162_v55 = vrot.slane %v10148_v27, %v27368_v61 }
 0x626   : > { %v10279_v13 = vcombine.low %v10214_v32, %v10230_v14 }
 0x627   : > { %16413 = vxpose.xlu0.b32.start [1/2] (short) (narrow) %v9929_v31, 8  ;;  %v10114_v31 = vcombine.low %v10070_v4, %v10102_v37  ;;  %v10166_v8 = vcombine.high %v10162_v55, %v30542_v51  ;;  %v27909_v53 = vpop.trf.xlu0 }
 0x628   : > { %v10287_v47 = vrot.slane %v10279_v13, %v27368_v61  ;;  %v31051_v13 = vld [vmem:[#allocation73_spill] sm:$0xff] }
 0x629   : > { %16445 = vxpose.xlu1.b32.start [1/2] (short) (narrow) %v9930_v36, 8  ;;  %v27873_v36 = vpop.trf.xlu1 }
 0x62b   : > { %16414 = vxpose.xlu0.b32.end [2/2] (short) (narrow) %v9970_v63, 8  ;;  %v10115_v63 = vcombine.high %v10070_v4, %v10102_v37  ;;  %v31040_v37 = vcombine.high %v31037_v54, %v31038_v46  ;;  %v10303_v4 = vcombine.high %v27859_v18, %v30542_v51 }
 0x62d   : > { %16446 = vxpose.xlu1.b32.end [2/2] (short) (narrow) %v9980_v56, 8  ;;  %v10207_v56 = vrot.slane %v10199_v42, %v25994_v40  ;;  %v10246_v5 = vrot.slane %v31040_v37, %v27368_v61  ;;  %v10317_v26 = vrot.slane %v10303_v4, %v25994_v40  ;;  %v31041_v42 = vld [vmem:[#allocation70_spill] sm:$0xff]  ;;  %v10495_v37 = vrot.slane %v27873_v36, %v25994_v40 }
 0x62f   : > { %16477 = vxpose.xlu0.b32.start [1/2] (short) (narrow) %v9931_v52, 8  ;;  %v10263_v52 = vcombine.low %v10207_v56, %v10223_v44 }
 0x631   : > { %16509 = vxpose.xlu1.b32.start [1/2] (short) (narrow) %v9932_v10, 8  ;;  %v10116_v10 = vcombine.low %v10077_v0, %v10109_v23  ;;  %v10280_v23 = vcombine.high %v10214_v32, %v10230_v14 }
 0x633   : > { %16478 = vxpose.xlu0.b32.end [2/2] (short) (narrow) %v9977_v25, 8  ;;  %v27887_v25 = vpop.trf.xlu1 }
 0x635   : > { %16510 = vxpose.xlu1.b32.end [2/2] (short) (narrow) %v9981_v1, 8  ;;  %v10271_v1 = vrot.slane %v10263_v52, %v27368_v61  ;;  %v31046_v52 = vld [vmem:[#allocation188_spill] sm:$0xff] }
 0x637   : > { %16541 = vxpose.xlu0.b32.start [1/2] (short) (narrow) %v10110_v6, 8  ;;  %v27891_v22 = vpop.trf.xlu1  ;;  %v31039_v6 = vcombine.low %v31037_v54, %v31038_v46  ;;  %v10294_v54 = vrot.slane %v10280_v23, %v27368_v61 }
 0x639   : > { %16573 = vxpose.xlu1.b32.start [1/2] (short) (narrow) %v10111_v21, 8  ;;  %v10264_v21 = vcombine.high %v10207_v56, %v10223_v44  ;;  %v31044_v56 = vld [vmem:[#allocation216_spill] sm:$0xff] }
 0x63b   : > { %16542 = vxpose.xlu0.b32.end [2/2] (short) (narrow) %v10140_v43, 8  ;;  %v10239_v43 = vrot.slane %v31039_v6, %v27368_v61  ;;  %v10278_v11 = vrot.slane %v10264_v21, %v27368_v61 }
 0x63d   : > { %16574 = vxpose.xlu1.b32.end [2/2] (short) (narrow) %v10163_v28, 8  ;;  %v10295_v58 = vcombine.low %v10239_v43, %v10271_v1  ;;  %v27904_v28 = vpop.trf.xlu1  ;;  %v10296_v41 = vcombine.high %v10239_v43, %v10271_v1  ;;  %v10297_v24 = vcombine.low %v10246_v5, %v10278_v11  ;;  %v10298_v9 = vcombine.high %v10246_v5, %v10278_v11 }
 0x63e   : > { %v10340_v1 = vrot.slane %v10317_v26, %v27368_v61 }
 0x63f   : > { %16605 = vxpose.xlu0.b32.start [1/2] (short) (narrow) %v10112_v62, 8 }
 0x640   : > { %v10350_v43 = vcombine.high %v10340_v1, %v30542_v51 }
 0x641   : > { %16637 = vxpose.xlu1.b32.start [1/2] (short) (narrow) %v10113_v15, 8  ;;  %v27913_v62 = vpop.trf.xlu1  ;;  %v10318_v15 = vcombine.high %v10310_v59, %v30542_v51 }
 0x643   : > { %16606 = vxpose.xlu0.b32.end [2/2] (short) (narrow) %v10147_v45, 8  ;;  %v10348_v45 = vcombine.high %v10325_v57, %v30542_v51  ;;  %v10332_v33 = vrot.slane %v10318_v15, %v27368_v61 }
 0x645   : > { %16638 = vxpose.xlu1.b32.end [2/2] (short) (narrow) %v10164_v38, 8  ;;  %v27922_v38 = vpop.trf.xlu0  ;;  %v27924_v60 = vpop.trf.xlu1  ;;  %v10349_v7 = vcombine.high %v10332_v33, %v30542_v51 }
 0x647   : > { %16669 = vxpose.xlu0.b32.start [1/2] (short) (narrow) %v10114_v31, 8 }
 0x649   : > { %16701 = vxpose.xlu1.b32.start [1/2] (short) (narrow) %v10115_v63, 8  ;;  %v27929_v20 = vpop.trf.xlu0  ;;  %v27932_v31 = vpop.trf.xlu1  ;;  %v31042_v63 = vld [vmem:[#allocation115_spill] sm:$0xff] }
 0x64a   : > { %v31043_v18 = vcombine.low %v31041_v42, %v31042_v63  ;;  %v31048_v30 = vcombine.high %v31041_v42, %v31042_v63 }
 0x64b   : > { %16670 = vxpose.xlu0.b32.end [2/2] (short) (narrow) %v10155_v29, 8 }
 0x64c   : > { %v10255_v29 = vrot.slane %v31043_v18, %v27368_v61  ;;  %v10262_v21 = vrot.slane %v31048_v30, %v27368_v61 }
 0x64d   : > { %16702 = vxpose.xlu1.b32.end [2/2] (short) (narrow) %v10165_v19, 8  ;;  %v27940_v44 = vpop.trf.xlu0  ;;  %v31045_v19 = vld [vmem:[#allocation164_spill] sm:$0xff]  ;;  %v27944_v27 = vpop.trf.xlu1 }
 0x64e   : > { %v10400_v39 = vcombine.low %v31045_v19, %v31044_v56  ;;  %v10299_v0 = vcombine.low %v10255_v29, %v10287_v47  ;;  %v10302_v14 = vcombine.high %v10262_v21, %v10294_v54 }
 0x64f   : > { %16733 = vxpose.xlu0.b32.start [1/2] (short) (narrow) %v10116_v10, 8  ;;  %v31047_v10 = vld [vmem:[#allocation141_spill] sm:$0xff] }
 0x650   : > { %v10385_v63 = vcombine.high %v31047_v10, %v31046_v52 }
 0x651   : > { %16765 = vxpose.xlu1.b32.start [1/2] (short) (narrow) %v10117_v34, 8  ;;  %v10384_v34 = vcombine.low %v31047_v10, %v31046_v52  ;;  %v27949_v59 = vpop.trf.xlu0  ;;  %v27953_v46 = vpop.trf.xlu1 }
 0x653   : > { %16734 = vxpose.xlu0.b32.end [2/2] (short) (narrow) %v10162_v55, 8  ;;  %v10300_v55 = vcombine.high %v10255_v29, %v10287_v47  ;;  %v10392_v6 = vrot.slane %v10384_v34, %v25994_v40  ;;  %v10510_v29 = vrot.slane %v10495_v37, %v27368_v61 }
 0x655   : > { %16766 = vxpose.xlu1.b32.end [2/2] (short) (narrow) %v10166_v8, 8  ;;  %v10408_v8 = vrot.slane %v10400_v39, %v25994_v40  ;;  %v27962_v48 = vpop.trf.xlu0  ;;  %v27967_v15 = vpop.trf.xlu1 }
 0x656   : > { %31050 = vst [vmem:[#allocation110_spill] sm:$0xff] %v27967_v15 }
 0x657   : > { %16797 = vxpose.xlu0.b32.start [1/2] (short) (narrow) %v10295_v58, 8  ;;  %v10333_v58 = vcombine.high %v10317_v26, %v30542_v51  ;;  %v10449_v47 = vcombine.high %v10392_v6, %v10408_v8 }
 0x659   : > { %16829 = vxpose.xlu1.b32.start [1/2] (short) (narrow) %v10296_v41, 8  ;;  %v10448_v41 = vcombine.low %v10392_v6, %v10408_v8  ;;  %v10347_v11 = vrot.slane %v10333_v58, %v27368_v61  ;;  %v27965_v32 = vpop.trf.xlu0  ;;  %v27981_v42 = vpop.trf.xlu1  ;;  %v10463_v39 = vrot.slane %v10449_v47, %v27368_v61 }
 0x65a   : > { %31049 = vst [vmem:[#allocation57_spill] sm:$0xff] %v27965_v32  ;;  %31055 = vst [vmem:[#allocation111_spill] sm:$0xff] %v27981_v42 }
 0x65b   : > { %16798 = vxpose.xlu0.b32.end [2/2] (short) (narrow) %v10325_v57, 8  ;;  %v10301_v57 = vcombine.low %v10262_v21, %v10294_v54  ;;  %v10351_v5 = vcombine.high %v10347_v11, %v30542_v51  ;;  %v10488_v54 = vcombine.high %v27873_v36, %v30542_v51 }
 0x65d   : > { %16830 = vxpose.xlu1.b32.end [2/2] (short) (narrow) %v10348_v45, 8  ;;  %v10456_v45 = vrot.slane %v10448_v41, %v27368_v61  ;;  %v10502_v41 = vrot.slane %v10488_v54, %v25994_v40 }
 0x65f   : > { %16861 = vxpose.xlu0.b32.start [1/2] (short) (narrow) %v10297_v24, 8  ;;  %v31052_v24 = vld [vmem:[#allocation116_spill] sm:$0xff] }
 0x660   : > { %v31053_v4 = vcombine.low %v31051_v13, %v31052_v24  ;;  %v31056_v52 = vcombine.high %v31051_v13, %v31052_v24  ;;  %v31061_v13 = vld [vmem:[#allocation165_spill] sm:$0xff] }
 0x661   : > { %16893 = vxpose.xlu1.b32.start [1/2] (short) (narrow) %v10298_v9, 8 }
 0x662   : > { %v10424_v9 = vrot.slane %v31053_v4, %v27368_v61  ;;  %v10431_v10 = vrot.slane %v31056_v52, %v27368_v61 }
 0x663   : > { %16862 = vxpose.xlu0.b32.end [2/2] (short) (narrow) %v10332_v33, 8  ;;  %v10401_v33 = vcombine.high %v31045_v19, %v31044_v56  ;;  %v10399_v56 = vrot.slane %v10385_v63, %v25994_v40  ;;  %v10503_v19 = vcombine.high %v10495_v37, %v30542_v51  ;;  %v10525_v63 = vrot.slane %v10502_v41, %v27368_v61 }
 0x664   : > { %v10480_v26 = vcombine.low %v10424_v9, %v10456_v45  ;;  %v10481_v18 = vcombine.high %v10424_v9, %v10456_v45  ;;  %v10482_v8 = vcombine.low %v10431_v10, %v10463_v39  ;;  %v10483_v6 = vcombine.high %v10431_v10, %v10463_v39  ;;  %v31062_v9 = vld [vmem:[#allocation187_spill] sm:$0xff] }
 0x665   : > { %16894 = vxpose.xlu1.b32.end [2/2] (short) (narrow) %v10349_v7, 8  ;;  %v27979_v7 = vpop.trf.xlu0  ;;  %v10415_v23 = vrot.slane %v10401_v33, %v25994_v40  ;;  %v31063_v33 = vld [vmem:[#allocation142_spill] sm:$0xff]  ;;  %v10518_v10 = vcombine.high %v10502_v41, %v30542_v51 }
 0x666   : > { %31054 = vst [vmem:[#allocation58_spill] sm:$0xff] %v27979_v7  ;;  %v10569_v47 = vcombine.low %v31063_v33, %v31062_v9 }
 0x667   : > { %16925 = vxpose.xlu0.b32.start [1/2] (short) (narrow) %v10299_v0, 8  ;;  %v10533_v0 = vcombine.high %v10510_v29, %v30542_v51  ;;  %v10465_v36 = vcombine.high %v10399_v56, %v10415_v23 }
 0x669   : > { %16957 = vxpose.xlu1.b32.start [1/2] (short) (narrow) %v10300_v55, 8  ;;  %v14253_v34 = vpop.trf.xlu0  ;;  %v14285_v55 = vpop.trf.xlu1 }
 0x66b   : > { %16926 = vxpose.xlu0.b32.end [2/2] (short) (narrow) %v10340_v1, 8  ;;  %v10464_v1 = vcombine.low %v10399_v56, %v10415_v23  ;;  %v10577_v23 = vrot.slane %v10569_v47, %v25994_v40  ;;  %v10535_v56 = vcombine.high %v10525_v63, %v30542_v51 }
 0x66d   : > { %16958 = vxpose.xlu1.b32.end [2/2] (short) (narrow) %v10350_v43, 8  ;;  %v10517_v43 = vrot.slane %v10503_v19, %v27368_v61  ;;  %v10472_v30 = vrot.slane %v10464_v1, %v27368_v61  ;;  %v14317_v21 = vpop.trf.xlu0  ;;  %v14349_v58 = vpop.trf.xlu1  ;;  %v10479_v19 = vrot.slane %v10465_v36, %v27368_v61 }
 0x66f   : > { %16989 = vxpose.xlu0.b32.start [1/2] (short) (narrow) %v10301_v57, 8  ;;  %v10534_v57 = vcombine.high %v10517_v43, %v30542_v51 }
 0x671   : > { %17021 = vxpose.xlu1.b32.start [1/2] (short) (narrow) %v10302_v14, 8  ;;  %v31057_v14 = vld [vmem:[#allocation74_spill] sm:$0xff] }
 0x673   : > { %16990 = vxpose.xlu0.b32.end [2/2] (short) (narrow) %v10347_v11, 8  ;;  %v31058_v11 = vld [vmem:[#allocation117_spill] sm:$0xff] }
 0x674   : > { %v31059_v45 = vcombine.low %v31057_v14, %v31058_v11 }
 0x675   : > { %17022 = vxpose.xlu1.b32.end [2/2] (short) (narrow) %v10351_v5, 8  ;;  %v31060_v5 = vld [vmem:[#allocation206_spill] sm:$0xff] }
 0x676   : > { %v10440_v37 = vrot.slane %v31059_v45, %v27368_v61  ;;  %v10585_v24 = vcombine.low %v31061_v13, %v31060_v5  ;;  %v22437_v45 = vcombine.low %v14285_v55, %v14349_v58  ;;  %v10586_v58 = vcombine.high %v31061_v13, %v31060_v5 }
 0x677   : > { %17053 = vxpose.xlu0.b32.start [1/2] (short) (narrow) %v10480_v26, 8 }
 0x678   : > { %v10484_v4 = vcombine.low %v10440_v37, %v10472_v30  ;;  %v10485_v26 = vcombine.high %v10440_v37, %v10472_v30  ;;  %v10593_v39 = vrot.slane %v10585_v24, %v25994_v40  ;;  %v10532_v30 = vrot.slane %v10518_v10, %v27368_v61 }
 0x679   : > { %17085 = vxpose.xlu1.b32.start [1/2] (short) (narrow) %v10481_v18, 8  ;;  %v14381_v18 = vpop.trf.xlu0 }
 0x67a   : > { %v10633_v1 = vcombine.low %v10577_v23, %v10593_v39  ;;  %v10536_v41 = vcombine.high %v10532_v30, %v30542_v51 }
 0x67b   : > { %17054 = vxpose.xlu0.b32.end [2/2] (short) (narrow) %v10510_v29, 8  ;;  %v14413_v29 = vpop.trf.xlu1 }
 0x67c   : > { %v10641_v24 = vrot.slane %v10633_v1, %v27368_v61  ;;  %v10600_v1 = vrot.slane %v10586_v58, %v25994_v40  ;;  %v31075_v58 = vld [vmem:[#allocation167_spill] sm:$0xff] }
 0x67d   : > { %17086 = vxpose.xlu1.b32.end [2/2] (short) (narrow) %v10533_v0, 8  ;;  %v31064_v0 = vcombine.high %v31057_v14, %v31058_v11  ;;  %v14445_v54 = vpop.trf.xlu0  ;;  %v10680_v14 = vrot.slane %v27885_v12, %v25994_v40  ;;  %v31065_v11 = vld [vmem:[#allocation75_spill] sm:$0xff] }
 0x67e   : > { %v22445_v37 = vcombine.low %v14381_v18, %v14445_v54  ;;  %v10634_v18 = vcombine.high %v10577_v23, %v10593_v39 }
 0x67f   : > { %17117 = vxpose.xlu0.b32.start [1/2] (short) (narrow) %v10482_v8, 8  ;;  %v10447_v52 = vrot.slane %v31064_v0, %v27368_v61  ;;  %v10695_v0 = vrot.slane %v10680_v14, %v27368_v61  ;;  %v10688_v5 = vcombine.high %v10680_v14, %v30542_v51 }
 0x680   : > { %v22452_v55 = vrot.slane %v22445_v37, %v25994_v40 }
 0x681   : > { %17149 = vxpose.xlu1.b32.start [1/2] (short) (narrow) %v10483_v6, 8  ;;  %v10486_v8 = vcombine.low %v10447_v52, %v10479_v19  ;;  %v14477_v6 = vpop.trf.xlu1  ;;  %v10718_v13 = vcombine.high %v10695_v0, %v30542_v51  ;;  %v14509_v39 = vpop.trf.xlu0 }
 0x682   : > { %v22453_v36 = vcombine.low %v14413_v29, %v14477_v6 }
 0x683   : > { %17118 = vxpose.xlu0.b32.end [2/2] (short) (narrow) %v10517_v43, 8  ;;  %v10487_v43 = vcombine.high %v10447_v52, %v10479_v19  ;;  %v10570_v19 = vcombine.high %v31063_v33, %v31062_v9 }
 0x685   : > { %17150 = vxpose.xlu1.b32.end [2/2] (short) (narrow) %v10534_v57, 8  ;;  %v22429_v57 = vcombine.low %v14253_v34, %v14317_v21  ;;  %v22444_v34 = vrot.slane %v22437_v45, %v25994_v40  ;;  %v22460_v21 = vrot.slane %v22453_v36, %v25994_v40  ;;  %v10584_v54 = vrot.slane %v10570_v19, %v25994_v40  ;;  %v14541_v23 = vpop.trf.xlu1  ;;  %v31076_v19 = vld [vmem:[#allocation189_spill] sm:$0xff] }
 0x686   : > { %v10673_v45 = vcombine.high %v27885_v12, %v30542_v51  ;;  %v10702_v36 = vrot.slane %v10688_v5, %v27368_v61  ;;  %v31072_v12 = vld [vmem:[#allocation36_spill] sm:$0xff] }
 0x687   : > { %17181 = vxpose.xlu0.b32.start [1/2] (short) (narrow) %v10484_v4, 8  ;;  %v31066_v4 = vld [vmem:[#allocation35_spill] sm:$0xff]  ;;  %v22469_v10 = vcombine.low %v22452_v55, %v22460_v21  ;;  %v10650_v55 = vcombine.high %v10584_v54, %v10600_v1 }
 0x688   : > { %v31067_v47 = vcombine.low %v31065_v11, %v31066_v4  ;;  %v31068_v9 = vcombine.high %v31065_v11, %v31066_v4  ;;  %v10687_v4 = vrot.slane %v10673_v45, %v25994_v40  ;;  %v31074_v21 = vld [vmem:[#allocation207_spill] sm:$0xff] }
 0x689   : > { %17213 = vxpose.xlu1.b32.start [1/2] (short) (narrow) %v10485_v26, 8  ;;  %v14605_v11 = vpop.trf.xlu1 }
 0x68a   : > { %v10609_v26 = vrot.slane %v31067_v47, %v27368_v61  ;;  %v10616_v33 = vrot.slane %v31068_v9, %v27368_v61  ;;  %v10719_v47 = vcombine.high %v10702_v36, %v30542_v51  ;;  %v10664_v9 = vrot.slane %v10650_v55, %v27368_v61 }
 0x68b   : > { %17182 = vxpose.xlu0.b32.end [2/2] (short) (narrow) %v10525_v63, 8  ;;  %v22436_v63 = vrot.slane %v22429_v57, %v25994_v40  ;;  %v22487_v55 = vcombine.low %v14541_v23, %v14605_v11  ;;  %v10771_v11 = vcombine.high %v31075_v58, %v31074_v21 }
 0x68c   : > { %v10665_v29 = vcombine.low %v10609_v26, %v10641_v24 }
 0x68d   : > { %17214 = vxpose.xlu1.b32.end [2/2] (short) (narrow) %v10535_v56, 8  ;;  %v10666_v56 = vcombine.high %v10609_v26, %v10641_v24  ;;  %v22461_v52 = vcombine.low %v22436_v63, %v22444_v34  ;;  %v31071_v26 = vld [vmem:[#allocation76_spill] sm:$0xff]  ;;  %v14669_v5 = vpop.trf.xlu1 }
 0x68e   : > { %v31073_v63 = vcombine.low %v31071_v26, %v31072_v12 }
 0x68f   : > { %17245 = vxpose.xlu0.b32.start [1/2] (short) (narrow) %v10486_v8, 8  ;;  %v10648_v8 = vrot.slane %v10634_v18, %v27368_v61  ;;  %v28047_v6 = vrot.slane %v22461_v52, %v27368_v61  ;;  %v10770_v18 = vcombine.low %v31075_v58, %v31074_v21 }
 0x690   : > { %v10625_v34 = vrot.slane %v31073_v63, %v27368_v61 }
 0x691   : > { %17277 = vxpose.xlu1.b32.start [1/2] (short) (narrow) %v10487_v43, 8  ;;  %31069 = vst [vmem:[#allocation59_spill] sm:$0xff] %v28047_v6  ;;  %v28050_v43 = vrot.slane %v22469_v10, %v27368_v61  ;;  %v10667_v57 = vcombine.low %v10616_v33, %v10648_v8  ;;  %v10668_v37 = vcombine.high %v10616_v33, %v10648_v8 }
 0x692   : > { %v10710_v10 = vrot.slane %v10687_v4, %v27368_v61  ;;  %v31078_v33 = vcombine.high %v31071_v26, %v31072_v12  ;;  %v10865_v26 = vrot.slane %v27896_v17, %v25994_v40  ;;  %v31079_v12 = vld [vmem:[#allocation79_spill] sm:$0xff] }
 0x693   : > { %17246 = vxpose.xlu0.b32.end [2/2] (short) (narrow) %v10532_v30, 8  ;;  %31070 = vst [vmem:[#allocation26_spill] sm:$0xff] %v28050_v43  ;;  %v10649_v30 = vcombine.low %v10584_v54, %v10600_v1 }
 0x694   : > { %v10720_v54 = vcombine.high %v10710_v10, %v30542_v51  ;;  %v10873_v21 = vcombine.high %v10865_v26, %v30542_v51 }
 0x695   : > { %17278 = vxpose.xlu1.b32.end [2/2] (short) (narrow) %v10536_v41, 8  ;;  %v10657_v14 = vrot.slane %v10649_v30, %v27368_v61  ;;  %v14573_v41 = vpop.trf.xlu0  ;;  %v10632_v30 = vrot.slane %v31078_v33, %v27368_v61 }
 0x697   : > { %17309 = vxpose.xlu0.b32.start [1/2] (short) (narrow) %v10665_v29, 8  ;;  %v10669_v29 = vcombine.low %v10625_v34, %v10657_v14  ;;  %v10670_v52 = vcombine.high %v10625_v34, %v10657_v14  ;;  %v14733_v14 = vpop.trf.xlu1  ;;  %v22479_v34 = vcombine.low %v14509_v39, %v14573_v41  ;;  %v22494_v39 = vrot.slane %v22487_v55, %v25994_v40 }
 0x699   : > { %17341 = vxpose.xlu1.b32.start [1/2] (short) (narrow) %v10666_v56, 8  ;;  %v31077_v56 = vld [vmem:[#allocation144_spill] sm:$0xff]  ;;  %v14637_v8 = vpop.trf.xlu0 }
 0x69a   : > { %v10755_v33 = vcombine.high %v31077_v56, %v31076_v19 }
 0x69b   : > { %17310 = vxpose.xlu0.b32.end [2/2] (short) (narrow) %v10695_v0, 8  ;;  %v10754_v0 = vcombine.low %v31077_v56, %v31076_v19 }
 0x69d   : > { %17342 = vxpose.xlu1.b32.end [2/2] (short) (narrow) %v10718_v13, 8  ;;  %v10778_v13 = vrot.slane %v10770_v18, %v25994_v40  ;;  %v10762_v1 = vrot.slane %v10754_v0, %v25994_v40 }
 0x69f   : > { %17373 = vxpose.xlu0.b32.start [1/2] (short) (narrow) %v10667_v57, 8  ;;  %v10703_v57 = vcombine.high %v10687_v4, %v30542_v51  ;;  %v10818_v45 = vcombine.low %v10762_v1, %v10778_v13 }
 0x6a1   : > { %17405 = vxpose.xlu1.b32.start [1/2] (short) (narrow) %v10668_v37, 8  ;;  %v10671_v37 = vcombine.low %v10632_v30, %v10664_v9  ;;  %v10717_v63 = vrot.slane %v10703_v57, %v27368_v61  ;;  %v10826_v0 = vrot.slane %v10818_v45, %v27368_v61  ;;  %v10880_v57 = vrot.slane %v10865_v26, %v27368_v61 }
 0x6a2   : > { %v10887_v26 = vrot.slane %v10873_v21, %v27368_v61 }
 0x6a3   : > { %17374 = vxpose.xlu0.b32.end [2/2] (short) (narrow) %v10702_v36, 8  ;;  %v14701_v36 = vpop.trf.xlu0  ;;  %v10721_v4 = vcombine.high %v10717_v63, %v30542_v51  ;;  %v10903_v58 = vcombine.high %v10880_v57, %v30542_v51 }
 0x6a4   : > { %v22495_v18 = vcombine.low %v14637_v8, %v14701_v36  ;;  %v10819_v8 = vcombine.high %v10762_v1, %v10778_v13  ;;  %v10785_v36 = vrot.slane %v10771_v11, %v25994_v40  ;;  %v14797_v1 = vpop.trf.xlu1  ;;  %v31088_v11 = vld [vmem:[#allocation218_spill] sm:$0xff] }
 0x6a5   : > { %17406 = vxpose.xlu1.b32.end [2/2] (short) (narrow) %v10719_v47, 8  ;;  %v10672_v47 = vcombine.high %v10632_v30, %v10664_v9 }
 0x6a6   : > { %v22502_v23 = vrot.slane %v22495_v18, %v25994_v40 }
 0x6a7   : > { %17437 = vxpose.xlu0.b32.start [1/2] (short) (narrow) %v10669_v29, 8  ;;  %v22503_v29 = vcombine.low %v14669_v5, %v14733_v14  ;;  %v10833_v14 = vrot.slane %v10819_v8, %v27368_v61  ;;  %v14765_v13 = vpop.trf.xlu0  ;;  %v31089_v8 = vld [vmem:[#allocation166_spill] sm:$0xff] }
 0x6a9   : > { %17469 = vxpose.xlu1.b32.start [1/2] (short) (narrow) %v10670_v52, 8  ;;  %v31080_v52 = vld [vmem:[#allocation37_spill] sm:$0xff]  ;;  %v22510_v41 = vrot.slane %v22503_v29, %v25994_v40  ;;  %v10858_v29 = vcombine.high %v27896_v17, %v30542_v51  ;;  %v31086_v17 = vld [vmem:[#allocation38_spill] sm:$0xff] }
 0x6aa   : > { %v31082_v19 = vcombine.high %v31079_v12, %v31080_v52 }
 0x6ab   : > { %17438 = vxpose.xlu0.b32.end [2/2] (short) (narrow) %v10710_v10, 8  ;;  %v31081_v10 = vcombine.low %v31079_v12, %v31080_v52  ;;  %v14829_v52 = vpop.trf.xlu0 }
 0x6ac   : > { %v10801_v56 = vrot.slane %v31082_v19, %v27368_v61 }
 0x6ad   : > { %17470 = vxpose.xlu1.b32.end [2/2] (short) (narrow) %v10720_v54, 8  ;;  %v10794_v9 = vrot.slane %v31081_v10, %v27368_v61  ;;  %v22486_v54 = vrot.slane %v22479_v34, %v25994_v40  ;;  %v14861_v10 = vpop.trf.xlu1 }
 0x6ae   : > { %v10852_v18 = vcombine.low %v10801_v56, %v10833_v14 }
 0x6af   : > { %17501 = vxpose.xlu0.b32.start [1/2] (short) (narrow) %v10671_v37, 8  ;;  %v10850_v5 = vcombine.low %v10794_v9, %v10826_v0  ;;  %v10851_v30 = vcombine.high %v10794_v9, %v10826_v0  ;;  %v22511_v45 = vcombine.low %v22486_v54, %v22494_v39  ;;  %v22519_v37 = vcombine.low %v22502_v23, %v22510_v41  ;;  %v31085_v39 = vld [vmem:[#allocation80_spill] sm:$0xff] }
 0x6b0   : > { %v10853_v0 = vcombine.high %v10801_v56, %v10833_v14  ;;  %v10872_v9 = vrot.slane %v10858_v29, %v25994_v40  ;;  %v10904_v54 = vcombine.high %v10887_v26, %v30542_v51  ;;  %v31087_v23 = vcombine.low %v31085_v39, %v31086_v17 }
 0x6b1   : > { %17533 = vxpose.xlu1.b32.start [1/2] (short) (narrow) %v10672_v47, 8  ;;  %v10769_v47 = vrot.slane %v10755_v33, %v25994_v40  ;;  %v28109_v34 = vrot.slane %v22519_v37, %v27368_v61  ;;  %v14925_v19 = vpop.trf.xlu1 }
 0x6b2   : > { %v10810_v41 = vrot.slane %v31087_v23, %v27368_v61  ;;  %v10895_v21 = vrot.slane %v10872_v9, %v27368_v61 }
 0x6b3   : > { %17502 = vxpose.xlu0.b32.end [2/2] (short) (narrow) %v10717_v63, 8  ;;  %v28106_v63 = vrot.slane %v22511_v45, %v27368_v61  ;;  %31084 = vst [vmem:[#allocation113_spill] sm:$0xff] %v28109_v34  ;;  %v10834_v55 = vcombine.low %v10769_v47, %v10785_v36  ;;  %v10835_v33 = vcombine.high %v10769_v47, %v10785_v36  ;;  %v31091_v45 = vld [vmem:[#allocation143_spill] sm:$0xff] }
 0x6b4   : > { %v10905_v36 = vcombine.high %v10895_v21, %v30542_v51  ;;  %v31092_v47 = vcombine.high %v31085_v39, %v31086_v17  ;;  %v11050_v39 = vrot.slane %v27887_v25, %v25994_v40  ;;  %v31093_v17 = vld [vmem:[#allocation77_spill] sm:$0xff] }
 0x6b5   : > { %17534 = vxpose.xlu1.b32.end [2/2] (short) (narrow) %v10721_v4, 8  ;;  %31083 = vst [vmem:[#allocation60_spill] sm:$0xff] %v28106_v63  ;;  %v10842_v12 = vrot.slane %v10834_v55, %v27368_v61  ;;  %v10849_v55 = vrot.slane %v10835_v33, %v27368_v61  ;;  %v14989_v23 = vpop.trf.xlu1  ;;  %v22529_v33 = vcombine.low %v14765_v13, %v14829_v52 }
 0x6b6   : > { %v10817_v29 = vrot.slane %v31092_v47, %v27368_v61 }
 0x6b7   : > { %17565 = vxpose.xlu0.b32.start [1/2] (short) (narrow) %v10850_v5, 8  ;;  %v10955_v5 = vcombine.low %v31089_v8, %v31088_v11  ;;  %v10855_v14 = vcombine.high %v10810_v41, %v10842_v12 }
 0x6b9   : > { %17597 = vxpose.xlu1.b32.start [1/2] (short) (narrow) %v10851_v30, 8  ;;  %v10854_v30 = vcombine.low %v10810_v41, %v10842_v12  ;;  %v10963_v56 = vrot.slane %v10955_v5, %v25994_v40  ;;  %v10856_v12 = vcombine.low %v10817_v29, %v10849_v55  ;;  %v10857_v41 = vcombine.high %v10817_v29, %v10849_v55 }
 0x6ba   : > { %v22536_v29 = vrot.slane %v22529_v33, %v25994_v40 }
 0x6bb   : > { %17566 = vxpose.xlu0.b32.end [2/2] (short) (narrow) %v10880_v57, 8  ;;  %v31090_v57 = vld [vmem:[#allocation190_spill] sm:$0xff] }
 0x6bc   : > { %v10939_v37 = vcombine.low %v31091_v45, %v31090_v57 }
 0x6bd   : > { %17598 = vxpose.xlu1.b32.end [2/2] (short) (narrow) %v10903_v58, 8  ;;  %v14893_v58 = vpop.trf.xlu0 }
 0x6bf   : > { %17629 = vxpose.xlu0.b32.start [1/2] (short) (narrow) %v10852_v18, 8  ;;  %v10947_v18 = vrot.slane %v10939_v37, %v25994_v40 }
 0x6c1   : > { %17661 = vxpose.xlu1.b32.start [1/2] (short) (narrow) %v10853_v0, 8  ;;  %v10888_v0 = vcombine.high %v10872_v9, %v30542_v51 }
 0x6c3   : > { %17630 = vxpose.xlu0.b32.end [2/2] (short) (narrow) %v10887_v26, 8  ;;  %v11003_v26 = vcombine.low %v10947_v18, %v10963_v56  ;;  %v10902_v5 = vrot.slane %v10888_v0, %v27368_v61  ;;  %v10940_v0 = vcombine.high %v31091_v45, %v31090_v57 }
 0x6c5   : > { %17662 = vxpose.xlu1.b32.end [2/2] (short) (narrow) %v10904_v54, 8  ;;  %v14957_v54 = vpop.trf.xlu0  ;;  %v10906_v9 = vcombine.high %v10902_v5, %v30542_v51  ;;  %v10954_v33 = vrot.slane %v10940_v0, %v25994_v40  ;;  %v31102_v0 = vld [vmem:[#allocation219_spill] sm:$0xff] }
 0x6c6   : > { %v22545_v37 = vcombine.low %v14893_v58, %v14957_v54  ;;  %v11004_v58 = vcombine.high %v10947_v18, %v10963_v56  ;;  %v15053_v18 = vpop.trf.xlu1 }
 0x6c7   : > { %17693 = vxpose.xlu0.b32.start [1/2] (short) (narrow) %v10854_v30, 8  ;;  %v22537_v30 = vcombine.low %v14797_v1, %v14861_v10  ;;  %v10956_v10 = vcombine.high %v31089_v8, %v31088_v11  ;;  %v11058_v11 = vcombine.high %v11050_v39, %v30542_v51 }
 0x6c8   : > { %v22552_v1 = vrot.slane %v22545_v37, %v25994_v40 }
 0x6c9   : > { %17725 = vxpose.xlu1.b32.start [1/2] (short) (narrow) %v10855_v14, 8  ;;  %v22553_v14 = vcombine.low %v14925_v19, %v14989_v23  ;;  %v22544_v13 = vrot.slane %v22537_v30, %v25994_v40  ;;  %v15021_v56 = vpop.trf.xlu0 }
 0x6cb   : > { %17694 = vxpose.xlu0.b32.end [2/2] (short) (narrow) %v10895_v21, 8  ;;  %v11011_v21 = vrot.slane %v11003_v26, %v27368_v61  ;;  %v22560_v52 = vrot.slane %v22553_v14, %v25994_v40  ;;  %v22561_v54 = vcombine.low %v22536_v29, %v22544_v13  ;;  %v15117_v29 = vpop.trf.xlu1 }
 0x6cd   : > { %17726 = vxpose.xlu1.b32.end [2/2] (short) (narrow) %v10905_v36, 8  ;;  %v31094_v36 = vld [vmem:[#allocation118_spill] sm:$0xff]  ;;  %v22569_v23 = vcombine.low %v22552_v1, %v22560_v52  ;;  %v28165_v30 = vrot.slane %v22561_v54, %v27368_v61 }
 0x6ce   : > { %v31095_v47 = vcombine.low %v31093_v17, %v31094_v36  ;;  %v31096_v57 = vcombine.high %v31093_v17, %v31094_v36  ;;  %v31099_v52 = vld [vmem:[#allocation78_spill] sm:$0xff] }
 0x6cf   : > { %17757 = vxpose.xlu0.b32.start [1/2] (short) (narrow) %v10856_v12, 8  ;;  %v11065_v12 = vrot.slane %v11050_v39, %v27368_v61  ;;  %31097 = vst [vmem:[#allocation29_spill] sm:$0xff] %v28165_v30  ;;  %v28168_v37 = vrot.slane %v22569_v23, %v27368_v61  ;;  %v11043_v39 = vcombine.high %v27887_v25, %v30542_v51  ;;  %v31100_v25 = vld [vmem:[#allocation119_spill] sm:$0xff]  ;;  %v31104_v23 = vld [vmem:[#allocation193_spill] sm:$0xff] }
 0x6d0   : > { %v10979_v55 = vrot.slane %v31095_v47, %v27368_v61  ;;  %v10986_v45 = vrot.slane %v31096_v57, %v27368_v61  ;;  %v11072_v47 = vrot.slane %v11058_v11, %v27368_v61 }
 0x6d1   : > { %17789 = vxpose.xlu1.b32.start [1/2] (short) (narrow) %v10857_v41, 8  ;;  %v10970_v41 = vrot.slane %v10956_v10, %v25994_v40  ;;  %v11088_v8 = vcombine.high %v11065_v12, %v30542_v51  ;;  %31098 = vst [vmem:[#allocation30_spill] sm:$0xff] %v28168_v37  ;;  %v11057_v13 = vrot.slane %v11043_v39, %v25994_v40 }
 0x6d2   : > { %v11035_v19 = vcombine.low %v10979_v55, %v11011_v21  ;;  %v11036_v26 = vcombine.high %v10979_v55, %v11011_v21  ;;  %v15085_v55 = vpop.trf.xlu0  ;;  %v11089_v1 = vcombine.high %v11072_v47, %v30542_v51  ;;  %v31101_v10 = vcombine.low %v31099_v52, %v31100_v25 }
 0x6d3   : > { %17758 = vxpose.xlu0.b32.end [2/2] (short) (narrow) %v10902_v5, 8  ;;  %v11018_v5 = vrot.slane %v11004_v58, %v27368_v61  ;;  %v11019_v14 = vcombine.low %v10954_v33, %v10970_v41  ;;  %v11080_v57 = vrot.slane %v11057_v13, %v27368_v61 }
 0x6d4   : > { %v10995_v58 = vrot.slane %v31101_v10, %v27368_v61 }
 0x6d5   : > { %17790 = vxpose.xlu1.b32.end [2/2] (short) (narrow) %v10906_v9, 8  ;;  %v11037_v21 = vcombine.low %v10986_v45, %v11018_v5  ;;  %v11038_v9 = vcombine.high %v10986_v45, %v11018_v5  ;;  %v11027_v36 = vrot.slane %v11019_v14, %v27368_v61  ;;  %v31105_v5 = vld [vmem:[#allocation145_spill] sm:$0xff]  ;;  %v15181_v14 = vpop.trf.xlu1 }
 0x6d6   : > { %v11124_v11 = vcombine.low %v31105_v5, %v31104_v23  ;;  %v15149_v45 = vpop.trf.xlu0 }
 0x6d7   : > { %17821 = vxpose.xlu0.b32.start [1/2] (short) (narrow) %v11035_v19, 8  ;;  %v11020_v19 = vcombine.high %v10954_v33, %v10970_v41  ;;  %v11039_v54 = vcombine.low %v10995_v58, %v11027_v36  ;;  %v11090_v33 = vcombine.high %v11080_v57, %v30542_v51 }
 0x6d8   : > { %v11132_v41 = vrot.slane %v11124_v11, %v25994_v40  ;;  %v22579_v11 = vcombine.low %v15021_v56, %v15085_v55 }
 0x6d9   : > { %17853 = vxpose.xlu1.b32.start [1/2] (short) (narrow) %v11036_v26, 8  ;;  %v31103_v26 = vld [vmem:[#allocation168_spill] sm:$0xff]  ;;  %v11034_v39 = vrot.slane %v11020_v19, %v27368_v61 }
 0x6db   : > { %17822 = vxpose.xlu0.b32.end [2/2] (short) (narrow) %v11065_v12, 8  ;;  %v11140_v12 = vcombine.low %v31103_v26, %v31102_v0 }
 0x6dd   : > { %17854 = vxpose.xlu1.b32.end [2/2] (short) (narrow) %v11088_v8, 8  ;;  %v11040_v8 = vcombine.high %v10995_v58, %v11027_v36  ;;  %v11073_v36 = vcombine.high %v11057_v13, %v30542_v51  ;;  %v15213_v58 = vpop.trf.xlu0 }
 0x6de   : > { %v22595_v17 = vcombine.low %v15149_v45, %v15213_v58 }
 0x6df   : > { %17885 = vxpose.xlu0.b32.start [1/2] (short) (narrow) %v11037_v21, 8  ;;  %v11148_v21 = vrot.slane %v11140_v12, %v25994_v40  ;;  %v15245_v12 = vpop.trf.xlu1  ;;  %v11087_v19 = vrot.slane %v11073_v36, %v27368_v61  ;;  %v11125_v36 = vcombine.high %v31105_v5, %v31104_v23 }
 0x6e1   : > { %17917 = vxpose.xlu1.b32.start [1/2] (short) (narrow) %v11038_v9, 8  ;;  %v31106_v9 = vcombine.high %v31099_v52, %v31100_v25  ;;  %v11235_v52 = vrot.slane %v27891_v22, %v25994_v40  ;;  %v11091_v13 = vcombine.high %v11087_v19, %v30542_v51  ;;  %v31107_v25 = vld [vmem:[#allocation81_spill] sm:$0xff]  ;;  %v11189_v45 = vcombine.high %v11132_v41, %v11148_v21  ;;  %v15277_v5 = vpop.trf.xlu0 }
 0x6e3   : > { %17886 = vxpose.xlu0.b32.end [2/2] (short) (narrow) %v11072_v47, 8  ;;  %v11002_v47 = vrot.slane %v31106_v9, %v27368_v61 }
 0x6e5   : > { %17918 = vxpose.xlu1.b32.end [2/2] (short) (narrow) %v11089_v1, 8  ;;  %v11188_v1 = vcombine.low %v11132_v41, %v11148_v21  ;;  %v11041_v10 = vcombine.low %v11002_v47, %v11034_v39  ;;  %v15309_v21 = vpop.trf.xlu1 }
 0x6e7   : > { %17949 = vxpose.xlu0.b32.start [1/2] (short) (narrow) %v11039_v54, 8  ;;  %v11042_v54 = vcombine.high %v11002_v47, %v11034_v39  ;;  %v11196_v4 = vrot.slane %v11188_v1, %v27368_v61  ;;  %v22586_v47 = vrot.slane %v22579_v11, %v25994_v40 }
 0x6e9   : > { %17981 = vxpose.xlu1.b32.start [1/2] (short) (narrow) %v11040_v8, 8  ;;  %v22587_v8 = vcombine.low %v15053_v18, %v15117_v29  ;;  %v22602_v18 = vrot.slane %v22595_v17, %v25994_v40  ;;  %v11141_v29 = vcombine.high %v31103_v26, %v31102_v0  ;;  %v11203_v17 = vrot.slane %v11189_v45, %v27368_v61 }
 0x6ea   : > { %v11243_v0 = vcombine.high %v11235_v52, %v30542_v51 }
 0x6eb   : > { %17950 = vxpose.xlu0.b32.end [2/2] (short) (narrow) %v11080_v57, 8  ;;  %v22603_v57 = vcombine.low %v15181_v14, %v15245_v12  ;;  %v22594_v56 = vrot.slane %v22587_v8, %v25994_v40 }
 0x6ed   : > { %17982 = vxpose.xlu1.b32.end [2/2] (short) (narrow) %v11090_v33, 8  ;;  %v31108_v33 = vld [vmem:[#allocation120_spill] sm:$0xff]  ;;  %v22610_v55 = vrot.slane %v22603_v57, %v25994_v40  ;;  %v22611_v58 = vcombine.low %v22586_v47, %v22594_v56  ;;  %v15373_v47 = vpop.trf.xlu1 }
 0x6ee   : > { %v31109_v9 = vcombine.low %v31107_v25, %v31108_v33 }
 0x6ef   : > { %18013 = vxpose.xlu0.b32.start [1/2] (short) (narrow) %v11041_v10, 8  ;;  %v11250_v10 = vrot.slane %v11235_v52, %v27368_v61  ;;  %v22619_v12 = vcombine.low %v22602_v18, %v22610_v55  ;;  %v28224_v41 = vrot.slane %v22611_v58, %v27368_v61  ;;  %v11228_v52 = vcombine.high %v27891_v22, %v30542_v51  ;;  %v31113_v55 = vld [vmem:[#allocation82_spill] sm:$0xff]  ;;  %v31114_v22 = vld [vmem:[#allocation121_spill] sm:$0xff] }
 0x6f0   : > { %v11164_v39 = vrot.slane %v31109_v9, %v27368_v61  ;;  %v11257_v9 = vrot.slane %v11243_v0, %v27368_v61 }
 0x6f1   : > { %18045 = vxpose.xlu1.b32.start [1/2] (short) (narrow) %v11042_v54, 8  ;;  %v11155_v54 = vrot.slane %v11141_v29, %v25994_v40  ;;  %v11273_v26 = vcombine.high %v11250_v10, %v30542_v51  ;;  %31111 = vst [vmem:[#allocation62_spill] sm:$0xff] %v28224_v41  ;;  %v28227_v11 = vrot.slane %v22619_v12, %v27368_v61  ;;  %v31118_v12 = vld [vmem:[#allocation191_spill] sm:$0xff] }
 0x6f2   : > { %v11220_v14 = vcombine.low %v11164_v39, %v11196_v4  ;;  %v11221_v1 = vcombine.high %v11164_v39, %v11196_v4  ;;  %v31110_v4 = vcombine.high %v31107_v25, %v31108_v33  ;;  %v15341_v39 = vpop.trf.xlu0  ;;  %v11242_v56 = vrot.slane %v11228_v52, %v25994_v40 }
 0x6f3   : > { %18014 = vxpose.xlu0.b32.end [2/2] (short) (narrow) %v11087_v19, 8  ;;  %v11139_v19 = vrot.slane %v11125_v36, %v25994_v40  ;;  %31112 = vst [vmem:[#allocation27_spill] sm:$0xff] %v28227_v11  ;;  %v11274_v18 = vcombine.high %v11257_v9, %v30542_v51  ;;  %v31115_v29 = vcombine.low %v31113_v55, %v31114_v22  ;;  %v31116_v36 = vld [vmem:[#allocation208_spill] sm:$0xff] }
 0x6f4   : > { %v11171_v23 = vrot.slane %v31110_v4, %v27368_v61  ;;  %v11265_v4 = vrot.slane %v11242_v56, %v27368_v61 }
 0x6f5   : > { %18046 = vxpose.xlu1.b32.end [2/2] (short) (narrow) %v11091_v13, 8  ;;  %v11204_v8 = vcombine.low %v11139_v19, %v11155_v54  ;;  %v11180_v45 = vrot.slane %v31115_v29, %v27368_v61 }
 0x6f6   : > { %v11222_v57 = vcombine.low %v11171_v23, %v11203_v17  ;;  %v11223_v13 = vcombine.high %v11171_v23, %v11203_v17  ;;  %v31119_v17 = vld [vmem:[#allocation146_spill] sm:$0xff]  ;;  %v15405_v23 = vpop.trf.xlu0 }
 0x6f7   : > { %18077 = vxpose.xlu0.b32.start [1/2] (short) (narrow) %v11220_v14, 8  ;;  %v11212_v33 = vrot.slane %v11204_v8, %v27368_v61  ;;  %v11205_v14 = vcombine.high %v11139_v19, %v11155_v54  ;;  %v11309_v0 = vcombine.low %v31119_v17, %v31118_v12  ;;  %v15437_v8 = vpop.trf.xlu1  ;;  %v11275_v19 = vcombine.high %v11265_v4, %v30542_v51 }
 0x6f9   : > { %18109 = vxpose.xlu1.b32.start [1/2] (short) (narrow) %v11221_v1, 8  ;;  %v31117_v1 = vld [vmem:[#allocation169_spill] sm:$0xff]  ;;  %v11224_v58 = vcombine.low %v11180_v45, %v11212_v33  ;;  %v11219_v52 = vrot.slane %v11205_v14, %v27368_v61  ;;  %v11317_v54 = vrot.slane %v11309_v0, %v25994_v40  ;;  %v22629_v0 = vcombine.low %v15277_v5, %v15341_v39 }
 0x6fb   : > { %18078 = vxpose.xlu0.b32.end [2/2] (short) (narrow) %v11250_v10, 8  ;;  %v11325_v10 = vcombine.low %v31117_v1, %v31116_v36 }
 0x6fd   : > { %18110 = vxpose.xlu1.b32.end [2/2] (short) (narrow) %v11273_v26, 8  ;;  %v11225_v26 = vcombine.high %v11180_v45, %v11212_v33  ;;  %v11258_v33 = vcombine.high %v11242_v56, %v30542_v51  ;;  %v15469_v45 = vpop.trf.xlu0 }
 0x6fe   : > { %v22645_v25 = vcombine.low %v15405_v23, %v15469_v45 }
 0x6ff   : > { %18141 = vxpose.xlu0.b32.start [1/2] (short) (narrow) %v11222_v57, 8  ;;  %v11333_v57 = vrot.slane %v11325_v10, %v25994_v40  ;;  %v15501_v10 = vpop.trf.xlu1  ;;  %v11272_v14 = vrot.slane %v11258_v33, %v27368_v61  ;;  %v11310_v33 = vcombine.high %v31119_v17, %v31118_v12 }
 0x701   : > { %18173 = vxpose.xlu1.b32.start [1/2] (short) (narrow) %v11223_v13, 8  ;;  %v31120_v13 = vcombine.high %v31113_v55, %v31114_v22  ;;  %v11420_v55 = vrot.slane %v27909_v53, %v25994_v40  ;;  %v11276_v56 = vcombine.high %v11272_v14, %v30542_v51  ;;  %v31121_v22 = vld [vmem:[#allocation83_spill] sm:$0xff]  ;;  %v11374_v23 = vcombine.high %v11317_v54, %v11333_v57  ;;  %v28273_v45 = vpop.trf.xlu0 }
 0x703   : > { %18142 = vxpose.xlu0.b32.end [2/2] (short) (narrow) %v11257_v9, 8  ;;  %v11187_v9 = vrot.slane %v31120_v13, %v27368_v61 }
 0x705   : > { %18174 = vxpose.xlu1.b32.end [2/2] (short) (narrow) %v11274_v18, 8  ;;  %v11373_v18 = vcombine.low %v11317_v54, %v11333_v57  ;;  %v11226_v29 = vcombine.low %v11187_v9, %v11219_v52  ;;  %v11428_v57 = vcombine.high %v11420_v55, %v30542_v51 }
 0x707   : > { %18205 = vxpose.xlu0.b32.start [1/2] (short) (narrow) %v11224_v58, 8  ;;  %v11227_v58 = vcombine.high %v11187_v9, %v11219_v52  ;;  %v11381_v24 = vrot.slane %v11373_v18, %v27368_v61  ;;  %v22636_v9 = vrot.slane %v22629_v0, %v25994_v40 }
 0x709   : > { %18237 = vxpose.xlu1.b32.start [1/2] (short) (narrow) %v11225_v26, 8  ;;  %v22637_v26 = vcombine.low %v15309_v21, %v15373_v47  ;;  %v22652_v21 = vrot.slane %v22645_v25, %v25994_v40  ;;  %v11326_v47 = vcombine.high %v31117_v1, %v31116_v36  ;;  %v28277_v36 = vpop.trf.xlu1  ;;  %v11324_v1 = vrot.slane %v11310_v33, %v25994_v40 }
 0x70b   : > { %18206 = vxpose.xlu0.b32.end [2/2] (short) (narrow) %v11265_v4, 8  ;;  %v22653_v4 = vcombine.low %v15437_v8, %v15501_v10  ;;  %v22644_v5 = vrot.slane %v22637_v26, %v25994_v40  ;;  %v11340_v25 = vrot.slane %v11326_v47, %v25994_v40  ;;  %v31128_v47 = vld [vmem:[#allocation40_spill] sm:$0xff] }
 0x70d   : > { %18238 = vxpose.xlu1.b32.end [2/2] (short) (narrow) %v11275_v19, 8  ;;  %v31122_v19 = vld [vmem:[#allocation39_spill] sm:$0xff]  ;;  %v22660_v39 = vrot.slane %v22653_v4, %v25994_v40  ;;  %v22661_v10 = vcombine.low %v22636_v9, %v22644_v5  ;;  %v11389_v26 = vcombine.low %v11324_v1, %v11340_v25  ;;  %v15629_v9 = vpop.trf.xlu1  ;;  %v11390_v33 = vcombine.high %v11324_v1, %v11340_v25 }
 0x70e   : > { %v31123_v13 = vcombine.low %v31121_v22, %v31122_v19  ;;  %v31124_v12 = vcombine.high %v31121_v22, %v31122_v19  ;;  %v22687_v22 = vcombine.low %v28277_v36, %v15629_v9 }
 0x70f   : > { %18269 = vxpose.xlu0.b32.start [1/2] (short) (narrow) %v11226_v29, 8  ;;  %v11435_v29 = vrot.slane %v11420_v55, %v27368_v61  ;;  %v28287_v54 = vrot.slane %v22661_v10, %v27368_v61  ;;  %v11413_v55 = vcombine.high %v27909_v53, %v30542_v51  ;;  %v11397_v19 = vrot.slane %v11389_v26, %v27368_v61 }
 0x710   : > { %v11349_v52 = vrot.slane %v31123_v13, %v27368_v61  ;;  %v11356_v17 = vrot.slane %v31124_v12, %v27368_v61  ;;  %v22694_v36 = vrot.slane %v22687_v22, %v25994_v40 }
 0x711   : > { %18301 = vxpose.xlu1.b32.start [1/2] (short) (narrow) %v11227_v58, 8  ;;  %v22669_v58 = vcombine.low %v22652_v21, %v22660_v39  ;;  %31125 = vst [vmem:[#allocation63_spill] sm:$0xff] %v28287_v54  ;;  %v11427_v5 = vrot.slane %v11413_v55, %v25994_v40  ;;  %v31127_v39 = vld [vmem:[#allocation84_spill] sm:$0xff]  ;;  %v11404_v55 = vrot.slane %v11390_v33, %v27368_v61 }
 0x712   : > { %v11405_v8 = vcombine.low %v11349_v52, %v11381_v24  ;;  %v11406_v18 = vcombine.high %v11349_v52, %v11381_v24  ;;  %v11458_v24 = vcombine.high %v11435_v29, %v30542_v51  ;;  %v11442_v52 = vrot.slane %v11428_v57, %v27368_v61  ;;  %v31132_v57 = vld [vmem:[#allocation192_spill] sm:$0xff] }
 0x713   : > { %18270 = vxpose.xlu0.b32.end [2/2] (short) (narrow) %v11272_v14, 8  ;;  %v11388_v14 = vrot.slane %v11374_v23, %v27368_v61  ;;  %v28290_v0 = vrot.slane %v22669_v58, %v27368_v61  ;;  %v31129_v53 = vcombine.low %v31127_v39, %v31128_v47  ;;  %v11450_v26 = vrot.slane %v11427_v5, %v27368_v61 }
 0x714   : > { %v11459_v21 = vcombine.high %v11442_v52, %v30542_v51 }
 0x715   : > { %18302 = vxpose.xlu1.b32.end [2/2] (short) (narrow) %v11276_v56, 8  ;;  %31126 = vst [vmem:[#allocation28_spill] sm:$0xff] %v28290_v0  ;;  %v11407_v4 = vcombine.low %v11356_v17, %v11388_v14  ;;  %v15597_v56 = vpop.trf.xlu0  ;;  %v11408_v13 = vcombine.high %v11356_v17, %v11388_v14  ;;  %v11365_v23 = vrot.slane %v31129_v53, %v27368_v61  ;;  %v15693_v14 = vpop.trf.xlu1 }
 0x716   : > { %v11460_v1 = vcombine.high %v11450_v26, %v30542_v51 }
 0x717   : > { %18333 = vxpose.xlu0.b32.start [1/2] (short) (narrow) %v11405_v8, 8  ;;  %v11409_v58 = vcombine.low %v11365_v23, %v11397_v19  ;;  %v11410_v17 = vcombine.high %v11365_v23, %v11397_v19  ;;  %v11443_v19 = vcombine.high %v11427_v5, %v30542_v51 }
 0x719   : > { %18365 = vxpose.xlu1.b32.start [1/2] (short) (narrow) %v11406_v18, 8  ;;  %v15661_v8 = vpop.trf.xlu0  ;;  %v31130_v18 = vld [vmem:[#allocation209_spill] sm:$0xff]  ;;  %v15757_v53 = vpop.trf.xlu1 }
 0x71b   : > { %18334 = vxpose.xlu0.b32.end [2/2] (short) (narrow) %v11435_v29, 8  ;;  %v31131_v29 = vld [vmem:[#allocation171_spill] sm:$0xff] }
 0x71c   : > { %v11510_v10 = vcombine.low %v31131_v29, %v31130_v18 }
 0x71d   : > { %18366 = vxpose.xlu1.b32.end [2/2] (short) (narrow) %v11458_v24, 8  ;;  %v31133_v24 = vld [vmem:[#allocation148_spill] sm:$0xff] }
 0x71e   : > { %v11494_v12 = vcombine.low %v31133_v24, %v31132_v57 }
 0x71f   : > { %18397 = vxpose.xlu0.b32.start [1/2] (short) (narrow) %v11407_v4, 8  ;;  %v11518_v4 = vrot.slane %v11510_v10, %v25994_v40 }
 0x720   : > { %v11502_v25 = vrot.slane %v11494_v12, %v25994_v40  ;;  %v11457_v12 = vrot.slane %v11443_v19, %v27368_v61 }
 0x721   : > { %18429 = vxpose.xlu1.b32.start [1/2] (short) (narrow) %v11408_v13, 8  ;;  %v15725_v13 = vpop.trf.xlu0 }
 0x722   : > { %v11558_v23 = vcombine.low %v11502_v25, %v11518_v4 }
 0x723   : > { %18398 = vxpose.xlu0.b32.end [2/2] (short) (narrow) %v11442_v52, 8  ;;  %v31134_v52 = vcombine.high %v31127_v39, %v31128_v47  ;;  %v22695_v39 = vcombine.low %v15661_v8, %v15725_v13  ;;  %v22703_v47 = vcombine.low %v15693_v14, %v15757_v53  ;;  %v11511_v8 = vcombine.high %v31131_v29, %v31130_v18 }
 0x724   : > { %v11566_v5 = vrot.slane %v11558_v23, %v27368_v61  ;;  %v11559_v14 = vcombine.high %v11502_v25, %v11518_v4  ;;  %v11495_v23 = vcombine.high %v31133_v24, %v31132_v57 }
 0x725   : > { %18430 = vxpose.xlu1.b32.end [2/2] (short) (narrow) %v11459_v21, 8  ;;  %v11372_v21 = vrot.slane %v31134_v52, %v27368_v61  ;;  %v11461_v52 = vcombine.high %v11457_v12, %v30542_v51  ;;  %v22710_v9 = vrot.slane %v22703_v47, %v25994_v40 }
 0x726   : > { %v11573_v47 = vrot.slane %v11559_v14, %v27368_v61  ;;  %v11509_v29 = vrot.slane %v11495_v23, %v25994_v40  ;;  %v31141_v23 = vld [vmem:[#allocation88_spill] sm:$0xff] }
 0x727   : > { %18461 = vxpose.xlu0.b32.start [1/2] (short) (narrow) %v11409_v58, 8  ;;  %v11411_v10 = vcombine.low %v11372_v21, %v11404_v55  ;;  %v28318_v58 = vpop.trf.xlu0  ;;  %v11412_v33 = vcombine.high %v11372_v21, %v11404_v55  ;;  %v31135_v55 = vld [vmem:[#allocation87_spill] sm:$0xff]  ;;  %v31136_v21 = vld [vmem:[#allocation41_spill] sm:$0xff] }
 0x728   : > { %v31137_v19 = vcombine.low %v31135_v55, %v31136_v21  ;;  %v31138_v24 = vcombine.high %v31135_v55, %v31136_v21 }
 0x729   : > { %18493 = vxpose.xlu1.b32.start [1/2] (short) (narrow) %v11410_v17, 8  ;;  %v28321_v17 = vpop.trf.xlu1 }
 0x72a   : > { %v11541_v25 = vrot.slane %v31138_v24, %v27368_v61 }
 0x72b   : > { %18462 = vxpose.xlu0.b32.end [2/2] (short) (narrow) %v11450_v26, 8  ;;  %v22679_v26 = vcombine.low %v28273_v45, %v15597_v56  ;;  %v28333_v54 = vpop.trf.xlu0  ;;  %v22702_v56 = vrot.slane %v22695_v39, %v25994_v40  ;;  %v11525_v39 = vrot.slane %v11511_v8, %v25994_v40 }
 0x72d   : > { %18494 = vxpose.xlu1.b32.end [2/2] (short) (narrow) %v11460_v1, 8  ;;  %v11605_v1 = vrot.slane %v27922_v38, %v25994_v40  ;;  %v22686_v45 = vrot.slane %v22679_v26, %v25994_v40  ;;  %v28341_v53 = vpop.trf.xlu1  ;;  %v22719_v26 = vcombine.low %v22702_v56, %v22710_v9 }
 0x72f   : > { %18525 = vxpose.xlu0.b32.start [1/2] (short) (narrow) %v11411_v10, 8  ;;  %v11534_v10 = vrot.slane %v31137_v19, %v27368_v61  ;;  %v22711_v22 = vcombine.low %v22686_v45, %v22694_v36  ;;  %v28348_v18 = vpop.trf.xlu0  ;;  %v11613_v4 = vcombine.high %v11605_v1, %v30542_v51  ;;  %v28361_v19 = vrot.slane %v22719_v26, %v27368_v61  ;;  %v31144_v26 = vld [vmem:[#allocation220_spill] sm:$0xff] }
 0x730   : > { %v11592_v45 = vcombine.low %v11541_v25, %v11573_v47  ;;  %v11593_v36 = vcombine.high %v11541_v25, %v11573_v47  ;;  %v31145_v47 = vld [vmem:[#allocation170_spill] sm:$0xff] }
 0x731   : > { %18557 = vxpose.xlu1.b32.start [1/2] (short) (narrow) %v11412_v33, 8  ;;  %v11590_v13 = vcombine.low %v11534_v10, %v11566_v5  ;;  %v11591_v33 = vcombine.high %v11534_v10, %v11566_v5  ;;  %v15949_v5 = vpop.trf.xlu1  ;;  %31140 = vst [vmem:[#allocation61_spill] sm:$0xff] %v28361_v19  ;;  %v11574_v10 = vcombine.low %v11509_v29, %v11525_v39 }
 0x732   : > { %v11627_v56 = vrot.slane %v11613_v4, %v27368_v61  ;;  %v11695_v4 = vcombine.low %v31145_v47, %v31144_v26 }
 0x733   : > { %18526 = vxpose.xlu0.b32.end [2/2] (short) (narrow) %v11457_v12, 8  ;;  %v11620_v12 = vrot.slane %v11605_v1, %v27368_v61  ;;  %v11598_v1 = vcombine.high %v27922_v38, %v30542_v51  ;;  %v15981_v9 = vpop.trf.xlu0  ;;  %v11582_v21 = vrot.slane %v11574_v10, %v27368_v61  ;;  %v31142_v38 = vld [vmem:[#allocation42_spill] sm:$0xff]  ;;  %v31146_v10 = vld [vmem:[#allocation195_spill] sm:$0xff] }
 0x734   : > { %v11703_v55 = vrot.slane %v11695_v4, %v25994_v40 }
 0x735   : > { %18558 = vxpose.xlu1.b32.end [2/2] (short) (narrow) %v11461_v52, 8  ;;  %v11643_v57 = vcombine.high %v11620_v12, %v30542_v51  ;;  %v28358_v52 = vrot.slane %v22711_v22, %v27368_v61  ;;  %v16013_v8 = vpop.trf.xlu1  ;;  %v11612_v14 = vrot.slane %v11598_v1, %v25994_v40 }
 0x737   : > { %18589 = vxpose.xlu0.b32.start [1/2] (short) (narrow) %v11590_v13, 8  ;;  %31139 = vst [vmem:[#allocation65_spill] sm:$0xff] %v28358_v52  ;;  %v11644_v13 = vcombine.high %v11627_v56, %v30542_v51  ;;  %v28375_v22 = vpop.trf.xlu0  ;;  %v31149_v52 = vcombine.high %v31141_v23, %v31142_v38 }
 0x739   : > { %18621 = vxpose.xlu1.b32.start [1/2] (short) (narrow) %v11591_v33, 8  ;;  %v31143_v33 = vcombine.low %v31141_v23, %v31142_v38  ;;  %v28379_v25 = vpop.trf.xlu1  ;;  %v22737_v23 = vcombine.low %v28321_v17, %v28341_v53 }
 0x73b   : > { %18590 = vxpose.xlu0.b32.end [2/2] (short) (narrow) %v11620_v12, 8  ;;  %v11550_v12 = vrot.slane %v31143_v33, %v27368_v61  ;;  %v28386_v51 = vpop.trf.xlu0  ;;  %v22744_v53 = vrot.slane %v22737_v23, %v25994_v40 }
 0x73d   : > { %18622 = vxpose.xlu1.b32.end [2/2] (short) (narrow) %v11643_v57, 8  ;;  %v11575_v57 = vcombine.high %v11509_v29, %v11525_v39  ;;  %v11594_v24 = vcombine.low %v11550_v12, %v11582_v21  ;;  %v31148_v29 = vmov 0.0  }
 0x73f   : > { %18653 = vxpose.xlu0.b32.start [1/2] (short) (narrow) %v11592_v45, 8  ;;  %v31147_v45 = vld [vmem:[#allocation147_spill] sm:$0xff]  ;;  %v11589_v33 = vrot.slane %v11575_v57, %v27368_v61 }
 0x740   : > { %v11679_v1 = vcombine.low %v31147_v45, %v31146_v10 }
 0x741   : > { %18685 = vxpose.xlu1.b32.start [1/2] (short) (narrow) %v11593_v36, 8  ;;  %v11595_v36 = vcombine.high %v11550_v12, %v11582_v21  ;;  %v11628_v21 = vcombine.high %v11612_v14, %v31148_v29  ;;  %v28395_v12 = vpop.trf.xlu1 }
 0x742   : > { %v11687_v39 = vrot.slane %v11679_v1, %v25994_v40  ;;  %v28398_v1 = vpop.trf.xlu0 }
 0x743   : > { %18654 = vxpose.xlu0.b32.end [2/2] (short) (narrow) %v11627_v56, 8  ;;  %v11635_v56 = vrot.slane %v11612_v14, %v27368_v61  ;;  %v11642_v19 = vrot.slane %v11628_v21, %v27368_v61  ;;  %v22753_v14 = vcombine.low %v15949_v5, %v16013_v8  ;;  %v31150_v21 = vld [vmem:[#allocation85_spill] sm:$0xff] }
 0x744   : > { %v11743_v4 = vcombine.low %v11687_v39, %v11703_v55  ;;  %v11744_v8 = vcombine.high %v11687_v39, %v11703_v55 }
 0x745   : > { %18686 = vxpose.xlu1.b32.end [2/2] (short) (narrow) %v11644_v13, 8  ;;  %v11645_v13 = vcombine.high %v11635_v56, %v31148_v29  ;;  %v22760_v5 = vrot.slane %v22753_v14, %v25994_v40 }
 0x746   : > { %v11751_v38 = vrot.slane %v11743_v4, %v27368_v61  ;;  %v11758_v55 = vrot.slane %v11744_v8, %v27368_v61 }
 0x747   : > { %18717 = vxpose.xlu0.b32.start [1/2] (short) (narrow) %v11594_v24, 8  ;;  %v11557_v24 = vrot.slane %v31149_v52, %v27368_v61  ;;  %v22745_v52 = vcombine.low %v28348_v18, %v15981_v9  ;;  %v11696_v9 = vcombine.high %v31145_v47, %v31144_v26 }
 0x749   : > { %18749 = vxpose.xlu1.b32.start [1/2] (short) (narrow) %v11595_v36, 8  ;;  %v11596_v36 = vcombine.low %v11557_v24, %v11589_v33  ;;  %v11597_v57 = vcombine.high %v11557_v24, %v11589_v33  ;;  %v11790_v33 = vrot.slane %v27904_v28, %v25994_v40  ;;  %v11646_v24 = vcombine.high %v11642_v19, %v31148_v29 }
 0x74a   : > { %v22752_v18 = vrot.slane %v22745_v52, %v25994_v40  ;;  %v11710_v14 = vrot.slane %v11696_v9, %v25994_v40 }
 0x74b   : > { %18718 = vxpose.xlu0.b32.end [2/2] (short) (narrow) %v11635_v56, 8  ;;  %v22729_v56 = vcombine.low %v28318_v58, %v28333_v54  ;;  %v31151_v54 = vld [vmem:[#allocation122_spill] sm:$0xff]  ;;  %v11798_v39 = vcombine.high %v11790_v33, %v31148_v29 }
 0x74c   : > { %v31152_v58 = vcombine.low %v31150_v21, %v31151_v54  ;;  %v22769_v0 = vcombine.low %v22752_v18, %v22760_v5 }
 0x74d   : > { %18750 = vxpose.xlu1.b32.end [2/2] (short) (narrow) %v11645_v13, 8  ;;  %v28406_v13 = vpop.trf.xlu1  ;;  %v22736_v17 = vrot.slane %v22729_v56, %v25994_v40  ;;  %v11805_v56 = vrot.slane %v11790_v33, %v27368_v61  ;;  %v11783_v33 = vcombine.high %v27904_v28, %v31148_v29  ;;  %v11812_v9 = vrot.slane %v11798_v39, %v27368_v61  ;;  %v31156_v28 = vld [vmem:[#allocation86_spill] sm:$0xff]  ;;  %v31159_v39 = vld [vmem:[#allocation56_spill] sm:$0xff] }
 0x74f   : > { %18781 = vxpose.xlu0.b32.start [1/2] (short) (narrow) %v11596_v36, 8  ;;  %v11719_v36 = vrot.slane %v31152_v58, %v27368_v61  ;;  %v22761_v52 = vcombine.low %v22736_v17, %v22744_v53  ;;  %v28445_v17 = vrot.slane %v22769_v0, %v27368_v61 }
 0x751   : > { %18813 = vxpose.xlu1.b32.start [1/2] (short) (narrow) %v11597_v57, 8  ;;  %v11775_v4 = vcombine.low %v11719_v36, %v11751_v38  ;;  %v11680_v57 = vcombine.high %v31147_v45, %v31146_v10  ;;  %v11776_v58 = vcombine.high %v11719_v36, %v11751_v38  ;;  %v28426_v23 = vpop.trf.xlu1  ;;  %v11828_v10 = vcombine.high %v11805_v56, %v31148_v29 }
 0x752   : > { %v31153_v45 = vcombine.high %v31150_v21, %v31151_v54  ;;  %v28442_v36 = vrot.slane %v22761_v52, %v27368_v61  ;;  %31155 = vst [vmem:[#allocation114_spill] sm:$0xff] %v28445_v17 }
 0x753   : > { %18782 = vxpose.xlu0.b32.end [2/2] (short) (narrow) %v11642_v19, 8  ;;  %v28421_v19 = vpop.trf.xlu0  ;;  %v11694_v47 = vrot.slane %v11680_v57, %v25994_v40  ;;  %v11829_v57 = vcombine.high %v11812_v9, %v31148_v29 }
 0x754   : > { %v11726_v38 = vrot.slane %v31153_v45, %v27368_v61  ;;  %31154 = vst [vmem:[#allocation66_spill] sm:$0xff] %v28442_v36 }
 0x755   : > { %18814 = vxpose.xlu1.b32.end [2/2] (short) (narrow) %v11646_v24, 8  ;;  %v28439_v24 = vpop.trf.xlu1  ;;  %v11759_v53 = vcombine.low %v11694_v47, %v11710_v14 }
 0x756   : > { %v11777_v18 = vcombine.low %v11726_v38, %v11758_v55  ;;  %v11778_v5 = vcombine.high %v11726_v38, %v11758_v55  ;;  %v11760_v55 = vcombine.high %v11694_v47, %v11710_v14 }
 0x757   : > { %18845 = vxpose.xlu0.b32.start [1/2] (short) (narrow) %v11775_v4, 8  ;;  %v28430_v26 = vpop.trf.xlu0  ;;  %v11767_v8 = vrot.slane %v11759_v53, %v27368_v61  ;;  %v11797_v4 = vrot.slane %v11783_v33, %v25994_v40  ;;  %v31161_v53 = vld [vmem:[#allocation198_spill] sm:$0xff] }
 0x758   : > { %v11774_v14 = vrot.slane %v11760_v55, %v27368_v61 }
 0x759   : > { %18877 = vxpose.xlu1.b32.start [1/2] (short) (narrow) %v11776_v58, 8  ;;  %v28455_v0 = vpop.trf.xlu1  ;;  %v31157_v58 = vld [vmem:[#allocation123_spill] sm:$0xff] }
 0x75b   : > { %18846 = vxpose.xlu0.b32.end [2/2] (short) (narrow) %v11805_v56, 8  ;;  %v28450_v21 = vpop.trf.xlu0  ;;  %v31158_v56 = vcombine.low %v31156_v28, %v31157_v58 }
 0x75d   : > { %18878 = vxpose.xlu1.b32.end [2/2] (short) (narrow) %v11828_v10, 8  ;;  %v11735_v52 = vrot.slane %v31158_v56, %v27368_v61  ;;  %v31160_v10 = vld [vmem:[#allocation172_spill] sm:$0xff]  ;;  %v28470_v36 = vpop.trf.xlu1  ;;  %v31163_v56 = vcombine.high %v31156_v28, %v31157_v58  ;;  %v22787_v28 = vcombine.low %v28379_v25, %v28395_v12  ;;  %v22803_v58 = vcombine.low %v28406_v13, %v28426_v23 }
 0x75e   : > { %v11880_v45 = vcombine.low %v31160_v10, %v31159_v39  ;;  %v31165_v25 = vld [vmem:[#allocation124_spill] sm:$0xff]  ;;  %v11881_v23 = vcombine.high %v31160_v10, %v31159_v39 }
 0x75f   : > { %18909 = vxpose.xlu0.b32.start [1/2] (short) (narrow) %v11777_v18, 8  ;;  %v11779_v38 = vcombine.low %v11735_v52, %v11767_v8  ;;  %v28465_v18 = vpop.trf.xlu0  ;;  %v11780_v33 = vcombine.high %v11735_v52, %v11767_v8  ;;  %v11813_v8 = vcombine.high %v11797_v4, %v31148_v29  ;;  %v22794_v13 = vrot.slane %v22787_v28, %v25994_v40 }
 0x760   : > { %v11888_v17 = vrot.slane %v11880_v45, %v25994_v40 }
 0x761   : > { %18941 = vxpose.xlu1.b32.start [1/2] (short) (narrow) %v11778_v5, 8  ;;  %v31162_v5 = vld [vmem:[#allocation149_spill] sm:$0xff] }
 0x762   : > { %v11864_v54 = vcombine.low %v31162_v5, %v31161_v53 }
 0x763   : > { %18910 = vxpose.xlu0.b32.end [2/2] (short) (narrow) %v11812_v9, 8  ;;  %v11820_v9 = vrot.slane %v11797_v4, %v27368_v61  ;;  %v28481_v52 = vpop.trf.xlu0  ;;  %v22795_v4 = vcombine.low %v28398_v1, %v28421_v19 }
 0x764   : > { %v11872_v47 = vrot.slane %v11864_v54, %v25994_v40  ;;  %v11827_v54 = vrot.slane %v11813_v8, %v27368_v61 }
 0x765   : > { %18942 = vxpose.xlu1.b32.end [2/2] (short) (narrow) %v11829_v57, 8  ;;  %v11830_v57 = vcombine.high %v11820_v9, %v31148_v29  ;;  %v22802_v19 = vrot.slane %v22795_v4, %v25994_v40 }
 0x766   : > { %v11928_v41 = vcombine.low %v11872_v47, %v11888_v17  ;;  %v11929_v8 = vcombine.high %v11872_v47, %v11888_v17 }
 0x767   : > { %18973 = vxpose.xlu0.b32.start [1/2] (short) (narrow) %v11779_v38, 8  ;;  %v11742_v38 = vrot.slane %v31163_v56, %v27368_v61  ;;  %v28486_v11 = vpop.trf.xlu0  ;;  %v11975_v56 = vrot.slane %v27913_v62, %v25994_v40 }
 0x768   : > { %v11943_v17 = vrot.slane %v11929_v8, %v27368_v61 }
 0x769   : > { %19005 = vxpose.xlu1.b32.start [1/2] (short) (narrow) %v11780_v33, 8  ;;  %v11781_v45 = vcombine.low %v11742_v38, %v11774_v14  ;;  %v28483_v33 = vpop.trf.xlu1  ;;  %v11782_v55 = vcombine.high %v11742_v38, %v11774_v14  ;;  %v11983_v10 = vcombine.high %v11975_v56, %v31148_v29 }
 0x76b   : > { %18974 = vxpose.xlu0.b32.end [2/2] (short) (narrow) %v11820_v9, 8  ;;  %v22779_v9 = vcombine.low %v28375_v22, %v28386_v51  ;;  %v11831_v51 = vcombine.high %v11827_v54, %v31148_v29  ;;  %v31164_v22 = vld [vmem:[#allocation89_spill] sm:$0xff] }
 0x76c   : > { %v31166_v12 = vcombine.low %v31164_v22, %v31165_v25 }
 0x76d   : > { %19006 = vxpose.xlu1.b32.end [2/2] (short) (narrow) %v11830_v57, 8  ;;  %v11936_v57 = vrot.slane %v11928_v41, %v27368_v61  ;;  %v28497_v14 = vpop.trf.xlu1  ;;  %v22786_v1 = vrot.slane %v22779_v9, %v25994_v40  ;;  %v22810_v41 = vrot.slane %v22803_v58, %v25994_v40  ;;  %v11990_v9 = vrot.slane %v11975_v56, %v27368_v61 }
 0x76e   : > { %v11904_v38 = vrot.slane %v31166_v12, %v27368_v61  ;;  %v11895_v58 = vrot.slane %v11881_v23, %v25994_v40 }
 0x76f   : > { %19037 = vxpose.xlu0.b32.start [1/2] (short) (narrow) %v11781_v45, 8  ;;  %v22811_v4 = vcombine.low %v22786_v1, %v22794_v13  ;;  %v22819_v30 = vcombine.low %v22802_v19, %v22810_v41  ;;  %v11968_v19 = vcombine.high %v27913_v62, %v31148_v29  ;;  %v31171_v62 = vld [vmem:[#allocation125_spill] sm:$0xff] }
 0x770   : > { %v11960_v45 = vcombine.low %v11904_v38, %v11936_v57  ;;  %v11961_v12 = vcombine.high %v11904_v38, %v11936_v57 }
 0x771   : > { %19069 = vxpose.xlu1.b32.start [1/2] (short) (narrow) %v11782_v55, 8  ;;  %v28512_v55 = vpop.trf.xlu0  ;;  %v28517_v28 = vpop.trf.xlu1  ;;  %v28534_v38 = vrot.slane %v22819_v30, %v27368_v61  ;;  %v11982_v8 = vrot.slane %v11968_v19, %v25994_v40  ;;  %v31176_v19 = vld [vmem:[#allocation150_spill] sm:$0xff] }
 0x773   : > { %19038 = vxpose.xlu0.b32.end [2/2] (short) (narrow) %v11827_v54, 8  ;;  %v11865_v54 = vcombine.high %v31162_v5, %v31161_v53  ;;  %v12013_v53 = vcombine.high %v11990_v9, %v31148_v29  ;;  %v31167_v5 = vcombine.high %v31164_v22, %v31165_v25  ;;  %31169 = vst [vmem:[#allocation31_spill] sm:$0xff] %v28534_v38 }
 0x774   : > { %v11997_v22 = vrot.slane %v11983_v10, %v27368_v61  ;;  %v31173_v10 = vld [vmem:[#allocation210_spill] sm:$0xff]  ;;  %v12005_v25 = vrot.slane %v11982_v8, %v27368_v61 }
 0x775   : > { %19070 = vxpose.xlu1.b32.end [2/2] (short) (narrow) %v11831_v51, 8  ;;  %v11879_v39 = vrot.slane %v11865_v54, %v25994_v40  ;;  %v11911_v47 = vrot.slane %v31167_v5, %v27368_v61  ;;  %v28528_v57 = vpop.trf.xlu0  ;;  %v28531_v51 = vrot.slane %v22811_v4, %v27368_v61  ;;  %v28536_v56 = vpop.trf.xlu1  ;;  %v31170_v54 = vld [vmem:[#allocation90_spill] sm:$0xff] }
 0x776   : > { %v31177_v38 = vcombine.high %v31170_v54, %v31171_v62 }
 0x777   : > { %19101 = vxpose.xlu0.b32.start [1/2] (short) (narrow) %v11960_v45, 8  ;;  %31168 = vst [vmem:[#allocation67_spill] sm:$0xff] %v28531_v51  ;;  %v11944_v1 = vcombine.low %v11879_v39, %v11895_v58  ;;  %v11962_v13 = vcombine.low %v11911_v47, %v11943_v17  ;;  %v11963_v41 = vcombine.high %v11911_v47, %v11943_v17 }
 0x778   : > { %v12014_v45 = vcombine.high %v11997_v22, %v31148_v29  ;;  %v11945_v17 = vcombine.high %v11879_v39, %v11895_v58 }
 0x779   : > { %19133 = vxpose.xlu1.b32.start [1/2] (short) (narrow) %v11961_v12, 8  ;;  %v11952_v23 = vrot.slane %v11944_v1, %v27368_v61  ;;  %v28544_v30 = vpop.trf.xlu0  ;;  %v31172_v12 = vcombine.low %v31170_v54, %v31171_v62  ;;  %v28552_v4 = vpop.trf.xlu1  ;;  %v22837_v54 = vcombine.low %v28439_v24, %v28455_v0  ;;  %v31179_v24 = vld [vmem:[#allocation43_spill] sm:$0xff] }
 0x77a   : > { %v11959_v58 = vrot.slane %v11945_v17, %v27368_v61 }
 0x77b   : > { %19102 = vxpose.xlu0.b32.end [2/2] (short) (narrow) %v11990_v9, 8  ;;  %v11920_v9 = vrot.slane %v31172_v12, %v27368_v61 }
 0x77d   : > { %19134 = vxpose.xlu1.b32.end [2/2] (short) (narrow) %v12013_v53, 8  ;;  %v31174_v53 = vld [vmem:[#allocation173_spill] sm:$0xff]  ;;  %v11964_v47 = vcombine.low %v11920_v9, %v11952_v23  ;;  %v28556_v1 = vpop.trf.xlu0  ;;  %v28561_v51 = vpop.trf.xlu1 }
 0x77e   : > { %v12065_v5 = vcombine.low %v31174_v53, %v31173_v10 }
 0x77f   : > { %19165 = vxpose.xlu0.b32.start [1/2] (short) (narrow) %v11962_v13, 8  ;;  %v31175_v13 = vld [vmem:[#allocation194_spill] sm:$0xff] }
 0x780   : > { %v12073_v12 = vrot.slane %v12065_v5, %v25994_v40 }
 0x781   : > { %19197 = vxpose.xlu1.b32.start [1/2] (short) (narrow) %v11963_v41, 8  ;;  %v12049_v41 = vcombine.low %v31176_v19, %v31175_v13 }
 0x783   : > { %19166 = vxpose.xlu0.b32.end [2/2] (short) (narrow) %v11997_v22, 8  ;;  %v11965_v22 = vcombine.high %v11920_v9, %v11952_v23  ;;  %v12057_v39 = vrot.slane %v12049_v41, %v25994_v40  ;;  %v11998_v23 = vcombine.high %v11982_v8, %v31148_v29  ;;  %v28572_v9 = vpop.trf.xlu0  ;;  %v22853_v8 = vcombine.low %v28470_v36, %v28483_v33 }
 0x785   : > { %19198 = vxpose.xlu1.b32.end [2/2] (short) (narrow) %v12014_v45, 8  ;;  %v12015_v45 = vcombine.high %v12005_v25, %v31148_v29  ;;  %v12113_v37 = vcombine.low %v12057_v39, %v12073_v12  ;;  %v12012_v41 = vrot.slane %v11998_v23, %v27368_v61  ;;  %v22860_v33 = vrot.slane %v22853_v8, %v25994_v40 }
 0x786   : > { %v12066_v23 = vcombine.high %v31174_v53, %v31173_v10 }
 0x787   : > { %19229 = vxpose.xlu0.b32.start [1/2] (short) (narrow) %v11964_v47, 8  ;;  %v11927_v47 = vrot.slane %v31177_v38, %v27368_v61  ;;  %v22845_v38 = vcombine.low %v28465_v18, %v28481_v52  ;;  %v12121_v62 = vrot.slane %v12113_v37, %v27368_v61  ;;  %v22844_v52 = vrot.slane %v22837_v54, %v25994_v40 }
 0x789   : > { %19261 = vxpose.xlu1.b32.start [1/2] (short) (narrow) %v11965_v22, 8  ;;  %v11966_v5 = vcombine.low %v11927_v47, %v11959_v58  ;;  %v28574_v22 = vpop.trf.xlu1  ;;  %v11967_v17 = vcombine.high %v11927_v47, %v11959_v58  ;;  %v12160_v58 = vrot.slane %v27929_v20, %v25994_v40  ;;  %v22852_v37 = vrot.slane %v22845_v38, %v25994_v40 }
 0x78a   : > { %v12080_v38 = vrot.slane %v12066_v23, %v25994_v40 }
 0x78b   : > { %19230 = vxpose.xlu0.b32.end [2/2] (short) (narrow) %v12005_v25, 8  ;;  %v22829_v25 = vcombine.low %v28430_v26, %v28450_v21  ;;  %v12016_v26 = vcombine.high %v12012_v41, %v31148_v29  ;;  %v31178_v21 = vld [vmem:[#allocation91_spill] sm:$0xff]  ;;  %v12175_v6 = vrot.slane %v12160_v58, %v27368_v61  ;;  %v22869_v43 = vcombine.low %v22852_v37, %v22860_v33 }
 0x78c   : > { %v31180_v0 = vcombine.low %v31178_v21, %v31179_v24 }
 0x78d   : > { %19262 = vxpose.xlu1.b32.end [2/2] (short) (narrow) %v12015_v45, 8  ;;  %v28586_v45 = vpop.trf.xlu0  ;;  %v28595_v18 = vpop.trf.xlu1  ;;  %v22836_v36 = vrot.slane %v22829_v25, %v25994_v40 }
 0x78e   : > { %v12089_v47 = vrot.slane %v31180_v0, %v27368_v61 }
 0x78f   : > { %19293 = vxpose.xlu0.b32.start [1/2] (short) (narrow) %v11966_v5, 8  ;;  %v12114_v5 = vcombine.high %v12057_v39, %v12073_v12  ;;  %v22861_v54 = vcombine.low %v22836_v36, %v22844_v52  ;;  %v12168_v12 = vcombine.high %v12160_v58, %v31148_v29 }
 0x790   : > { %v12146_v0 = vcombine.high %v12089_v47, %v12121_v62 }
 0x791   : > { %19325 = vxpose.xlu1.b32.start [1/2] (short) (narrow) %v11967_v17, 8  ;;  %v12145_v17 = vcombine.low %v12089_v47, %v12121_v62  ;;  %v28606_v25 = vpop.trf.xlu0  ;;  %v12128_v8 = vrot.slane %v12114_v5, %v27368_v61  ;;  %v28610_v10 = vpop.trf.xlu1  ;;  %v28625_v47 = vrot.slane %v22869_v43, %v27368_v61 }
 0x793   : > { %19294 = vxpose.xlu0.b32.end [2/2] (short) (narrow) %v12012_v41, 8  ;;  %v12050_v41 = vcombine.high %v31176_v19, %v31175_v13  ;;  %v12198_v13 = vcombine.high %v12175_v6, %v31148_v29  ;;  %v31181_v19 = vcombine.high %v31178_v21, %v31179_v24  ;;  %31183 = vst [vmem:[#allocation32_spill] sm:$0xff] %v28625_v47 }
 0x794   : > { %v12182_v21 = vrot.slane %v12168_v12, %v27368_v61  ;;  %v31187_v12 = vld [vmem:[#allocation211_spill] sm:$0xff] }
 0x795   : > { %19326 = vxpose.xlu1.b32.end [2/2] (short) (narrow) %v12016_v26, 8  ;;  %v12064_v53 = vrot.slane %v12050_v41, %v25994_v40  ;;  %v12096_v39 = vrot.slane %v31181_v19, %v27368_v61  ;;  %v28619_v62 = vpop.trf.xlu0  ;;  %v28622_v26 = vrot.slane %v22861_v54, %v27368_v61  ;;  %v28627_v58 = vpop.trf.xlu1 }
 0x796   : > { %v12199_v5 = vcombine.high %v12182_v21, %v31148_v29 }
 0x797   : > { %19357 = vxpose.xlu0.b32.start [1/2] (short) (narrow) %v12145_v17, 8  ;;  %31182 = vst [vmem:[#allocation68_spill] sm:$0xff] %v28622_v26  ;;  %v12129_v36 = vcombine.low %v12064_v53, %v12080_v38  ;;  %v12147_v52 = vcombine.low %v12096_v39, %v12128_v8  ;;  %v12148_v37 = vcombine.high %v12096_v39, %v12128_v8  ;;  %v31184_v17 = vld [vmem:[#allocation92_spill] sm:$0xff] }
 0x798   : > { %v12130_v8 = vcombine.high %v12064_v53, %v12080_v38 }
 0x799   : > { %19389 = vxpose.xlu1.b32.start [1/2] (short) (narrow) %v12146_v0, 8  ;;  %v12137_v33 = vrot.slane %v12129_v36, %v27368_v61  ;;  %v28635_v43 = vpop.trf.xlu0  ;;  %v28643_v54 = vpop.trf.xlu1  ;;  %v31189_v36 = vld [vmem:[#allocation196_spill] sm:$0xff] }
 0x79b   : > { %19358 = vxpose.xlu0.b32.end [2/2] (short) (narrow) %v12175_v6, 8  ;;  %v12153_v6 = vcombine.high %v27929_v20, %v31148_v29  ;;  %v31185_v20 = vld [vmem:[#allocation44_spill] sm:$0xff] }
 0x79c   : > { %v31186_v41 = vcombine.low %v31184_v17, %v31185_v20 }
 0x79d   : > { %19390 = vxpose.xlu1.b32.end [2/2] (short) (narrow) %v12198_v13, 8  ;;  %v12167_v23 = vrot.slane %v12153_v6, %v25994_v40  ;;  %v31188_v13 = vld [vmem:[#allocation175_spill] sm:$0xff]  ;;  %v28650_v24 = vpop.trf.xlu0  ;;  %v28654_v38 = vpop.trf.xlu1 }
 0x79e   : > { %v12105_v0 = vrot.slane %v31186_v41, %v27368_v61  ;;  %v12250_v19 = vcombine.low %v31188_v13, %v31187_v12  ;;  %v12144_v41 = vrot.slane %v12130_v8, %v27368_v61 }
 0x79f   : > { %19421 = vxpose.xlu0.b32.start [1/2] (short) (narrow) %v12147_v52, 8  ;;  %v31190_v52 = vld [vmem:[#allocation152_spill] sm:$0xff] }
 0x7a0   : > { %v12149_v39 = vcombine.low %v12105_v0, %v12137_v33  ;;  %v12150_v6 = vcombine.high %v12105_v0, %v12137_v33  ;;  %v12258_v26 = vrot.slane %v12250_v19, %v25994_v40  ;;  %v31191_v33 = vcombine.high %v31184_v17, %v31185_v20 }
 0x7a1   : > { %19453 = vxpose.xlu1.b32.start [1/2] (short) (narrow) %v12148_v37, 8  ;;  %v12234_v37 = vcombine.low %v31190_v52, %v31189_v36  ;;  %v22887_v17 = vcombine.low %v28497_v14, %v28517_v28  ;;  %v22903_v20 = vcombine.low %v28536_v56, %v28552_v4  ;;  %v31193_v14 = vld [vmem:[#allocation45_spill] sm:$0xff] }
 0x7a2   : > { %v12112_v0 = vrot.slane %v31191_v33, %v27368_v61  ;;  %v12345_v33 = vrot.slane %v27940_v44, %v25994_v40 }
 0x7a3   : > { %19422 = vxpose.xlu0.b32.end [2/2] (short) (narrow) %v12182_v21, 8  ;;  %v12190_v21 = vrot.slane %v12167_v23, %v27368_v61  ;;  %v12242_v53 = vrot.slane %v12234_v37, %v25994_v40  ;;  %v28666_v37 = vpop.trf.xlu1 }
 0x7a4   : > { %v12151_v19 = vcombine.low %v12112_v0, %v12144_v41  ;;  %v12152_v8 = vcombine.high %v12112_v0, %v12144_v41  ;;  %v12360_v34 = vrot.slane %v12345_v33, %v27368_v61 }
 0x7a5   : > { %19454 = vxpose.xlu1.b32.end [2/2] (short) (narrow) %v12199_v5, 8  ;;  %v12200_v5 = vcombine.high %v12190_v21, %v31148_v29  ;;  %v12298_v47 = vcombine.low %v12242_v53, %v12258_v26 }
 0x7a7   : > { %19485 = vxpose.xlu0.b32.start [1/2] (short) (narrow) %v12149_v39, 8  ;;  %v12183_v39 = vcombine.high %v12167_v23, %v31148_v29  ;;  %v22895_v23 = vcombine.low %v28528_v57, %v28544_v30  ;;  %v28686_v57 = vpop.trf.xlu1  ;;  %v22894_v30 = vrot.slane %v22887_v17, %v25994_v40 }
 0x7a9   : > { %19517 = vxpose.xlu1.b32.start [1/2] (short) (narrow) %v12150_v6, 8  ;;  %v28663_v6 = vpop.trf.xlu0  ;;  %v12197_v63 = vrot.slane %v12183_v39, %v27368_v61  ;;  %v22902_v4 = vrot.slane %v22895_v23, %v25994_v40  ;;  %v12251_v39 = vcombine.high %v31188_v13, %v31187_v12  ;;  %v12353_v13 = vcombine.high %v12345_v33, %v31148_v29 }
 0x7aa   : > { %v12338_v33 = vcombine.high %v27940_v44, %v31148_v29  ;;  %v31199_v44 = vld [vmem:[#allocation46_spill] sm:$0xff] }
 0x7ab   : > { %19486 = vxpose.xlu0.b32.end [2/2] (short) (narrow) %v12190_v21, 8  ;;  %v22879_v21 = vcombine.low %v28486_v11, %v28512_v55  ;;  %v12201_v11 = vcombine.high %v12197_v63, %v31148_v29  ;;  %v31192_v55 = vld [vmem:[#allocation95_spill] sm:$0xff]  ;;  %v12265_v23 = vrot.slane %v12251_v39, %v25994_v40  ;;  %v28701_v12 = vpop.trf.xlu1 }
 0x7ac   : > { %v31194_v28 = vcombine.low %v31192_v55, %v31193_v14 }
 0x7ad   : > { %19518 = vxpose.xlu1.b32.end [2/2] (short) (narrow) %v12200_v5, 8  ;;  %v12306_v5 = vrot.slane %v12298_v47, %v27368_v61  ;;  %v28677_v41 = vpop.trf.xlu0  ;;  %v22886_v56 = vrot.slane %v22879_v21, %v25994_v40  ;;  %v22910_v47 = vrot.slane %v22903_v20, %v25994_v40 }
 0x7ae   : > { %v12274_v0 = vrot.slane %v31194_v28, %v27368_v61 }
 0x7af   : > { %19549 = vxpose.xlu0.b32.start [1/2] (short) (narrow) %v12151_v19, 8  ;;  %v12299_v19 = vcombine.high %v12242_v53, %v12258_v26  ;;  %v22911_v17 = vcombine.low %v22886_v56, %v22894_v30  ;;  %v22919_v42 = vcombine.low %v22902_v4, %v22910_v47  ;;  %v12367_v4 = vrot.slane %v12353_v13, %v27368_v61 }
 0x7b0   : > { %v12331_v28 = vcombine.high %v12274_v0, %v12306_v5  ;;  %v12352_v47 = vrot.slane %v12338_v33, %v25994_v40 }
 0x7b1   : > { %19581 = vxpose.xlu1.b32.start [1/2] (short) (narrow) %v12152_v8, 8  ;;  %v12235_v8 = vcombine.high %v31190_v52, %v31189_v36  ;;  %v28697_v21 = vpop.trf.xlu0  ;;  %v12313_v20 = vrot.slane %v12299_v19, %v27368_v61  ;;  %v12383_v36 = vcombine.high %v12360_v34, %v31148_v29  ;;  %v31195_v52 = vcombine.high %v31192_v55, %v31193_v14  ;;  %v28721_v55 = vpop.trf.xlu1  ;;  %v31198_v19 = vld [vmem:[#allocation96_spill] sm:$0xff] }
 0x7b2   : > { %v12384_v39 = vcombine.high %v12367_v4, %v31148_v29 }
 0x7b3   : > { %19550 = vxpose.xlu0.b32.end [2/2] (short) (narrow) %v12197_v63, 8  ;;  %v12330_v63 = vcombine.low %v12274_v0, %v12306_v5  ;;  %v12249_v26 = vrot.slane %v12235_v8, %v25994_v40  ;;  %v12281_v53 = vrot.slane %v31195_v52, %v27368_v61  ;;  %v28711_v5 = vrot.slane %v22911_v17, %v27368_v61  ;;  %v31201_v17 = vld [vmem:[#allocation174_spill] sm:$0xff] }
 0x7b5   : > { %19582 = vxpose.xlu1.b32.end [2/2] (short) (narrow) %v12201_v11, 8  ;;  %31196 = vst [vmem:[#allocation24_spill] sm:$0xff] %v28711_v5  ;;  %v28714_v11 = vrot.slane %v22919_v42, %v27368_v61  ;;  %v12314_v0 = vcombine.low %v12249_v26, %v12265_v23  ;;  %v12332_v56 = vcombine.low %v12281_v53, %v12313_v20  ;;  %v28716_v30 = vpop.trf.xlu0  ;;  %v28736_v52 = vpop.trf.xlu1 }
 0x7b6   : > { %v12315_v13 = vcombine.high %v12249_v26, %v12265_v23 }
 0x7b7   : > { %19613 = vxpose.xlu0.b32.start [1/2] (short) (narrow) %v12330_v63, 8  ;;  %31197 = vst [vmem:[#allocation163_spill] sm:$0xff] %v28714_v11  ;;  %v12322_v42 = vrot.slane %v12314_v0, %v27368_v61  ;;  %v31200_v63 = vcombine.low %v31198_v19, %v31199_v44  ;;  %v31203_v0 = vld [vmem:[#allocation151_spill] sm:$0xff] }
 0x7b8   : > { %v12329_v14 = vrot.slane %v12315_v13, %v27368_v61 }
 0x7b9   : > { %19645 = vxpose.xlu1.b32.start [1/2] (short) (narrow) %v12331_v28, 8  ;;  %v12290_v8 = vrot.slane %v31200_v63, %v27368_v61  ;;  %v28732_v28 = vpop.trf.xlu0  ;;  %v28745_v5 = vpop.trf.xlu1 }
 0x7bb   : > { %19614 = vxpose.xlu0.b32.end [2/2] (short) (narrow) %v12360_v34, 8  ;;  %v12333_v34 = vcombine.high %v12281_v53, %v12313_v20  ;;  %v12435_v20 = vcombine.low %v31201_v17, %v27464_v49  ;;  %v31202_v53 = vld [vmem:[#allocation200_spill] sm:$0xff]  ;;  %v12335_v33 = vcombine.high %v12290_v8, %v12322_v42 }
 0x7bd   : > { %19646 = vxpose.xlu1.b32.end [2/2] (short) (narrow) %v12383_v36, 8  ;;  %v12334_v36 = vcombine.low %v12290_v8, %v12322_v42  ;;  %v12443_v63 = vrot.slane %v12435_v20, %v25994_v40  ;;  %v31204_v42 = vcombine.high %v31198_v19, %v31199_v44  ;;  %v12368_v8 = vcombine.high %v12352_v47, %v31148_v29 }
 0x7be   : > { %v22937_v19 = vcombine.low %v28561_v51, %v28574_v22  ;;  %v22953_v44 = vcombine.low %v28595_v18, %v28610_v10 }
 0x7bf   : > { %19677 = vxpose.xlu0.b32.start [1/2] (short) (narrow) %v12332_v56, 8  ;;  %v12419_v56 = vcombine.low %v31203_v0, %v31202_v53  ;;  %v12382_v11 = vrot.slane %v12368_v8, %v27368_v61  ;;  %v12436_v8 = vcombine.high %v31201_v17, %v27464_v49 }
 0x7c0   : > { %v22944_v18 = vrot.slane %v22937_v19, %v25994_v40  ;;  %v22960_v10 = vrot.slane %v22953_v44, %v25994_v40 }
 0x7c1   : > { %19709 = vxpose.xlu1.b32.start [1/2] (short) (narrow) %v12333_v34, 8  ;;  %v12375_v34 = vrot.slane %v12352_v47, %v27368_v61  ;;  %v12427_v23 = vrot.slane %v12419_v56, %v25994_v40  ;;  %v28757_v56 = vpop.trf.xlu1  ;;  %v22945_v47 = vcombine.low %v28586_v45, %v28606_v25 }
 0x7c3   : > { %19678 = vxpose.xlu0.b32.end [2/2] (short) (narrow) %v12367_v4, 8  ;;  %v28741_v4 = vpop.trf.xlu0  ;;  %v12385_v26 = vcombine.high %v12375_v34, %v31148_v29  ;;  %v22952_v25 = vrot.slane %v22945_v47, %v25994_v40  ;;  %v12450_v47 = vrot.slane %v12436_v8, %v25994_v40 }
 0x7c5   : > { %19710 = vxpose.xlu1.b32.end [2/2] (short) (narrow) %v12384_v39, 8  ;;  %v12297_v39 = vrot.slane %v31204_v42, %v27368_v61  ;;  %v12386_v42 = vcombine.high %v12382_v11, %v31148_v29  ;;  %v22969_v2 = vcombine.low %v22952_v25, %v22960_v10  ;;  %v12523_v25 = vcombine.high %v27924_v60, %v31148_v29 }
 0x7c7   : > { %19741 = vxpose.xlu0.b32.start [1/2] (short) (narrow) %v12334_v36, 8  ;;  %v12483_v36 = vcombine.low %v12427_v23, %v12443_v63  ;;  %v12336_v20 = vcombine.low %v12297_v39, %v12329_v14  ;;  %v12337_v13 = vcombine.high %v12297_v39, %v12329_v14  ;;  %v12530_v14 = vrot.slane %v27924_v60, %v25994_v40  ;;  %v31212_v60 = vld [vmem:[#allocation127_spill] sm:$0xff] }
 0x7c9   : > { %19773 = vxpose.xlu1.b32.start [1/2] (short) (narrow) %v12335_v33, 8  ;;  %v28754_v33 = vpop.trf.xlu0 }
 0x7cb   : > { %19742 = vxpose.xlu0.b32.end [2/2] (short) (narrow) %v12375_v34, 8  ;;  %v22929_v34 = vcombine.low %v28556_v1, %v28572_v9  ;;  %v31205_v1 = vld [vmem:[#allocation93_spill] sm:$0xff]  ;;  %v31206_v9 = vld [vmem:[#allocation126_spill] sm:$0xff] }
 0x7cc   : > { %v31207_v39 = vcombine.low %v31205_v1, %v31206_v9 }
 0x7cd   : > { %19774 = vxpose.xlu1.b32.end [2/2] (short) (narrow) %v12385_v26, 8  ;;  %v12491_v26 = vrot.slane %v12483_v36, %v27368_v61  ;;  %v28775_v22 = vpop.trf.xlu0  ;;  %v22936_v45 = vrot.slane %v22929_v34, %v25994_v40  ;;  %v12484_v36 = vcombine.high %v12427_v23, %v12443_v63  ;;  %v12545_v34 = vrot.slane %v12530_v14, %v27368_v61 }
 0x7ce   : > { %v12459_v51 = vrot.slane %v31207_v39, %v27368_v61  ;;  %v12538_v63 = vcombine.high %v12530_v14, %v31148_v29 }
 0x7cf   : > { %19805 = vxpose.xlu0.b32.start [1/2] (short) (narrow) %v12336_v20, 8  ;;  %v28783_v20 = vpop.trf.xlu1  ;;  %v22961_v19 = vcombine.low %v22936_v45, %v22944_v18  ;;  %v12498_v44 = vrot.slane %v12484_v36, %v27368_v61  ;;  %v12537_v36 = vrot.slane %v12523_v25, %v25994_v40 }
 0x7d0   : > { %v12516_v39 = vcombine.high %v12459_v51, %v12491_v26 }
 0x7d1   : > { %19837 = vxpose.xlu1.b32.start [1/2] (short) (narrow) %v12337_v13, 8  ;;  %v12420_v13 = vcombine.high %v31203_v0, %v31202_v53  ;;  %v28790_v49 = vpop.trf.xlu0  ;;  %v12568_v53 = vcombine.high %v12545_v34, %v31148_v29  ;;  %v31208_v0 = vcombine.high %v31205_v1, %v31206_v9  ;;  %v12552_v1 = vrot.slane %v12538_v63, %v27368_v61  ;;  %v31214_v63 = vld [vmem:[#allocation176_spill] sm:$0xff] }
 0x7d3   : > { %19806 = vxpose.xlu0.b32.end [2/2] (short) (narrow) %v12382_v11, 8  ;;  %v12515_v11 = vcombine.low %v12459_v51, %v12491_v26  ;;  %v12434_v17 = vrot.slane %v12420_v13, %v25994_v40  ;;  %v12466_v23 = vrot.slane %v31208_v0, %v27368_v61  ;;  %v28799_v26 = vpop.trf.xlu1  ;;  %v28805_v51 = vrot.slane %v22969_v2, %v27368_v61  ;;  %v31211_v13 = vld [vmem:[#allocation94_spill] sm:$0xff] }
 0x7d5   : > { %19838 = vxpose.xlu1.b32.end [2/2] (short) (narrow) %v12386_v42, 8  ;;  %v28802_v42 = vrot.slane %v22961_v19, %v27368_v61  ;;  %31210 = vst [vmem:[#allocation140_spill] sm:$0xff] %v28805_v51  ;;  %v12499_v45 = vcombine.low %v12434_v17, %v12450_v47  ;;  %v12517_v18 = vcombine.low %v12466_v23, %v12498_v44  ;;  %v28807_v14 = vpop.trf.xlu0 }
 0x7d6   : > { %v12518_v10 = vcombine.high %v12466_v23, %v12498_v44  ;;  %v12500_v44 = vcombine.high %v12434_v17, %v12450_v47 }
 0x7d7   : > { %19869 = vxpose.xlu0.b32.start [1/2] (short) (narrow) %v12515_v11, 8  ;;  %31209 = vst [vmem:[#allocation186_spill] sm:$0xff] %v28802_v42  ;;  %v28812_v9 = vpop.trf.xlu1  ;;  %v12507_v2 = vrot.slane %v12499_v45, %v27368_v61  ;;  %v12569_v11 = vcombine.high %v12552_v1, %v31148_v29  ;;  %v31215_v45 = vld [vmem:[#allocation203_spill] sm:$0xff]  ;;  %v31217_v42 = vcombine.high %v31211_v13, %v31212_v60 }
 0x7d9   : > { %19901 = vxpose.xlu1.b32.start [1/2] (short) (narrow) %v12516_v39, 8  ;;  %v31213_v39 = vcombine.low %v31211_v13, %v31212_v60  ;;  %v28823_v19 = vpop.trf.xlu0  ;;  %v22987_v13 = vcombine.low %v28627_v58, %v28643_v54  ;;  %v31219_v58 = vld [vmem:[#allocation128_spill] sm:$0xff] }
 0x7db   : > { %19870 = vxpose.xlu0.b32.end [2/2] (short) (narrow) %v12545_v34, 8  ;;  %v12475_v34 = vrot.slane %v31213_v39, %v27368_v61  ;;  %v28827_v23 = vpop.trf.xlu1  ;;  %v12514_v39 = vrot.slane %v12500_v44, %v27368_v61 }
 0x7dd   : > { %19902 = vxpose.xlu1.b32.end [2/2] (short) (narrow) %v12568_v53, 8  ;;  %v12620_v53 = vcombine.low %v31214_v63, %v27469_v3  ;;  %v12519_v0 = vcombine.low %v12475_v34, %v12507_v2  ;;  %v28834_v47 = vpop.trf.xlu0 }
 0x7df   : > { %19933 = vxpose.xlu0.b32.start [1/2] (short) (narrow) %v12517_v18, 8  ;;  %v31216_v18 = vld [vmem:[#allocation153_spill] sm:$0xff]  ;;  %v12628_v8 = vrot.slane %v12620_v53, %v25994_v40 }
 0x7e0   : > { %v12604_v25 = vcombine.low %v31216_v18, %v31215_v45 }
 0x7e1   : > { %19965 = vxpose.xlu1.b32.start [1/2] (short) (narrow) %v12518_v10, 8  ;;  %v12520_v10 = vcombine.high %v12475_v34, %v12507_v2  ;;  %v12553_v2 = vcombine.high %v12537_v36, %v31148_v29  ;;  %v28843_v34 = vpop.trf.xlu1 }
 0x7e2   : > { %v12612_v17 = vrot.slane %v12604_v25, %v25994_v40  ;;  %v28846_v25 = vpop.trf.xlu0 }
 0x7e3   : > { %19934 = vxpose.xlu0.b32.end [2/2] (short) (narrow) %v12552_v1, 8  ;;  %v12560_v1 = vrot.slane %v12537_v36, %v27368_v61  ;;  %v12567_v51 = vrot.slane %v12553_v2, %v27368_v61  ;;  %v23003_v36 = vcombine.low %v28654_v38, %v28666_v37 }
 0x7e4   : > { %v12668_v53 = vcombine.low %v12612_v17, %v12628_v8 }
 0x7e5   : > { %19966 = vxpose.xlu1.b32.end [2/2] (short) (narrow) %v12569_v11, 8  ;;  %v12570_v11 = vcombine.high %v12560_v1, %v31148_v29  ;;  %v23010_v2 = vrot.slane %v23003_v36, %v25994_v40 }
 0x7e6   : > { %v12676_v60 = vrot.slane %v12668_v53, %v27368_v61  ;;  %v12621_v53 = vcombine.high %v31214_v63, %v27469_v3 }
 0x7e7   : > { %19997 = vxpose.xlu0.b32.start [1/2] (short) (narrow) %v12519_v0, 8  ;;  %v12482_v0 = vrot.slane %v31217_v42, %v27368_v61  ;;  %v22995_v42 = vcombine.low %v28650_v24, %v28663_v6  ;;  %v28866_v24 = vpop.trf.xlu0  ;;  %v22994_v6 = vrot.slane %v22987_v13, %v25994_v40 }
 0x7e8   : > { %v12635_v36 = vrot.slane %v12621_v53, %v25994_v40  ;;  %v31231_v53 = vld [vmem:[#allocation197_spill] sm:$0xff] }
 0x7e9   : > { %20029 = vxpose.xlu1.b32.start [1/2] (short) (narrow) %v12520_v10, 8  ;;  %v12521_v10 = vcombine.low %v12482_v0, %v12514_v39  ;;  %v12522_v44 = vcombine.high %v12482_v0, %v12514_v39  ;;  %v28857_v39 = vpop.trf.xlu1  ;;  %v23002_v37 = vrot.slane %v22995_v42, %v25994_v40 }
 0x7eb   : > { %19998 = vxpose.xlu0.b32.end [2/2] (short) (narrow) %v12560_v1, 8  ;;  %v22979_v1 = vcombine.low %v28619_v62, %v28635_v43  ;;  %v12571_v62 = vcombine.high %v12567_v51, %v31148_v29  ;;  %v31218_v43 = vld [vmem:[#allocation98_spill] sm:$0xff]  ;;  %v28879_v13 = vpop.trf.xlu0  ;;  %v23019_v50 = vcombine.low %v23002_v37, %v23010_v2  ;;  %v12708_v37 = vcombine.high %v27932_v31, %v31148_v29 }
 0x7ec   : > { %v31220_v54 = vcombine.low %v31218_v43, %v31219_v58 }
 0x7ed   : > { %20030 = vxpose.xlu1.b32.end [2/2] (short) (narrow) %v12570_v11, 8  ;;  %v12715_v11 = vrot.slane %v27932_v31, %v25994_v40  ;;  %v22986_v38 = vrot.slane %v22979_v1, %v25994_v40  ;;  %v31224_v31 = vld [vmem:[#allocation99_spill] sm:$0xff] }
 0x7ee   : > { %v12644_v0 = vrot.slane %v31220_v54, %v27368_v61  ;;  %v12605_v54 = vcombine.high %v31216_v18, %v31215_v45  ;;  %v31221_v18 = vcombine.high %v31218_v43, %v31219_v58 }
 0x7ef   : > { %20061 = vxpose.xlu0.b32.start [1/2] (short) (narrow) %v12521_v10, 8  ;;  %v12669_v10 = vcombine.high %v12612_v17, %v12628_v8  ;;  %v12730_v1 = vrot.slane %v12715_v11, %v27368_v61  ;;  %v23011_v42 = vcombine.low %v22986_v38, %v22994_v6  ;;  %v12723_v17 = vcombine.high %v12715_v11, %v31148_v29 }
 0x7f0   : > { %v12701_v15 = vcombine.high %v12644_v0, %v12676_v60  ;;  %v12619_v63 = vrot.slane %v12605_v54, %v25994_v40 }
 0x7f1   : > { %20093 = vxpose.xlu1.b32.start [1/2] (short) (narrow) %v12522_v44, 8  ;;  %v28874_v44 = vpop.trf.xlu1  ;;  %v12683_v3 = vrot.slane %v12669_v10, %v27368_v61  ;;  %v12753_v45 = vcombine.high %v12730_v1, %v31148_v29  ;;  %v12737_v43 = vrot.slane %v12723_v17, %v27368_v61 }
 0x7f2   : > { %v12684_v38 = vcombine.low %v12619_v63, %v12635_v36 }
 0x7f3   : > { %20062 = vxpose.xlu0.b32.end [2/2] (short) (narrow) %v12567_v51, 8  ;;  %v12700_v51 = vcombine.low %v12644_v0, %v12676_v60  ;;  %v12651_v60 = vrot.slane %v31221_v18, %v27368_v61  ;;  %v28898_v0 = vrot.slane %v23019_v50, %v27368_v61  ;;  %v12754_v54 = vcombine.high %v12737_v43, %v31148_v29  ;;  %v31228_v18 = vld [vmem:[#allocation212_spill] sm:$0xff] }
 0x7f4   : > { %v12692_v50 = vrot.slane %v12684_v38, %v27368_v61 }
 0x7f5   : > { %20094 = vxpose.xlu1.b32.end [2/2] (short) (narrow) %v12571_v62, 8  ;;  %v28883_v8 = vpop.trf.xlu1  ;;  %v28892_v62 = vpop.trf.xlu0  ;;  %31223 = vst [vmem:[#allocation33_spill] sm:$0xff] %v28898_v0  ;;  %v12702_v6 = vcombine.low %v12651_v60, %v12683_v3  ;;  %v12703_v2 = vcombine.high %v12651_v60, %v12683_v3  ;;  %v31229_v60 = vld [vmem:[#allocation177_spill] sm:$0xff] }
 0x7f7   : > { %20125 = vxpose.xlu0.b32.start [1/2] (short) (narrow) %v12700_v51, 8  ;;  %v12722_v51 = vrot.slane %v12708_v37, %v25994_v40  ;;  %v31232_v37 = vld [vmem:[#allocation154_spill] sm:$0xff] }
 0x7f9   : > { %20157 = vxpose.xlu1.b32.start [1/2] (short) (narrow) %v12701_v15, 8  ;;  %v28895_v15 = vrot.slane %v23011_v42, %v27368_v61  ;;  %v28900_v11 = vpop.trf.xlu1  ;;  %v28905_v58 = vpop.trf.xlu0  ;;  %v12745_v0 = vrot.slane %v12722_v51, %v27368_v61 }
 0x7fb   : > { %20126 = vxpose.xlu0.b32.end [2/2] (short) (narrow) %v12730_v1, 8  ;;  %31222 = vst [vmem:[#allocation71_spill] sm:$0xff] %v28895_v15  ;;  %v31225_v1 = vld [vmem:[#allocation129_spill] sm:$0xff]  ;;  %v12789_v15 = vcombine.low %v31232_v37, %v31231_v53  ;;  %v12755_v32 = vcombine.high %v12745_v0, %v31148_v29 }
 0x7fc   : > { %v31226_v42 = vcombine.low %v31224_v31, %v31225_v1 }
 0x7fd   : > { %20158 = vxpose.xlu1.b32.end [2/2] (short) (narrow) %v12753_v45, 8  ;;  %v28910_v10 = vpop.trf.xlu1  ;;  %v28918_v17 = vpop.trf.xlu0  ;;  %v12685_v45 = vcombine.high %v12619_v63, %v12635_v36 }
 0x7fe   : > { %v12660_v3 = vrot.slane %v31226_v42, %v27368_v61  ;;  %31227 = vst [vmem:[#allocation72_spill] sm:$0xff] %v28918_v17 }
 0x7ff   : > { %20189 = vxpose.xlu0.b32.start [1/2] (short) (narrow) %v12702_v6, 8  ;;  %v12805_v6 = vcombine.low %v31229_v60, %v31228_v18  ;;  %v12699_v36 = vrot.slane %v12685_v45, %v27368_v61 }
 0x800   : > { %v12704_v38 = vcombine.low %v12660_v3, %v12692_v50 }
 0x801   : > { %20221 = vxpose.xlu1.b32.start [1/2] (short) (narrow) %v12703_v2, 8  ;;  %v28922_v2 = vpop.trf.xlu1  ;;  %v28927_v7 = vpop.trf.xlu0  ;;  %v12813_v42 = vrot.slane %v12805_v6, %v25994_v40 }
 0x802   : > { %31230 = vst [vmem:[#allocation34_spill] sm:$0xff] %v28922_v2 }
 0x803   : > { %20190 = vxpose.xlu0.b32.end [2/2] (short) (narrow) %v12737_v43, 8  ;;  %v12705_v43 = vcombine.high %v12660_v3, %v12692_v50  ;;  %v31234_v50 = vcombine.high %v31224_v31, %v31225_v1  ;;  %v23037_v31 = vcombine.low %v28686_v57, %v28701_v12  ;;  %v31237_v57 = vld [vmem:[#allocation47_spill] sm:$0xff] }
 0x805   : > { %20222 = vxpose.xlu1.b32.end [2/2] (short) (narrow) %v12754_v54, 8  ;;  %v28931_v63 = vpop.trf.xlu1  ;;  %v12797_v54 = vrot.slane %v12789_v15, %v25994_v40  ;;  %v12667_v3 = vrot.slane %v31234_v50, %v27368_v61  ;;  %v28940_v2 = vpop.trf.xlu0  ;;  %v12900_v50 = vrot.slane %v27949_v59, %v25994_v40 }
 0x806   : > { %31233 = vst [vmem:[#allocation213_spill] sm:$0xff] %v28931_v63 }
 0x807   : > { %20253 = vxpose.xlu0.b32.start [1/2] (short) (narrow) %v12704_v38, 8  ;;  %v12738_v38 = vcombine.high %v12722_v51, %v31148_v29  ;;  %v12853_v6 = vcombine.low %v12797_v54, %v12813_v42  ;;  %v12707_v63 = vcombine.high %v12667_v3, %v12699_v36  ;;  %v23045_v51 = vcombine.low %v28716_v30, %v28732_v28 }
 0x808   : > { %v23044_v28 = vrot.slane %v23037_v31, %v25994_v40 }
 0x809   : > { %20285 = vxpose.xlu1.b32.start [1/2] (short) (narrow) %v12705_v43, 8  ;;  %v12706_v43 = vcombine.low %v12667_v3, %v12699_v36  ;;  %v28942_v45 = vpop.trf.xlu1  ;;  %v12752_v15 = vrot.slane %v12738_v38, %v27368_v61  ;;  %v28945_v17 = vpop.trf.xlu0  ;;  %v12861_v1 = vrot.slane %v12853_v6, %v27368_v61  ;;  %v12806_v38 = vcombine.high %v31229_v60, %v31228_v18 }
 0x80a   : > { %31235 = vst [vmem:[#allocation162_spill] sm:$0xff] %v28942_v45  ;;  %v12854_v6 = vcombine.high %v12797_v54, %v12813_v42  ;;  %v12908_v54 = vcombine.high %v12900_v50, %v31148_v29 }
 0x80b   : > { %20254 = vxpose.xlu0.b32.end [2/2] (short) (narrow) %v12745_v0, 8  ;;  %v23029_v0 = vcombine.low %v28677_v41, %v28697_v21  ;;  %v12756_v41 = vcombine.high %v12752_v15, %v31148_v29  ;;  %v31236_v21 = vld [vmem:[#allocation100_spill] sm:$0xff] }
 0x80c   : > { %v31238_v12 = vcombine.low %v31236_v21, %v31237_v57  ;;  %v12868_v18 = vrot.slane %v12854_v6, %v27368_v61 }
 0x80d   : > { %20286 = vxpose.xlu1.b32.end [2/2] (short) (narrow) %v12755_v32, 8  ;;  %v23053_v32 = vcombine.low %v28721_v55, %v28736_v52  ;;  %v28956_v36 = vpop.trf.xlu1  ;;  %v28965_v30 = vpop.trf.xlu0  ;;  %v23036_v55 = vrot.slane %v23029_v0, %v25994_v40  ;;  %v23052_v52 = vrot.slane %v23045_v51, %v25994_v40  ;;  %v12915_v0 = vrot.slane %v12900_v50, %v27368_v61 }
 0x80e   : > { %v12829_v3 = vrot.slane %v31238_v12, %v27368_v61  ;;  %31239 = vst [vmem:[#allocation185_spill] sm:$0xff] %v28965_v30  ;;  %v12790_v12 = vcombine.high %v31232_v37, %v31231_v53  ;;  %v31240_v37 = vcombine.high %v31236_v21, %v31237_v57  ;;  %v12922_v21 = vrot.slane %v12908_v54, %v27368_v61 }
 0x80f   : > { %20317 = vxpose.xlu0.b32.start [1/2] (short) (narrow) %v12706_v43, 8  ;;  %v23061_v51 = vcombine.low %v23036_v55, %v23044_v28  ;;  %v12938_v53 = vcombine.high %v12915_v0, %v31148_v29 }
 0x810   : > { %v12885_v43 = vcombine.low %v12829_v3, %v12861_v1  ;;  %v12886_v30 = vcombine.high %v12829_v3, %v12861_v1  ;;  %v12804_v42 = vrot.slane %v12790_v12, %v25994_v40  ;;  %v12836_v1 = vrot.slane %v31240_v37, %v27368_v61  ;;  %v31248_v37 = vld [vmem:[#allocation214_spill] sm:$0xff] }
 0x811   : > { %20349 = vxpose.xlu1.b32.start [1/2] (short) (narrow) %v12707_v63, 8  ;;  %v23060_v63 = vrot.slane %v23053_v32, %v25994_v40  ;;  %v28978_v31 = vpop.trf.xlu0  ;;  %v12820_v32 = vrot.slane %v12806_v38, %v25994_v40  ;;  %v28994_v3 = vrot.slane %v23061_v51, %v27368_v61  ;;  %v12939_v12 = vcombine.high %v12922_v21, %v31148_v29  ;;  %v31251_v38 = vld [vmem:[#allocation199_spill] sm:$0xff] }
 0x812   : > { %v12887_v28 = vcombine.low %v12836_v1, %v12868_v18 }
 0x813   : > { %20318 = vxpose.xlu0.b32.end [2/2] (short) (narrow) %v12752_v15, 8  ;;  %v28973_v15 = vpop.trf.xlu1  ;;  %v23069_v45 = vcombine.low %v23052_v52, %v23060_v63  ;;  %31241 = vst [vmem:[#allocation139_spill] sm:$0xff] %v28994_v3  ;;  %v12869_v55 = vcombine.low %v12804_v42, %v12820_v32  ;;  %v12893_v52 = vcombine.high %v27949_v59, %v31148_v29  ;;  %v31244_v59 = vld [vmem:[#allocation101_spill] sm:$0xff] }
 0x814   : > { %v12888_v63 = vcombine.high %v12836_v1, %v12868_v18  ;;  %v31249_v1 = vld [vmem:[#allocation179_spill] sm:$0xff] }
 0x815   : > { %20350 = vxpose.xlu1.b32.end [2/2] (short) (narrow) %v12756_v41, 8  ;;  %v28991_v41 = vpop.trf.xlu0 }
 0x817   : > { %20381 = vxpose.xlu0.b32.start [1/2] (short) (narrow) %v12885_v43, 8  ;;  %v28982_v60 = vpop.trf.xlu1  ;;  %v12907_v43 = vrot.slane %v12893_v52, %v25994_v40  ;;  %v31252_v52 = vld [vmem:[#allocation156_spill] sm:$0xff] }
 0x818   : > { %v12974_v3 = vcombine.low %v31252_v52, %v31251_v38 }
 0x819   : > { %20413 = vxpose.xlu1.b32.start [1/2] (short) (narrow) %v12886_v30, 8  ;;  %v28997_v30 = vrot.slane %v23069_v45, %v27368_v61  ;;  %v29004_v57 = vpop.trf.xlu0  ;;  %v12877_v45 = vrot.slane %v12869_v55, %v27368_v61 }
 0x81b   : > { %20382 = vxpose.xlu0.b32.end [2/2] (short) (narrow) %v12915_v0, 8  ;;  %31242 = vst [vmem:[#allocation69_spill] sm:$0xff] %v28997_v30  ;;  %v28999_v50 = vpop.trf.xlu1  ;;  %v31245_v0 = vld [vmem:[#allocation48_spill] sm:$0xff]  ;;  %v12930_v30 = vrot.slane %v12907_v43, %v27368_v61 }
 0x81c   : > { %31243 = vst [vmem:[#allocation64_spill] sm:$0xff] %v28999_v50  ;;  %v31246_v51 = vcombine.low %v31244_v59, %v31245_v0 }
 0x81d   : > { %20414 = vxpose.xlu1.b32.end [2/2] (short) (narrow) %v12938_v53, 8  ;;  %v29017_v54 = vpop.trf.xlu0  ;;  %v12870_v53 = vcombine.high %v12804_v42, %v12820_v32 }
 0x81e   : > { %v12845_v18 = vrot.slane %v31246_v51, %v27368_v61  ;;  %31247 = vst [vmem:[#allocation70_spill] sm:$0xff] %v29017_v54 }
 0x81f   : > { %20445 = vxpose.xlu0.b32.start [1/2] (short) (narrow) %v12887_v28, 8  ;;  %v29009_v6 = vpop.trf.xlu1  ;;  %v12990_v28 = vcombine.low %v31249_v1, %v31248_v37  ;;  %v12884_v32 = vrot.slane %v12870_v53, %v27368_v61 }
 0x820   : > { %v12889_v55 = vcombine.low %v12845_v18, %v12877_v45 }
 0x821   : > { %20477 = vxpose.xlu1.b32.start [1/2] (short) (narrow) %v12888_v63, 8  ;;  %v29026_v50 = vpop.trf.xlu0  ;;  %v12998_v51 = vrot.slane %v12990_v28, %v25994_v40 }
 0x822   : > { %31253 = vst [vmem:[#allocation216_spill] sm:$0xff] %v29026_v50 }
 0x823   : > { %20446 = vxpose.xlu0.b32.end [2/2] (short) (narrow) %v12922_v21, 8  ;;  %v29021_v63 = vpop.trf.xlu1  ;;  %v12890_v21 = vcombine.high %v12845_v18, %v12877_v45  ;;  %v31255_v45 = vcombine.high %v31244_v59, %v31245_v0  ;;  %v23087_v59 = vcombine.low %v28745_v5, %v28757_v56  ;;  %v23103_v0 = vcombine.low %v28783_v20, %v28799_v26  ;;  %v31258_v5 = vld [vmem:[#allocation49_spill] sm:$0xff] }
 0x824   : > { %31250 = vst [vmem:[#allocation115_spill] sm:$0xff] %v29021_v63  ;;  %v12940_v63 = vcombine.high %v12930_v30, %v31148_v29 }
 0x825   : > { %20478 = vxpose.xlu1.b32.end [2/2] (short) (narrow) %v12939_v12, 8  ;;  %v12982_v12 = vrot.slane %v12974_v3, %v25994_v40  ;;  %v12852_v18 = vrot.slane %v31255_v45, %v27368_v61  ;;  %v29039_v54 = vpop.trf.xlu0  ;;  %v13085_v45 = vrot.slane %v27962_v48, %v25994_v40 }
 0x827   : > { %20509 = vxpose.xlu0.b32.start [1/2] (short) (narrow) %v12889_v55, 8  ;;  %v29030_v42 = vpop.trf.xlu1  ;;  %v12923_v55 = vcombine.high %v12907_v43, %v31148_v29  ;;  %v13038_v28 = vcombine.low %v12982_v12, %v12998_v51  ;;  %v23095_v43 = vcombine.low %v28775_v22, %v28790_v49  ;;  %v23094_v49 = vrot.slane %v23087_v59, %v25994_v40 }
 0x828   : > { %31254 = vst [vmem:[#allocation164_spill] sm:$0xff] %v29030_v42  ;;  %v12892_v42 = vcombine.high %v12852_v18, %v12884_v32 }
 0x829   : > { %20541 = vxpose.xlu1.b32.start [1/2] (short) (narrow) %v12890_v21, 8  ;;  %v12891_v21 = vcombine.low %v12852_v18, %v12884_v32  ;;  %v12937_v3 = vrot.slane %v12923_v55, %v27368_v61  ;;  %v29044_v50 = vpop.trf.xlu0  ;;  %v23102_v26 = vrot.slane %v23095_v43, %v25994_v40  ;;  %v12991_v55 = vcombine.high %v31249_v1, %v31248_v37 }
 0x82b   : > { %20510 = vxpose.xlu0.b32.end [2/2] (short) (narrow) %v12930_v30, 8  ;;  %v29041_v53 = vpop.trf.xlu1  ;;  %v23079_v30 = vcombine.low %v28741_v4, %v28754_v33  ;;  %v12941_v4 = vcombine.high %v12937_v3, %v31148_v29  ;;  %v31257_v33 = vld [vmem:[#allocation104_spill] sm:$0xff] }
 0x82c   : > { %31256 = vst [vmem:[#allocation188_spill] sm:$0xff] %v29041_v53  ;;  %v31259_v56 = vcombine.low %v31257_v33, %v31258_v5 }
 0x82d   : > { %20542 = vxpose.xlu1.b32.end [2/2] (short) (narrow) %v12940_v63, 8  ;;  %v13046_v63 = vrot.slane %v13038_v28, %v27368_v61  ;;  %v29064_v22 = vpop.trf.xlu0  ;;  %v23086_v20 = vrot.slane %v23079_v30, %v25994_v40  ;;  %v13039_v28 = vcombine.high %v12982_v12, %v12998_v51  ;;  %v13100_v30 = vrot.slane %v13085_v45, %v27368_v61 }
 0x82e   : > { %v13014_v18 = vrot.slane %v31259_v56, %v27368_v61  ;;  %31260 = vst [vmem:[#allocation141_spill] sm:$0xff] %v29064_v22  ;;  %v12975_v56 = vcombine.high %v31252_v52, %v31251_v38  ;;  %v13093_v12 = vcombine.high %v13085_v45, %v31148_v29  ;;  %v31261_v52 = vcombine.high %v31257_v33, %v31258_v5 }
 0x82f   : > { %20573 = vxpose.xlu0.b32.start [1/2] (short) (narrow) %v12891_v21, 8  ;;  %v29055_v32 = vpop.trf.xlu1  ;;  %v23111_v43 = vcombine.low %v23086_v20, %v23094_v49  ;;  %v13053_v37 = vrot.slane %v13039_v28, %v27368_v61  ;;  %v13123_v38 = vcombine.high %v13100_v30, %v31148_v29 }
 0x830   : > { %v13070_v21 = vcombine.low %v13014_v18, %v13046_v63  ;;  %v13071_v22 = vcombine.high %v13014_v18, %v13046_v63  ;;  %v12989_v51 = vrot.slane %v12975_v56, %v25994_v40  ;;  %v13021_v63 = vrot.slane %v31261_v52, %v27368_v61 }
 0x831   : > { %20605 = vxpose.xlu1.b32.start [1/2] (short) (narrow) %v12892_v42, 8  ;;  %v23110_v42 = vrot.slane %v23103_v0, %v25994_v40  ;;  %v29077_v59 = vpop.trf.xlu0  ;;  %v13005_v0 = vrot.slane %v12991_v55, %v25994_v40  ;;  %v29093_v18 = vrot.slane %v23111_v43, %v27368_v61  ;;  %v13107_v33 = vrot.slane %v13093_v12, %v27368_v61 }
 0x832   : > { %v13072_v49 = vcombine.low %v13021_v63, %v13053_v37 }
 0x833   : > { %20574 = vxpose.xlu0.b32.end [2/2] (short) (narrow) %v12937_v3, 8  ;;  %v29072_v3 = vpop.trf.xlu1  ;;  %v23119_v53 = vcombine.low %v23102_v26, %v23110_v42  ;;  %31262 = vst [vmem:[#allocation73_spill] sm:$0xff] %v29093_v18  ;;  %v13054_v20 = vcombine.low %v12989_v51, %v13005_v0  ;;  %v13078_v26 = vcombine.high %v27962_v48, %v31148_v29  ;;  %v31265_v48 = vld [vmem:[#allocation105_spill] sm:$0xff] }
 0x834   : > { %v13073_v42 = vcombine.high %v13021_v63, %v13053_v37  ;;  %v13124_v56 = vcombine.high %v13107_v33, %v31148_v29  ;;  %v13055_v63 = vcombine.high %v12989_v51, %v13005_v0 }
 0x835   : > { %20606 = vxpose.xlu1.b32.end [2/2] (short) (narrow) %v12941_v4, 8  ;;  %v29090_v4 = vpop.trf.xlu0 }
 0x837   : > { %20637 = vxpose.xlu0.b32.start [1/2] (short) (narrow) %v13070_v21, 8  ;;  %v29081_v1 = vpop.trf.xlu1  ;;  %v13092_v21 = vrot.slane %v13078_v26, %v25994_v40  ;;  %v31272_v26 = vld [vmem:[#allocation155_spill] sm:$0xff] }
 0x839   : > { %20669 = vxpose.xlu1.b32.start [1/2] (short) (narrow) %v13071_v22, 8  ;;  %v29096_v22 = vrot.slane %v23119_v53, %v27368_v61  ;;  %v29103_v5 = vpop.trf.xlu0  ;;  %v13062_v53 = vrot.slane %v13054_v20, %v27368_v61  ;;  %v13115_v18 = vrot.slane %v13092_v21, %v27368_v61 }
 0x83b   : > { %20638 = vxpose.xlu0.b32.end [2/2] (short) (narrow) %v13100_v30, 8  ;;  %31263 = vst [vmem:[#allocation116_spill] sm:$0xff] %v29096_v22  ;;  %v29098_v45 = vpop.trf.xlu1  ;;  %v31266_v30 = vld [vmem:[#allocation50_spill] sm:$0xff]  ;;  %v13125_v51 = vcombine.high %v13115_v18, %v31148_v29 }
 0x83c   : > { %31264 = vst [vmem:[#allocation74_spill] sm:$0xff] %v29098_v45  ;;  %v31267_v43 = vcombine.low %v31265_v48, %v31266_v30 }
 0x83d   : > { %20670 = vxpose.xlu1.b32.end [2/2] (short) (narrow) %v13123_v38, 8  ;;  %v29116_v12 = vpop.trf.xlu0  ;;  %v31269_v38 = vld [vmem:[#allocation178_spill] sm:$0xff] }
 0x83e   : > { %v13030_v37 = vrot.slane %v31267_v43, %v27368_v61  ;;  %31268 = vst [vmem:[#allocation117_spill] sm:$0xff] %v29116_v12  ;;  %v13175_v52 = vcombine.low %v31269_v38, %v27481_v35  ;;  %v13069_v12 = vrot.slane %v13055_v63, %v27368_v61 }
 0x83f   : > { %20701 = vxpose.xlu0.b32.start [1/2] (short) (narrow) %v13072_v49, 8  ;;  %v29108_v28 = vpop.trf.xlu1 }
 0x840   : > { %v13074_v20 = vcombine.low %v13030_v37, %v13062_v53  ;;  %v13183_v43 = vrot.slane %v13175_v52, %v25994_v40 }
 0x841   : > { %20733 = vxpose.xlu1.b32.start [1/2] (short) (narrow) %v13073_v42, 8  ;;  %v31271_v42 = vld [vmem:[#allocation204_spill] sm:$0xff]  ;;  %v29125_v22 = vpop.trf.xlu0 }
 0x842   : > { %v13159_v55 = vcombine.low %v31272_v26, %v31271_v42 }
 0x843   : > { %20702 = vxpose.xlu0.b32.end [2/2] (short) (narrow) %v13107_v33, 8  ;;  %v29120_v49 = vpop.trf.xlu1  ;;  %v13075_v33 = vcombine.high %v13030_v37, %v13062_v53  ;;  %v31274_v53 = vcombine.high %v31265_v48, %v31266_v30  ;;  %v13108_v37 = vcombine.high %v13092_v21, %v31148_v29  ;;  %v23137_v48 = vcombine.low %v28812_v9, %v28827_v23  ;;  %v31277_v9 = vld [vmem:[#allocation130_spill] sm:$0xff] }
 0x844   : > { %31270 = vst [vmem:[#allocation206_spill] sm:$0xff] %v29120_v49  ;;  %v13167_v0 = vrot.slane %v13159_v55, %v25994_v40  ;;  %v23145_v21 = vcombine.low %v28834_v47, %v28846_v25  ;;  %v23153_v30 = vcombine.low %v28843_v34, %v28857_v39 }
 0x845   : > { %20734 = vxpose.xlu1.b32.end [2/2] (short) (narrow) %v13124_v56, 8  ;;  %v13037_v56 = vrot.slane %v31274_v53, %v27368_v61  ;;  %v13122_v55 = vrot.slane %v13108_v37, %v27368_v61  ;;  %v13270_v53 = vrot.slane %v27944_v27, %v25994_v40  ;;  %v23144_v25 = vrot.slane %v23137_v48, %v25994_v40 }
 0x846   : > { %v13223_v52 = vcombine.low %v13167_v0, %v13183_v43  ;;  %v23152_v39 = vrot.slane %v23145_v21, %v25994_v40  ;;  %v13176_v37 = vcombine.high %v31269_v38, %v27481_v35 }
 0x847   : > { %20765 = vxpose.xlu0.b32.start [1/2] (short) (narrow) %v13074_v20, 8  ;;  %v29129_v45 = vpop.trf.xlu1  ;;  %v29138_v20 = vpop.trf.xlu0  ;;  %v13077_v49 = vcombine.high %v13037_v56, %v13069_v12 }
 0x848   : > { %31273 = vst [vmem:[#allocation165_spill] sm:$0xff] %v29129_v45 }
 0x849   : > { %20797 = vxpose.xlu1.b32.start [1/2] (short) (narrow) %v13075_v33, 8  ;;  %v13076_v33 = vcombine.low %v13037_v56, %v13069_v12 }
 0x84b   : > { %20766 = vxpose.xlu0.b32.end [2/2] (short) (narrow) %v13115_v18, 8  ;;  %v29140_v63 = vpop.trf.xlu1  ;;  %v29143_v45 = vpop.trf.xlu0  ;;  %v23129_v18 = vcombine.low %v28807_v14, %v28823_v19  ;;  %v13126_v14 = vcombine.high %v13122_v55, %v31148_v29  ;;  %v31276_v19 = vld [vmem:[#allocation102_spill] sm:$0xff] }
 0x84c   : > { %31275 = vst [vmem:[#allocation187_spill] sm:$0xff] %v29140_v63  ;;  %v31278_v23 = vcombine.low %v31276_v19, %v31277_v9 }
 0x84d   : > { %20798 = vxpose.xlu1.b32.end [2/2] (short) (narrow) %v13125_v51, 8  ;;  %v13231_v51 = vrot.slane %v13223_v52, %v27368_v61  ;;  %v23136_v34 = vrot.slane %v23129_v18, %v25994_v40  ;;  %v13224_v52 = vcombine.high %v13167_v0, %v13183_v43  ;;  %v13285_v18 = vrot.slane %v13270_v53, %v27368_v61 }
 0x84e   : > { %v13199_v56 = vrot.slane %v31278_v23, %v27368_v61  ;;  %v13160_v23 = vcombine.high %v31272_v26, %v31271_v42  ;;  %v13278_v0 = vcombine.high %v13270_v53, %v31148_v29  ;;  %v31280_v26 = vcombine.high %v31276_v19, %v31277_v9 }
 0x84f   : > { %20829 = vxpose.xlu0.b32.start [1/2] (short) (narrow) %v13076_v33, 8  ;;  %v29154_v12 = vpop.trf.xlu1  ;;  %v29163_v47 = vpop.trf.xlu0  ;;  %v23161_v21 = vcombine.low %v23136_v34, %v23144_v25  ;;  %v13238_v35 = vrot.slane %v13224_v52, %v27368_v61  ;;  %v13308_v42 = vcombine.high %v13285_v18, %v31148_v29  ;;  %v13263_v53 = vcombine.high %v27944_v27, %v31148_v29  ;;  %v31283_v27 = vld [vmem:[#allocation103_spill] sm:$0xff] }
 0x850   : > { %31279 = vst [vmem:[#allocation142_spill] sm:$0xff] %v29163_v47  ;;  %v13255_v33 = vcombine.low %v13199_v56, %v13231_v51  ;;  %v13256_v47 = vcombine.high %v13199_v56, %v13231_v51  ;;  %v13174_v43 = vrot.slane %v13160_v23, %v25994_v40  ;;  %v13206_v51 = vrot.slane %v31280_v26, %v27368_v61  ;;  %v31284_v23 = vld [vmem:[#allocation131_spill] sm:$0xff] }
 0x851   : > { %20861 = vxpose.xlu1.b32.start [1/2] (short) (narrow) %v13077_v49, 8  ;;  %v23160_v49 = vrot.slane %v23153_v30, %v25994_v40  ;;  %v13190_v30 = vrot.slane %v13176_v37, %v25994_v40  ;;  %v29192_v56 = vrot.slane %v23161_v21, %v27368_v61  ;;  %v13277_v52 = vrot.slane %v13263_v53, %v25994_v40  ;;  %v31288_v53 = vld [vmem:[#allocation157_spill] sm:$0xff] }
 0x852   : > { %v13257_v25 = vcombine.low %v13206_v51, %v13238_v35 }
 0x853   : > { %20830 = vxpose.xlu0.b32.end [2/2] (short) (narrow) %v13122_v55, 8  ;;  %v29171_v55 = vpop.trf.xlu1  ;;  %v29176_v48 = vpop.trf.xlu0  ;;  %v23169_v63 = vcombine.low %v23152_v39, %v23160_v49  ;;  %31281 = vst [vmem:[#allocation75_spill] sm:$0xff] %v29192_v56  ;;  %v13239_v34 = vcombine.low %v13174_v43, %v13190_v30  ;;  %v13258_v39 = vcombine.high %v13206_v51, %v13238_v35 }
 0x854   : > { %v13292_v49 = vrot.slane %v13278_v0, %v27368_v61  ;;  %v13240_v35 = vcombine.high %v13174_v43, %v13190_v30  ;;  %v31286_v0 = vld [vmem:[#allocation180_spill] sm:$0xff]  ;;  %v13300_v37 = vrot.slane %v13277_v52, %v27368_v61 }
 0x855   : > { %20862 = vxpose.xlu1.b32.end [2/2] (short) (narrow) %v13126_v14, 8 }
 0x856   : > { %v13254_v30 = vrot.slane %v13240_v35, %v27368_v61 }
 0x857   : > { %20893 = vxpose.xlu0.b32.start [1/2] (short) (narrow) %v13255_v33, 8  ;;  %v29180_v38 = vpop.trf.xlu1  ;;  %v29189_v14 = vpop.trf.xlu0  ;;  %v13309_v33 = vcombine.high %v13292_v49, %v31148_v29 }
 0x859   : > { %20925 = vxpose.xlu1.b32.start [1/2] (short) (narrow) %v13256_v47, 8  ;;  %v29195_v47 = vrot.slane %v23169_v63, %v27368_v61  ;;  %v13247_v63 = vrot.slane %v13239_v34, %v27368_v61  ;;  %v31287_v34 = vld [vmem:[#allocation20_spill] sm:$0xff] }
 0x85b   : > { %20894 = vxpose.xlu0.b32.end [2/2] (short) (narrow) %v13285_v18, 8  ;;  %31282 = vst [vmem:[#allocation35_spill] sm:$0xff] %v29195_v47  ;;  %v29200_v19 = vpop.trf.xlu1  ;;  %v29202_v9 = vpop.trf.xlu0  ;;  %v31285_v18 = vcombine.low %v31283_v27, %v31284_v23 }
 0x85d   : > { %20926 = vxpose.xlu1.b32.end [2/2] (short) (narrow) %v13308_v42, 8  ;;  %v13215_v21 = vrot.slane %v31285_v18, %v27368_v61  ;;  %v13360_v42 = vcombine.low %v31286_v0, %v27492_v16  ;;  %v31289_v18 = vcombine.high %v31283_v27, %v31284_v23  ;;  %v23187_v27 = vcombine.low %v28874_v44, %v28883_v8  ;;  %v31292_v44 = vld [vmem:[#allocation106_spill] sm:$0xff] }
 0x85e   : > { %v23203_v23 = vcombine.low %v28900_v11, %v28910_v10 }
 0x85f   : > { %20957 = vxpose.xlu0.b32.start [1/2] (short) (narrow) %v13257_v25, 8  ;;  %v13259_v26 = vcombine.low %v13215_v21, %v13247_v63  ;;  %v29215_v51 = vpop.trf.xlu1  ;;  %v29217_v25 = vpop.trf.xlu0  ;;  %v13368_v56 = vrot.slane %v13360_v42, %v25994_v40  ;;  %v13222_v47 = vrot.slane %v31289_v18, %v27368_v61 }
 0x861   : > { %20989 = vxpose.xlu1.b32.start [1/2] (short) (narrow) %v13258_v39, 8  ;;  %v13344_v39 = vcombine.low %v31288_v53, %v31287_v34  ;;  %v13262_v35 = vcombine.high %v13222_v47, %v13254_v30 }
 0x863   : > { %20958 = vxpose.xlu0.b32.end [2/2] (short) (narrow) %v13292_v49, 8  ;;  %v13260_v49 = vcombine.high %v13215_v21, %v13247_v63  ;;  %v13352_v43 = vrot.slane %v13344_v39, %v25994_v40  ;;  %v29231_v63 = vpop.trf.xlu1  ;;  %v29233_v21 = vpop.trf.xlu0 }
 0x864   : > { %31290 = vst [vmem:[#allocation76_spill] sm:$0xff] %v29231_v63 }
 0x865   : > { %20990 = vxpose.xlu1.b32.end [2/2] (short) (narrow) %v13309_v33, 8  ;;  %v13310_v33 = vcombine.high %v13300_v37, %v31148_v29  ;;  %v13408_v42 = vcombine.low %v13352_v43, %v13368_v56 }
 0x867   : > { %21021 = vxpose.xlu0.b32.start [1/2] (short) (narrow) %v13259_v26, 8  ;;  %v13293_v26 = vcombine.high %v13277_v52, %v31148_v29  ;;  %v23195_v52 = vcombine.low %v28892_v62, %v28905_v58  ;;  %v29245_v18 = vpop.trf.xlu1  ;;  %v23194_v58 = vrot.slane %v23187_v27, %v25994_v40 }
 0x869   : > { %21053 = vxpose.xlu1.b32.start [1/2] (short) (narrow) %v13260_v49, 8  ;;  %v13261_v49 = vcombine.low %v13222_v47, %v13254_v30  ;;  %v13307_v39 = vrot.slane %v13293_v26, %v27368_v61  ;;  %v29247_v47 = vpop.trf.xlu0  ;;  %v13455_v30 = vrot.slane %v27953_v46, %v25994_v40  ;;  %v23202_v10 = vrot.slane %v23195_v52, %v25994_v40 }
 0x86a   : > { %31291 = vst [vmem:[#allocation36_spill] sm:$0xff] %v29247_v47  ;;  %v23210_v26 = vrot.slane %v23203_v23, %v25994_v40 }
 0x86b   : > { %21022 = vxpose.xlu0.b32.end [2/2] (short) (narrow) %v13300_v37, 8  ;;  %v23179_v37 = vcombine.low %v28866_v24, %v28879_v13  ;;  %v13311_v24 = vcombine.high %v13307_v39, %v31148_v29  ;;  %v31293_v13 = vld [vmem:[#allocation97_spill] sm:$0xff] }
 0x86c   : > { %v31294_v8 = vcombine.low %v31292_v44, %v31293_v13  ;;  %v23219_v63 = vcombine.low %v23202_v10, %v23210_v26 }
 0x86d   : > { %21054 = vxpose.xlu1.b32.end [2/2] (short) (narrow) %v13310_v33, 8  ;;  %v13416_v33 = vrot.slane %v13408_v42, %v27368_v61  ;;  %v23186_v11 = vrot.slane %v23179_v37, %v25994_v40  ;;  %v13361_v42 = vcombine.high %v31286_v0, %v27492_v16  ;;  %v29265_v37 = vpop.trf.xlu1  ;;  %v13463_v0 = vcombine.high %v13455_v30, %v31148_v29 }
 0x86e   : > { %v13384_v62 = vrot.slane %v31294_v8, %v27368_v61  ;;  %v13470_v8 = vrot.slane %v13455_v30, %v27368_v61 }
 0x86f   : > { %21085 = vxpose.xlu0.b32.start [1/2] (short) (narrow) %v13261_v49, 8  ;;  %v13409_v49 = vcombine.high %v13352_v43, %v13368_v56  ;;  %v29267_v27 = vpop.trf.xlu0  ;;  %v23211_v52 = vcombine.low %v23186_v11, %v23194_v58  ;;  %v13375_v23 = vrot.slane %v13361_v42, %v25994_v40  ;;  %v13448_v58 = vcombine.high %v27953_v46, %v31148_v29 }
 0x870   : > { %v13441_v47 = vcombine.high %v13384_v62, %v13416_v33 }
 0x871   : > { %21117 = vxpose.xlu1.b32.start [1/2] (short) (narrow) %v13262_v35, 8  ;;  %v13440_v35 = vcombine.low %v13384_v62, %v13416_v33  ;;  %v13423_v16 = vrot.slane %v13409_v49, %v27368_v61  ;;  %v29279_v33 = vrot.slane %v23211_v52, %v27368_v61  ;;  %v29284_v11 = vpop.trf.xlu1  ;;  %v13462_v26 = vrot.slane %v13448_v58, %v25994_v40  ;;  %v31299_v49 = vld [vmem:[#allocation107_spill] sm:$0xff] }
 0x873   : > { %21086 = vxpose.xlu0.b32.end [2/2] (short) (narrow) %v13307_v39, 8  ;;  %v13345_v39 = vcombine.high %v31288_v53, %v31287_v34  ;;  %v13493_v34 = vcombine.high %v13470_v8, %v31148_v29  ;;  %v31295_v53 = vcombine.high %v31292_v44, %v31293_v13  ;;  %31296 = vst [vmem:[#allocation207_spill] sm:$0xff] %v29279_v33  ;;  %v31308_v13 = vld [vmem:[#allocation181_spill] sm:$0xff] }
 0x874   : > { %v13477_v44 = vrot.slane %v13463_v0, %v27368_v61 }
 0x875   : > { %21118 = vxpose.xlu1.b32.end [2/2] (short) (narrow) %v13311_v24, 8  ;;  %v13359_v56 = vrot.slane %v13345_v39, %v25994_v40  ;;  %v13391_v43 = vrot.slane %v31295_v53, %v27368_v61  ;;  %v29282_v24 = vrot.slane %v23219_v63, %v27368_v61  ;;  %v31305_v53 = vld [vmem:[#allocation34_spill] sm:$0xff] }
 0x876   : > { %v13494_v42 = vcombine.high %v13477_v44, %v31148_v29 }
 0x877   : > { %21149 = vxpose.xlu0.b32.start [1/2] (short) (narrow) %v13440_v35, 8  ;;  %31297 = vst [vmem:[#allocation167_spill] sm:$0xff] %v29282_v24  ;;  %v13442_v62 = vcombine.low %v13391_v43, %v13423_v16  ;;  %v29286_v30 = vpop.trf.xlu0  ;;  %v13443_v10 = vcombine.high %v13391_v43, %v13423_v16  ;;  %v31300_v35 = vld [vmem:[#allocation132_spill] sm:$0xff]  ;;  %v31309_v24 = vld [vmem:[#allocation201_spill] sm:$0xff] }
 0x878   : > { %31298 = vst [vmem:[#allocation189_spill] sm:$0xff] %v29286_v30  ;;  %v31301_v39 = vcombine.low %v31299_v49, %v31300_v35  ;;  %v31303_v16 = vld [vmem:[#allocation72_spill] sm:$0xff] }
 0x879   : > { %21181 = vxpose.xlu1.b32.start [1/2] (short) (narrow) %v13441_v47, 8  ;;  %v13424_v47 = vcombine.low %v13359_v56, %v13375_v23  ;;  %v23229_v0 = vcombine.low %v31303_v16, %v28927_v7  ;;  %v13485_v16 = vrot.slane %v13462_v26, %v27368_v61 }
 0x87a   : > { %v13400_v46 = vrot.slane %v31301_v39, %v27368_v61 }
 0x87b   : > { %21150 = vxpose.xlu0.b32.end [2/2] (short) (narrow) %v13470_v8, 8  ;;  %v13432_v63 = vrot.slane %v13424_v47, %v27368_v61  ;;  %v29300_v8 = vpop.trf.xlu1  ;;  %v23245_v47 = vcombine.low %v28940_v2, %v28945_v17 }
 0x87c   : > { %31302 = vst [vmem:[#allocation144_spill] sm:$0xff] %v29300_v8  ;;  %v31310_v8 = vld [vmem:[#allocation158_spill] sm:$0xff] }
 0x87d   : > { %21182 = vxpose.xlu1.b32.end [2/2] (short) (narrow) %v13493_v34, 8  ;;  %v31304_v34 = vld [vmem:[#allocation213_spill] sm:$0xff]  ;;  %v13444_v33 = vcombine.low %v13400_v46, %v13432_v63  ;;  %v13529_v30 = vcombine.low %v31310_v8, %v31309_v24  ;;  %v13445_v7 = vcombine.high %v13400_v46, %v13432_v63  ;;  %v23252_v2 = vrot.slane %v23245_v47, %v25994_v40 }
 0x87e   : > { %v23237_v43 = vcombine.low %v31305_v53, %v31304_v34  ;;  %v23236_v34 = vrot.slane %v23229_v0, %v25994_v40  ;;  %v13495_v63 = vcombine.high %v13485_v16, %v31148_v29  ;;  %v31312_v46 = vcombine.high %v31299_v49, %v31300_v35 }
 0x87f   : > { %21213 = vxpose.xlu0.b32.start [1/2] (short) (narrow) %v13442_v62, 8  ;;  %v29302_v52 = vpop.trf.xlu0  ;;  %v31306_v62 = vld [vmem:[#allocation162_spill] sm:$0xff] }
 0x880   : > { %v23253_v58 = vcombine.low %v31306_v62, %v28956_v36  ;;  %v23244_v17 = vrot.slane %v23237_v43, %v25994_v40  ;;  %v13407_v0 = vrot.slane %v31312_v46, %v27368_v61  ;;  %v13478_v43 = vcombine.high %v13462_v26, %v31148_v29 }
 0x881   : > { %21245 = vxpose.xlu1.b32.start [1/2] (short) (narrow) %v13443_v10, 8  ;;  %v13425_v10 = vcombine.high %v13359_v56, %v13375_v23 }
 0x882   : > { %v23260_v36 = vrot.slane %v23253_v58, %v25994_v40  ;;  %v23261_v47 = vcombine.low %v23236_v34, %v23244_v17  ;;  %v31314_v34 = vld [vmem:[#allocation57_spill] sm:$0xff] }
 0x883   : > { %21214 = vxpose.xlu0.b32.end [2/2] (short) (narrow) %v13477_v44, 8  ;;  %v31307_v44 = vld [vmem:[#allocation215_spill] sm:$0xff]  ;;  %v13439_v56 = vrot.slane %v13425_v10, %v27368_v61  ;;  %v13640_v17 = vrot.slane %v31314_v34, %v25994_v40 }
 0x884   : > { %v13545_v39 = vcombine.low %v31308_v13, %v31307_v44  ;;  %v23269_v62 = vcombine.low %v23252_v2, %v23260_v36  ;;  %v31315_v36 = vld [vmem:[#allocation108_spill] sm:$0xff] }
 0x885   : > { %21246 = vxpose.xlu1.b32.end [2/2] (short) (narrow) %v13494_v42, 8  ;;  %v29323_v42 = vpop.trf.xlu1  ;;  %v13446_v10 = vcombine.low %v13407_v0, %v13439_v56 }
 0x886   : > { %v13553_v23 = vrot.slane %v13545_v39, %v25994_v40  ;;  %31311 = vst [vmem:[#allocation79_spill] sm:$0xff] %v29323_v42  ;;  %v13447_v39 = vcombine.high %v13407_v0, %v13439_v56  ;;  %v29343_v49 = vrot.slane %v23269_v62, %v27368_v61  ;;  %v31316_v56 = vld [vmem:[#allocation51_spill] sm:$0xff]  ;;  %v31318_v0 = vld [vmem:[#allocation185_spill] sm:$0xff]  ;;  %v23295_v62 = vcombine.low %v28991_v41, %v29004_v57 }
 0x887   : > { %21277 = vxpose.xlu0.b32.start [1/2] (short) (narrow) %v13444_v33, 8  ;;  %v29325_v53 = vpop.trf.xlu0  ;;  %v13537_v33 = vrot.slane %v13529_v30, %v25994_v40 }
 0x889   : > { %21309 = vxpose.xlu1.b32.start [1/2] (short) (narrow) %v13445_v7, 8  ;;  %v13593_v58 = vcombine.low %v13537_v33, %v13553_v23  ;;  %v13492_v7 = vrot.slane %v13478_v43, %v27368_v61  ;;  %v29335_v30 = vpop.trf.xlu1  ;;  %v23279_v43 = vcombine.low %v31318_v0, %v28978_v31  ;;  %v13594_v26 = vcombine.high %v13537_v33, %v13553_v23 }
 0x88b   : > { %21278 = vxpose.xlu0.b32.end [2/2] (short) (narrow) %v13485_v16, 8  ;;  %v29340_v16 = vrot.slane %v23261_v47, %v27368_v61  ;;  %v13601_v35 = vrot.slane %v13593_v58, %v27368_v61  ;;  %v13496_v2 = vcombine.high %v13492_v7, %v31148_v29  ;;  %v23287_v47 = vcombine.low %v28973_v15, %v28982_v60  ;;  %v31319_v58 = vld [vmem:[#allocation64_spill] sm:$0xff] }
 0x88c   : > { %v13530_v15 = vcombine.high %v31310_v8, %v31309_v24  ;;  %v13655_v60 = vrot.slane %v13640_v17, %v27368_v61  ;;  %v23286_v41 = vrot.slane %v23279_v43, %v25994_v40  ;;  %v13608_v23 = vrot.slane %v13594_v26, %v27368_v61 }
 0x88d   : > { %21310 = vxpose.xlu1.b32.end [2/2] (short) (narrow) %v13495_v63, 8  ;;  %v31317_v63 = vcombine.low %v31315_v36, %v31316_v56  ;;  %v23294_v57 = vrot.slane %v23287_v47, %v25994_v40  ;;  %v13648_v8 = vcombine.high %v13640_v17, %v31148_v29  ;;  %v13633_v26 = vcombine.high %v31314_v34, %v31148_v29 }
 0x88e   : > { %v13544_v24 = vrot.slane %v13530_v15, %v25994_v40 }
 0x88f   : > { %21341 = vxpose.xlu0.b32.start [1/2] (short) (narrow) %v13446_v10, 8  ;;  %v29337_v42 = vpop.trf.xlu0  ;;  %v13569_v46 = vrot.slane %v31317_v63, %v27368_v61  ;;  %v23303_v10 = vcombine.low %v31319_v58, %v29009_v6  ;;  %v23302_v6 = vrot.slane %v23295_v62, %v25994_v40  ;;  %v23311_v43 = vcombine.low %v23286_v41, %v23294_v57  ;;  %v31323_v41 = vld [vmem:[#allocation52_spill] sm:$0xff] }
 0x890   : > { %31313 = vst [vmem:[#allocation37_spill] sm:$0xff] %v29337_v42  ;;  %v13662_v17 = vrot.slane %v13648_v8, %v27368_v61 }
 0x891   : > { %21373 = vxpose.xlu1.b32.start [1/2] (short) (narrow) %v13447_v39, 8  ;;  %v13625_v63 = vcombine.low %v13569_v46, %v13601_v35  ;;  %v29367_v42 = vpop.trf.xlu1  ;;  %v13626_v31 = vcombine.high %v13569_v46, %v13601_v35  ;;  %v13678_v35 = vcombine.high %v13655_v60, %v31148_v29 }
 0x892   : > { %v13679_v8 = vcombine.high %v13662_v17, %v31148_v29 }
 0x893   : > { %21342 = vxpose.xlu0.b32.end [2/2] (short) (narrow) %v13492_v7, 8  ;;  %v13546_v7 = vcombine.high %v31308_v13, %v31307_v44  ;;  %v23310_v13 = vrot.slane %v23303_v10, %v25994_v40 }
 0x895   : > { %21374 = vxpose.xlu1.b32.end [2/2] (short) (narrow) %v13496_v2, 8  ;;  %v13560_v44 = vrot.slane %v13546_v7, %v25994_v40  ;;  %v31320_v2 = vcombine.high %v31315_v36, %v31316_v56  ;;  %v23319_v47 = vcombine.low %v23302_v6, %v23310_v13 }
 0x897   : > { %21405 = vxpose.xlu0.b32.start [1/2] (short) (narrow) %v13625_v63, 8  ;;  %v20397_v33 = vpop.trf.xlu0  ;;  %v13576_v46 = vrot.slane %v31320_v2, %v27368_v61  ;;  %v13609_v62 = vcombine.low %v13544_v24, %v13560_v44  ;;  %v29389_v63 = vrot.slane %v23311_v43, %v27368_v61  ;;  %v29392_v36 = vrot.slane %v23319_v47, %v27368_v61  ;;  %v31328_v43 = vld [vmem:[#allocation115_spill] sm:$0xff] }
 0x899   : > { %21437 = vxpose.xlu1.b32.start [1/2] (short) (narrow) %v13626_v31, 8  ;;  %v20429_v0 = vpop.trf.xlu1  ;;  %v13627_v58 = vcombine.low %v13576_v46, %v13608_v23  ;;  %v13628_v10 = vcombine.high %v13576_v46, %v13608_v23  ;;  %31321 = vst [vmem:[#allocation80_spill] sm:$0xff] %v29389_v63  ;;  %v13617_v15 = vrot.slane %v13609_v62, %v27368_v61  ;;  %v31327_v46 = vld [vmem:[#allocation164_spill] sm:$0xff] }
 0x89a   : > { %v13647_v23 = vrot.slane %v13633_v26, %v25994_v40  ;;  %v23337_v47 = vcombine.low %v31328_v43, %v31327_v46  ;;  %v23345_v62 = vcombine.low %v29039_v54, %v29044_v50  ;;  %v13610_v26 = vcombine.high %v13544_v24, %v13560_v44  ;;  %v31333_v50 = vld [vmem:[#allocation160_spill] sm:$0xff] }
 0x89b   : > { %21406 = vxpose.xlu0.b32.end [2/2] (short) (narrow) %v13655_v60, 8  ;;  %v31322_v60 = vld [vmem:[#allocation109_spill] sm:$0xff] }
 0x89c   : > { %v31324_v34 = vcombine.low %v31322_v60, %v31323_v41  ;;  %v23344_v43 = vrot.slane %v23337_v47, %v25994_v40  ;;  %v23352_v44 = vrot.slane %v23345_v62, %v25994_v40  ;;  %v13663_v47 = vcombine.high %v13647_v23, %v31148_v29 }
 0x89d   : > { %21438 = vxpose.xlu1.b32.end [2/2] (short) (narrow) %v13678_v35, 8  ;;  %v31325_v35 = vld [vmem:[#allocation216_spill] sm:$0xff] }
 0x89e   : > { %v13585_v57 = vrot.slane %v31324_v34, %v27368_v61 }
 0x89f   : > { %21469 = vxpose.xlu0.b32.start [1/2] (short) (narrow) %v13627_v58, 8  ;;  %v20461_v7 = vpop.trf.xlu0  ;;  %v31329_v58 = vld [vmem:[#allocation188_spill] sm:$0xff] }
 0x8a0   : > { %v23629_v56 = vcombine.low %v20397_v33, %v20461_v7  ;;  %v31326_v33 = vld [vmem:[#allocation70_spill] sm:$0xff]  ;;  %v13629_v34 = vcombine.low %v13585_v57, %v13617_v15 }
 0x8a1   : > { %21501 = vxpose.xlu1.b32.start [1/2] (short) (narrow) %v13628_v10, 8  ;;  %v20493_v31 = vpop.trf.xlu1  ;;  %v23329_v2 = vcombine.low %v31326_v33, %v31325_v35  ;;  %v23353_v10 = vcombine.low %v31329_v58, %v29055_v32  ;;  %v31332_v33 = vld [vmem:[#allocation202_spill] sm:$0xff]  ;;  %v13630_v32 = vcombine.high %v13585_v57, %v13617_v15  ;;  %v13624_v58 = vrot.slane %v13610_v26, %v27368_v61 }
 0x8a2   : > { %v29400_v6 = vrot.slane %v23629_v56, %v25994_v40  ;;  %v23637_v13 = vcombine.low %v20429_v0, %v20493_v31  ;;  %v31331_v56 = vld [vmem:[#allocation183_spill] sm:$0xff]  ;;  %v13714_v54 = vcombine.low %v31333_v50, %v31332_v33  ;;  %v31334_v57 = vcombine.high %v31322_v60, %v31323_v41 }
 0x8a3   : > { %21470 = vxpose.xlu0.b32.end [2/2] (short) (narrow) %v13662_v17, 8  ;;  %v31330_v17 = vld [vmem:[#allocation217_spill] sm:$0xff]  ;;  %v23336_v46 = vrot.slane %v23329_v2, %v25994_v40  ;;  %v23360_v24 = vrot.slane %v23353_v10, %v25994_v40 }
 0x8a4   : > { %v29413_v7 = vrot.slane %v23637_v13, %v25994_v40  ;;  %v13730_v31 = vcombine.low %v31331_v56, %v31330_v17  ;;  %v13670_v13 = vrot.slane %v13647_v23, %v27368_v61  ;;  %v13722_v39 = vrot.slane %v13714_v54, %v25994_v40 }
 0x8a5   : > { %21502 = vxpose.xlu1.b32.end [2/2] (short) (narrow) %v13679_v8, 8  ;;  %v13592_v2 = vrot.slane %v31334_v57, %v27368_v61  ;;  %v23361_v10 = vcombine.low %v23336_v46, %v23344_v43  ;;  %v13677_v54 = vrot.slane %v13663_v47, %v27368_v61  ;;  %v31335_v46 = vld [vmem:[#allocation112_spill] sm:$0xff]  ;;  %v31336_v43 = vld [vmem:[#allocation53_spill] sm:$0xff]  ;;  %v31338_v57 = vld [vmem:[#allocation58_spill] sm:$0xff] }
 0x8a6   : > { %v13738_v8 = vrot.slane %v13730_v31, %v25994_v40  ;;  %v13680_v15 = vcombine.high %v13670_v13, %v31148_v29 }
 0x8a7   : > { %21533 = vxpose.xlu0.b32.start [1/2] (short) (narrow) %v13629_v34, 8  ;;  %v20525_v0 = vpop.trf.xlu0  ;;  %v23369_v34 = vcombine.low %v23352_v44, %v23360_v24  ;;  %v13632_v26 = vcombine.high %v13592_v2, %v13624_v58  ;;  %v31337_v44 = vcombine.low %v31335_v46, %v31336_v43  ;;  %v13681_v47 = vcombine.high %v13677_v54, %v31148_v29 }
 0x8a8   : > { %v13778_v31 = vcombine.low %v13722_v39, %v13738_v8 }
 0x8a9   : > { %21565 = vxpose.xlu1.b32.start [1/2] (short) (narrow) %v13630_v32, 8  ;;  %v20557_v62 = vpop.trf.xlu1  ;;  %v13631_v32 = vcombine.low %v13592_v2, %v13624_v58  ;;  %v29442_v63 = vrot.slane %v23369_v34, %v27368_v61  ;;  %v13754_v24 = vrot.slane %v31337_v44, %v27368_v61  ;;  %v13825_v2 = vrot.slane %v31338_v57, %v25994_v40 }
 0x8aa   : > { %v13786_v41 = vrot.slane %v13778_v31, %v27368_v61  ;;  %v23395_v34 = vcombine.low %v29090_v4, %v29103_v5  ;;  %v31340_v31 = vld [vmem:[#allocation74_spill] sm:$0xff] }
 0x8ab   : > { %21534 = vxpose.xlu0.b32.end [2/2] (short) (narrow) %v13670_v13, 8  ;;  %v29439_v13 = vrot.slane %v23361_v10, %v27368_v61  ;;  %v23387_v10 = vcombine.low %v29072_v3, %v29081_v1  ;;  %v13715_v1 = vcombine.high %v31333_v50, %v31332_v33  ;;  %v13840_v5 = vrot.slane %v13825_v2, %v27368_v61 }
 0x8ac   : > { %v13811_v4 = vcombine.high %v13754_v24, %v13786_v41  ;;  %v23402_v44 = vrot.slane %v23395_v34, %v25994_v40  ;;  %v13833_v33 = vcombine.high %v13825_v2, %v31148_v29 }
 0x8ad   : > { %21566 = vxpose.xlu1.b32.end [2/2] (short) (narrow) %v13680_v15, 8  ;;  %v13863_v50 = vcombine.high %v13840_v5, %v31148_v29 }
 0x8ae   : > { %v13847_v2 = vrot.slane %v13833_v33, %v27368_v61 }
 0x8af   : > { %21597 = vxpose.xlu0.b32.start [1/2] (short) (narrow) %v13631_v32, 8  ;;  %v20589_v35 = vpop.trf.xlu0  ;;  %v23403_v32 = vcombine.low %v31340_v31, %v29108_v28 }
 0x8b0   : > { %v23645_v60 = vcombine.low %v20525_v0, %v20589_v35  ;;  %v31339_v0 = vld [vmem:[#allocation141_spill] sm:$0xff] }
 0x8b1   : > { %21629 = vxpose.xlu1.b32.start [1/2] (short) (narrow) %v13632_v26, 8  ;;  %v20621_v23 = vpop.trf.xlu1  ;;  %v23379_v35 = vcombine.low %v31339_v0, %v29077_v59  ;;  %v13810_v59 = vcombine.low %v13754_v24, %v13786_v41  ;;  %v31341_v41 = vcombine.high %v31335_v46, %v31336_v43 }
 0x8b2   : > { %v29450_v58 = vrot.slane %v23645_v60, %v25994_v40  ;;  %v23653_v15 = vcombine.low %v20557_v62, %v20621_v23  ;;  %v13779_v60 = vcombine.high %v13722_v39, %v13738_v8  ;;  %v23394_v23 = vrot.slane %v23387_v10, %v25994_v40 }
 0x8b3   : > { %21598 = vxpose.xlu0.b32.end [2/2] (short) (narrow) %v13677_v54, 8  ;;  %v13731_v54 = vcombine.high %v31331_v56, %v31330_v17  ;;  %v23386_v28 = vrot.slane %v23379_v35, %v25994_v40  ;;  %v23410_v39 = vrot.slane %v23403_v32, %v25994_v40  ;;  %v13729_v8 = vrot.slane %v13715_v1, %v25994_v40 }
 0x8b4   : > { %v29464_v62 = vrot.slane %v23653_v15, %v25994_v40  ;;  %v13793_v56 = vrot.slane %v13779_v60, %v27368_v61  ;;  %v13761_v24 = vrot.slane %v31341_v41, %v27368_v61  ;;  %v13818_v10 = vcombine.high %v31338_v57, %v31148_v29  ;;  %v31342_v57 = vld [vmem:[#allocation25_spill] sm:$0xff]  ;;  %v31343_v60 = vld [vmem:[#allocation54_spill] sm:$0xff] }
 0x8b5   : > { %21630 = vxpose.xlu1.b32.end [2/2] (short) (narrow) %v13681_v47, 8  ;;  %v13745_v17 = vrot.slane %v13731_v54, %v25994_v40  ;;  %v23411_v15 = vcombine.low %v23386_v28, %v23394_v23  ;;  %v23419_v47 = vcombine.low %v23402_v44, %v23410_v39  ;;  %v13864_v54 = vcombine.high %v13847_v2, %v31148_v29  ;;  %v31346_v28 = vld [vmem:[#allocation165_spill] sm:$0xff]  ;;  %v31347_v23 = vld [vmem:[#allocation206_spill] sm:$0xff] }
 0x8b6   : > { %v23669_v3 = vcombine.low %v29450_v58, %v29464_v62  ;;  %v13812_v35 = vcombine.low %v13761_v24, %v13793_v56  ;;  %v13813_v34 = vcombine.high %v13761_v24, %v13793_v56  ;;  %v13832_v43 = vrot.slane %v13818_v10, %v25994_v40  ;;  %v31348_v56 = vld [vmem:[#allocation187_spill] sm:$0xff]  ;;  %v31349_v41 = vld [vmem:[#allocation22_spill] sm:$0xff] }
 0x8b7   : > { %21661 = vxpose.xlu0.b32.start [1/2] (short) (narrow) %v13810_v59, 8  ;;  %v13794_v0 = vcombine.low %v13729_v8, %v13745_v17  ;;  %v29492_v31 = vrot.slane %v23411_v15, %v27368_v61  ;;  %v29495_v32 = vrot.slane %v23419_v47, %v27368_v61  ;;  %v31344_v59 = vcombine.low %v31342_v57, %v31343_v60  ;;  %v31350_v24 = vld [vmem:[#allocation182_spill] sm:$0xff] }
 0x8b8   : > { %v23437_v44 = vcombine.low %v31347_v23, %v31346_v28  ;;  %v23445_v39 = vcombine.low %v29138_v20, %v29143_v45  ;;  %v23453_v33 = vcombine.low %v31348_v56, %v29154_v12  ;;  %v13915_v15 = vcombine.low %v31350_v24, %v31349_v41 }
 0x8b9   : > { %21693 = vxpose.xlu1.b32.start [1/2] (short) (narrow) %v13811_v4, 8  ;;  %v13802_v46 = vrot.slane %v13794_v0, %v27368_v61  ;;  %v13770_v1 = vrot.slane %v31344_v59, %v27368_v61  ;;  %v31345_v4 = vld [vmem:[#allocation117_spill] sm:$0xff]  ;;  %v13795_v47 = vcombine.high %v13729_v8, %v13745_v17 }
 0x8ba   : > { %v23444_v20 = vrot.slane %v23437_v44, %v25994_v40  ;;  %v23452_v12 = vrot.slane %v23445_v39, %v25994_v40  ;;  %v23460_v59 = vrot.slane %v23453_v33, %v25994_v40 }
 0x8bb   : > { %21662 = vxpose.xlu0.b32.end [2/2] (short) (narrow) %v13840_v5, 8  ;;  %v23429_v5 = vcombine.low %v31345_v4, %v29125_v22  ;;  %v13814_v0 = vcombine.low %v13770_v1, %v13802_v46  ;;  %v31352_v22 = vld [vmem:[#allocation159_spill] sm:$0xff]  ;;  %v13923_v4 = vrot.slane %v13915_v15, %v25994_v40  ;;  %v13809_v17 = vrot.slane %v13795_v47, %v27368_v61 }
 0x8bc   : > { %v23469_v23 = vcombine.low %v23452_v12, %v23460_v59  ;;  %v31359_v59 = vcombine.low %v29400_v6, %v29413_v7  ;;  %v13916_v7 = vcombine.high %v31350_v24, %v31349_v41 }
 0x8bd   : > { %21694 = vxpose.xlu1.b32.end [2/2] (short) (narrow) %v13863_v50, 8  ;;  %v23436_v45 = vrot.slane %v23429_v5, %v25994_v40  ;;  %v13848_v5 = vcombine.high %v13832_v43, %v31148_v29 }
 0x8be   : > { %v29537_v47 = vrot.slane %v23469_v23, %v27368_v61  ;;  %v13930_v41 = vrot.slane %v13916_v7, %v25994_v40 }
 0x8bf   : > { %21725 = vxpose.xlu0.b32.start [1/2] (short) (narrow) %v13812_v35, 8  ;;  %v31351_v35 = vld [vmem:[#allocation55_spill] sm:$0xff]  ;;  %v23461_v28 = vcombine.low %v23436_v45, %v23444_v20  ;;  %v13862_v33 = vrot.slane %v13848_v5, %v27368_v61  ;;  %v31358_v20 = vld [vmem:[#allocation142_spill] sm:$0xff] }
 0x8c0   : > { %v13899_v10 = vcombine.low %v31352_v22, %v31351_v35  ;;  %v23479_v12 = vcombine.low %v31358_v20, %v29176_v48  ;;  %v23503_v48 = vcombine.low %v29200_v19, %v29215_v51  ;;  %v13900_v62 = vcombine.high %v31352_v22, %v31351_v35 }
 0x8c1   : > { %21757 = vxpose.xlu1.b32.start [1/2] (short) (narrow) %v13813_v34, 8  ;;  %v13815_v34 = vcombine.high %v13770_v1, %v13802_v46  ;;  %v29534_v15 = vrot.slane %v23461_v28, %v27368_v61  ;;  %v13866_v45 = vcombine.high %v13862_v33, %v31148_v29 }
 0x8c2   : > { %v13907_v8 = vrot.slane %v13899_v10, %v25994_v40  ;;  %v31356_v10 = vld [vmem:[#allocation133_spill] sm:$0xff]  ;;  %v23486_v19 = vrot.slane %v23479_v12, %v25994_v40  ;;  %v13914_v35 = vrot.slane %v13900_v62, %v25994_v40  ;;  %v31361_v12 = vld [vmem:[#allocation23_spill] sm:$0xff]  ;;  %v31365_v62 = vld [vmem:[#allocation36_spill] sm:$0xff] }
 0x8c3   : > { %21726 = vxpose.xlu0.b32.end [2/2] (short) (narrow) %v13847_v2, 8  ;;  %v13855_v2 = vrot.slane %v13832_v43, %v27368_v61  ;;  %v31354_v43 = vld [vmem:[#allocation110_spill] sm:$0xff]  ;;  %v23478_v26 = vcombine.high %v29534_v15, %v29537_v47 }
 0x8c4   : > { %v13963_v44 = vcombine.low %v13907_v8, %v13923_v4  ;;  %v13964_v5 = vcombine.high %v13907_v8, %v13923_v4 }
 0x8c5   : > { %21758 = vxpose.xlu1.b32.end [2/2] (short) (narrow) %v13864_v54, 8  ;;  %v13865_v46 = vcombine.high %v13855_v2, %v31148_v29  ;;  %v31353_v54 = vcombine.high %v31342_v57, %v31343_v60  ;;  %v14010_v60 = vrot.slane %v31354_v43, %v25994_v40 }
 0x8c6   : > { %v13971_v57 = vrot.slane %v13963_v44, %v27368_v61  ;;  %v13978_v24 = vrot.slane %v13964_v5, %v27368_v61  ;;  %v31364_v5 = vld [vmem:[#allocation76_spill] sm:$0xff] }
 0x8c7   : > { %21789 = vxpose.xlu0.b32.start [1/2] (short) (narrow) %v13814_v0, 8  ;;  %v13777_v1 = vrot.slane %v31353_v54, %v27368_v61  ;;  %v31355_v0 = vld [vmem:[#allocation21_spill] sm:$0xff]  ;;  %v23487_v54 = vcombine.low %v29171_v55, %v29180_v38  ;;  %v14025_v38 = vrot.slane %v14010_v60, %v27368_v61  ;;  %v14018_v22 = vcombine.high %v14010_v60, %v31148_v29 }
 0x8c8   : > { %v31360_v8 = vcombine.high %v31355_v0, %v31356_v10 }
 0x8c9   : > { %21821 = vxpose.xlu1.b32.start [1/2] (short) (narrow) %v13815_v34, 8  ;;  %v13816_v39 = vcombine.low %v13777_v1, %v13809_v17  ;;  %v13817_v56 = vcombine.high %v13777_v1, %v13809_v17  ;;  %v31357_v34 = vcombine.low %v31355_v0, %v31356_v10  ;;  %v29553_v17 = vrot.slane %v31359_v59, %v27368_v61  ;;  %v31362_v59 = vld [vmem:[#allocation134_spill] sm:$0xff] }
 0x8ca   : > { %v23495_v1 = vcombine.low %v29189_v14, %v29202_v9  ;;  %v23494_v9 = vrot.slane %v23487_v54, %v25994_v40  ;;  %v14048_v4 = vcombine.high %v14025_v38, %v31148_v29  ;;  %v13946_v28 = vrot.slane %v31360_v8, %v27368_v61 }
 0x8cb   : > { %21790 = vxpose.xlu0.b32.end [2/2] (short) (narrow) %v13855_v2, 8  ;;  %v13939_v2 = vrot.slane %v31357_v34, %v27368_v61  ;;  %v14032_v34 = vrot.slane %v14018_v22, %v27368_v61  ;;  %v31363_v54 = vcombine.low %v31361_v12, %v31362_v59  ;;  %v31368_v22 = vld [vmem:[#allocation205_spill] sm:$0xff] }
 0x8cc   : > { %v23502_v51 = vrot.slane %v23495_v1, %v25994_v40  ;;  %v23511_v23 = vcombine.low %v23486_v19, %v23494_v9  ;;  %v13998_v60 = vcombine.high %v13946_v28, %v13978_v24  ;;  %v13980_v9 = vcombine.high %v13914_v35, %v13930_v41  ;;  %v31398_v19 = vld [vmem:[#allocation63_spill] sm:$0xff] }
 0x8cd   : > { %21822 = vxpose.xlu1.b32.end [2/2] (short) (narrow) %v13865_v46, 8  ;;  %v29559_v46 = vrot.slane %v23669_v3, %v27368_v61  ;;  %v13995_v58 = vcombine.low %v13939_v2, %v13971_v57  ;;  %v13996_v55 = vcombine.high %v13939_v2, %v13971_v57  ;;  %v23510_v3 = vrot.slane %v23503_v48, %v25994_v40  ;;  %v29594_v2 = vpop.trf.xlu1 }
 0x8ce   : > { %v14003_v57 = vcombine.high %v31354_v43, %v31148_v29  ;;  %v14049_v43 = vcombine.high %v14032_v34, %v31148_v29  ;;  %v13955_v1 = vrot.slane %v31363_v54, %v27368_v61  ;;  %v23529_v48 = vcombine.low %v29217_v25, %v29233_v21 }
 0x8cf   : > { %21853 = vxpose.xlu0.b32.start [1/2] (short) (narrow) %v13816_v39, 8  ;;  %v23519_v44 = vcombine.low %v23502_v51, %v23510_v3  ;;  %v13979_v39 = vcombine.low %v13914_v35, %v13930_v41  ;;  %v31366_v51 = vld [vmem:[#allocation221_spill] sm:$0xff]  ;;  %v31367_v3 = vld [vmem:[#allocation184_spill] sm:$0xff] }
 0x8d0   : > { %v14017_v20 = vrot.slane %v14003_v57, %v25994_v40  ;;  %v31370_v57 = vcombine.high %v31361_v12, %v31362_v59 }
 0x8d1   : > { %21885 = vxpose.xlu1.b32.start [1/2] (short) (narrow) %v13817_v56, 8  ;;  %v13997_v56 = vcombine.low %v13946_v28, %v13978_v24  ;;  %v29600_v0 = vrot.slane %v23519_v44, %v27368_v61  ;;  %v13987_v10 = vrot.slane %v13979_v39, %v27368_v61  ;;  %v14100_v24 = vcombine.low %v31367_v3, %v31366_v51  ;;  %v29623_v21 = vpop.trf.xlu1 }
 0x8d3   : > { %21854 = vxpose.xlu0.b32.end [2/2] (short) (narrow) %v13862_v33, 8  ;;  %v29589_v33 = vpop.trf.xlu0  ;;  %v13999_v25 = vcombine.low %v13955_v1, %v13987_v10  ;;  %v14000_v8 = vcombine.high %v13955_v1, %v13987_v10  ;;  %v14108_v28 = vrot.slane %v14100_v24, %v25994_v40 }
 0x8d5   : > { %21886 = vxpose.xlu1.b32.end [2/2] (short) (narrow) %v13866_v45, 8  ;;  %v29597_v45 = vrot.slane %v23511_v23, %v27368_v61  ;;  %v13994_v23 = vrot.slane %v13980_v9, %v27368_v61  ;;  %v29643_v10 = vpop.trf.xlu1 }
 0x8d7   : > { %21917 = vxpose.xlu0.b32.start [1/2] (short) (narrow) %v13995_v58, 8  ;;  %v29611_v7 = vpop.trf.xlu0  ;;  %v23537_v58 = vcombine.low %v31364_v5, %v29245_v18 }
 0x8d9   : > { %21949 = vxpose.xlu1.b32.start [1/2] (short) (narrow) %v13996_v55, 8  ;;  %v23545_v55 = vcombine.low %v31365_v62, %v29267_v27  ;;  %v14040_v27 = vrot.slane %v14017_v20, %v27368_v61  ;;  %v29655_v59 = vpop.trf.xlu1 }
 0x8db   : > { %21918 = vxpose.xlu0.b32.end [2/2] (short) (narrow) %v14025_v38, 8  ;;  %v23553_v38 = vcombine.low %v29265_v37, %v29284_v11  ;;  %v23536_v37 = vrot.slane %v23529_v48, %v25994_v40  ;;  %v23544_v11 = vrot.slane %v23537_v58, %v25994_v40  ;;  %v23552_v41 = vrot.slane %v23545_v55, %v25994_v40  ;;  %v29634_v44 = vpop.trf.xlu0 }
 0x8dd   : > { %21950 = vxpose.xlu1.b32.end [2/2] (short) (narrow) %v14048_v4, 8  ;;  %v31369_v4 = vld [vmem:[#allocation161_spill] sm:$0xff]  ;;  %v23560_v35 = vrot.slane %v23553_v38, %v25994_v40  ;;  %v31371_v38 = vld [vmem:[#allocation111_spill] sm:$0xff] }
 0x8de   : > { %v14084_v18 = vcombine.low %v31369_v4, %v31368_v22  ;;  %v14195_v9 = vrot.slane %v31371_v38, %v25994_v40 }
 0x8df   : > { %21981 = vxpose.xlu0.b32.start [1/2] (short) (narrow) %v13997_v56, 8  ;;  %v14050_v56 = vcombine.high %v14040_v27, %v31148_v29  ;;  %v23569_v54 = vcombine.low %v23552_v41, %v23560_v35  ;;  %v29646_v62 = vpop.trf.xlu0  ;;  %v31376_v41 = vld [vmem:[#allocation79_spill] sm:$0xff]  ;;  %v31377_v35 = vld [vmem:[#allocation144_spill] sm:$0xff] }
 0x8e0   : > { %v14092_v39 = vrot.slane %v14084_v18, %v25994_v40  ;;  %v31373_v18 = vld [vmem:[#allocation135_spill] sm:$0xff] }
 0x8e1   : > { %22013 = vxpose.xlu1.b32.start [1/2] (short) (narrow) %v13998_v60, 8  ;;  %v13962_v60 = vrot.slane %v31370_v57, %v27368_v61  ;;  %v29652_v12 = vrot.slane %v23569_v54, %v27368_v61  ;;  %v31397_v57 = vld [vmem:[#allocation28_spill] sm:$0xff] }
 0x8e2   : > { %v14148_v1 = vcombine.low %v14092_v39, %v14108_v28  ;;  %v22678_v6 = vcombine.high %v31398_v19, %v31397_v57 }
 0x8e3   : > { %21982 = vxpose.xlu0.b32.end [2/2] (short) (narrow) %v14032_v34, 8  ;;  %v14033_v34 = vcombine.high %v14017_v20, %v31148_v29  ;;  %v14001_v48 = vcombine.low %v13962_v60, %v13994_v23  ;;  %v14002_v5 = vcombine.high %v13962_v60, %v13994_v23  ;;  %v23587_v23 = vcombine.low %v31377_v35, %v31376_v41  ;;  %v29674_v54 = vpop.trf.xlu0 }
 0x8e4   : > { %v14156_v20 = vrot.slane %v14148_v1, %v27368_v61  ;;  %v14101_v60 = vcombine.high %v31367_v3, %v31366_v51  ;;  %v31378_v51 = vld [vmem:[#allocation37_spill] sm:$0xff] }
 0x8e5   : > { %22014 = vxpose.xlu1.b32.end [2/2] (short) (narrow) %v14049_v43, 8  ;;  %v23561_v43 = vcombine.low %v23536_v37, %v23544_v11  ;;  %v14047_v58 = vrot.slane %v14033_v34, %v27368_v61  ;;  %v31375_v37 = vld [vmem:[#allocation189_spill] sm:$0xff]  ;;  %v14149_v34 = vcombine.high %v14092_v39, %v14108_v28  ;;  %v31379_v3 = vcombine.low %v29325_v53, %v31378_v51 }
 0x8e6   : > { %v23579_v11 = vcombine.low %v31375_v37, %v29302_v52  ;;  %v14085_v52 = vcombine.high %v31369_v4, %v31368_v22 }
 0x8e7   : > { %22045 = vxpose.xlu0.b32.start [1/2] (short) (narrow) %v13999_v25, 8  ;;  %v29649_v55 = vrot.slane %v23561_v43, %v27368_v61  ;;  %v14051_v24 = vcombine.high %v14047_v58, %v31148_v29  ;;  %v31372_v25 = vld [vmem:[#allocation137_spill] sm:$0xff]  ;;  %v23602_v28 = vrot.slane %v31379_v3, %v25994_v40  ;;  %v14163_v22 = vrot.slane %v14149_v34, %v27368_v61 }
 0x8e8   : > { %v14099_v4 = vrot.slane %v14085_v52, %v25994_v40 }
 0x8e9   : > { %22077 = vxpose.xlu1.b32.start [1/2] (short) (narrow) %v14000_v8, 8  ;;  %v31374_v8 = vcombine.low %v31372_v25, %v31373_v18 }
 0x8eb   : > { %22046 = vxpose.xlu0.b32.end [2/2] (short) (narrow) %v14040_v27, 8  ;;  %v14124_v27 = vrot.slane %v31374_v8, %v27368_v61  ;;  %v31380_v8 = vcombine.high %v31372_v25, %v31373_v18 }
 0x8ed   : > { %22078 = vxpose.xlu1.b32.end [2/2] (short) (narrow) %v14050_v56, 8  ;;  %v23603_v56 = vcombine.low %v29335_v30, %v29367_v42  ;;  %v14180_v43 = vcombine.low %v14124_v27, %v14156_v20  ;;  %v14181_v1 = vcombine.high %v14124_v27, %v14156_v20  ;;  %v23586_v42 = vrot.slane %v23579_v11, %v25994_v40  ;;  %v20973_v27 = vpop.trf.xlu0 }
 0x8ee   : > { %v23594_v30 = vrot.slane %v23587_v23, %v25994_v40  ;;  %v14203_v20 = vcombine.high %v14195_v9, %v31148_v29  ;;  %v14131_v53 = vrot.slane %v31380_v8, %v27368_v61 }
 0x8ef   : > { %22109 = vxpose.xlu0.b32.start [1/2] (short) (narrow) %v14001_v48, 8  ;;  %v14210_v48 = vrot.slane %v14195_v9, %v27368_v61  ;;  %v23610_v39 = vrot.slane %v23603_v56, %v25994_v40  ;;  %v14188_v56 = vcombine.high %v31371_v38, %v31148_v29  ;;  %v31381_v38 = vld [vmem:[#allocation138_spill] sm:$0xff] }
 0x8f0   : > { %v23611_v37 = vcombine.low %v23586_v42, %v23594_v30  ;;  %v14182_v35 = vcombine.low %v14131_v53, %v14163_v22  ;;  %v14183_v9 = vcombine.high %v14131_v53, %v14163_v22 }
 0x8f1   : > { %22141 = vxpose.xlu1.b32.start [1/2] (short) (narrow) %v14002_v5, 8  ;;  %v29679_v5 = vpop.trf.xlu1  ;;  %v23619_v11 = vcombine.low %v23602_v28, %v23610_v39  ;;  %v14202_v52 = vrot.slane %v14188_v56, %v25994_v40 }
 0x8f2   : > { %v29701_v34 = vrot.slane %v23611_v37, %v27368_v61 }
 0x8f3   : > { %22110 = vxpose.xlu0.b32.end [2/2] (short) (narrow) %v14047_v58, 8  ;;  %v14115_v58 = vrot.slane %v14101_v60, %v25994_v40  ;;  %v14217_v60 = vrot.slane %v14203_v20, %v27368_v61  ;;  %v29704_v25 = vrot.slane %v23619_v11, %v27368_v61  ;;  %v14225_v20 = vrot.slane %v14202_v52, %v27368_v61 }
 0x8f5   : > { %22142 = vxpose.xlu1.b32.end [2/2] (short) (narrow) %v14051_v24, 8  ;;  %v14233_v24 = vcombine.high %v14210_v48, %v31148_v29  ;;  %v14164_v41 = vcombine.low %v14099_v4, %v14115_v58  ;;  %v21005_v23 = vpop.trf.xlu1  ;;  %v14165_v28 = vcombine.high %v14099_v4, %v14115_v58  ;;  %v14235_v37 = vcombine.high %v14225_v20, %v31148_v29 }
 0x8f6   : > { %v14218_v58 = vcombine.high %v14202_v52, %v31148_v29 }
 0x8f7   : > { %22173 = vxpose.xlu0.b32.start [1/2] (short) (narrow) %v14180_v43, 8  ;;  %v14172_v18 = vrot.slane %v14164_v41, %v27368_v61  ;;  %v21037_v43 = vpop.trf.xlu0  ;;  %v14179_v8 = vrot.slane %v14165_v28, %v27368_v61 }
 0x8f9   : > { %22205 = vxpose.xlu1.b32.start [1/2] (short) (narrow) %v14181_v1, 8  ;;  %v14234_v1 = vcombine.high %v14217_v60, %v31148_v29  ;;  %v21069_v51 = vpop.trf.xlu1 }
 0x8fb   : > { %22174 = vxpose.xlu0.b32.end [2/2] (short) (narrow) %v14210_v48, 8  ;;  %v31382_v48 = vld [vmem:[#allocation136_spill] sm:$0xff] }
 0x8fc   : > { %v31383_v42 = vcombine.low %v31381_v38, %v31382_v48  ;;  %v31384_v11 = vcombine.high %v31381_v38, %v31382_v48 }
 0x8fd   : > { %22206 = vxpose.xlu1.b32.end [2/2] (short) (narrow) %v14233_v24, 8  ;;  %v21101_v24 = vpop.trf.xlu0  ;;  %v21133_v53 = vpop.trf.xlu1 }
 0x8fe   : > { %v14140_v30 = vrot.slane %v31383_v42, %v27368_v61  ;;  %v14147_v41 = vrot.slane %v31384_v11, %v27368_v61 }
 0x8ff   : > { %22237 = vxpose.xlu0.b32.start [1/2] (short) (narrow) %v14182_v35, 8 }
 0x900   : > { %v14184_v39 = vcombine.low %v14140_v30, %v14172_v18  ;;  %v14185_v22 = vcombine.high %v14140_v30, %v14172_v18  ;;  %v14186_v4 = vcombine.low %v14147_v41, %v14179_v8  ;;  %v14187_v56 = vcombine.high %v14147_v41, %v14179_v8  ;;  %v24190_v41 = vld [vmem:[%s30167_s4] sm:$0xff] }
 0x901   : > { %22269 = vxpose.xlu1.b32.start [1/2] (short) (narrow) %v14183_v9, 8  ;;  %v21165_v35 = vpop.trf.xlu0  ;;  %v14232_v9 = vrot.slane %v14218_v58, %v27368_v61  ;;  %v23753_v8 = vcombine.low %v21069_v51, %v21133_v53  ;;  %v24191_v58 = vld [vmem:[%s30167_s4 + $0x8] sm:$0xff] }
 0x903   : > { %22238 = vxpose.xlu0.b32.end [2/2] (short) (narrow) %v14217_v60, 8  ;;  %v21197_v60 = vpop.trf.xlu1  ;;  %v14236_v18 = vcombine.high %v14232_v9, %v31148_v29 }
 0x905   : > { %22270 = vxpose.xlu1.b32.end [2/2] (short) (narrow) %v14234_v1, 8  ;;  %v21229_v1 = vpop.trf.xlu0 }
 0x907   : > { %22301 = vxpose.xlu0.b32.start [1/2] (short) (narrow) %v14184_v39, 8  ;;  %v21261_v38 = vpop.trf.xlu1  ;;  %v23729_v39 = vcombine.low %v29674_v54, %v20973_v27  ;;  %v23760_v27 = vrot.slane %v23753_v8, %v25994_v40 }
 0x908   : > { %v23787_v8 = vcombine.low %v21197_v60, %v21261_v38  ;;  %v31388_v60 = vld [vmem:[#allocation80_spill] sm:$0xff] }
 0x909   : > { %22333 = vxpose.xlu1.b32.start [1/2] (short) (narrow) %v14185_v22, 8  ;;  %v21293_v48 = vpop.trf.xlu0  ;;  %v23737_v22 = vcombine.low %v29679_v5, %v21005_v23  ;;  %v23736_v29 = vrot.slane %v23729_v39, %v25994_v40  ;;  %v25135_v23 = vpack.c.bf16 %v24191_v58, %v24190_v41 }
 0x90b   : > { %22302 = vxpose.xlu0.b32.end [2/2] (short) (narrow) %v14225_v20, 8  ;;  %v21325_v52 = vpop.trf.xlu1  ;;  %v23745_v20 = vcombine.low %v21037_v43, %v21101_v24  ;;  %v23744_v54 = vrot.slane %v23737_v22, %v25994_v40  ;;  %25175 = vmatprep.subr.bf16.mxu1 %v25135_v23  ;;  %v24192_v43 = vld [vmem:[%s30167_s4 + $0x10] sm:$0x3]  ;;  %v23779_v22 = vcombine.low %v21165_v35, %v21229_v1 }
 0x90c   : > { %25136 = vmatprep.subr.bf16.mxu0 %v25135_v23  ;;  %25177 = vmatpush3.bf16.msra.mxu1 %v25135_v23  ;;  %v23328_v1 = vcombine.high %v31388_v60, %v29392_v36 }
 0x90d   : > { %22334 = vxpose.xlu1.b32.end [2/2] (short) (narrow) %v14235_v37, 8  ;;  %v23752_v5 = vrot.slane %v23745_v20, %v25994_v40  ;;  %25138 = vmatpush3.bf16.msra.mxu0 %v25135_v23  ;;  %v23761_v24 = vcombine.low %v23736_v29, %v23744_v54  ;;  %v31386_v54 = vld [vmem:[#allocation113_spill] sm:$0xff] }
 0x90e   : > { %25176 = vmatprep.subr.msk.mxu1 %vm24290_vm3, %v24192_v43  ;;  %25085 = vmatprep.subr.msk.mxu0 %vm24290_vm3, %v24192_v43 }
 0x90f   : > { %22365 = vxpose.xlu0.b32.start [1/2] (short) (narrow) %v14186_v4, 8  ;;  %v21357_v30 = vpop.trf.xlu0  ;;  %v23769_v53 = vcombine.low %v23752_v5, %v23760_v27  ;;  %v31387_v5 = vld [vmem:[#allocation60_spill] sm:$0xff] }
 0x910   : > { %25178 = vmatpush3.msk.msra.mxu1 %vm24290_vm3, %v24192_v43  ;;  %v23795_v29 = vcombine.low %v21293_v48, %v21357_v30  ;;  %v22528_v27 = vcombine.high %v31387_v5, %v31386_v54  ;;  %v31389_v48 = vld [vmem:[#allocation26_spill] sm:$0xff] }
 0x911   : > { %22397 = vxpose.xlu1.b32.start [1/2] (short) (narrow) %v14187_v56, 8  ;;  %v21389_v28 = vpop.trf.xlu1  ;;  %25086 = vmatpush3.msk.msra.mxu0 %vm24290_vm3, %v24192_v43  ;;  %v29747_v56 = vrot.slane %v23761_v24, %v27368_v61  ;;  %v23786_v43 = vrot.slane %v23779_v22, %v25994_v40  ;;  %v23794_v24 = vrot.slane %v23787_v8, %v25994_v40  ;;  %v31391_v22 = vld [vmem:[#allocation30_spill] sm:$0xff] }
 0x912   : > { %v23803_v41 = vcombine.low %v21325_v52, %v21389_v28  ;;  %v31390_v52 = vld [vmem:[#allocation59_spill] sm:$0xff] }
 0x913   : > { %22366 = vxpose.xlu0.b32.end [2/2] (short) (narrow) %v14232_v9, 8  ;;  %v29750_v9 = vrot.slane %v23769_v53, %v27368_v61  ;;  %v23802_v53 = vrot.slane %v23795_v29, %v25994_v40  ;;  %v22478_v30 = vcombine.high %v31390_v52, %v31389_v48  ;;  %v23811_v28 = vcombine.low %v23786_v43, %v23794_v24  ;;  %v31395_v24 = vld [vmem:[#allocation27_spill] sm:$0xff] }
 0x914   : > { %v23810_v35 = vrot.slane %v23803_v41, %v25994_v40  ;;  %v23378_v29 = vcombine.high %v29439_v13, %v29442_v63 }
 0x915   : > { %22398 = vxpose.xlu1.b32.end [2/2] (short) (narrow) %v14236_v18, 8  ;;  %31385 = vst [vmem:[#allocation38_spill] sm:$0xff] %v29750_v9  ;;  %v23278_v18 = vcombine.high %v29340_v16, %v29343_v49  ;;  %v29776_v42 = vrot.slane %v23811_v28, %v27368_v61 }
 0x917   : > { %v29729_v37 = vpop.trf.xlu0  ;;  %31393 = vst [vmem:[#allocation218_spill] sm:$0xff] %v29776_v42 }
 0x919   : > { %v29732_v11 = vpop.trf.xlu1 }
 0x91f   : > { %v21485_v51 = vpop.trf.xlu0 }
 0x921   : > { %v21517_v4 = vpop.trf.xlu1 }
 0x922   : > { %v23837_v28 = vcombine.low %v29732_v11, %v21517_v4 }
 0x924   : > { %v23844_v11 = vrot.slane %v23837_v28, %v25994_v40 }
 0x927   : > { %v21549_v39 = vpop.trf.xlu0 }
 0x929   : > { %v21581_v20 = vpop.trf.xlu1 }
 0x92f   : > { %v21613_v23 = vpop.trf.xlu0 }
 0x930   : > { %v23845_v3 = vcombine.low %v21549_v39, %v21613_v23  ;;  %v23679_v39 = vcombine.low %v29589_v33, %v29611_v7  ;;  %v31400_v23 = vld [vmem:[#allocation65_spill] sm:$0xff] }
 0x931   : > { %v21645_v38 = vpop.trf.xlu1 }
 0x932   : > { %v23686_v28 = vrot.slane %v23679_v39, %v25994_v40 }
 0x933   : > { %24093 = vrot.lane.b32.xlu1 %v23278_v18, %s25529_s16  ;;  %v23819_v18 = vcombine.low %v23802_v53, %v23810_v35  ;;  %v31396_v53 = vld [vmem:[#allocation62_spill] sm:$0xff] }
 0x934   : > { %v22628_v35 = vcombine.high %v31396_v53, %v31395_v24 }
 0x935   : > { %v29780_v43 = vrot.slane %v23819_v18, %v27368_v61 }
 0x937   : > { %24063 = vrot.lane.b32.xlu1 %v22528_v27, %s25529_s16  ;;  %v31392_v27 = vld [vmem:[#allocation29_spill] sm:$0xff]  ;;  %v21677_v58 = vpop.trf.xlu0  ;;  %31394 = vst [vmem:[#allocation166_spill] sm:$0xff] %v29780_v43 }
 0x938   : > { %v22578_v8 = vcombine.high %v31392_v27, %v31391_v22 }
 0x939   : > { %v21709_v41 = vpop.trf.xlu1 }
 0x93b   : > { %24095 = vrot.lane.b32.xlu1 %v23328_v1, %s25529_s16  ;;  %v23428_v1 = vcombine.high %v29492_v31, %v29495_v32 }
 0x93c   : > { %24061 = vrot.lane.b32.xlu0 %v22478_v30, %s25529_s16  ;;  %v23829_v30 = vcombine.low %v29729_v37, %v21485_v51  ;;  %v23852_v51 = vrot.slane %v23845_v3, %v25994_v40  ;;  %v23528_v3 = vcombine.high %v29597_v45, %v29600_v0 }
 0x93e   : > { %v23836_v37 = vrot.slane %v23829_v30, %v25994_v40 }
 0x93f   : > { %24065 = vrot.lane.b32.xlu1 %v22578_v8, %s25529_s16  ;;  %v21741_v8 = vpop.trf.xlu0 }
 0x940   : > { %24097 = vrot.lane.b32.xlu0 %v23378_v29, %s25529_s16  ;;  %v23853_v29 = vcombine.low %v21581_v20, %v21645_v38  ;;  %v31399_v20 = vld [vmem:[#allocation61_spill] sm:$0xff]  ;;  %v23861_v33 = vcombine.low %v23836_v37, %v23844_v11  ;;  %v23879_v37 = vcombine.low %v21677_v58, %v21741_v8  ;;  %v23628_v58 = vcombine.high %v29701_v34, %v29704_v25 }
 0x941   : > { %v21773_v50 = vpop.trf.xlu1  ;;  %v22728_v38 = vcombine.high %v31400_v23, %v31399_v20 }
 0x942   : > { %v23860_v4 = vrot.slane %v23853_v29, %v25994_v40  ;;  %v31401_v29 = vld [vmem:[#allocation114_spill] sm:$0xff]  ;;  %v23887_v39 = vcombine.low %v21709_v41, %v21773_v50 }
 0x943   : > { %24067 = vrot.lane.b32.xlu1 %v22628_v35, %s25529_s16 }
 0x944   : > { %24099 = vrot.lane.b32.xlu0 %v23428_v1, %s25529_s16  ;;  %v23703_v1 = vcombine.low %v29643_v10, %v29655_v59  ;;  %v23869_v7 = vcombine.low %v23852_v51, %v23860_v4  ;;  %v23578_v59 = vcombine.high %v29649_v55, %v29652_v12  ;;  %v29826_v51 = vrot.slane %v23861_v33, %v27368_v61 }
 0x945   : > { %v23886_v33 = vrot.slane %v23879_v37, %v25994_v40 }
 0x946   : > { %v23710_v10 = vrot.slane %v23703_v1, %v25994_v40  ;;  %31403 = vst [vmem:[#allocation190_spill] sm:$0xff] %v29826_v51  ;;  %v29830_v4 = vrot.slane %v23869_v7, %v27368_v61  ;;  %v23894_v7 = vrot.slane %v23887_v39, %v25994_v40  ;;  %v31411_v39 = vld [vmem:[#allocation24_spill] sm:$0xff] }
 0x947   : > { %24069 = vrot.lane.b32.xlu1 %v22678_v6, %s25529_s16  ;;  %v21805_v35 = vpop.trf.xlu0  ;;  %v23687_v6 = vcombine.low %v29594_v2, %v29623_v21  ;;  %v31402_v2 = vld [vmem:[#allocation66_spill] sm:$0xff] }
 0x948   : > { %24101 = vrot.lane.b32.xlu0 %v23478_v26, %s25529_s16  ;;  %v23695_v26 = vcombine.low %v29634_v44, %v29646_v62  ;;  %v22778_v21 = vcombine.high %v31402_v2, %v31401_v29  ;;  %31404 = vst [vmem:[#allocation143_spill] sm:$0xff] %v29830_v4 }
 0x949   : > { %v21837_v30 = vpop.trf.xlu1  ;;  %v23694_v44 = vrot.slane %v23687_v6, %v25994_v40  ;;  %v31405_v6 = vld [vmem:[#allocation31_spill] sm:$0xff] }
 0x94a   : > { %v23702_v62 = vrot.slane %v23695_v26, %v25994_v40  ;;  %v31406_v26 = vld [vmem:[#allocation67_spill] sm:$0xff] }
 0x94b   : > { %24071 = vrot.lane.b32.xlu1 %v22728_v38, %s25529_s16  ;;  %v22828_v1 = vcombine.high %v31406_v26, %v31405_v6  ;;  %v23711_v18 = vcombine.low %v23686_v28, %v23694_v44  ;;  %v31407_v28 = vld [vmem:[#allocation32_spill] sm:$0xff] }
 0x94c   : > { %24103 = vrot.lane.b32.xlu0 %v23528_v3, %s25529_s16  ;;  %v23719_v14 = vcombine.low %v23702_v62, %v23710_v10  ;;  %v31409_v10 = vcombine.high %v29553_v17, %v29559_v46 }
 0x94e   : > { %v29850_v62 = vrot.slane %v23719_v14, %v27368_v61 }
 0x94f   : > { %24073 = vrot.lane.b32.xlu1 %v22778_v21, %s25529_s16  ;;  %v21869_v11 = vpop.trf.xlu0  ;;  %v31408_v21 = vld [vmem:[#allocation68_spill] sm:$0xff] }
 0x950   : > { %24105 = vrot.lane.b32.xlu0 %v23578_v59, %s25529_s16  ;;  %v23895_v38 = vcombine.low %v21805_v35, %v21869_v11  ;;  %v22878_v44 = vcombine.high %v31408_v21, %v31407_v28  ;;  %v23911_v59 = vcombine.low %v23886_v33, %v23894_v7  ;;  %v31410_v11 = vld [vmem:[#allocation163_spill] sm:$0xff]  ;;  %v23778_v7 = vcombine.high %v29747_v56, %v29750_v9 }
 0x951   : > { %v21901_v3 = vpop.trf.xlu1  ;;  %v31419_v35 = vld [vmem:[#allocation139_spill] sm:$0xff] }
 0x952   : > { %v23903_v8 = vcombine.low %v21837_v30, %v21901_v3  ;;  %v23902_v50 = vrot.slane %v23895_v38, %v25994_v40  ;;  %v29847_v30 = vrot.slane %v23711_v18, %v27368_v61  ;;  %v22928_v38 = vcombine.high %v31411_v39, %v31410_v11  ;;  %v31414_v3 = vld [vmem:[#allocation140_spill] sm:$0xff] }
 0x953   : > { %24075 = vrot.lane.b32.xlu1 %v22828_v1, %s25529_s16  ;;  %v29863_v14 = vrot.slane %v23911_v59, %v27368_v61 }
 0x954   : > { %24107 = vrot.lane.b32.xlu0 %v23628_v58, %s25529_s16  ;;  %v23910_v41 = vrot.slane %v23903_v8, %v25994_v40  ;;  %v23728_v1 = vcombine.high %v29847_v30, %v29850_v62  ;;  %v31415_v58 = vld [vmem:[#allocation186_spill] sm:$0xff] }
 0x955   : > { %31412 = vst [vmem:[#allocation77_spill] sm:$0xff] %v29863_v14  ;;  %v22978_v8 = vcombine.high %v31415_v58, %v31414_v3 }
 0x956   : > { %v23919_v37 = vcombine.low %v23902_v50, %v23910_v41 }
 0x957   : > { %24077 = vrot.lane.b32.xlu1 %v22878_v44, %s25529_s16  ;;  %v21933_v33 = vpop.trf.xlu0  ;;  %v31416_v44 = vld [vmem:[#allocation33_spill] sm:$0xff] }
 0x958   : > { %24109 = vrot.lane.b32.xlu0 %v31409_v10, %s25529_s16  ;;  %v29867_v18 = vrot.slane %v23919_v37, %v27368_v61  ;;  %v31417_v10 = vld [vmem:[#allocation71_spill] sm:$0xff]  ;;  %v23828_v37 = vcombine.high %v29776_v42, %v29780_v43  ;;  %v31420_v43 = vld [vmem:[#allocation116_spill] sm:$0xff]  ;;  %v31421_v42 = vld [vmem:[#allocation73_spill] sm:$0xff] }
 0x959   : > { %v21965_v41 = vpop.trf.xlu1  ;;  %v23028_v59 = vcombine.high %v31417_v10, %v31416_v44 }
 0x95a   : > { %31413 = vst [vmem:[#allocation118_spill] sm:$0xff] %v29867_v18 }
 0x95b   : > { %24079 = vrot.lane.b32.xlu1 %v22928_v38, %s25529_s16 }
 0x95c   : > { %24111 = vrot.lane.b32.xlu0 %v23728_v1, %s25529_s16  ;;  %v31418_v1 = vld [vmem:[#allocation69_spill] sm:$0xff] }
 0x95d   : > { %v23078_v9 = vcombine.high %v31419_v35, %v31418_v1  ;;  %v31422_v35 = vld [vmem:[#allocation35_spill] sm:$0xff] }
 0x95f   : > { %24081 = vrot.lane.b32.xlu1 %v22978_v8, %s25529_s16  ;;  %v21997_v38 = vpop.trf.xlu0  ;;  %v23878_v8 = vcombine.high %v29826_v51, %v29830_v4  ;;  %v31423_v4 = vld [vmem:[#allocation75_spill] sm:$0xff] }
 0x960   : > { %24113 = vrot.lane.b32.xlu0 %v23778_v7, %s25529_s16  ;;  %v23928_v7 = vcombine.high %v29863_v14, %v29867_v18  ;;  %v23929_v10 = vcombine.low %v21933_v33, %v21997_v38  ;;  %v23178_v51 = vcombine.high %v31423_v4, %v31422_v35  ;;  %v31425_v33 = vld [vmem:[#allocation207_spill] sm:$0xff] }
 0x961   : > { %v22029_v50 = vpop.trf.xlu1 }
 0x963   : > { %24083 = vrot.lane.b32.xlu1 %v23028_v59, %s25529_s16  ;;  %v23128_v59 = vcombine.high %v31421_v42, %v31420_v43  ;;  %v31424_v42 = vld [vmem:[#allocation167_spill] sm:$0xff] }
 0x964   : > { %24115 = vrot.lane.b32.xlu0 %v23828_v37, %s25529_s16  ;;  %v23937_v37 = vcombine.low %v21965_v41, %v22029_v50  ;;  %v23228_v50 = vcombine.high %v31425_v33, %v31424_v42 }
 0x967   : > { %24085 = vrot.lane.b32.xlu1 %v23078_v9, %s25529_s16  ;;  %v22061_v44 = vpop.trf.xlu0  ;;  %v23936_v9 = vrot.slane %v23929_v10, %v25994_v40 }
 0x968   : > { %24117 = vrot.lane.b32.xlu0 %v23878_v8, %s25529_s16  ;;  %v23944_v8 = vrot.slane %v23937_v37, %v25994_v40 }
 0x969   : > { %v22093_v1 = vpop.trf.xlu1 }
 0x96a   : > { %v23961_v41 = vcombine.low %v23936_v9, %v23944_v8 }
 0x96b   : > { %24087 = vrot.lane.b32.xlu1 %v23128_v59, %s25529_s16 }
 0x96c   : > { %24119 = vrot.lane.b32.xlu0 %v23928_v7, %s25529_s16  ;;  %v29906_v10 = vrot.slane %v23961_v41, %v27368_v61 }
 0x96e   : > { %31426 = vst [vmem:[#allocation78_spill] sm:$0xff] %v29906_v10 }
 0x96f   : > { %24089 = vrot.lane.b32.xlu1 %v23178_v51, %s25529_s16  ;;  %v22125_v18 = vpop.trf.xlu0 }
 0x970   : > { %v23945_v14 = vcombine.low %v22061_v44, %v22125_v18 }
 0x971   : > { %v22157_v43 = vpop.trf.xlu1 }
 0x972   : > { %v23952_v38 = vrot.slane %v23945_v14, %v25994_v40  ;;  %v23953_v59 = vcombine.low %v22093_v1, %v22157_v43 }
 0x973   : > { %24091 = vrot.lane.b32.xlu1 %v23228_v50, %s25529_s16 }
 0x974   : > { %v23960_v7 = vrot.slane %v23953_v59, %v25994_v40 }
 0x976   : > { %v23969_v37 = vcombine.low %v23952_v38, %v23960_v7 }
 0x977   : > { %v22189_v43 = vpop.trf.xlu0 }
 0x978   : > { %v29909_v51 = vrot.slane %v23969_v37, %v27368_v61 }
 0x979   : > { %v22221_v14 = vpop.trf.xlu1 }
 0x97a   : > { %31427 = vst [vmem:[#allocation119_spill] sm:$0xff] %v29909_v51  ;;  %v23978_v18 = vcombine.high %v29906_v10, %v29909_v51 }
 0x97c   : > { %24121 = vrot.lane.b32.xlu0 %v23978_v18, %s25529_s16 }
 0x97f   : > { %v22253_v1 = vpop.trf.xlu0 }
 0x980   : > { %v23979_v41 = vcombine.low %v22189_v43, %v22253_v1 }
 0x981   : > { %v22285_v9 = vpop.trf.xlu1 }
 0x982   : > { %v23987_v59 = vcombine.low %v22221_v14, %v22285_v9  ;;  %v23986_v7 = vrot.slane %v23979_v41, %v25994_v40  ;;  %v31430_v9 = vcombine.low %v31390_v52, %v31389_v48  ;;  %v31433_v48 = vcombine.low %v29439_v13, %v29442_v63 }
 0x983   : > { %v31436_v13 = vcombine.low %v31398_v19, %v31397_v57  ;;  %v31439_v19 = vcombine.low %v29597_v45, %v29600_v0  ;;  %v31442_v0 = vcombine.low %v31406_v26, %v31405_v6  ;;  %v31445_v6 = vcombine.low %v29553_v17, %v29559_v46 }
 0x984   : > { %v23994_v37 = vrot.slane %v23987_v59, %v25994_v40  ;;  %v31447_v46 = vcombine.low %v31415_v58, %v31414_v3  ;;  %v31453_v3 = vld [vmem:[#allocation218_spill] sm:$0xff] }
 0x985   : > { %v31454_v58 = vld [vmem:[#allocation166_spill] sm:$0xff] }
 0x986   : > { %v24011_v4 = vcombine.low %v23986_v7, %v23994_v37 }
 0x987   : > { %v22317_v8 = vpop.trf.xlu0 }
 0x988   : > { %v29921_v10 = vrot.slane %v24011_v4, %v27368_v61 }
 0x989   : > { %v22349_v50 = vpop.trf.xlu1 }
 0x98f   : > { %v22381_v38 = vpop.trf.xlu0 }
 0x990   : > { %v23995_v42 = vcombine.low %v22317_v8, %v22381_v38 }
 0x991   : > { %v22413_v33 = vpop.trf.xlu1 }
 0x992   : > { %v24003_v35 = vcombine.low %v22349_v50, %v22413_v33  ;;  %v24002_v44 = vrot.slane %v23995_v42, %v25994_v40  ;;  %v31429_v33 = vcombine.low %v31388_v60, %v29392_v36  ;;  %v31432_v60 = vcombine.low %v31392_v27, %v31391_v22 }
 0x993   : > { %v31435_v22 = vcombine.low %v29492_v31, %v29495_v32  ;;  %v31438_v32 = vcombine.low %v31400_v23, %v31399_v20  ;;  %v31441_v20 = vcombine.low %v29649_v55, %v29652_v12  ;;  %v31444_v12 = vcombine.low %v31408_v21, %v31407_v28 }
 0x994   : > { %v24010_v18 = vrot.slane %v24003_v35, %v25994_v40  ;;  %v31428_v40 = vcombine.low %v29340_v16, %v29343_v49  ;;  %v31431_v16 = vcombine.low %v31387_v5, %v31386_v54  ;;  %v31434_v5 = vcombine.low %v31396_v53, %v31395_v24 }
 0x995   : > { %v31437_v24 = vcombine.low %v29534_v15, %v29537_v47  ;;  %v31440_v47 = vcombine.low %v31402_v2, %v31401_v29  ;;  %v31443_v29 = vcombine.low %v29701_v34, %v29704_v25  ;;  %v23727_v25 = vcombine.low %v29847_v30, %v29850_v62  ;;  %v31448_v30 = vld [vmem:[#allocation38_spill] sm:$0xff] }
 0x996   : > { %v24019_v51 = vcombine.low %v24002_v44, %v24010_v18  ;;  %v31449_v62 = vcombine.low %v29747_v56, %v31448_v30 }
 0x998   : > { %v29924_v43 = vrot.slane %v24019_v51, %v27368_v61 }
 0x99a   : > { %v24028_v14 = vcombine.high %v29921_v10, %v29924_v43  ;;  %v24027_v1 = vcombine.low %v29921_v10, %v29924_v43 }
 0x99c   : > { %24123 = vrot.lane.b32.xlu0 %v24028_v14, %s25529_s16 }
 0x9a5   : > { %v24094_v42 = vpop.permute.xlu1 %24093 }
 0x9a6   : > { %v24174_v4 = vsel %vm24157_vm4, %v31428_v40, %v24094_v42 }
 0x9a7   : > { %25111 = vmatprep.mubr.msk.f32.mxu1 %vm24193_vm5, %v24174_v4 }
 0x9a9   : > { %v24064_v61 = vpop.permute.xlu1 %24063 }
 0x9aa   : > { %v24159_v49 = vsel %vm24157_vm4, %v31431_v16, %v24064_v61  ;;  %v31450_v16 = vld [vmem:[#allocation71_spill] sm:$0xff] }
 0x9ad   : > { %v24096_v35 = vpop.permute.xlu1 %24095 }
 0x9ae   : > { %v24175_v51 = vsel %vm24157_vm4, %v31429_v33, %v24096_v35  ;;  %v24062_v44 = vpop.permute.xlu0 %24061 }
 0x9af   : > { %25112 = vmatmul.mubr.msk.f32.vlgmr.msra.gmra.mrb[0].mxu1 %vm24193_vm5, %v24175_v51  ;;  %v24158_v8 = vsel %vm24157_vm4, %v31430_v9, %v24062_v44  ;;  %v31446_v51 = vcombine.low %v31411_v39, %v31410_v11 }
 0x9b0   : > { %25087 = vmatprep.mubr.msk.f32.mxu0 %vm24193_vm5, %v24158_v8 }
 0x9b1   : > { %25088 = vmatmul.mubr.msk.f32.vlgmr.msra.gmra.mrb[0].mxu0 %vm24193_vm5, %v24159_v49  ;;  %v24066_v36 = vpop.permute.xlu1 %24065  ;;  %v31451_v49 = vld [vmem:[#allocation33_spill] sm:$0xff] }
 0x9b2   : > { %v24160_v50 = vsel %vm24157_vm4, %v31432_v60, %v24066_v36  ;;  %v24098_v41 = vpop.permute.xlu0 %24097  ;;  %v31452_v36 = vcombine.low %v31450_v16, %v31451_v49 }
 0x9b3   : > { %v24176_v52 = vsel %vm24157_vm4, %v31433_v48, %v24098_v41  ;;  %25090 = vmatprep.mubr.msk.f32.mxu0 %vm24193_vm5, %v24160_v50  ;;  %v31455_v41 = vcombine.low %v31453_v3, %v31454_v58 }
 0x9b4   : > { %25114 = vmatprep.mubr.msk.f32.mxu1 %vm24193_vm5, %v24176_v52  ;;  %v31456_v52 = vld [vmem:[#allocation139_spill] sm:$0xff] }
 0x9b5   : > { %v24068_v54 = vpop.permute.xlu1 %24067 }
 0x9b6   : > { %v24161_v59 = vsel %vm24157_vm4, %v31434_v5, %v24068_v54  ;;  %v24100_v38 = vpop.permute.xlu0 %24099  ;;  %v31457_v54 = vld [vmem:[#allocation69_spill] sm:$0xff] }
 0x9b7   : > { %v24177_v27 = vsel %vm24157_vm4, %v31435_v22, %v24100_v38  ;;  %25091 = vmatmul.mubr.msk.f32.gmra.mrb[2].mxu0 %vm24193_vm5, %v24161_v59  ;;  %v31458_v5 = vcombine.low %v31456_v52, %v31457_v54  ;;  %v31459_v22 = vld [vmem:[#allocation190_spill] sm:$0xff] }
 0x9b8   : > { %25115 = vmatmul.mubr.msk.f32.gmra.mrb[2].mxu1 %vm24193_vm5, %v24177_v27  ;;  %v31460_v27 = vld [vmem:[#allocation143_spill] sm:$0xff] }
 0x9b9   : > { %v24070_v63 = vpop.permute.xlu1 %24069 }
 0x9ba   : > { %v24162_v7 = vsel %vm24157_vm4, %v31436_v13, %v24070_v63  ;;  %v24102_v37 = vpop.permute.xlu0 %24101  ;;  %v31461_v63 = vcombine.low %v31459_v22, %v31460_v27 }
 0x9bb   : > { %v24178_v53 = vsel %vm24157_vm4, %v31437_v24, %v24102_v37  ;;  %25093 = vmatprep.mubr.msk.f32.mxu0 %vm24193_vm5, %v24162_v7  ;;  %v31462_v37 = vld [vmem:[#allocation73_spill] sm:$0xff]  ;;  %v31463_v24 = vld [vmem:[#allocation116_spill] sm:$0xff] }
 0x9bc   : > { %25117 = vmatprep.mubr.msk.f32.mxu1 %vm24193_vm5, %v24178_v53  ;;  %v31464_v53 = vcombine.low %v31462_v37, %v31463_v24 }
 0x9bd   : > { %v24072_v31 = vpop.permute.xlu1 %24071 }
 0x9be   : > { %v24163_v18 = vsel %vm24157_vm4, %v31438_v32, %v24072_v31  ;;  %v24104_v14 = vpop.permute.xlu0 %24103 }
 0x9bf   : > { %v24179_v57 = vsel %vm24157_vm4, %v31439_v19, %v24104_v14  ;;  %25094 = vmatmul.mubr.msk.f32.gmra.mrb[4].mxu0 %vm24193_vm5, %v24163_v18  ;;  %v31465_v18 = vld [vmem:[#allocation77_spill] sm:$0xff]  ;;  %v31466_v14 = vld [vmem:[#allocation118_spill] sm:$0xff] }
 0x9c0   : > { %25118 = vmatmul.mubr.msk.f32.gmra.mrb[4].mxu1 %vm24193_vm5, %v24179_v57  ;;  %v31467_v19 = vcombine.low %v31465_v18, %v31466_v14 }
 0x9c1   : > { %v24074_v15 = vpop.permute.xlu1 %24073 }
 0x9c2   : > { %v24164_v42 = vsel %vm24157_vm4, %v31440_v47, %v24074_v15  ;;  %v24106_v40 = vpop.permute.xlu0 %24105  ;;  %v31468_v47 = vld [vmem:[#allocation75_spill] sm:$0xff] }
 0x9c3   : > { %v24180_v23 = vsel %vm24157_vm4, %v31441_v20, %v24106_v40  ;;  %25096 = vmatprep.mubr.msk.f32.mxu0 %vm24193_vm5, %v24164_v42  ;;  %v31469_v42 = vld [vmem:[#allocation35_spill] sm:$0xff] }
 0x9c4   : > { %25120 = vmatprep.mubr.msk.f32.mxu1 %vm24193_vm5, %v24180_v23  ;;  %v31470_v40 = vcombine.low %v31468_v47, %v31469_v42 }
 0x9c5   : > { %v24076_v45 = vpop.permute.xlu1 %24075 }
 0x9c6   : > { %v24165_v4 = vsel %vm24157_vm4, %v31442_v0, %v24076_v45  ;;  %v24108_v61 = vpop.permute.xlu0 %24107  ;;  %v31471_v45 = vld [vmem:[#allocation207_spill] sm:$0xff] }
 0x9c7   : > { %v24181_v2 = vsel %vm24157_vm4, %v31443_v29, %v24108_v61  ;;  %25097 = vmatmul.mubr.msk.f32.gmra.mrb[6].mxu0 %vm24193_vm5, %v24165_v4  ;;  %v31472_v0 = vld [vmem:[#allocation167_spill] sm:$0xff] }
 0x9c8   : > { %25121 = vmatmul.mubr.msk.f32.gmra.mrb[6].mxu1 %vm24193_vm5, %v24181_v2  ;;  %v31473_v4 = vcombine.low %v31471_v45, %v31472_v0  ;;  %v31474_v2 = vld [vmem:[#allocation78_spill] sm:$0xff] }
 0x9c9   : > { %v24078_v55 = vpop.permute.xlu1 %24077 }
 0x9ca   : > { %v24166_v35 = vsel %vm24157_vm4, %v31444_v12, %v24078_v55  ;;  %v24110_v33 = vpop.permute.xlu0 %24109  ;;  %v31475_v55 = vld [vmem:[#allocation119_spill] sm:$0xff] }
 0x9cb   : > { %v24182_v26 = vsel %vm24157_vm4, %v31445_v6, %v24110_v33  ;;  %25099 = vmatprep.mubr.msk.f32.mxu0 %vm24193_vm5, %v24166_v35  ;;  %v31476_v12 = vcombine.low %v31474_v2, %v31475_v55 }
 0x9cc   : > { %25123 = vmatprep.mubr.msk.f32.mxu1 %vm24193_vm5, %v24182_v26 }
 0x9cd   : > { %v24080_v34 = vpop.permute.xlu1 %24079 }
 0x9ce   : > { %v24167_v28 = vsel %vm24157_vm4, %v31446_v51, %v24080_v34  ;;  %v24112_v21 = vpop.permute.xlu0 %24111 }
 0x9cf   : > { %v24183_v44 = vsel %vm24157_vm4, %v23727_v25, %v24112_v21  ;;  %25100 = vmatmul.mubr.msk.f32.gmra.mrb[8].mxu0 %vm24193_vm5, %v24167_v28 }
 0x9d0   : > { %25124 = vmatmul.mubr.msk.f32.gmra.mrb[8].mxu1 %vm24193_vm5, %v24183_v44 }
 0x9d1   : > { %v24082_v17 = vpop.permute.xlu1 %24081 }
 0x9d2   : > { %v24168_v9 = vsel %vm24157_vm4, %v31447_v46, %v24082_v17  ;;  %v24114_v8 = vpop.permute.xlu0 %24113 }
 0x9d3   : > { %v24184_v11 = vsel %vm24157_vm4, %v31449_v62, %v24114_v8  ;;  %25102 = vmatprep.mubr.msk.f32.mxu0 %vm24193_vm5, %v24168_v9 }
 0x9d4   : > { %25126 = vmatprep.mubr.msk.f32.mxu1 %vm24193_vm5, %v24184_v11 }
 0x9d5   : > { %v24084_v39 = vpop.permute.xlu1 %24083 }
 0x9d6   : > { %v24169_v60 = vsel %vm24157_vm4, %v31452_v36, %v24084_v39  ;;  %v24116_v50 = vpop.permute.xlu0 %24115 }
 0x9d7   : > { %v24185_v48 = vsel %vm24157_vm4, %v31455_v41, %v24116_v50  ;;  %25103 = vmatmul.mubr.msk.f32.gmra.mrb[10].mxu0 %vm24193_vm5, %v24169_v60 }
 0x9d8   : > { %25127 = vmatmul.mubr.msk.f32.gmra.mrb[10].mxu1 %vm24193_vm5, %v24185_v48 }
 0x9d9   : > { %v24086_v56 = vpop.permute.xlu1 %24085 }
 0x9da   : > { %v24170_v59 = vsel %vm24157_vm4, %v31458_v5, %v24086_v56  ;;  %v24118_v38 = vpop.permute.xlu0 %24117 }
 0x9db   : > { %v24186_v13 = vsel %vm24157_vm4, %v31461_v63, %v24118_v38  ;;  %25105 = vmatprep.mubr.msk.f32.mxu0 %vm24193_vm5, %v24170_v59 }
 0x9dc   : > { %25129 = vmatprep.mubr.msk.f32.mxu1 %vm24193_vm5, %v24186_v13 }
 0x9dd   : > { %v24088_v7 = vpop.permute.xlu1 %24087 }
 0x9de   : > { %v24171_v31 = vsel %vm24157_vm4, %v31464_v53, %v24088_v7  ;;  %v24120_v32 = vpop.permute.xlu0 %24119 }
 0x9df   : > { %v24187_v57 = vsel %vm24157_vm4, %v31467_v19, %v24120_v32  ;;  %25106 = vmatmul.mubr.msk.f32.gmra.mrb[12].mxu0 %vm24193_vm5, %v24171_v31 }
 0x9e0   : > { %25130 = vmatmul.mubr.msk.f32.gmra.mrb[12].mxu1 %vm24193_vm5, %v24187_v57 }
 0x9e1   : > { %v24090_v15 = vpop.permute.xlu1 %24089 }
 0x9e2   : > { %v24172_v20 = vsel %vm24157_vm4, %v31470_v40, %v24090_v15 }
 0x9e3   : > { %25108 = vmatprep.mubr.msk.f32.mxu0 %vm24193_vm5, %v24172_v20 }
 0x9e5   : > { %v24092_v23 = vpop.permute.xlu1 %24091 }
 0x9e6   : > { %v24173_v61 = vsel %vm24157_vm4, %v31473_v4, %v24092_v23 }
 0x9e7   : > { %25109 = vmatmul.mubr.msk.f32.gmra.mrb[14].mxu0 %vm24193_vm5, %v24173_v61 }
 0x9ee   : > { %v24122_v29 = vpop.permute.xlu0 %24121 }
 0x9ef   : > { %v24188_v35 = vsel %vm24157_vm4, %v31476_v12, %v24122_v29 }
 0x9f0   : > { %25132 = vmatprep.mubr.msk.f32.mxu1 %vm24193_vm5, %v24188_v35 }
 0xa0e   : > { %v24124_v33 = vpop.permute.xlu0 %24123 }
 0xa0f   : > { %v24189_v6 = vsel %vm24157_vm4, %v24027_v1, %v24124_v33 }
 0xa10   : > { %25133 = vmatmul.mubr.msk.f32.gmra.mrb[14].mxu1 %vm24193_vm5, %v24189_v6 }
 0xa82   : > { %v25113_v26 = vpop.f32.mrb[0].mxu1 }
 0xa83   : > { %24536 = vst.msk [vmem:[#allocation11 + $0x88] sm:$0xff] %vm2840_vm2, %v25113_v26  ;;  %v24440_v34 = vpop.f32.mrb[1].mxu1 }
 0xa84   : > { %24535 = vst.msk [vmem:[#allocation11 + $0x80] sm:$0xff] %vm2840_vm2, %v24440_v34  ;;  %v25089_v25 = vpop.f32.mrb[0].mxu0 }
 0xa85   : > { %24520 = vst.msk [vmem:[#allocation11 + $0x8] sm:$0xff] %vm2840_vm2, %v25089_v25  ;;  %v24360_v51 = vpop.f32.mrb[1].mxu0 }
 0xa86   : > { %24519 = vst.msk [vmem:[#allocation11] sm:$0xff] %vm2840_vm2, %v24360_v51 }
 0xa8a   : > { %v25092_v28 = vpop.f32.mrb[2].mxu0 }
 0xa8b   : > { %24522 = vst.msk [vmem:[#allocation11 + $0x18] sm:$0xff] %vm2840_vm2, %v25092_v28  ;;  %v24370_v10 = vpop.f32.mrb[3].mxu0  ;;  %v25116_v43 = vpop.f32.mrb[2].mxu1 }
 0xa8c   : > { %24521 = vst.msk [vmem:[#allocation11 + $0x10] sm:$0xff] %vm2840_vm2, %v24370_v10  ;;  %24538 = vst.msk [vmem:[#allocation11 + $0x98] sm:$0xff] %vm2840_vm2, %v25116_v43  ;;  %v24450_v1 = vpop.f32.mrb[3].mxu1 }
 0xa8d   : > { %24537 = vst.msk [vmem:[#allocation11 + $0x90] sm:$0xff] %vm2840_vm2, %v24450_v1 }
 0xa92   : > { %v25095_v21 = vpop.f32.mrb[4].mxu0 }
 0xa93   : > { %24524 = vst.msk [vmem:[#allocation11 + $0x28] sm:$0xff] %vm2840_vm2, %v25095_v21  ;;  %v24380_v44 = vpop.f32.mrb[5].mxu0  ;;  %v25119_v17 = vpop.f32.mrb[4].mxu1 }
 0xa94   : > { %24523 = vst.msk [vmem:[#allocation11 + $0x20] sm:$0xff] %vm2840_vm2, %v24380_v44  ;;  %24540 = vst.msk [vmem:[#allocation11 + $0xa8] sm:$0xff] %vm2840_vm2, %v25119_v17  ;;  %v24460_v46 = vpop.f32.mrb[5].mxu1 }
 0xa95   : > { %24539 = vst.msk [vmem:[#allocation11 + $0xa0] sm:$0xff] %vm2840_vm2, %v24460_v46 }
 0xa9a   : > { %v25098_v9 = vpop.f32.mrb[6].mxu0 }
 0xa9b   : > { %24526 = vst.msk [vmem:[#allocation11 + $0x38] sm:$0xff] %vm2840_vm2, %v25098_v9  ;;  %v24390_v8 = vpop.f32.mrb[7].mxu0  ;;  %v25122_v30 = vpop.f32.mrb[6].mxu1 }
 0xa9c   : > { %24525 = vst.msk [vmem:[#allocation11 + $0x30] sm:$0xff] %vm2840_vm2, %v24390_v8  ;;  %24542 = vst.msk [vmem:[#allocation11 + $0xb8] sm:$0xff] %vm2840_vm2, %v25122_v30  ;;  %v24470_v62 = vpop.f32.mrb[7].mxu1 }
 0xa9d   : > { %24541 = vst.msk [vmem:[#allocation11 + $0xb0] sm:$0xff] %vm2840_vm2, %v24470_v62 }
 0xaa2   : > { %v25101_v11 = vpop.f32.mrb[8].mxu0 }
 0xaa3   : > { %24528 = vst.msk [vmem:[#allocation11 + $0x48] sm:$0xff] %vm2840_vm2, %v25101_v11  ;;  %v24400_v39 = vpop.f32.mrb[9].mxu0  ;;  %v25125_v16 = vpop.f32.mrb[8].mxu1 }
 0xaa4   : > { %24527 = vst.msk [vmem:[#allocation11 + $0x40] sm:$0xff] %vm2840_vm2, %v24400_v39  ;;  %24544 = vst.msk [vmem:[#allocation11 + $0xc8] sm:$0xff] %vm2840_vm2, %v25125_v16  ;;  %v24480_v49 = vpop.f32.mrb[9].mxu1 }
 0xaa5   : > { %24543 = vst.msk [vmem:[#allocation11 + $0xc0] sm:$0xff] %vm2840_vm2, %v24480_v49 }
 0xaaa   : > { %v25104_v36 = vpop.f32.mrb[10].mxu0 }
 0xaab   : > { %24530 = vst.msk [vmem:[#allocation11 + $0x58] sm:$0xff] %vm2840_vm2, %v25104_v36  ;;  %v24410_v60 = vpop.f32.mrb[11].mxu0  ;;  %v25128_v50 = vpop.f32.mrb[10].mxu1 }
 0xaac   : > { %24529 = vst.msk [vmem:[#allocation11 + $0x50] sm:$0xff] %vm2840_vm2, %v24410_v60  ;;  %24546 = vst.msk [vmem:[#allocation11 + $0xd8] sm:$0xff] %vm2840_vm2, %v25128_v50  ;;  %v24490_v3 = vpop.f32.mrb[11].mxu1 }
 0xaad   : > { %24545 = vst.msk [vmem:[#allocation11 + $0xd0] sm:$0xff] %vm2840_vm2, %v24490_v3 }
 0xab2   : > { %v25107_v58 = vpop.f32.mrb[12].mxu0 }
 0xab3   : > { %24532 = vst.msk [vmem:[#allocation11 + $0x68] sm:$0xff] %vm2840_vm2, %v25107_v58  ;;  %v24420_v41 = vpop.f32.mrb[13].mxu0  ;;  %v25131_v48 = vpop.f32.mrb[12].mxu1 }
 0xab4   : > { %24531 = vst.msk [vmem:[#allocation11 + $0x60] sm:$0xff] %vm2840_vm2, %v24420_v41  ;;  %24548 = vst.msk [vmem:[#allocation11 + $0xe8] sm:$0xff] %vm2840_vm2, %v25131_v48  ;;  %v24500_v56 = vpop.f32.mrb[13].mxu1 }
 0xab5   : > { %24547 = vst.msk [vmem:[#allocation11 + $0xe0] sm:$0xff] %vm2840_vm2, %v24500_v56 }
 0xaba   : > { %v25110_v52 = vpop.f32.mrb[14].mxu0 }
 0xabb   : > { %24534 = vst.msk [vmem:[#allocation11 + $0x78] sm:$0xff] %vm2840_vm2, %v25110_v52  ;;  %v24430_v54 = vpop.f32.mrb[15].mxu0 }
 0xabc   : > { %24533 = vst.msk [vmem:[#allocation11 + $0x70] sm:$0xff] %vm2840_vm2, %v24430_v54 }
 0xae3   : > { %v25134_v5 = vpop.f32.mrb[14].mxu1 }
 0xae4   : > { %24550 = vst.msk [vmem:[#allocation11 + $0xf8] sm:$0xff] %vm2840_vm2, %v25134_v5  ;;  %v24510_v59 = vpop.f32.mrb[15].mxu1 }
 0xae5   : > { %24549 = vst.msk [vmem:[#allocation11 + $0xf0] sm:$0xff] %vm2840_vm2, %v24510_v59 }
 0xae6 PF: > { %p25210_p6 = scmp.eq.s32.totalorder %s25592_s24, 1  ;;  %s25530_s13 = smov [#allocation11]  }
 0xae7   : > { %s24561_s6 = sshll.u32 %s25530_s13, 4  ;;  %s24562_s6 = int_to_ptr.vmem [resolvable:$true] %s24561_s6 }
 0xae8   : > { %s25428_s27 = scalar_lea.vmem %s24562_s6, 4096  ;;  %p25435_p0 = scmp.lt.s32.totalorder %s24562_s6, %s24562_s6 }
 0xae9   : > { %p25429_p8 = scmp.ne.s32.totalorder %s24562_s6, %s25428_s27  ;;  %p25436_p2 = scmp.lt.s32.totalorder %s25428_s27, %s25428_s27 }
 0xaeb   : > { %p25430_p11 = pnand %p25429_p8, %p25210_p6  ;;  %p25437_p12 = por %p25436_p2, %p25435_p0 }
 0xaed   : > { %p25431_p5 = pneg %p25430_p11 }
 0xaef   : > { %p25438_p3 = pnand %p25437_p12, %p25431_p5 }
 0xaf1   : > { %25441 = shalt.err (!%p25438_p3)
}
 0xaf2   : > { %s25442_s0 = scalar_lea.hbm %s30168_s5, 4096 }
 0xaf3   : > { %p25443_p10 = scmp.ne.s32.totalorder %s30168_s5, %s25442_s0  ;;  %p25448_p7 = scmp.lt.u32.totalorder %s25442_s0, %s30168_s5 }
 0xaf5   : > { %p25444_p1 = pnand %p25443_p10, %p25210_p6 }
 0xaf7   : > { %p25445_p13 = pneg %p25444_p1 }
 0xaf9   : > { %p25450_p9 = pnand %p25448_p7, %p25445_p13 }
 0xafb   : > { %25453 = shalt.err (!%p25450_p9)
}
 0xafc   : > { %s25531_s1 = smov 128   ;;  %s25532_s30 = smov 8  }
 0xafd   : > { %25193 = dma.vmem_to_hbm [thread:$0]  (%p25210_p6), %s24562_s6, 4096, %s30168_s5, [#allocation5], %s25531_s1, %s25531_s1, %s25532_s30  }
 0xafe   : > { %25491 = dma.done.wait (%p25210_p6), [#allocation5], 4096  }
 0xaff   : > { %25493 = vsyncadd (%p25210_p6), [#allocation5], 4294963200 }
 0xb00 PF: > { %s25_s23 = sadd.s32 1, %s25516_s23   ;;  %s31477_s11 = sld [smem:[#allocation16_spill]] }
 0xb01   : > { %p22_p4 = scmp.ge.s32.totalorder %s25_s23, 4   ;;  %s31478_s20 = sld [smem:[#allocation19_spill]] }
 0xb02   : > { %s31479_s21 = sld [smem:[#allocation17_spill]]  ;;  %s31480_s22 = sld [smem:[#allocation18_spill]] }
 0xb03   : > { %s31481_s18 = smov %s25500_s19  ;;  %24 = sbr.rel (!%p22_p4) target bundleno = 12 (0xc), region = 123 }
 0xb06   : > { %s31482_s19 = smov %s31477_s11 }
 0xb0a   :  { %24577 = vsyncpa [#allocation4], 1 }
 0xb0b   :  { %24579 = vsyncpa [#allocation4 + $0x1], 1 }
 0xb0c   :  { %24580 = vsyncpa [#allocation7], 1 }
 0xb0d   :  { %24582 = vsyncpa [#allocation7 + $0x1], 1 }
 0xb0e   :  { %24583 = vsyncpa [#allocation10], 1 }
 0xb0f   :  { %24585 = vsyncpa [#allocation10 + $0x1], 1 }
 0xb10   :  { %24586 = vsyncpa [#allocation5], 1 }
 0xb11   :  { %24588 = vsyncpa [#allocation5 + $0x1], 1 }

</bundles_post_ra>
